<compile_context>
chip_gen: v7x
topology: tpu7x:2x2x1
jax: 0.10.0
libtpu: 0.0.40
codegen_flags: <defaults>
</compile_context>

<pallas_src>
import functools

import jax
import jax.numpy as jnp
from jax.experimental import pallas as pl
from jax.experimental.pallas import tpu as pltpu

K = 5       # Conv1d kernel size
PAD = 2     # 'same' padding for kernel_size=5, stride=1
POOL = 8    # MaxPool1d(8)
EPS = 1e-5  # BatchNorm1d default eps


def _round_up(x, m):
    return -(-x // m) * m


def _bt_cap():
    """Generation-tuned batch-tile cap: 16 on v5e, 32 on v6e/v7x."""
    try:
        kind = jax.devices()[0].device_kind.lower()
    except Exception:
        return 32
    if "v5 lite" in kind or "v5e" in kind or "v5lite" in kind:
        return 16
    return 32


def _pick_bt(batch):
    """Batch samples per grid step, chosen from the real batch size."""
    cap = _bt_cap()
    if batch <= 16:
        return max(8, _round_up(batch, 8))       # single small step, minimal waste
    # prefer >= 2 grid steps (pipelining; both TensorCores on v7x)
    return min(cap, _round_up(_round_up(batch, 2) // 2, 8))


# ---------------------------------------------------------------------------
# Fully fused kernel: layer1..layer4 (+MaxPool) -> FC (+BN) -> Softmax,
# for Bt batch samples per grid step.  Activations are channels-last
# (Bt, L, C): sequence on sublanes, channels on lanes.
# ---------------------------------------------------------------------------
def _fused_kernel(x_ref, w1_ref, w2_ref, w34_ref, aff1_ref, aff2_ref,
                  wfc_ref, tfc_ref, o_ref, pad_ref, *, Bt, L):
    f32 = jnp.float32
    bf16 = jnp.bfloat16
    L4 = L // POOL

    # ---- layer1: Conv1d(1->256) as one bf16 im2col MXU matmul, BN fold, ReLU
    x = x_ref[...]                                           # (Bt, L, 1) f32
    z1 = jnp.zeros((Bt, PAD, 1), f32)
    xp = jnp.concatenate([z1, x, z1], axis=1).astype(bf16)   # (Bt, L+4, 1)
    xcol = jnp.concatenate([xp[:, k:k + L, :] for k in range(K)], axis=-1)
    h1 = jnp.dot(xcol.reshape(Bt * L, K), w1_ref[...],
                 preferred_element_type=f32)                 # (Bt*L, 256)
    s1 = aff1_ref[0:1, :]                                    # folded BN scale
    t1 = aff1_ref[1:2, :]                                    # conv bias + BN shift
    h1 = jnp.maximum(h1 * s1 + t1, 0.0)

    # Persistent bf16 halo scratch: zero the PAD halo rows, write the
    # activation (cast to bf16 exactly once) into the centre.
    pad_ref[:, 0:PAD, :] = jnp.zeros((Bt, PAD, 256), bf16)
    pad_ref[:, L + PAD:L + 2 * PAD, :] = jnp.zeros((Bt, PAD, 256), bf16)
    pad_ref[:, PAD:PAD + L, :] = h1.reshape(Bt, L, 256).astype(bf16)

    # ---- layer2: Conv1d(256->128) + bias + ReLU + BN (post-ReLU) + MaxPool(8)
    cols2 = jnp.concatenate([pad_ref[:, k:k + L, :] for k in range(K)],
                            axis=-1)                         # (Bt, L, 5*256) bf16
    acc2 = jnp.dot(cols2.reshape(Bt * L, K * 256), w2_ref[...],
                   preferred_element_type=f32)               # (Bt*L, 128)
    b2 = aff2_ref[0:1, :]
    s2 = aff2_ref[1:2, :]
    t2 = aff2_ref[2:3, :]
    y2 = jnp.maximum(acc2 + b2, 0.0) * s2 + t2
    y2 = jnp.max(y2.reshape(Bt * L4, POOL, 128), axis=1)     # MaxPool1d(8)
    h = y2.reshape(Bt, L4, 128)

    # Tail layers reuse the same scratch (first 128 lanes, length L4+4).
    # Rows [L4+PAD, L4+2*PAD) still hold layer1 data -> zero them once.
    pad_ref[:, L4 + PAD:L4 + 2 * PAD, 0:128] = jnp.zeros((Bt, PAD, 128), bf16)

    # ---- layers 3a, 3b, 3c (BN folded), 4: Conv1d(128->128) + affine + ReLU
    taps = ((None,              aff2_ref[3:4, :]),   # 3a: +bias, ReLU
            (None,              aff2_ref[4:5, :]),   # 3b: +bias, ReLU
            (aff2_ref[5:6, :],  aff2_ref[6:7, :]),   # 3c: folded BN, ReLU
            (None,              aff2_ref[7:8, :]))   # 4 : +bias, ReLU
    for i, (s, t) in enumerate(taps):
        pad_ref[:, PAD:PAD + L4, 0:128] = h.astype(bf16)
        cols = jnp.concatenate(
            [pad_ref[:, k:k + L4, 0:128] for k in range(K)], axis=-1)
        acc = jnp.dot(cols.reshape(Bt * L4, K * 128), w34_ref[i],
                      preferred_element_type=f32)            # (Bt*L4, 128)
        y = acc * s + t if s is not None else acc + t
        h = jnp.maximum(y, 0.0).reshape(Bt, L4, 128)

    # ---- FC (BN(6) folded) + Softmax(dim=1) epilogue (h stays in VMEM)
    flat = h.reshape(Bt, L4 * 128)                           # channels-last flatten
    logits = jnp.dot(flat, wfc_ref[...],
                     preferred_element_type=f32) + tfc_ref[...]
    m = jnp.max(logits, axis=1, keepdims=True)
    e = jnp.exp(logits - m)
    o_ref[...] = (e / jnp.sum(e, axis=1, keepdims=True)).astype(o_ref.dtype)


def _fused_forward(x, p, *, L, Bt):
    """x: (Bp, L, 1) f32 with Bp % Bt == 0.  Returns (Bp, 6) f32 softmax."""
    Bp = x.shape[0]
    L4 = L // POOL
    F = 128 * L4
    kern = functools.partial(_fused_kernel, Bt=Bt, L=L)
    return pl.pallas_call(
        kern,
        out_shape=jax.ShapeDtypeStruct((Bp, 6), jnp.float32),
        grid_spec=pltpu.PrefetchScalarGridSpec(
            num_scalar_prefetch=0,
            grid=(Bp // Bt,),
            in_specs=[
                pl.BlockSpec((Bt, L, 1), lambda b: (b, 0, 0)),        # x
                pl.BlockSpec((K, 256), lambda b: (0, 0)),             # w1 im2col
                pl.BlockSpec((K * 256, 128), lambda b: (0, 0)),       # w2 im2col
                pl.BlockSpec((4, K * 128, 128), lambda b: (0, 0, 0)), # w3a..w4
                pl.BlockSpec((2, 256), lambda b: (0, 0)),             # aff1
                pl.BlockSpec((8, 128), lambda b: (0, 0)),             # aff2
                pl.BlockSpec((F, 6), lambda b: (0, 0)),               # wfc
                pl.BlockSpec((1, 6), lambda b: (0, 0)),               # tfc
            ],
            out_specs=pl.BlockSpec((Bt, 6), lambda b: (b, 0)),
            scratch_shapes=[pltpu.VMEM((Bt, L + 2 * PAD, 256), jnp.bfloat16)],
        ),
        compiler_params=pltpu.CompilerParams(
            dimension_semantics=("parallel",),
            vmem_limit_bytes=48 * 1024 * 1024),
    )(x, p["w1"], p["w2"], p["w34"], p["aff1"], p["aff2"], p["wfc"], p["tfc"])


# ---------------------------------------------------------------------------
# Deterministic parameter initialization (shapes from CNN_ONEDIM.__init__).
# BatchNorm params/stats use PyTorch defaults (gamma=1, beta=0, mean=0, var=1).
# ---------------------------------------------------------------------------
def _conv_params(key, cin, cout):
    kw, kb = jax.random.split(key)
    bound = 1.0 / jnp.sqrt(float(cin * K))
    w_t = jax.random.uniform(kw, (cout, cin, K), jnp.float32, -bound, bound)
    b = jax.random.uniform(kb, (cout,), jnp.float32, -bound, bound)
    return jnp.transpose(w_t, (2, 1, 0)), b          # (K, Cin, Cout), (Cout,)


def _bn_fold(c):
    gamma = jnp.ones((c,), jnp.float32)
    beta = jnp.zeros((c,), jnp.float32)
    mean = jnp.zeros((c,), jnp.float32)
    var = jnp.ones((c,), jnp.float32)
    inv = gamma / jnp.sqrt(var + EPS)
    return inv, beta - mean * inv                    # scale, shift


def init_params(key, L=64):
    assert L % POOL == 0
    L4 = L // POOL
    F = 128 * L4                                     # LazyLinear in-features
    keys = jax.random.split(key, 8)
    bf16 = jnp.bfloat16

    # layer1: Conv(1->256) + BN + ReLU   (BN folded pre-ReLU)
    w1, b1 = _conv_params(keys[0], 1, 256)           # (K, 1, 256)
    inv1, sh1 = _bn_fold(256)
    aff1 = jnp.stack([inv1, b1 * inv1 + sh1])        # (2, 256): scale / shift

    # layer2: Conv(256->128) + ReLU + Dropout1d + BN + MaxPool(8)
    w2, b2 = _conv_params(keys[1], 256, 128)         # (K, 256, 128)
    inv2, sh2 = _bn_fold(128)
    # layer3: Conv+ReLU, Conv+ReLU, Conv+BN+ReLU (+Dropout1d)
    w3a, b3a = _conv_params(keys[2], 128, 128)
    w3b, b3b = _conv_params(keys[3], 128, 128)
    w3c, b3c = _conv_params(keys[4], 128, 128)
    inv3, sh3 = _bn_fold(128)
    # layer4: Conv(128->128) + ReLU (+ Flatten + Dropout)
    w4, b4 = _conv_params(keys[5], 128, 128)

    aff2 = jnp.stack([b2, inv2, sh2,                 # layer2 bias / BN scale / shift
                      b3a, b3b,                      # layer3a / 3b biases
                      inv3, b3c * inv3 + sh3,        # layer3c folded BN scale/shift
                      b4])                           # layer4 bias  -> (8, 128)

    # im2col weight layouts: rows indexed k*Cin + cin
    w1c = w1.reshape(K, 256).astype(bf16)                       # (5, 256)
    w2c = w2.reshape(K * 256, 128).astype(bf16)                 # (1280, 128)
    w34 = jnp.stack([w.reshape(K * 128, 128)
                     for w in (w3a, w3b, w3c, w4)]).astype(bf16)  # (4, 640, 128)

    # fc: LazyLinear(F -> 6) + BatchNorm1d(6) + Softmax
    bound = 1.0 / jnp.sqrt(float(F))
    w_lin = jax.random.uniform(keys[6], (6, F), jnp.float32, -bound, bound)
    b_lin = jax.random.uniform(keys[7], (6,), jnp.float32, -bound, bound)
    invf, shf = _bn_fold(6)
    # Pre-permute rows so a channels-LAST flatten (index l*128 + c) matches
    # PyTorch's channel-major flatten (index c*L4 + l); fold BN scale into cols.
    w_perm = (jnp.transpose(w_lin)                   # (F, 6), rows indexed c*L4+l
              .reshape(128, L4, 6).transpose(1, 0, 2).reshape(F, 6))
    wfc = w_perm * invf[None, :]
    tfc = (b_lin * invf + shf).reshape(1, 6)

    return dict(w1=w1c, w2=w2c, w34=w34, aff1=aff1, aff2=aff2, wfc=wfc, tfc=tfc)


# ---------------------------------------------------------------------------
# Forward pass (inference semantics).
# ---------------------------------------------------------------------------
def cnn_onedim_forward(x, params):
    """x: (B, 1, L) float32, NCL like the PyTorch module."""
    B, cin, L = x.shape
    assert cin == 1 and L % POOL == 0
    Bt = _pick_bt(B)
    Bp = _round_up(B, Bt)

    h = x.reshape(B, L, 1)                           # NCL (Cin=1) -> channels-last (free)
    if Bp != B:                                      # pad batch to a Bt multiple
        h = jnp.pad(h, ((0, Bp - B), (0, 0), (0, 0)))

    # TODO(synk): Dropout1d / Dropout are stochastic train-time ops; identity in eval.
    out = _fused_forward(h, params, L=L, Bt=Bt)      # (Bp, 6)
    return out[:B]


if __name__ == "__main__":
    B, L = 2, 64
    key = jax.random.PRNGKey(0)
    kx, kp = jax.random.split(key)
    x = jax.random.normal(kx, (B, 1, L), jnp.float32)
    params = init_params(kp, L=L)

    out = jax.block_until_ready(jax.jit(cnn_onedim_forward)(x, params))

    assert out.shape == (B, 6), out.shape
    assert bool(jnp.all(jnp.isfinite(out)))
    row_sums = jnp.sum(out, axis=1)
    assert bool(jnp.all(jnp.abs(row_sums - 1.0) < 1e-4)), row_sums
    print("KERNEL_OK")
</pallas_src>

<mosaic_0001>
module attributes {stable_mosaic.version = 11 : i64} {
  func.func @_fused_kernel(%arg0: i32, %arg1: memref<8x64x1xf32, #tpu.memory_space<vmem>>, %arg2: memref<5x256xbf16, #tpu.memory_space<vmem>>, %arg3: memref<1280x128xbf16, #tpu.memory_space<vmem>>, %arg4: memref<4x640x128xbf16, #tpu.memory_space<vmem>>, %arg5: memref<2x256xf32, #tpu.memory_space<vmem>>, %arg6: memref<8x128xf32, #tpu.memory_space<vmem>>, %arg7: memref<1024x6xf32, #tpu.memory_space<vmem>>, %arg8: memref<1x6xf32, #tpu.memory_space<vmem>>, %arg9: memref<8x6xf32, #tpu.memory_space<vmem>>, %arg10: memref<8x68x256xbf16, #tpu.memory_space<vmem>>) attributes {dimension_semantics = [#tpu.dimension_semantics<parallel>], iteration_bounds = array<i64: 1>, scalar_prefetch = 0 : i64, scratch_operands = 1 : i64, tpu.core_type = #tpu.core_type<tc>, window_params = [{transform_indices = @transform_0, window_bounds = array<i64: 8, 64, 1>}, {pipeline_mode = #tpu.pipeline_mode<synchronous>, transform_indices = @transform_1, window_bounds = array<i64: 5, 256>}, {pipeline_mode = #tpu.pipeline_mode<synchronous>, transform_indices = @transform_2, window_bounds = array<i64: 1280, 128>}, {pipeline_mode = #tpu.pipeline_mode<synchronous>, transform_indices = @transform_3, window_bounds = array<i64: 4, 640, 128>}, {pipeline_mode = #tpu.pipeline_mode<synchronous>, transform_indices = @transform_4, window_bounds = array<i64: 2, 256>}, {pipeline_mode = #tpu.pipeline_mode<synchronous>, transform_indices = @transform_5, window_bounds = array<i64: 8, 128>}, {pipeline_mode = #tpu.pipeline_mode<synchronous>, transform_indices = @transform_6, window_bounds = array<i64: 1024, 6>}, {pipeline_mode = #tpu.pipeline_mode<synchronous>, transform_indices = @transform_7, window_bounds = array<i64: 1, 6>}, {transform_indices = @transform_8, window_bounds = array<i64: 8, 6>}]} {
    %c0 = arith.constant 0 : index
    %c0_0 = arith.constant 0 : index
    %c0_1 = arith.constant 0 : index
    %0 = vector.load %arg1[%c0, %c0_0, %c0_1] : memref<8x64x1xf32, #tpu.memory_space<vmem>>, vector<8x64x1xf32>
    %cst = arith.constant 0.000000e+00 : f32
    %1 = vector.broadcast %cst : f32 to vector<8x2x1xf32>
    %2 = tpu.concatenate %1, %0, %1 in 1 : vector<8x2x1xf32>, vector<8x64x1xf32>, vector<8x2x1xf32> -> vector<8x68x1xf32>
    %3 = arith.truncf %2 : vector<8x68x1xf32> to vector<8x68x1xbf16>
    %4 = vector.extract_strided_slice %3 {offsets = [0, 0, 0], sizes = [8, 64, 1], strides = [1, 1, 1]} : vector<8x68x1xbf16> to vector<8x64x1xbf16>
    %5 = vector.extract_strided_slice %3 {offsets = [0, 1, 0], sizes = [8, 64, 1], strides = [1, 1, 1]} : vector<8x68x1xbf16> to vector<8x64x1xbf16>
    %6 = vector.extract_strided_slice %3 {offsets = [0, 2, 0], sizes = [8, 64, 1], strides = [1, 1, 1]} : vector<8x68x1xbf16> to vector<8x64x1xbf16>
    %7 = vector.extract_strided_slice %3 {offsets = [0, 3, 0], sizes = [8, 64, 1], strides = [1, 1, 1]} : vector<8x68x1xbf16> to vector<8x64x1xbf16>
    %8 = vector.extract_strided_slice %3 {offsets = [0, 4, 0], sizes = [8, 64, 1], strides = [1, 1, 1]} : vector<8x68x1xbf16> to vector<8x64x1xbf16>
    %9 = tpu.concatenate %4, %5, %6, %7, %8 in 2 : vector<8x64x1xbf16>, vector<8x64x1xbf16>, vector<8x64x1xbf16>, vector<8x64x1xbf16>, vector<8x64x1xbf16> -> vector<8x64x5xbf16>
    %10 = vector.shape_cast %9 : vector<8x64x5xbf16> to vector<512x5xbf16>
    %c0_2 = arith.constant 0 : index
    %c0_3 = arith.constant 0 : index
    %11 = vector.load %arg2[%c0_2, %c0_3] : memref<5x256xbf16, #tpu.memory_space<vmem>>, vector<5x256xbf16>
    %cst_4 = arith.constant dense<0.000000e+00> : vector<512x256xf32>
    %12 = tpu.matmul %10, %11, %cst_4 {dimension_numbers = #tpu.dot_dimension_numbers<[1], [0], [0], [1], [0, 0, 1, 1], [], []>} : vector<512x5xbf16>, vector<5x256xbf16>, vector<512x256xf32> -> vector<512x256xf32>
    %c0_5 = arith.constant 0 : index
    %c0_6 = arith.constant 0 : index
    %13 = vector.load %arg5[%c0_5, %c0_6] : memref<2x256xf32, #tpu.memory_space<vmem>>, vector<1x256xf32>
    %c1 = arith.constant 1 : index
    %c0_7 = arith.constant 0 : index
    %14 = vector.load %arg5[%c1, %c0_7] : memref<2x256xf32, #tpu.memory_space<vmem>>, vector<1x256xf32>
    %15 = vector.broadcast %13 : vector<1x256xf32> to vector<512x256xf32>
    %16 = arith.mulf %12, %15 : vector<512x256xf32>
    %17 = vector.broadcast %14 : vector<1x256xf32> to vector<512x256xf32>
    %18 = arith.addf %16, %17 : vector<512x256xf32>
    %cst_8 = arith.constant 0.000000e+00 : f32
    %19 = vector.broadcast %cst_8 : f32 to vector<512x256xf32>
    %20 = arith.maximumf %18, %19 : vector<512x256xf32>
    %cst_9 = arith.constant 0.000000e+00 : bf16
    %21 = vector.broadcast %cst_9 : bf16 to vector<8x2x256xbf16>
    %c0_10 = arith.constant 0 : index
    %c0_11 = arith.constant 0 : index
    %c0_12 = arith.constant 0 : index
    %22 = vector.load %arg10[%c0_10, %c0_11, %c0_12] : memref<8x68x256xbf16, #tpu.memory_space<vmem>>, vector<8x2x256xbf16>
    tpu.vector_store %arg10[%c0_10, %c0_11, %c0_12], %21 {strides = array<i32>} : memref<8x68x256xbf16, #tpu.memory_space<vmem>>, vector<8x2x256xbf16>,
    %cst_13 = arith.constant 0.000000e+00 : bf16
    %23 = vector.broadcast %cst_13 : bf16 to vector<8x2x256xbf16>
    %c0_14 = arith.constant 0 : index
    %c66 = arith.constant 66 : index
    %c0_15 = arith.constant 0 : index
    %24 = vector.load %arg10[%c0_14, %c66, %c0_15] : memref<8x68x256xbf16, #tpu.memory_space<vmem>>, vector<8x2x256xbf16>
    tpu.vector_store %arg10[%c0_14, %c66, %c0_15], %23 {strides = array<i32>} : memref<8x68x256xbf16, #tpu.memory_space<vmem>>, vector<8x2x256xbf16>,
    %25 = vector.shape_cast %20 : vector<512x256xf32> to vector<8x64x256xf32>
    %26 = arith.truncf %25 : vector<8x64x256xf32> to vector<8x64x256xbf16>
    %c0_16 = arith.constant 0 : index
    %c2 = arith.constant 2 : index
    %c0_17 = arith.constant 0 : index
    %27 = vector.load %arg10[%c0_16, %c2, %c0_17] : memref<8x68x256xbf16, #tpu.memory_space<vmem>>, vector<8x64x256xbf16>
    tpu.vector_store %arg10[%c0_16, %c2, %c0_17], %26 {strides = array<i32>} : memref<8x68x256xbf16, #tpu.memory_space<vmem>>, vector<8x64x256xbf16>,
    %c0_18 = arith.constant 0 : index
    %c0_19 = arith.constant 0 : index
    %c0_20 = arith.constant 0 : index
    %28 = vector.load %arg10[%c0_18, %c0_19, %c0_20] : memref<8x68x256xbf16, #tpu.memory_space<vmem>>, vector<8x64x256xbf16>
    %c0_21 = arith.constant 0 : index
    %c1_22 = arith.constant 1 : index
    %c0_23 = arith.constant 0 : index
    %29 = vector.load %arg10[%c0_21, %c1_22, %c0_23] : memref<8x68x256xbf16, #tpu.memory_space<vmem>>, vector<8x64x256xbf16>
    %c0_24 = arith.constant 0 : index
    %c2_25 = arith.constant 2 : index
    %c0_26 = arith.constant 0 : index
    %30 = vector.load %arg10[%c0_24, %c2_25, %c0_26] : memref<8x68x256xbf16, #tpu.memory_space<vmem>>, vector<8x64x256xbf16>
    %c0_27 = arith.constant 0 : index
    %c3 = arith.constant 3 : index
    %c0_28 = arith.constant 0 : index
    %31 = vector.load %arg10[%c0_27, %c3, %c0_28] : memref<8x68x256xbf16, #tpu.memory_space<vmem>>, vector<8x64x256xbf16>
    %c0_29 = arith.constant 0 : index
    %c4 = arith.constant 4 : index
    %c0_30 = arith.constant 0 : index
    %32 = vector.load %arg10[%c0_29, %c4, %c0_30] : memref<8x68x256xbf16, #tpu.memory_space<vmem>>, vector<8x64x256xbf16>
    %33 = tpu.concatenate %28, %29, %30, %31, %32 in 2 : vector<8x64x256xbf16>, vector<8x64x256xbf16>, vector<8x64x256xbf16>, vector<8x64x256xbf16>, vector<8x64x256xbf16> -> vector<8x64x1280xbf16>
    %34 = vector.shape_cast %33 : vector<8x64x1280xbf16> to vector<512x1280xbf16>
    %c0_31 = arith.constant 0 : index
    %c0_32 = arith.constant 0 : index
    %35 = vector.load %arg3[%c0_31, %c0_32] : memref<1280x128xbf16, #tpu.memory_space<vmem>>, vector<1280x128xbf16>
    %cst_33 = arith.constant dense<0.000000e+00> : vector<512x128xf32>
    %36 = tpu.matmul %34, %35, %cst_33 {dimension_numbers = #tpu.dot_dimension_numbers<[1], [0], [0], [1], [0, 0, 1, 1], [], []>} : vector<512x1280xbf16>, vector<1280x128xbf16>, vector<512x128xf32> -> vector<512x128xf32>
    %c0_34 = arith.constant 0 : index
    %c0_35 = arith.constant 0 : index
    %37 = vector.load %arg6[%c0_34, %c0_35] : memref<8x128xf32, #tpu.memory_space<vmem>>, vector<1x128xf32>
    %c1_36 = arith.constant 1 : index
    %c0_37 = arith.constant 0 : index
    %38 = vector.load %arg6[%c1_36, %c0_37] : memref<8x128xf32, #tpu.memory_space<vmem>>, vector<1x128xf32>
    %c2_38 = arith.constant 2 : index
    %c0_39 = arith.constant 0 : index
    %39 = vector.load %arg6[%c2_38, %c0_39] : memref<8x128xf32, #tpu.memory_space<vmem>>, vector<1x128xf32>
    %40 = vector.broadcast %37 : vector<1x128xf32> to vector<512x128xf32>
    %41 = arith.addf %36, %40 : vector<512x128xf32>
    %cst_40 = arith.constant 0.000000e+00 : f32
    %42 = vector.broadcast %cst_40 : f32 to vector<512x128xf32>
    %43 = arith.maximumf %41, %42 : vector<512x128xf32>
    %44 = vector.broadcast %38 : vector<1x128xf32> to vector<512x128xf32>
    %45 = arith.mulf %43, %44 : vector<512x128xf32>
    %46 = vector.broadcast %39 : vector<1x128xf32> to vector<512x128xf32>
    %47 = arith.addf %45, %46 : vector<512x128xf32>
    %48 = vector.shape_cast %47 : vector<512x128xf32> to vector<64x8x128xf32>
    %cst_41 = arith.constant dense<0xFF800000> : vector<64x128xf32>
    %49 = vector.multi_reduction <maximumf>, %48, %cst_41 [1] : vector<64x8x128xf32> to vector<64x128xf32>
    %50 = vector.shape_cast %49 : vector<64x128xf32> to vector<8x8x128xf32>
    %cst_42 = arith.constant 0.000000e+00 : bf16
    %51 = vector.broadcast %cst_42 : bf16 to vector<8x2x128xbf16>
    %c0_43 = arith.constant 0 : index
    %c10 = arith.constant 10 : index
    %c0_44 = arith.constant 0 : index
    %52 = vector.load %arg10[%c0_43, %c10, %c0_44] : memref<8x68x256xbf16, #tpu.memory_space<vmem>>, vector<8x2x128xbf16>
    tpu.vector_store %arg10[%c0_43, %c10, %c0_44], %51 {strides = array<i32>} : memref<8x68x256xbf16, #tpu.memory_space<vmem>>, vector<8x2x128xbf16>,
    %c3_45 = arith.constant 3 : index
    %c0_46 = arith.constant 0 : index
    %53 = vector.load %arg6[%c3_45, %c0_46] : memref<8x128xf32, #tpu.memory_space<vmem>>, vector<1x128xf32>
    %c4_47 = arith.constant 4 : index
    %c0_48 = arith.constant 0 : index
    %54 = vector.load %arg6[%c4_47, %c0_48] : memref<8x128xf32, #tpu.memory_space<vmem>>, vector<1x128xf32>
    %c5 = arith.constant 5 : index
    %c0_49 = arith.constant 0 : index
    %55 = vector.load %arg6[%c5, %c0_49] : memref<8x128xf32, #tpu.memory_space<vmem>>, vector<1x128xf32>
    %c6 = arith.constant 6 : index
    %c0_50 = arith.constant 0 : index
    %56 = vector.load %arg6[%c6, %c0_50] : memref<8x128xf32, #tpu.memory_space<vmem>>, vector<1x128xf32>
    %c7 = arith.constant 7 : index
    %c0_51 = arith.constant 0 : index
    %57 = vector.load %arg6[%c7, %c0_51] : memref<8x128xf32, #tpu.memory_space<vmem>>, vector<1x128xf32>
    %58 = arith.truncf %50 : vector<8x8x128xf32> to vector<8x8x128xbf16>
    %c0_52 = arith.constant 0 : index
    %c2_53 = arith.constant 2 : index
    %c0_54 = arith.constant 0 : index
    %59 = vector.load %arg10[%c0_52, %c2_53, %c0_54] : memref<8x68x256xbf16, #tpu.memory_space<vmem>>, vector<8x8x128xbf16>
    tpu.vector_store %arg10[%c0_52, %c2_53, %c0_54], %58 {strides = array<i32>} : memref<8x68x256xbf16, #tpu.memory_space<vmem>>, vector<8x8x128xbf16>,
    %c0_55 = arith.constant 0 : index
    %c0_56 = arith.constant 0 : index
    %c0_57 = arith.constant 0 : index
    %60 = vector.load %arg10[%c0_55, %c0_56, %c0_57] : memref<8x68x256xbf16, #tpu.memory_space<vmem>>, vector<8x8x128xbf16>
    %c0_58 = arith.constant 0 : index
    %c1_59 = arith.constant 1 : index
    %c0_60 = arith.constant 0 : index
    %61 = vector.load %arg10[%c0_58, %c1_59, %c0_60] : memref<8x68x256xbf16, #tpu.memory_space<vmem>>, vector<8x8x128xbf16>
    %c0_61 = arith.constant 0 : index
    %c2_62 = arith.constant 2 : index
    %c0_63 = arith.constant 0 : index
    %62 = vector.load %arg10[%c0_61, %c2_62, %c0_63] : memref<8x68x256xbf16, #tpu.memory_space<vmem>>, vector<8x8x128xbf16>
    %c0_64 = arith.constant 0 : index
    %c3_65 = arith.constant 3 : index
    %c0_66 = arith.constant 0 : index
    %63 = vector.load %arg10[%c0_64, %c3_65, %c0_66] : memref<8x68x256xbf16, #tpu.memory_space<vmem>>, vector<8x8x128xbf16>
    %c0_67 = arith.constant 0 : index
    %c4_68 = arith.constant 4 : index
    %c0_69 = arith.constant 0 : index
    %64 = vector.load %arg10[%c0_67, %c4_68, %c0_69] : memref<8x68x256xbf16, #tpu.memory_space<vmem>>, vector<8x8x128xbf16>
    %65 = tpu.concatenate %60, %61, %62, %63, %64 in 2 : vector<8x8x128xbf16>, vector<8x8x128xbf16>, vector<8x8x128xbf16>, vector<8x8x128xbf16>, vector<8x8x128xbf16> -> vector<8x8x640xbf16>
    %66 = vector.shape_cast %65 : vector<8x8x640xbf16> to vector<64x640xbf16>
    %c0_70 = arith.constant 0 : index
    %c0_71 = arith.constant 0 : index
    %c0_72 = arith.constant 0 : index
    %67 = vector.load %arg4[%c0_70, %c0_71, %c0_72] : memref<4x640x128xbf16, #tpu.memory_space<vmem>>, vector<1x640x128xbf16>
    %68 = vector.shape_cast %67 : vector<1x640x128xbf16> to vector<640x128xbf16>
    %cst_73 = arith.constant dense<0.000000e+00> : vector<64x128xf32>
    %69 = tpu.matmul %66, %68, %cst_73 {dimension_numbers = #tpu.dot_dimension_numbers<[1], [0], [0], [1], [0, 0, 1, 1], [], []>} : vector<64x640xbf16>, vector<640x128xbf16>, vector<64x128xf32> -> vector<64x128xf32>
    %70 = vector.broadcast %53 : vector<1x128xf32> to vector<64x128xf32>
    %71 = arith.addf %69, %70 : vector<64x128xf32>
    %cst_74 = arith.constant 0.000000e+00 : f32
    %72 = vector.broadcast %cst_74 : f32 to vector<64x128xf32>
    %73 = arith.maximumf %71, %72 : vector<64x128xf32>
    %74 = vector.shape_cast %73 : vector<64x128xf32> to vector<8x8x128xf32>
    %75 = arith.truncf %74 : vector<8x8x128xf32> to vector<8x8x128xbf16>
    %c0_75 = arith.constant 0 : index
    %c2_76 = arith.constant 2 : index
    %c0_77 = arith.constant 0 : index
    %76 = vector.load %arg10[%c0_75, %c2_76, %c0_77] : memref<8x68x256xbf16, #tpu.memory_space<vmem>>, vector<8x8x128xbf16>
    tpu.vector_store %arg10[%c0_75, %c2_76, %c0_77], %75 {strides = array<i32>} : memref<8x68x256xbf16, #tpu.memory_space<vmem>>, vector<8x8x128xbf16>,
    %c0_78 = arith.constant 0 : index
    %c0_79 = arith.constant 0 : index
    %c0_80 = arith.constant 0 : index
    %77 = vector.load %arg10[%c0_78, %c0_79, %c0_80] : memref<8x68x256xbf16, #tpu.memory_space<vmem>>, vector<8x8x128xbf16>
    %c0_81 = arith.constant 0 : index
    %c1_82 = arith.constant 1 : index
    %c0_83 = arith.constant 0 : index
    %78 = vector.load %arg10[%c0_81, %c1_82, %c0_83] : memref<8x68x256xbf16, #tpu.memory_space<vmem>>, vector<8x8x128xbf16>
    %c0_84 = arith.constant 0 : index
    %c2_85 = arith.constant 2 : index
    %c0_86 = arith.constant 0 : index
    %79 = vector.load %arg10[%c0_84, %c2_85, %c0_86] : memref<8x68x256xbf16, #tpu.memory_space<vmem>>, vector<8x8x128xbf16>
    %c0_87 = arith.constant 0 : index
    %c3_88 = arith.constant 3 : index
    %c0_89 = arith.constant 0 : index
    %80 = vector.load %arg10[%c0_87, %c3_88, %c0_89] : memref<8x68x256xbf16, #tpu.memory_space<vmem>>, vector<8x8x128xbf16>
    %c0_90 = arith.constant 0 : index
    %c4_91 = arith.constant 4 : index
    %c0_92 = arith.constant 0 : index
    %81 = vector.load %arg10[%c0_90, %c4_91, %c0_92] : memref<8x68x256xbf16, #tpu.memory_space<vmem>>, vector<8x8x128xbf16>
    %82 = tpu.concatenate %77, %78, %79, %80, %81 in 2 : vector<8x8x128xbf16>, vector<8x8x128xbf16>, vector<8x8x128xbf16>, vector<8x8x128xbf16>, vector<8x8x128xbf16> -> vector<8x8x640xbf16>
    %83 = vector.shape_cast %82 : vector<8x8x640xbf16> to vector<64x640xbf16>
    %c1_93 = arith.constant 1 : index
    %c0_94 = arith.constant 0 : index
    %c0_95 = arith.constant 0 : index
    %84 = vector.load %arg4[%c1_93, %c0_94, %c0_95] : memref<4x640x128xbf16, #tpu.memory_space<vmem>>, vector<1x640x128xbf16>
    %85 = vector.shape_cast %84 : vector<1x640x128xbf16> to vector<640x128xbf16>
    %cst_96 = arith.constant dense<0.000000e+00> : vector<64x128xf32>
    %86 = tpu.matmul %83, %85, %cst_96 {dimension_numbers = #tpu.dot_dimension_numbers<[1], [0], [0], [1], [0, 0, 1, 1], [], []>} : vector<64x640xbf16>, vector<640x128xbf16>, vector<64x128xf32> -> vector<64x128xf32>
    %87 = vector.broadcast %54 : vector<1x128xf32> to vector<64x128xf32>
    %88 = arith.addf %86, %87 : vector<64x128xf32>
    %cst_97 = arith.constant 0.000000e+00 : f32
    %89 = vector.broadcast %cst_97 : f32 to vector<64x128xf32>
    %90 = arith.maximumf %88, %89 : vector<64x128xf32>
    %91 = vector.shape_cast %90 : vector<64x128xf32> to vector<8x8x128xf32>
    %92 = arith.truncf %91 : vector<8x8x128xf32> to vector<8x8x128xbf16>
    %c0_98 = arith.constant 0 : index
    %c2_99 = arith.constant 2 : index
    %c0_100 = arith.constant 0 : index
    %93 = vector.load %arg10[%c0_98, %c2_99, %c0_100] : memref<8x68x256xbf16, #tpu.memory_space<vmem>>, vector<8x8x128xbf16>
    tpu.vector_store %arg10[%c0_98, %c2_99, %c0_100], %92 {strides = array<i32>} : memref<8x68x256xbf16, #tpu.memory_space<vmem>>, vector<8x8x128xbf16>,
    %c0_101 = arith.constant 0 : index
    %c0_102 = arith.constant 0 : index
    %c0_103 = arith.constant 0 : index
    %94 = vector.load %arg10[%c0_101, %c0_102, %c0_103] : memref<8x68x256xbf16, #tpu.memory_space<vmem>>, vector<8x8x128xbf16>
    %c0_104 = arith.constant 0 : index
    %c1_105 = arith.constant 1 : index
    %c0_106 = arith.constant 0 : index
    %95 = vector.load %arg10[%c0_104, %c1_105, %c0_106] : memref<8x68x256xbf16, #tpu.memory_space<vmem>>, vector<8x8x128xbf16>
    %c0_107 = arith.constant 0 : index
    %c2_108 = arith.constant 2 : index
    %c0_109 = arith.constant 0 : index
    %96 = vector.load %arg10[%c0_107, %c2_108, %c0_109] : memref<8x68x256xbf16, #tpu.memory_space<vmem>>, vector<8x8x128xbf16>
    %c0_110 = arith.constant 0 : index
    %c3_111 = arith.constant 3 : index
    %c0_112 = arith.constant 0 : index
    %97 = vector.load %arg10[%c0_110, %c3_111, %c0_112] : memref<8x68x256xbf16, #tpu.memory_space<vmem>>, vector<8x8x128xbf16>
    %c0_113 = arith.constant 0 : index
    %c4_114 = arith.constant 4 : index
    %c0_115 = arith.constant 0 : index
    %98 = vector.load %arg10[%c0_113, %c4_114, %c0_115] : memref<8x68x256xbf16, #tpu.memory_space<vmem>>, vector<8x8x128xbf16>
    %99 = tpu.concatenate %94, %95, %96, %97, %98 in 2 : vector<8x8x128xbf16>, vector<8x8x128xbf16>, vector<8x8x128xbf16>, vector<8x8x128xbf16>, vector<8x8x128xbf16> -> vector<8x8x640xbf16>
    %100 = vector.shape_cast %99 : vector<8x8x640xbf16> to vector<64x640xbf16>
    %c2_116 = arith.constant 2 : index
    %c0_117 = arith.constant 0 : index
    %c0_118 = arith.constant 0 : index
    %101 = vector.load %arg4[%c2_116, %c0_117, %c0_118] : memref<4x640x128xbf16, #tpu.memory_space<vmem>>, vector<1x640x128xbf16>
    %102 = vector.shape_cast %101 : vector<1x640x128xbf16> to vector<640x128xbf16>
    %cst_119 = arith.constant dense<0.000000e+00> : vector<64x128xf32>
    %103 = tpu.matmul %100, %102, %cst_119 {dimension_numbers = #tpu.dot_dimension_numbers<[1], [0], [0], [1], [0, 0, 1, 1], [], []>} : vector<64x640xbf16>, vector<640x128xbf16>, vector<64x128xf32> -> vector<64x128xf32>
    %104 = vector.broadcast %55 : vector<1x128xf32> to vector<64x128xf32>
    %105 = arith.mulf %103, %104 : vector<64x128xf32>
    %106 = vector.broadcast %56 : vector<1x128xf32> to vector<64x128xf32>
    %107 = arith.addf %105, %106 : vector<64x128xf32>
    %cst_120 = arith.constant 0.000000e+00 : f32
    %108 = vector.broadcast %cst_120 : f32 to vector<64x128xf32>
    %109 = arith.maximumf %107, %108 : vector<64x128xf32>
    %110 = vector.shape_cast %109 : vector<64x128xf32> to vector<8x8x128xf32>
    %111 = arith.truncf %110 : vector<8x8x128xf32> to vector<8x8x128xbf16>
    %c0_121 = arith.constant 0 : index
    %c2_122 = arith.constant 2 : index
    %c0_123 = arith.constant 0 : index
    %112 = vector.load %arg10[%c0_121, %c2_122, %c0_123] : memref<8x68x256xbf16, #tpu.memory_space<vmem>>, vector<8x8x128xbf16>
    tpu.vector_store %arg10[%c0_121, %c2_122, %c0_123], %111 {strides = array<i32>} : memref<8x68x256xbf16, #tpu.memory_space<vmem>>, vector<8x8x128xbf16>,
    %c0_124 = arith.constant 0 : index
    %c0_125 = arith.constant 0 : index
    %c0_126 = arith.constant 0 : index
    %113 = vector.load %arg10[%c0_124, %c0_125, %c0_126] : memref<8x68x256xbf16, #tpu.memory_space<vmem>>, vector<8x8x128xbf16>
    %c0_127 = arith.constant 0 : index
    %c1_128 = arith.constant 1 : index
    %c0_129 = arith.constant 0 : index
    %114 = vector.load %arg10[%c0_127, %c1_128, %c0_129] : memref<8x68x256xbf16, #tpu.memory_space<vmem>>, vector<8x8x128xbf16>
    %c0_130 = arith.constant 0 : index
    %c2_131 = arith.constant 2 : index
    %c0_132 = arith.constant 0 : index
    %115 = vector.load %arg10[%c0_130, %c2_131, %c0_132] : memref<8x68x256xbf16, #tpu.memory_space<vmem>>, vector<8x8x128xbf16>
    %c0_133 = arith.constant 0 : index
    %c3_134 = arith.constant 3 : index
    %c0_135 = arith.constant 0 : index
    %116 = vector.load %arg10[%c0_133, %c3_134, %c0_135] : memref<8x68x256xbf16, #tpu.memory_space<vmem>>, vector<8x8x128xbf16>
    %c0_136 = arith.constant 0 : index
    %c4_137 = arith.constant 4 : index
    %c0_138 = arith.constant 0 : index
    %117 = vector.load %arg10[%c0_136, %c4_137, %c0_138] : memref<8x68x256xbf16, #tpu.memory_space<vmem>>, vector<8x8x128xbf16>
    %118 = tpu.concatenate %113, %114, %115, %116, %117 in 2 : vector<8x8x128xbf16>, vector<8x8x128xbf16>, vector<8x8x128xbf16>, vector<8x8x128xbf16>, vector<8x8x128xbf16> -> vector<8x8x640xbf16>
    %119 = vector.shape_cast %118 : vector<8x8x640xbf16> to vector<64x640xbf16>
    %c3_139 = arith.constant 3 : index
    %c0_140 = arith.constant 0 : index
    %c0_141 = arith.constant 0 : index
    %120 = vector.load %arg4[%c3_139, %c0_140, %c0_141] : memref<4x640x128xbf16, #tpu.memory_space<vmem>>, vector<1x640x128xbf16>
    %121 = vector.shape_cast %120 : vector<1x640x128xbf16> to vector<640x128xbf16>
    %cst_142 = arith.constant dense<0.000000e+00> : vector<64x128xf32>
    %122 = tpu.matmul %119, %121, %cst_142 {dimension_numbers = #tpu.dot_dimension_numbers<[1], [0], [0], [1], [0, 0, 1, 1], [], []>} : vector<64x640xbf16>, vector<640x128xbf16>, vector<64x128xf32> -> vector<64x128xf32>
    %123 = vector.broadcast %57 : vector<1x128xf32> to vector<64x128xf32>
    %124 = arith.addf %122, %123 : vector<64x128xf32>
    %cst_143 = arith.constant 0.000000e+00 : f32
    %125 = vector.broadcast %cst_143 : f32 to vector<64x128xf32>
    %126 = arith.maximumf %124, %125 : vector<64x128xf32>
    %127 = vector.shape_cast %126 : vector<64x128xf32> to vector<8x8x128xf32>
    %128 = vector.shape_cast %127 : vector<8x8x128xf32> to vector<8x1024xf32>
    %c0_144 = arith.constant 0 : index
    %c0_145 = arith.constant 0 : index
    %129 = vector.load %arg7[%c0_144, %c0_145] : memref<1024x6xf32, #tpu.memory_space<vmem>>, vector<1024x6xf32>
    %cst_146 = arith.constant dense<0.000000e+00> : vector<8x6xf32>
    %130 = tpu.matmul %128, %129, %cst_146 {dimension_numbers = #tpu.dot_dimension_numbers<[1], [0], [0], [1], [0, 0, 1, 1], [], []>} : vector<8x1024xf32>, vector<1024x6xf32>, vector<8x6xf32> -> vector<8x6xf32>
    %c0_147 = arith.constant 0 : index
    %c0_148 = arith.constant 0 : index
    %131 = vector.load %arg8[%c0_147, %c0_148] : memref<1x6xf32, #tpu.memory_space<vmem>>, vector<1x6xf32>
    %132 = vector.broadcast %131 : vector<1x6xf32> to vector<8x6xf32>
    %133 = arith.addf %130, %132 : vector<8x6xf32>
    %cst_149 = arith.constant dense<0xFF800000> : vector<8xf32>
    %134 = vector.multi_reduction <maximumf>, %133, %cst_149 [1] : vector<8x6xf32> to vector<8xf32>
    %135 = vector.shape_cast %134 : vector<8xf32> to vector<8x1xf32>
    %136 = vector.broadcast %135 : vector<8x1xf32> to vector<8x6xf32>
    %137 = arith.subf %133, %136 : vector<8x6xf32>
    %138 = math.exp %137 : vector<8x6xf32>
    %cst_150 = arith.constant dense<0.000000e+00> : vector<8xf32>
    %139 = vector.multi_reduction <add>, %138, %cst_150 [1] : vector<8x6xf32> to vector<8xf32>
    %140 = vector.shape_cast %139 : vector<8xf32> to vector<8x1xf32>
    %141 = vector.broadcast %140 : vector<8x1xf32> to vector<8x6xf32>
    %142 = arith.divf %138, %141 : vector<8x6xf32>
    %c0_151 = arith.constant 0 : index
    %c0_152 = arith.constant 0 : index
    %143 = vector.load %arg9[%c0_151, %c0_152] : memref<8x6xf32, #tpu.memory_space<vmem>>, vector<8x6xf32>
    tpu.vector_store %arg9[%c0_151, %c0_152], %142 {strides = array<i32>} : memref<8x6xf32, #tpu.memory_space<vmem>>, vector<8x6xf32>,
    return
  }
  func.func @transform_0(%arg0: i32) -> (i32, i32, i32) {
    %c0_i32 = arith.constant 0 : i32
    %c0_i32_0 = arith.constant 0 : i32
    %c0_i32_1 = arith.constant 0 : i32
    return %arg0, %c0_i32, %c0_i32_0 : i32, i32, i32
  }
  func.func @transform_1(%arg0: i32) -> (i32, i32) {
    %c0_i32 = arith.constant 0 : i32
    %c0_i32_0 = arith.constant 0 : i32
    %c0_i32_1 = arith.constant 0 : i32
    return %c0_i32, %c0_i32_0 : i32, i32
  }
  func.func @transform_2(%arg0: i32) -> (i32, i32) {
    %c0_i32 = arith.constant 0 : i32
    %c0_i32_0 = arith.constant 0 : i32
    %c0_i32_1 = arith.constant 0 : i32
    return %c0_i32, %c0_i32_0 : i32, i32
  }
  func.func @transform_3(%arg0: i32) -> (i32, i32, i32) {
    %c0_i32 = arith.constant 0 : i32
    %c0_i32_0 = arith.constant 0 : i32
    %c0_i32_1 = arith.constant 0 : i32
    %c0_i32_2 = arith.constant 0 : i32
    return %c0_i32, %c0_i32_0, %c0_i32_1 : i32, i32, i32
  }
  func.func @transform_4(%arg0: i32) -> (i32, i32) {
    %c0_i32 = arith.constant 0 : i32
    %c0_i32_0 = arith.constant 0 : i32
    %c0_i32_1 = arith.constant 0 : i32
    return %c0_i32, %c0_i32_0 : i32, i32
  }
  func.func @transform_5(%arg0: i32) -> (i32, i32) {
    %c0_i32 = arith.constant 0 : i32
    %c0_i32_0 = arith.constant 0 : i32
    %c0_i32_1 = arith.constant 0 : i32
    return %c0_i32, %c0_i32_0 : i32, i32
  }
  func.func @transform_6(%arg0: i32) -> (i32, i32) {
    %c0_i32 = arith.constant 0 : i32
    %c0_i32_0 = arith.constant 0 : i32
    %c0_i32_1 = arith.constant 0 : i32
    return %c0_i32, %c0_i32_0 : i32, i32
  }
  func.func @transform_7(%arg0: i32) -> (i32, i32) {
    %c0_i32 = arith.constant 0 : i32
    %c0_i32_0 = arith.constant 0 : i32
    %c0_i32_1 = arith.constant 0 : i32
    return %c0_i32, %c0_i32_0 : i32, i32
  }
  func.func @transform_8(%arg0: i32) -> (i32, i32) {
    %c0_i32 = arith.constant 0 : i32
    %c0_i32_0 = arith.constant 0 : i32
    return %arg0, %c0_i32 : i32, i32
  }
}

</mosaic_0001>

<bundles_post_ra>
// kernel: cnn_onedim_forward.1
= control target key start
LH: loop header
LB: loop body
LE: loop exit
PB: predicated region body
PF: predicated region fallthrough
CT: control target
= control target key end

     0   :  { %13 = vsyncpa [#allocation4], 0  ;;  %s15678_s27 = smov [#allocation3]   ;;  %s21070_s0 = inlined_call_operand.vmem [shape: f32[8,64,1], index: 0, kind: input, shape index: {}]   ;;  %s21071_s1 = inlined_call_operand.vmem [shape: bf16[5,256], index: 1, kind: input, shape index: {}]   ;;  %s21072_s2 = inlined_call_operand.hbm [shape: bf16[1280,128], index: 2, kind: input, shape index: {}]   ;;  %s21073_s3 = inlined_call_operand.vmem [shape: bf16[4,640,128], index: 3, kind: input, shape index: {}]   ;;  %s21074_s4 = inlined_call_operand.vmem [shape: f32[2,256], index: 4, kind: input, shape index: {}]   ;;  %s21075_s5 = inlined_call_operand.vmem [shape: f32[8,128], index: 5, kind: input, shape index: {}]   ;;  %s21076_s6 = inlined_call_operand.vmem [shape: f32[1024,6], index: 6, kind: input, shape index: {}]   ;;  %s21077_s7 = inlined_call_operand.vmem [shape: f32[1,6], index: 7, kind: input, shape index: {}]   ;;  %s21078_s8 = inlined_call_operand.vmem [shape: f32[8,6], index: 8, kind: output, shape index: {}]  }
   0x1   :  { %s23_s28 = sshll.u32 %s15678_s27, 4  ;;  %s15654_s9 = scalar_lea.hbm %s21072_s2, 10240  ;;  %s24_s28 = int_to_ptr.vmem [resolvable:$true] %s23_s28 }
   0x2   :  { %p15655_p0 = scmp.ne.s32.totalorder %s21072_s2, %s15654_s9  ;;  %p15658_p1 = scmp.lt.u32.totalorder %s15654_s9, %s21072_s2 }
   0x4   :  { %p15660_p2 = pnand %p15658_p1, %p15655_p0 }
   0x6   :  { %15663 = shalt.err (!%p15660_p2)
}
   0x7   :  { %s15664_s14 = scalar_lea.vmem %s24_s28, 10240  ;;  %p15669_p4 = scmp.lt.s32.totalorder %s24_s28, %s24_s28 }
   0x8   :  { %p15665_p3 = scmp.ne.s32.totalorder %s24_s28, %s15664_s14  ;;  %p15670_p5 = scmp.lt.s32.totalorder %s15664_s14, %s15664_s14 }
   0xa   :  { %p15671_p6 = por %p15670_p5, %p15669_p4 }
   0xc   :  { %p15672_p7 = pnand %p15671_p6, %p15665_p3 }
   0xe   :  { %15675 = shalt.err (!%p15672_p7)
}
   0xf   :  { %s15679_s15 = smov 64   ;;  %s15680_s16 = smov 4  }
  0x10   :  { %29 = dma.hbm_to_vmem [thread:$0]  %s21072_s2, 10240, %s24_s28, [#allocation4], %s15679_s15, %s15679_s15, %s15680_s16  }
  0x11   :  { %15676 = dma.done.wait [#allocation4], 10240  }
  0x12   :  { %15677 = vsyncadd [#allocation4], 4294957056  ;;  %v44_v0 = vld [vmem:[%s21070_s0] sm:$0xff]  ;;  %v45_v1 = vld [vmem:[%s21070_s0 + $0x8] sm:$0xff]  ;;  %vm172_vm0 = vcmask 1041408   ;;  %vm814_vm3 = vcmask 1046528  }
  0x13   :  { %v46_v2 = vld [vmem:[%s21070_s0 + $0x10] sm:$0xff]  ;;  %v47_v3 = vld [vmem:[%s21070_s0 + $0x18] sm:$0xff]  ;;  %v173_v4 = vrot.slane %v44_v0, 6  ;;  %v174_v5 = vrot.slane %v45_v1, 6  ;;  %v48_v7 = vld [vmem:[%s21070_s0 + $0x20] sm:$0xff]  ;;  %vm1184_vm4 = vcmask 1045504  }
  0x14   :  { %v176_v6 = vrot.slane %v46_v2, 6  ;;  %v49_v8 = vld [vmem:[%s21070_s0 + $0x28] sm:$0xff]  ;;  %v178_v9 = vrot.slane %v47_v3, 6  ;;  %v180_v10 = vrot.slane %v48_v7, 6  ;;  %v50_v15 = vld [vmem:[%s21070_s0 + $0x30] sm:$0xff]  ;;  %v51_v20 = vld [vmem:[%s21070_s0 + $0x38] sm:$0xff] }
  0x15   :  { %v182_v11 = vrot.slane %v49_v8, 6  ;;  %v175_v12 = vsel %vm172_vm0, %v173_v4, %v174_v5  ;;  %v365_v14 = vsel %vm172_vm0, 0.0, %v173_v4  ;;  %vm421_vm1 = vsmask.f32 7424  ;;  %s15681_s12 = smov 1   ;;  %s15682_s13 = smov 3  }
  0x16   :  { %v177_v13 = vsel %vm172_vm0, %v174_v5, %v176_v6  ;;  %v179_v16 = vsel %vm172_vm0, %v176_v6, %v178_v9  ;;  %v15770_v17 = vpack.c.bf16 %v175_v12, %v365_v14  ;;  %v181_v18 = vsel %vm172_vm0, %v178_v9, %v180_v10  ;;  %v52_v56 = vld [vmem:[%s21070_s0 + $0x40] sm:$0xff]  ;;  %v53_v57 = vld [vmem:[%s21070_s0 + $0x48] sm:$0xff]  ;;  %s15683_s19 = smov 2   ;;  %v54_v63 = vld [vmem:[%s21070_s0 + $0x50] sm:$0xff] }
  0x17   :  { %v183_v19 = vsel %vm172_vm0, %v180_v10, %v182_v11  ;;  %v15777_v21 = vpack.c.bf16 %v179_v16, %v177_v13  ;;  %vm951_vm2 = vsmask.f32 6400  ;;  %v184_v25 = vrot.slane %v50_v15, 6  ;;  %v55_v0 = vld [vmem:[%s21070_s0 + $0x58] sm:$0xff] }
  0x18   :  { %v15779_v22 = vpack.c.bf16 %v183_v19, %v181_v18  ;;  %v423_v23 = vshrl.u32 %v15770_v17, 16  ;;  %v425_v24 = vshll.u32 %v15770_v17, 16  ;;  %v815_v28 = vrot.slane %v15770_v17, 1 }
  0x19   :  { %v430_v26 = vshll.u32 %v15777_v21, 16  ;;  %v434_v27 = vshrl.u32 %v15777_v21, 16  ;;  %v186_v29 = vrot.slane %v51_v20, 6  ;;  %v816_v33 = vrot.slane %v15777_v21, 1  ;;  %v56_v20 = vld [vmem:[%s21070_s0 + $0x60] sm:$0xff] }
  0x1a   :  { %v427_v30 = vrot.slane %v425_v24, 1  ;;  %v952_v31 = vrot.slane %v423_v23, 1  ;;  %v953_v32 = vrot.slane %v425_v24, 2  ;;  %v438_v37 = vshll.u32 %v15779_v22, 16 }
  0x1b   :  { %v432_v34 = vrot.slane %v430_v26, 1  ;;  %v955_v35 = vrot.slane %v434_v27, 1  ;;  %v956_v36 = vrot.slane %v430_v26, 2  ;;  %v185_v40 = vsel %vm172_vm0, %v182_v11, %v184_v25 }
  0x1c   :  { %v428_v38 = vor.u32 %v427_v30, %v423_v23  ;;  %v954_v39 = vor.u32 %v953_v32, %v952_v31  ;;  %v1185_v42 = vrot.slane %v15770_v17, 2  ;;  %v1186_v43 = vrot.slane %v15777_v21, 2  ;;  %v57_v30 = vld [vmem:[%s21070_s0 + $0x68] sm:$0xff] }
  0x1d   :  { %v957_v41 = vor.u32 %v956_v36, %v955_v35  ;;  %v442_v44 = vshrl.u32 %v15779_v22, 16  ;;  %v187_v46 = vsel %vm172_vm0, %v184_v25, %v186_v29  ;;  %v817_v48 = vsel %vm814_vm3, %v815_v28, %v816_v33 }
  0x1e   :  { %v433_v45 = vsel %vm421_vm1, %v428_v38, %v432_v34  ;;  %v440_v49 = vrot.slane %v438_v37, 1  ;;  %v436_v50 = vor.u32 %v434_v27, %v432_v34  ;;  %v960_v52 = vrot.slane %v438_v37, 2 }
  0x1f   :  { %710 = vrot.lane.b32.xlu0 %v433_v45, %s15681_s12  ;;  %v958_v47 = vsel %vm951_vm2, %v954_v39, %v957_v41  ;;  %v959_v51 = vrot.slane %v442_v44, 1  ;;  %v15798_v53 = vpack.c.bf16 %v187_v46, %v185_v40  ;;  %v1187_v54 = vsel %vm1184_vm4, %v1185_v42, %v1186_v43 }
  0x20   :  { %1120 = vrot.lane.b32.xlu1 %v958_v47, %s15682_s13  ;;  %v818_v55 = vrot.slane %v15779_v22, 1  ;;  %v373_v60 = vsel %vm172_vm0, %v186_v29, 0.0  ;;  %v441_v61 = vsel %vm421_vm1, %v436_v50, %v440_v49  ;;  %v188_v1 = vrot.slane %v52_v56, 6 }
  0x21   :  { %v446_v58 = vshll.u32 %v15798_v53, 16  ;;  %v450_v59 = vshrl.u32 %v15798_v53, 16  ;;  %v961_v62 = vor.u32 %v960_v52, %v959_v51  ;;  %v1188_v3 = vrot.slane %v15779_v22, 2  ;;  %v58_v51 = vld [vmem:[%s21070_s0 + $0x70] sm:$0xff]  ;;  %v59_v52 = vld [vmem:[%s21070_s0 + $0x78] sm:$0xff] }
  0x22   :  { %v819_v2 = vsel %vm814_vm3, %v816_v33, %v818_v55  ;;  %v189_v4 = vrot.slane %v53_v57, 6  ;;  %v820_v5 = vrot.slane %v15798_v53, 1  ;;  %v15823_v6 = vpack.c.bf16 %v373_v60, %v373_v60 }
  0x23   :  { %887 = vrot.lane.b32.xlu0 %v817_v48, %s15683_s19  ;;  %v448_v7 = vrot.slane %v446_v58, 1  ;;  %v963_v8 = vrot.slane %v450_v59, 1  ;;  %v964_v9 = vrot.slane %v446_v58, 2  ;;  %v191_v10 = vrot.slane %v54_v63, 6 }
  0x24   :  { %1257 = vrot.lane.b32.xlu1 %v1187_v54, %s15680_s16  ;;  %v962_v11 = vsel %vm951_vm2, %v957_v41, %v961_v62  ;;  %v444_v12 = vor.u32 %v442_v44, %v440_v49  ;;  %v193_v13 = vrot.slane %v55_v0, 6  ;;  %v366_v14 = vsel %vm172_vm0, 0.0, %v188_v1 }
  0x25   :  { %v1189_v15 = vsel %vm1184_vm4, %v1186_v43, %v1188_v3  ;;  %v190_v16 = vsel %vm172_vm0, %v188_v1, %v189_v4  ;;  %v454_v18 = vshll.u32 %v15823_v6, 16  ;;  %v967_v19 = vshrl.u32 %v15823_v6, 16 }
  0x26   :  { %v449_v23 = vsel %vm421_vm1, %v444_v12, %v448_v7  ;;  %v965_v24 = vor.u32 %v964_v9, %v963_v8  ;;  %v15839_v25 = vpack.c.bf16 %v190_v16, %v366_v14  ;;  %v821_v26 = vsel %vm814_vm3, %v818_v55, %v820_v5 }
  0x27   :  { %712 = vrot.lane.b32.xlu0 %v441_v61, %s15681_s12  ;;  %v1190_v27 = vrot.slane %v15798_v53, 2  ;;  %v192_v28 = vsel %vm172_vm0, %v189_v4, %v191_v10  ;;  %v194_v29 = vsel %vm172_vm0, %v191_v10, %v193_v13  ;;  %v456_v31 = vrot.slane %v454_v18, 1 }
  0x28   :  { %889 = vrot.lane.b32.xlu1 %v819_v2, %s15683_s19  ;;  %v969_v32 = vrot.slane %v967_v19, 1  ;;  %v970_v33 = vrot.slane %v454_v18, 2  ;;  %v195_v34 = vrot.slane %v56_v20, 6  ;;  %v452_v35 = vor.u32 %v450_v59, %v448_v7 }
  0x29   :  { %v966_v36 = vsel %vm951_vm2, %v961_v62, %v965_v24  ;;  %v15851_v37 = vpack.c.bf16 %v194_v29, %v192_v28  ;;  %v461_v38 = vshll.u32 %v15839_v25, 16  ;;  %v197_v39 = vrot.slane %v57_v30, 6  ;;  %v61_v28 = vld [vmem:[%s21070_s0 + $0x88] sm:$0xff]  ;;  %v62_v29 = vld [vmem:[%s21070_s0 + $0x90] sm:$0xff] }
  0x2a   :  { %v1191_v40 = vsel %vm1184_vm4, %v1188_v3, %v1190_v27  ;;  %v822_v41 = vrot.slane %v15823_v6, 1  ;;  %v971_v42 = vor.u32 %v970_v33, %v969_v32  ;;  %v1192_v43 = vrot.slane %v15823_v6, 2 }
  0x2b   :  { %1122 = vrot.lane.b32.xlu0 %v962_v11, %s15682_s13  ;;  %v457_v44 = vsel %vm421_vm1, %v452_v35, %v456_v31  ;;  %v459_v45 = vshrl.u32 %v15839_v25, 16  ;;  %v470_v46 = vshrl.u32 %v15851_v37, 16  ;;  %v463_v47 = vrot.slane %v461_v38, 1 }
  0x2c   :  { %1259 = vrot.lane.b32.xlu1 %v1189_v15, %s15680_s16  ;;  %v466_v48 = vshll.u32 %v15851_v37, 16  ;;  %v196_v49 = vsel %vm172_vm0, %v193_v13, %v195_v34  ;;  %v198_v50 = vsel %vm172_vm0, %v195_v34, %v197_v39  ;;  %v823_v54 = vsel %vm814_vm3, %v820_v5, %v822_v41  ;;  %v63_v34 = vld [vmem:[%s21070_s0 + $0x98] sm:$0xff] }
  0x2d   :  { %v972_v55 = vsel %vm951_vm2, %v965_v24, %v971_v42  ;;  %v973_v56 = vrot.slane %v459_v45, 1  ;;  %v974_v57 = vrot.slane %v461_v38, 2  ;;  %v976_v58 = vrot.slane %v470_v46, 1 }
  0x2e   :  { %v977_v59 = vrot.slane %v466_v48, 2  ;;  %v15874_v60 = vpack.c.bf16 %v198_v50, %v196_v49  ;;  %v464_v61 = vor.u32 %v463_v47, %v459_v45  ;;  %v468_v62 = vrot.slane %v466_v48, 1  ;;  %v64_v48 = vld [vmem:[%s21070_s0 + $0xa0] sm:$0xff] }
  0x2f   :  { %714 = vrot.lane.b32.xlu0 %v449_v23, %s15681_s12  ;;  %v199_v63 = vrot.slane %v58_v51, 6  ;;  %v201_v0 = vrot.slane %v59_v52, 6  ;;  %v1193_v1 = vsel %vm1184_vm4, %v1190_v27, %v1192_v43  ;;  %v824_v2 = vrot.slane %v15839_v25, 1 }
  0x30   :  { %891 = vrot.lane.b32.xlu1 %v821_v26, %s15683_s19  ;;  %v825_v3 = vrot.slane %v15851_v37, 1  ;;  %v1194_v4 = vrot.slane %v15839_v25, 2  ;;  %v975_v5 = vor.u32 %v974_v57, %v973_v56  ;;  %v978_v6 = vor.u32 %v977_v59, %v976_v58  ;;  %v60_v26 = vld [vmem:[%s21070_s0 + $0x80] sm:$0xff] }
  0x31   :  { %v1195_v7 = vrot.slane %v15851_v37, 2  ;;  %v474_v8 = vshll.u32 %v15874_v60, 16  ;;  %v469_v9 = vsel %vm421_vm1, %v464_v61, %v468_v62  ;;  %v478_v10 = vshrl.u32 %v15874_v60, 16 }
  0x32   :  { %v200_v11 = vsel %vm172_vm0, %v197_v39, %v199_v63  ;;  %v202_v12 = vsel %vm172_vm0, %v199_v63, %v201_v0  ;;  %v826_v13 = vsel %vm814_vm3, %v824_v2, %v825_v3  ;;  %v979_v16 = vsel %vm951_vm2, %v975_v5, %v978_v6 }
  0x33   :  { %1124 = vrot.lane.b32.xlu0 %v966_v36, %s15682_s13  ;;  %v476_v14 = vrot.slane %v474_v8, 1  ;;  %v15891_v15 = vpack.c.bf16 %v202_v12, %v200_v11  ;;  %v472_v18 = vor.u32 %v470_v46, %v468_v62  ;;  %v980_v19 = vrot.slane %v478_v10, 1 }
  0x34   :  { %1261 = vrot.lane.b32.xlu1 %v1191_v40, %s15680_s16  ;;  %v981_v20 = vrot.slane %v474_v8, 2  ;;  %v1196_v23 = vsel %vm1184_vm4, %v1194_v4, %v1195_v7  ;;  %v827_v24 = vrot.slane %v15874_v60, 1  ;;  %v374_v27 = vsel %vm172_vm0, %v201_v0, 0.0 }
  0x35   :  { %v482_v30 = vshll.u32 %v15891_v15, 16  ;;  %v486_v31 = vshrl.u32 %v15891_v15, 16  ;;  %v477_v32 = vsel %vm421_vm1, %v472_v18, %v476_v14  ;;  %v203_v35 = vrot.slane %v60_v26, 6 }
  0x36   :  { %v982_v33 = vor.u32 %v981_v20, %v980_v19  ;;  %v828_v36 = vsel %vm814_vm3, %v825_v3, %v827_v24  ;;  %v1197_v38 = vrot.slane %v15874_v60, 2  ;;  %v204_v39 = vrot.slane %v61_v28, 6 }
  0x37   :  { %716 = vrot.lane.b32.xlu0 %v457_v44, %s15681_s12  ;;  %v480_v40 = vor.u32 %v478_v10, %v476_v14  ;;  %v15917_v41 = vpack.c.bf16 %v374_v27, %v374_v27  ;;  %v206_v42 = vrot.slane %v62_v29, 6  ;;  %v484_v43 = vrot.slane %v482_v30, 1  ;;  %v66_v14 = vld [vmem:[%s21070_s0 + $0xb0] sm:$0xff] }
  0x38   :  { %893 = vrot.lane.b32.xlu1 %v823_v54, %s15683_s19  ;;  %v984_v44 = vrot.slane %v486_v31, 1  ;;  %v985_v45 = vrot.slane %v482_v30, 2  ;;  %v208_v46 = vrot.slane %v63_v34, 6  ;;  %v983_v47 = vsel %vm951_vm2, %v978_v6, %v982_v33  ;;  %v15932_v54 = vld [vmem:[%s21070_s0 + $0xa8] sm:$0xff]  ;;  %v1581_v30 = vld [vmem:[%s21071_s1] sm:$0x77] }
  0x39   :  { %v1198_v49 = vsel %vm1184_vm4, %v1195_v7, %v1197_v38  ;;  %v829_v50 = vrot.slane %v15891_v15, 1  ;;  %v205_v51 = vsel %vm172_vm0, %v203_v35, %v204_v39  ;;  %v367_v52 = vsel %vm172_vm0, 0.0, %v203_v35 }
  0x3a   :  { %v490_v56 = vshll.u32 %v15917_v41, 16  ;;  %v988_v57 = vshrl.u32 %v15917_v41, 16  ;;  %v986_v58 = vor.u32 %v985_v45, %v984_v44  ;;  %v207_v59 = vsel %vm172_vm0, %v204_v39, %v206_v42 }
  0x3b   :  { %1126 = vrot.lane.b32.xlu0 %v972_v55, %s15682_s13  ;;  %v485_v55 = vsel %vm421_vm1, %v480_v40, %v484_v43  ;;  %v209_v61 = vsel %vm172_vm0, %v206_v42, %v208_v46  ;;  %v15941_v62 = vpack.c.bf16 %v205_v51, %v367_v52  ;;  %v830_v63 = vsel %vm814_vm3, %v827_v24, %v829_v50 }
  0x3c   :  { %1263 = vrot.lane.b32.xlu1 %v1193_v1, %s15680_s16  ;;  %v1199_v0 = vrot.slane %v15891_v15, 2  ;;  %v210_v1 = vrot.slane %v64_v48, 6  ;;  %v212_v2 = vrot.slane %v15932_v54, 6  ;;  %v831_v3 = vrot.slane %v15917_v41, 1 }
  0x3d   :  { %v488_v4 = vor.u32 %v486_v31, %v484_v43  ;;  %v492_v5 = vrot.slane %v490_v56, 1  ;;  %v990_v6 = vrot.slane %v988_v57, 1  ;;  %v15948_v7 = vpack.c.bf16 %v209_v61, %v207_v59  ;;  %v16000_v61 = vld [vmem:[%s21070_s0 + $0xc8] sm:$0xff] }
  0x3e   :  { %v987_v8 = vsel %vm951_vm2, %v982_v33, %v986_v58  ;;  %v497_v10 = vshll.u32 %v15941_v62, 16  ;;  %v1200_v11 = vsel %vm1184_vm4, %v1197_v38, %v1199_v0  ;;  %v211_v12 = vsel %vm172_vm0, %v208_v46, %v210_v1 }
  0x3f   :  { %718 = vrot.lane.b32.xlu0 %v469_v9, %s15681_s12  ;;  %v991_v9 = vrot.slane %v490_v56, 2  ;;  %vm1652_vm5 = vcmask 1042432   ;;  %v15684_v18 = vmov 65535   ;;  %v493_v20 = vsel %vm421_vm1, %v488_v4, %v492_v5  ;;  %v16014_v4 = vld [vmem:[%s21070_s0 + $0xd8] sm:$0xff] }
  0x40   :  { %895 = vrot.lane.b32.xlu1 %v826_v13, %s15683_s19  ;;  %v213_v13 = vsel %vm172_vm0, %v210_v1, %v212_v2  ;;  %v1653_v19 = vsel %vm172_vm0, 4294967295, %v15684_v18  ;;  %v506_v24 = vshrl.u32 %v15948_v7, 16  ;;  %v495_v27 = vshrl.u32 %v15941_v62, 16  ;;  %v70_v1 = vld [vmem:[%s21070_s0 + $0xd0] sm:$0xff] }
  0x41   :  { %v992_v26 = vor.u32 %v991_v9, %v990_v6  ;;  %v499_v28 = vrot.slane %v497_v10, 1  ;;  %v15969_v29 = vpack.c.bf16 %v213_v13, %v211_v12  ;;  %v832_v31 = vsel %vm814_vm3, %v829_v50, %v831_v3 }
  0x42   :  { %v833_v33 = vrot.slane %v15941_v62, 1  ;;  %v1654_v34 = vsel %vm1652_vm5, %v1653_v19, 0  ;;  %v834_v35 = vrot.slane %v15948_v7, 1  ;;  %v214_v38 = vrot.slane %v66_v14, 6 }
  0x43   :  { %1128 = vrot.lane.b32.xlu0 %v979_v16, %s15682_s13  ;;  %v67_v16 = vld [vmem:[%s21070_s0 + $0xb8] sm:$0xff]  ;;  %v995_v42 = vrot.slane %v497_v10, 2  ;;  %v997_v43 = vrot.slane %v506_v24, 1  ;;  %v12758_v44 = vcombine.high %v1581_v30, %v1581_v30  ;;  %v993_v45 = vsel %vm951_vm2, %v986_v58, %v992_v26 }
  0x44   :  { %1265 = vrot.lane.b32.xlu1 %v1196_v23, %s15680_s16  ;;  %v502_v23 = vshll.u32 %v15948_v7, 16  ;;  %v216_v39 = vrot.slane %v67_v16, 6  ;;  %v215_v50 = vsel %vm172_vm0, %v212_v2, %v214_v38  ;;  %v1203_v52 = vrot.slane %v15941_v62, 2 }
  0x45   :  { %v1204_v54 = vrot.slane %v15948_v7, 2  ;;  %v514_v59 = vshrl.u32 %v15969_v29, 16  ;;  %v836_v3 = vrot.slane %v15969_v29, 1  ;;  %v219_v9 = vrot.slane %v16000_v61, 6 }
  0x46   :  { %v504_v40 = vrot.slane %v502_v23, 1  ;;  %v998_v46 = vrot.slane %v502_v23, 2  ;;  %v217_v51 = vsel %vm172_vm0, %v214_v38, %v216_v39  ;;  %v221_v16 = vrot.slane %v70_v1, 6 }
  0x47   :  { %720 = vrot.lane.b32.xlu0 %v477_v32, %s15681_s12  ;;  %v1201_v32 = vrot.slane %v15917_v41, 2  ;;  %v500_v41 = vor.u32 %v499_v28, %v495_v27  ;;  %v1205_v6 = vsel %vm1184_vm4, %v1203_v52, %v1204_v54  ;;  %v1001_v12 = vrot.slane %v514_v59, 1  ;;  %v74_v52 = vld [vmem:[%s21070_s0 + $0xf0] sm:$0xff] }
  0x48   :  { %897 = vrot.lane.b32.xlu1 %v828_v36, %s15683_s19  ;;  %v994_v36 = vrot.slane %v495_v27, 1  ;;  %v15994_v58 = vor.u32 %v998_v46, %v997_v43  ;;  %v223_v18 = vrot.slane %v16014_v4, 6  ;;  %v12757_v19 = vcombine.low %v1581_v30, %v1581_v30 }
  0x49   :  { %v1202_v48 = vsel %vm1184_vm4, %v1199_v0, %v1201_v32  ;;  %v505_v56 = vsel %vm421_vm1, %v500_v41, %v504_v40  ;;  %v16003_v0 = vpack.c.bf16 %v217_v51, %v215_v50  ;;  %v837_v30 = vsel %vm814_vm3, %v834_v35, %v836_v3  ;;  %v73_v41 = vld [vmem:[%s21070_s0 + $0xe8] sm:$0xff] }
  0x4a   :  { %v996_v57 = vor.u32 %v995_v42, %v994_v36  ;;  %v1656_v27 = vand.u32 %v12757_v19, %v1654_v34  ;;  %v1206_v32 = vrot.slane %v15969_v29, 2  ;;  %v21080_v36 = vmov 0  }
  0x4b   :  { %1130 = vrot.lane.b32.xlu0 %v983_v47, %s15682_s13  ;;  %v510_v47 = vshll.u32 %v15969_v29, 16  ;;  %21313 = vst [vmem:[#allocation6_spill] sm:$0xff] %v16003_v0  ;;  %v518_v14 = vshll.u32 %v16003_v0, 16  ;;  %1693 = vmatprep.mubr.bf16.mxu0 %v21080_v36  ;;  %2423 = vst [vmem:[#allocation2] sm:$0x11] %v21080_v36  ;;  %v222_v43 = vsel %vm172_vm0, %v219_v9, %v221_v16  ;;  %vm1321_vm6 = vcmask 7168  }
  0x4c   :  { %1267 = vrot.lane.b32.xlu1 %v1198_v49, %s15680_s16  ;;  %v68_v49 = vld [vmem:[%s21070_s0 + $0xc0] sm:$0xff]  ;;  %v1000_v10 = vsel %vm951_vm2, %v996_v57, %v15994_v58  ;;  %2424 = vst [vmem:[#allocation2 + $0x48] sm:$0x11] %v21080_v36  ;;  %2425 = vst [vmem:[#allocation2 + $0x90] sm:$0x11] %v21080_v36  ;;  %14653 = vmatprep.subr.bf16.mxu1 %v21080_v36  ;;  %vm1386_vm7 = vcmask 15360  }
  0x4d   :  { %v16008_v2 = vrot.slane %v510_v47, 1  ;;  %v218_v5 = vrot.slane %v68_v49, 6  ;;  %v1002_v13 = vrot.slane %v510_v47, 2  ;;  %2426 = vst [vmem:[#allocation2 + $0xd8] sm:$0x11] %v21080_v36  ;;  %v1006_v42 = vrot.slane %v518_v14, 2 }
  0x4e   :  { %2427 = vst [vmem:[#allocation2 + $0x120] sm:$0x11] %v21080_v36  ;;  %2428 = vst [vmem:[#allocation2 + $0x168] sm:$0x11] %v21080_v36  ;;  %vm1451_vm8 = vcmask 23552   ;;  %vm1516_vm9 = vcmask 31744  }
  0x4f   :  { %722 = vrot.lane.b32.xlu0 %v485_v55, %s15681_s12  ;;  %v1659_v55 = vand.u32 %v12758_v44, %v1654_v34  ;;  %v368_v26 = vsel %vm172_vm0, 0.0, %v218_v5  ;;  %2429 = vst [vmem:[#allocation2 + $0x1b0] sm:$0x11] %v21080_v36  ;;  %2430 = vst [vmem:[#allocation2 + $0x1f8] sm:$0x11] %v21080_v36  ;;  %v520_v34 = vrot.slane %v518_v14, 1  ;;  %v224_v44 = vsel %vm172_vm0, %v221_v16, %v223_v18 }
  0x50   :  { %899 = vrot.lane.b32.xlu1 %v830_v63, %s15683_s19  ;;  %v835_v63 = vsel %vm814_vm3, %v833_v33, %v834_v35  ;;  %v838_v33 = vrot.slane %v16003_v0, 1  ;;  %2431 = vst [vmem:[#allocation2 + $0x40] sm:$0x22] %v21080_v36  ;;  %2432 = vst [vmem:[#allocation2 + $0x88] sm:$0x22] %v21080_v36  ;;  %v516_v47 = vor.u32 %v514_v59, %v16008_v2  ;;  %vm1587_vm10 = vcmask 39936  }
  0x51   :  { %1661 = vmatprep.subr.bf16.mxu0 %v1659_v55  ;;  %2433 = vst [vmem:[#allocation2 + $0xd0] sm:$0x22] %v21080_v36  ;;  %2434 = vst [vmem:[#allocation2 + $0x118] sm:$0x22] %v21080_v36  ;;  %v16093_v49 = vpack.c.bf16 %v224_v44, %v222_v43  ;;  %v75_v55 = vld [vmem:[%s21070_s0 + $0xf8] sm:$0xff]  ;;  %v78_v44 = vld [vmem:[%s21070_s0 + $0x110] sm:$0xff] }
  0x52   :  { %1662 = vmatpush1.bf16.msra.mxu0 %v1656_v27  ;;  %2435 = vst [vmem:[#allocation2 + $0x160] sm:$0x22] %v21080_v36  ;;  %2436 = vst [vmem:[#allocation2 + $0x1a8] sm:$0x22] %v21080_v36  ;;  %v521_v59 = vsel %vm421_vm1, %v516_v47, %v520_v34  ;;  %v839_v61 = vsel %vm814_vm3, %v836_v3, %v838_v33  ;;  %vm2759_vm11 = vcmask 1040384   ;;  %vm2760_vm12 = vcmask 1044484  }
  0x53   :  { %1132 = vrot.lane.b32.xlu0 %v987_v8, %s15682_s13  ;;  %v375_v8 = vsel %vm172_vm0, %v216_v39, 0.0  ;;  %2437 = vst [vmem:[#allocation2 + $0x1f0] sm:$0x22] %v21080_v36  ;;  %2438 = vst [vmem:[#allocation2 + $0x238] sm:$0x22] %v21080_v36  ;;  %5897 = vmatprep.subr.bf16.mxu0 %v21080_v36  ;;  %vm8259_vm14 = vcmask 1043459  }
  0x54   :  { %1269 = vrot.lane.b32.xlu1 %v1200_v11, %s15680_s16  ;;  %v508_v11 = vor.u32 %v506_v24, %v504_v40  ;;  %v16030_v23 = vpack.c.bf16 %v375_v8, %v375_v8  ;;  %v220_v24 = vsel %vm172_vm0, %v218_v5, %v219_v9  ;;  %21315 = vst [vmem:[#allocation8_spill] sm:$0xff] %v16093_v49  ;;  %v231_v8 = vrot.slane %v75_v55, 6  ;;  %vm17330_vm13 = vmor %vm2759_vm11, %vm2760_vm12 }
  0x55   :  { %v16064_v39 = vpack.c.bf16 %v220_v24, %v368_v26  ;;  %vm8263_vm15 = vcmask 1045509  }
  0x56   :  { %v513_v28 = vsel %vm421_vm1, %v508_v11, %v16008_v2  ;;  %v526_v35 = vshll.u32 %v16030_v23, 16  ;;  %v1009_v38 = vshrl.u32 %v16030_v23, 16  ;;  %v840_v57 = vrot.slane %v16030_v23, 1 }
  0x57   :  { %724 = vrot.lane.b32.xlu0 %v493_v20, %s15681_s12  ;;  %v522_v20 = vshrl.u32 %v16003_v0, 16  ;;  %21314 = vst [vmem:[#allocation7_spill] sm:$0xff] %v16064_v39  ;;  %v533_v50 = vshll.u32 %v16064_v39, 16  ;;  %v531_v9 = vshrl.u32 %v16064_v39, 16  ;;  %v538_v11 = vshll.u32 %v16093_v49, 16 }
  0x58   :  { %901 = vrot.lane.b32.xlu1 %v832_v31, %s15683_s19  ;;  %v16038_v31 = vor.u32 %v1002_v13, %v1001_v12  ;;  %v528_v1 = vrot.slane %v526_v35, 1  ;;  %v1011_v2 = vrot.slane %v1009_v38, 1  ;;  %v1012_v5 = vrot.slane %v526_v35, 2 }
  0x59   :  { %v1005_v40 = vrot.slane %v522_v20, 1  ;;  %v542_v12 = vshrl.u32 %v16093_v49, 16  ;;  %v524_v13 = vor.u32 %v522_v20, %v520_v34  ;;  %v540_v24 = vrot.slane %v538_v11, 1 }
  0x5a   :  { %v1004_v46 = vsel %vm951_vm2, %v15994_v58, %v16038_v31  ;;  %v227_v58 = vrot.slane %v73_v41, 6  ;;  %v842_v4 = vrot.slane %v16064_v39, 1  ;;  %v1015_v34 = vrot.slane %v531_v9, 1 }
  0x5b   :  { %1134 = vrot.lane.b32.xlu0 %v993_v45, %s15682_s13  ;;  %v72_v45 = vld [vmem:[%s21070_s0 + $0xe0] sm:$0xff]  ;;  %v1016_v35 = vrot.slane %v533_v50, 2  ;;  %v1212_v41 = vrot.slane %v16064_v39, 2 }
  0x5c   :  { %1271 = vrot.lane.b32.xlu1 %v1202_v48, %s15680_s16  ;;  %v1207_v48 = vsel %vm1184_vm4, %v1204_v54, %v1206_v32  ;;  %v225_v51 = vrot.slane %v72_v45, 6  ;;  %v1210_v54 = vrot.slane %v16030_v23, 2  ;;  %v1013_v23 = vor.u32 %v1012_v5, %v1011_v2  ;;  %v79_v45 = vld [vmem:[%s21070_s0 + $0x118] sm:$0xff]  ;;  %v81_v2 = vld [vmem:[%s21070_s0 + $0x128] sm:$0xff] }
  0x5d   :  { %v1017_v55 = vor.u32 %v1016_v35, %v1015_v34 }
  0x5e   :  { %v226_v3 = vsel %vm172_vm0, %v223_v18, %v225_v51  ;;  %v228_v14 = vsel %vm172_vm0, %v225_v51, %v227_v58  ;;  %v843_v18 = vrot.slane %v16093_v49, 1 }
  0x5f   :  { %726 = vrot.lane.b32.xlu0 %v505_v56, %s15681_s12  ;;  %v1208_v56 = vrot.slane %v16003_v0, 2  ;;  %v16133_v27 = vpack.c.bf16 %v228_v14, %v226_v3 }
  0x60   :  { %903 = vrot.lane.b32.xlu1 %v835_v63, %s15683_s19  ;;  %v1007_v63 = vor.u32 %v1006_v42, %v1005_v40  ;;  %v1018_v40 = vrot.slane %v542_v12, 1  ;;  %v1019_v42 = vrot.slane %v538_v11, 2 }
  0x61   :  { %v1209_v19 = vsel %vm1184_vm4, %v1206_v32, %v1208_v56  ;;  %21316 = vst [vmem:[#allocation9_spill] sm:$0xff] %v16133_v27  ;;  %v841_v32 = vsel %vm814_vm3, %v838_v33, %v840_v57  ;;  %v1213_v33 = vrot.slane %v16093_v49, 2  ;;  %v546_v51 = vshll.u32 %v16133_v27, 16 }
  0x62   :  { %v1008_v16 = vsel %vm951_vm2, %v16038_v31, %v1007_v63  ;;  %v77_v31 = vld [vmem:[%s21070_s0 + $0x108] sm:$0xff]  ;;  %v550_v57 = vshrl.u32 %v16133_v27, 16  ;;  %v845_v5 = vrot.slane %v16133_v27, 1  ;;  %v1215_v11 = vrot.slane %v16133_v27, 2 }
  0x63   :  { %1136 = vrot.lane.b32.xlu0 %v1000_v10, %s15682_s13  ;;  %v535_v10 = vrot.slane %v533_v50, 1  ;;  %v234_v47 = vrot.slane %v77_v31, 6  ;;  %v1211_v50 = vsel %vm1184_vm4, %v1208_v56, %v1210_v54  ;;  %v16168_v56 = vor.u32 %v1019_v42, %v1018_v40  ;;  %v83_v31 = vld [vmem:[%s21070_s0 + $0x138] sm:$0xff] }
  0x64   :  { %1273 = vrot.lane.b32.xlu1 %v1205_v6, %s15680_s16  ;;  %v229_v6 = vrot.slane %v74_v52, 6  ;;  %v376_v52 = vsel %vm172_vm0, %v231_v8, 0.0  ;;  %v544_v54 = vor.u32 %v542_v12, %v540_v24  ;;  %v1022_v3 = vrot.slane %v550_v57, 1 }
  0x65   :  { %v536_v38 = vor.u32 %v535_v10, %v531_v9  ;;  %v548_v10 = vrot.slane %v546_v51, 1  ;;  %v1023_v14 = vrot.slane %v546_v51, 2  ;;  %v246_v51 = vrot.slane %v83_v31, 6 }
  0x66   :  { %v230_v26 = vsel %vm172_vm0, %v227_v58, %v229_v6  ;;  %v232_v20 = vsel %vm172_vm0, %v229_v6, %v231_v8  ;;  %v236_v58 = vrot.slane %v78_v44, 6  ;;  %v16175_v6 = vpack.c.bf16 %v376_v52, %v376_v52 }
  0x67   :  { %728 = vrot.lane.b32.xlu0 %v513_v28, %s15681_s12  ;;  %v76_v28 = vld [vmem:[%s21070_s0 + $0x100] sm:$0xff]  ;;  %v16147_v43 = vpack.c.bf16 %v232_v20, %v230_v26  ;;  %v377_v31 = vsel %vm172_vm0, %v246_v51, 0.0 }
  0x68   :  { %905 = vrot.lane.b32.xlu1 %v837_v30, %s15683_s19  ;;  %v529_v30 = vsel %vm421_vm1, %v524_v13, %v528_v1  ;;  %v562_v34 = vshll.u32 %v16175_v6, 16  ;;  %v1030_v35 = vshrl.u32 %v16175_v6, 16 }
  0x69   :  { %21317 = vst [vmem:[#allocation10_spill] sm:$0xff] %v16147_v43  ;;  %v554_v1 = vshll.u32 %v16147_v43, 16  ;;  %v847_v13 = vrot.slane %v16147_v43, 1  ;;  %v558_v12 = vshrl.u32 %v16147_v43, 16 }
  0x6a   :  { %v16221_v52 = vrot.slane %v562_v34, 1 }
  0x6b   :  { %1138 = vrot.lane.b32.xlu0 %v1004_v46, %s15682_s13  ;;  %v233_v46 = vrot.slane %v76_v28, 6  ;;  %v16191_v26 = vrot.slane %v554_v1, 1  ;;  %v242_v28 = vrot.slane %v81_v2, 6  ;;  %v1026_v40 = vrot.slane %v558_v12, 1 }
  0x6c   :  { %1275 = vrot.lane.b32.xlu1 %v1207_v48, %s15680_s16  ;;  %v1014_v48 = vsel %vm951_vm2, %v1007_v63, %v1013_v23  ;;  %v541_v63 = vsel %vm421_vm1, %v536_v38, %v540_v24  ;;  %v82_v23 = vld [vmem:[%s21070_s0 + $0x130] sm:$0xff]  ;;  %v1021_v38 = vsel %vm951_vm2, %v1017_v55, %v16168_v56  ;;  %v1027_v42 = vrot.slane %v554_v1, 2 }
  0x6d   :  { %v235_v8 = vsel %vm172_vm0, %v233_v46, %v234_v47  ;;  %v369_v9 = vsel %vm172_vm0, 0.0, %v233_v46  ;;  %v244_v46 = vrot.slane %v82_v23, 6  ;;  %v849_v55 = vrot.slane %v16175_v6, 1 }
  0x6e   :  { %v16193_v20 = vpack.c.bf16 %v235_v8, %v369_v9 }
  0x6f   :  { %730 = vrot.lane.b32.xlu0 %v521_v59, %s15681_s12  ;;  %v238_v59 = vrot.slane %v79_v45, 6  ;;  %v16214_v45 = vor.u32 %v1023_v14, %v1022_v3  ;;  %v245_v23 = vsel %vm172_vm0, %v242_v28, %v244_v46 }
  0x70   :  { %907 = vrot.lane.b32.xlu1 %v839_v61, %s15683_s19  ;;  %v80_v61 = vld [vmem:[%s21070_s0 + $0x120] sm:$0xff]  ;;  %21318 = vst [vmem:[#allocation11_spill] sm:$0xff] %v16193_v20  ;;  %v21083_v1 = vshrl.u32 %v16193_v20, 16 }
  0x71   :  { %v240_v24 = vrot.slane %v80_v61, 6  ;;  %v1219_v61 = vrot.slane %v16175_v6, 2 }
  0x73   :  { %1140 = vrot.lane.b32.xlu0 %v1008_v16, %s15682_s13  ;;  %v237_v16 = vsel %vm172_vm0, %v234_v47, %v236_v58  ;;  %v569_v47 = vshll.u32 %v16193_v20, 16 }
  0x74   :  { %1277 = vrot.lane.b32.xlu1 %v1209_v19, %s15680_s16  ;;  %v239_v19 = vsel %vm172_vm0, %v236_v58, %v238_v59  ;;  %v16224_v58 = vrot.slane %v1030_v35, 1  ;;  %v848_v35 = vsel %vm814_vm3, %v845_v5, %v847_v13 }
  0x75   :  { %v16210_v44 = vpack.c.bf16 %v239_v19, %v237_v16  ;;  %v85_v16 = vld [vmem:[%s21070_s0 + $0x148] sm:$0xff]  ;;  %v16245_v19 = vrot.slane %v569_v47, 1 }
  0x77   :  { %732 = vrot.lane.b32.xlu0 %v529_v30, %s15681_s12  ;;  %v844_v30 = vsel %vm814_vm3, %v842_v4, %v843_v18  ;;  %21319 = vst [vmem:[#allocation12_spill] sm:$0xff] %v16210_v44  ;;  %v549_v4 = vsel %vm421_vm1, %v544_v54, %v548_v10  ;;  %v16230_v54 = vrot.slane %v562_v34, 2  ;;  %v21079_v9 = vshrl.u32 %v16210_v44, 16 }
  0x78   :  { %909 = vrot.lane.b32.xlu1 %v841_v32, %s15683_s19  ;;  %v1214_v32 = vsel %vm1184_vm4, %v1212_v41, %v1213_v33  ;;  %v1217_v41 = vrot.slane %v16147_v43, 2  ;;  %v846_v34 = vsel %vm814_vm3, %v843_v18, %v845_v5 }
  0x7b   :  { %1142 = vrot.lane.b32.xlu0 %v1014_v48, %s15682_s13  ;;  %v241_v48 = vsel %vm172_vm0, %v238_v59, %v240_v24  ;;  %v574_v59 = vshll.u32 %v16210_v44, 16 }
  0x7c   :  { %1279 = vrot.lane.b32.xlu1 %v1211_v50, %s15680_s16  ;;  %v243_v50 = vsel %vm172_vm0, %v240_v24, %v242_v28  ;;  %v247_v24 = vsel %vm172_vm0, %v244_v46, %v246_v51  ;;  %v1216_v28 = vsel %vm1184_vm4, %v1213_v33, %v1215_v11  ;;  %v16279_v46 = vrot.slane %v21083_v1, 1  ;;  %v90_v1 = vld [vmem:[%s21070_s0 + $0x170] sm:$0xff] }
  0x7d   :  { %v16239_v14 = vpack.c.bf16 %v243_v50, %v241_v48  ;;  %v16275_v18 = vrot.slane %v574_v59, 1  ;;  %v249_v48 = vrot.slane %v85_v16, 6  ;;  %v16287_v50 = vpack.c.bf16 %v247_v24, %v245_v23  ;;  %v16306_v23 = vld [vmem:[%s21070_s0 + $0x168] sm:$0xff] }
  0x7e   :  { %v16290_v51 = vrot.slane %v569_v47, 2  ;;  %v16296_v16 = vrot.slane %v574_v59, 2  ;;  %v16311_v59 = vor.u32 %v1027_v42, %v1026_v40 }
  0x7f   :  { %734 = vrot.lane.b32.xlu0 %v541_v63, %s15681_s12  ;;  %v84_v63 = vld [vmem:[%s21070_s0 + $0x140] sm:$0xff]  ;;  %21320 = vst [vmem:[#allocation13_spill] sm:$0xff] %v16239_v14  ;;  %v582_v5 = vshll.u32 %v16239_v14, 16  ;;  %21321 = vst [vmem:[#allocation14_spill] sm:$0xff] %v16287_v50  ;;  %v21084_v40 = vshrl.u32 %v16287_v50, 16  ;;  %v21333_v49 = vshrl.u32 %v16239_v14, 16 }
  0x80   :  { %911 = vrot.lane.b32.xlu1 %v844_v30, %s15683_s19  ;;  %v86_v30 = vld [vmem:[%s21070_s0 + $0x150] sm:$0xff]  ;;  %v248_v33 = vrot.slane %v84_v63, 6  ;;  %v16294_v63 = vrot.slane %v21079_v9, 1 }
  0x81   :  { %v251_v3 = vrot.slane %v86_v30, 6  ;;  %v16317_v2 = vrot.slane %v582_v5, 1  ;;  %v590_v30 = vshll.u32 %v16287_v50, 16 }
  0x82   :  { %v370_v36 = vsel %vm172_vm0, 0.0, %v248_v33 }
  0x83   :  { %1144 = vrot.lane.b32.xlu0 %v1021_v38, %s15682_s13  ;;  %v16273_v38 = vld [vmem:[%s21070_s0 + $0x158] sm:$0xff]  ;;  %v588_v39 = vor.u32 %v21333_v49, %v16317_v2 }
  0x84   :  { %1281 = vrot.lane.b32.xlu1 %v1214_v32, %s15680_s16  ;;  %v552_v32 = vor.u32 %v550_v57, %v548_v10  ;;  %v1025_v57 = vsel %vm951_vm2, %v16168_v56, %v16214_v45  ;;  %v21082_v10 = vshrl.u32 %v16239_v14, 16  ;;  %v88_v56 = vld [vmem:[%s21070_s0 + $0x160] sm:$0xff]  ;;  %v253_v9 = vrot.slane %v16273_v38, 6 }
  0x85   :  { %v1218_v38 = vsel %vm1184_vm4, %v1215_v11, %v1217_v41 }
  0x86   :  { %v16321_v24 = vrot.slane %v21082_v10, 1  ;;  %v557_v42 = vsel %vm421_vm1, %v552_v32, %v16191_v26  ;;  %v255_v10 = vrot.slane %v88_v56, 6  ;;  %v257_v32 = vrot.slane %v16306_v23, 6 }
  0x87   :  { %736 = vrot.lane.b32.xlu0 %v549_v4, %s15681_s12  ;;  %v16298_v4 = vpack.c.bf16 %v377_v31, %v377_v31  ;;  %v250_v31 = vsel %vm172_vm0, %v248_v33, %v249_v48  ;;  %v16333_v33 = vrot.slane %v582_v5, 2  ;;  %v252_v5 = vsel %vm172_vm0, %v249_v48, %v251_v3 }
  0x88   :  { %913 = vrot.lane.b32.xlu1 %v846_v34, %s15683_s19  ;;  %v560_v34 = vor.u32 %v558_v12, %v16191_v26  ;;  %v254_v8 = vsel %vm172_vm0, %v251_v3, %v253_v9  ;;  %v1029_v12 = vsel %vm951_vm2, %v16214_v45, %v16311_v59  ;;  %v850_v26 = vsel %vm814_vm3, %v847_v13, %v849_v55 }
  0x89   :  { %v16363_v3 = vrot.slane %v590_v30, 1  ;;  %v16367_v48 = vrot.slane %v21084_v40, 1  ;;  %v16370_v56 = vrot.slane %v590_v30, 2  ;;  %v16376_v11 = vpack.c.bf16 %v254_v8, %v252_v5 }
  0x8a   :  { %v256_v55 = vsel %vm172_vm0, %v253_v9, %v255_v10  ;;  %v258_v40 = vsel %vm172_vm0, %v255_v10, %v257_v32  ;;  %v1034_v30 = vor.u32 %v16230_v54, %v16224_v58  ;;  %v1220_v8 = vsel %vm1184_vm4, %v1217_v41, %v1219_v61 }
  0x8b   :  { %1146 = vrot.lane.b32.xlu0 %v1025_v57, %s15682_s13  ;;  %v598_v57 = vshll.u32 %v16298_v4, 16  ;;  %v21322_v5 = vshrl.u32 %v16193_v20, 16  ;;  %v16403_v61 = vpack.c.bf16 %v258_v40, %v256_v55  ;;  %v21325_v10 = vmov 0  }
  0x8c   :  { %1283 = vrot.lane.b32.xlu1 %v1216_v28, %s15680_s16  ;;  %v16339_v28 = vpack.c.bf16 %v250_v31, %v370_v36  ;;  %v16352_v36 = vld [vmem:[%s21070_s0 + $0x178] sm:$0xff]  ;;  %v1051_v31 = vshrl.u32 %v16298_v4, 16 }
  0x8d   :  { %v16372_v23 = vrot.slane %v598_v57, 1  ;;  %v572_v45 = vor.u32 %v16245_v19, %v21322_v5  ;;  %v16394_v9 = vrot.slane %v598_v57, 2  ;;  %v610_v57 = vshll.u32 %v16376_v11, 16 }
  0x8e   :  { %v605_v13 = vshll.u32 %v16339_v28, 16  ;;  %v16399_v6 = vrot.slane %v1051_v31, 1  ;;  %v21085_v58 = vshrl.u32 %v16339_v28, 16 }
  0x8f   :  { %738 = vrot.lane.b32.xlu0 %v557_v42, %s15681_s12 }
  0x90   :  { %915 = vrot.lane.b32.xlu1 %v848_v35, %s15683_s19  ;;  %v565_v35 = vsel %vm421_vm1, %v560_v34, %v16221_v52  ;;  %v259_v52 = vrot.slane %v90_v1, 6  ;;  %v261_v34 = vrot.slane %v16352_v36, 6  ;;  %v16411_v31 = vrot.slane %v605_v13, 1 }
  0x91   :  { %v711_v42 = vpop.permute.xlu0 %710  ;;  %v16427_v40 = vrot.slane %v605_v13, 2  ;;  %v21323_v13 = vrot.slane %v16210_v44, 1 }
  0x92   :  { %v1121_v47 = vpop.permute.xlu1 %1120  ;;  %v1323_v54 = vsel %vm1321_vm6, %v15770_v17, %v711_v42  ;;  %v16419_v17 = vrot.slane %v21085_v58, 1  ;;  %v260_v42 = vsel %vm172_vm0, %v257_v32, %v259_v52  ;;  %v262_v36 = vsel %vm172_vm0, %v259_v52, %v261_v34  ;;  %v93_v32 = vld [vmem:[%s21070_s0 + $0x188] sm:$0xff]  ;;  %v94_v52 = vld [vmem:[%s21070_s0 + $0x190] sm:$0xff] }
  0x93   :  { %1148 = vrot.lane.b32.xlu0 %v1029_v12, %s15682_s13  ;;  %v16465_v5 = vpack.c.bf16 %v262_v36, %v260_v42 }
  0x94   :  { %1285 = vrot.lane.b32.xlu1 %v1218_v38, %s15680_s16 }
  0x95   :  { %v888_v19 = vpop.permute.xlu0 %887 }
  0x96   :  { %v1388_v38 = vsel %vm1386_vm7, %v1323_v54, %v888_v19  ;;  %v1258_v12 = vpop.permute.xlu1 %1257  ;;  %v1035_v19 = vsel %vm951_vm2, %v16311_v59, %v1034_v30  ;;  %v16442_v59 = vld [vmem:[%s21070_s0 + $0x198] sm:$0xff]  ;;  %v21324_v30 = vrot.slane %v16193_v20, 1 }
  0x97   :  { %v1453_v55 = vsel %vm1451_vm8, %v1388_v38, %v1121_v47  ;;  %740 = vrot.lane.b32.xlu0 %v565_v35, %s15681_s12  ;;  %v618_v47 = vshll.u32 %v16403_v61, 16  ;;  %v92_v35 = vld [vmem:[%s21070_s0 + $0x180] sm:$0xff] }
  0x98   :  { %v1518_v54 = vsel %vm1516_vm9, %v1453_v55, %v1258_v12  ;;  %917 = vrot.lane.b32.xlu1 %v850_v26, %s15683_s19  ;;  %v853_v38 = vsel %vm814_vm3, %v21324_v30, %v21323_v13  ;;  %v1038_v12 = vor.u32 %v16290_v51, %v16279_v46  ;;  %v16452_v55 = vrot.slane %v610_v57, 1 }
  0x99   :  { %12759 = vmatmul.mubr.msk.bf16.vlgmr.msra.gmra.mrb[0].mxu0 %vm1587_vm10, %v1518_v54  ;;  %v713_v26 = vpop.permute.xlu0 %712  ;;  %v16460_v54 = vor.u32 %v16296_v16, %v16294_v63  ;;  %v21326_v13 = vshrl.u32 %v16210_v44, 16  ;;  %v21327_v51 = vshrl.u32 %v16376_v11, 16  ;;  %v378_v63 = vsel %vm172_vm0, %v261_v34, 0.0 }
  0x9a   :  { %v1325_v1 = vsel %vm1321_vm6, %v15777_v21, %v713_v26  ;;  %v890_v58 = vpop.permute.xlu1 %889  ;;  %1703 = vmatprep.mubr.bf16.mxu0 %v21325_v10  ;;  %v577_v21 = vsel %vm421_vm1, %v572_v45, %v16275_v18  ;;  %v16477_v16 = vrot.slane %v610_v57, 2  ;;  %v263_v42 = vrot.slane %v92_v35, 6 }
  0x9b   :  { %v580_v30 = vor.u32 %v21326_v13, %v16275_v18  ;;  %v1390_v46 = vsel %vm1386_vm7, %v1325_v1, %v890_v58  ;;  %1150 = vrot.lane.b32.xlu0 %v1035_v19, %s15682_s13  ;;  %v16473_v26 = vrot.slane %v21327_v51, 1  ;;  %v16479_v13 = vrot.slane %v618_v47, 1 }
  0x9c   :  { %1287 = vrot.lane.b32.xlu1 %v1220_v8, %s15680_s16  ;;  %v264_v19 = vrot.slane %v93_v32, 6  ;;  %v266_v18 = vrot.slane %v94_v52, 6  ;;  %v21087_v45 = vrot.slane %v16442_v59, 6  ;;  %v21328_v34 = vshrl.u32 %v16403_v61, 16 }
  0x9d   :  { %v1123_v1 = vpop.permute.xlu0 %1122  ;;  %v626_v57 = vshll.u32 %v16465_v5, 16  ;;  %v16490_v43 = vpack.c.bf16 %v378_v63, %v378_v63  ;;  %v21329_v35 = vrot.slane %v16210_v44, 2  ;;  %v21330_v32 = vrot.slane %v16193_v20, 2 }
  0x9e   :  { %v1455_v51 = vsel %vm1451_vm8, %v1390_v46, %v1123_v1  ;;  %v1260_v41 = vpop.permute.xlu1 %1259  ;;  %v16487_v8 = vrot.slane %v21328_v34, 1  ;;  %v16499_v46 = vrot.slane %v618_v47, 2  ;;  %v21090_v1 = vshrl.u32 %v16465_v5, 16 }
  0x9f   :  { %v1520_v36 = vsel %vm1516_vm9, %v1455_v51, %v1260_v41  ;;  %742 = vrot.lane.b32.xlu0 %v577_v21, %s15681_s12  ;;  %v1223_v52 = vsel %vm1184_vm4, %v21330_v32, %v21329_v35  ;;  %v1042_v63 = vsel %vm951_vm2, %v1038_v12, %v16460_v54  ;;  %v585_v41 = vsel %vm421_vm1, %v580_v30, %v16317_v2  ;;  %v96_v30 = vld [vmem:[%s21070_s0 + $0x1a0] sm:$0xff] }
  0xa0   :  { %919 = vrot.lane.b32.xlu1 %v853_v38, %s15683_s19  ;;  %v265_v47 = vsel %vm172_vm0, %v263_v42, %v264_v19  ;;  %v267_v35 = vsel %vm172_vm0, %v264_v19, %v266_v18  ;;  %v269_v38 = vsel %vm172_vm0, %v266_v18, %v21087_v45  ;;  %v371_v12 = vsel %vm172_vm0, 0.0, %v263_v42  ;;  %v97_v42 = vld [vmem:[%s21070_s0 + $0x1a8] sm:$0xff] }
  0xa1   :  { %12760 = vmatmul.mubr.msk.bf16.gmra.mrb[4].mxu0 %vm1587_vm10, %v1520_v36  ;;  %v715_v34 = vpop.permute.xlu0 %714  ;;  %v16522_v36 = vrot.slane %v626_v57, 1  ;;  %v634_v19 = vshll.u32 %v16490_v43, 16  ;;  %v1072_v21 = vshrl.u32 %v16490_v43, 16  ;;  %v16539_v58 = vrot.slane %v626_v57, 2 }
  0xa2   :  { %v1327_v32 = vsel %vm1321_vm6, %v15779_v22, %v715_v34  ;;  %v892_v51 = vpop.permute.xlu1 %891  ;;  %1713 = vmatprep.mubr.bf16.mxu0 %v21325_v10  ;;  %v16533_v22 = vor.u32 %v16333_v33, %v16321_v24  ;;  %v16537_v34 = vrot.slane %v21090_v1, 1  ;;  %v16544_v27 = vpack.c.bf16 %v265_v47, %v371_v12  ;;  %v98_v24 = vld [vmem:[%s21070_s0 + $0x1b0] sm:$0xff]  ;;  %v99_v33 = vld [vmem:[%s21070_s0 + $0x1b8] sm:$0xff] }
  0xa3   :  { %v1392_v18 = vsel %vm1386_vm7, %v1327_v32, %v892_v51  ;;  %1152 = vrot.lane.b32.xlu0 %v1042_v63, %s15682_s13  ;;  %v16546_v51 = vpack.c.bf16 %v269_v38, %v267_v35  ;;  %v21331_v63 = vrot.slane %v16239_v14, 1  ;;  %v270_v20 = vrot.slane %v96_v30, 6 }
  0xa4   :  { %1289 = vrot.lane.b32.xlu1 %v1223_v52, %s15680_s16  ;;  %v21332_v52 = vrot.slane %v16210_v44, 1  ;;  %v272_v47 = vrot.slane %v97_v42, 6  ;;  %v16560_v12 = vrot.slane %v634_v19, 1  ;;  %v16562_v45 = vrot.slane %v1072_v21, 1 }
  0xa5   :  { %v1125_v57 = vpop.permute.xlu0 %1124  ;;  %v16569_v0 = vrot.slane %v634_v19, 2  ;;  %v1046_v30 = vsel %vm951_vm2, %v16460_v54, %v16533_v22  ;;  %v21334_v21 = vrot.slane %v16239_v14, 2  ;;  %v21335_v42 = vrot.slane %v16210_v44, 2 }
  0xa6   :  { %v855_v32 = vsel %vm814_vm3, %v21332_v52, %v21331_v63  ;;  %v1457_v35 = vsel %vm1451_vm8, %v1392_v18, %v1125_v57  ;;  %v1262_v38 = vpop.permute.xlu1 %1261  ;;  %v274_v63 = vrot.slane %v98_v24, 6  ;;  %v646_v57 = vshll.u32 %v16546_v51, 16 }
  0xa7   :  { %v1522_v1 = vsel %vm1516_vm9, %v1457_v35, %v1262_v38  ;;  %744 = vrot.lane.b32.xlu0 %v585_v41, %s15681_s12  ;;  %v1225_v18 = vsel %vm1184_vm4, %v21335_v42, %v21334_v21  ;;  %v641_v41 = vshll.u32 %v16544_v27, 16  ;;  %v21094_v2 = vshrl.u32 %v16546_v51, 16 }
  0xa8   :  { %921 = vrot.lane.b32.xlu1 %v855_v32, %s15683_s19  ;;  %v21336_v19 = vrot.slane %v16442_v59, 6  ;;  %v273_v54 = vsel %vm172_vm0, %v270_v20, %v272_v47  ;;  %v276_v52 = vrot.slane %v99_v33, 6  ;;  %v21337_v38 = vrot.slane %v16287_v50, 1 }
  0xa9   :  { %12761 = vmatmul.mubr.msk.bf16.gmra.mrb[8].mxu0 %vm1587_vm10, %v1522_v1  ;;  %v717_v49 = vpop.permute.xlu0 %716  ;;  %v21338_v21 = vrot.slane %v16239_v14, 1  ;;  %v16602_v59 = vor.u32 %v16370_v56, %v16367_v48  ;;  %v275_v56 = vsel %vm172_vm0, %v272_v47, %v274_v63  ;;  %v16628_v48 = vrot.slane %v646_v57, 1 }
  0xaa   :  { %v271_v24 = vsel %vm172_vm0, %v21336_v19, %v270_v20  ;;  %v1329_v32 = vsel %vm1321_vm6, %v15798_v53, %v717_v49  ;;  %v894_v35 = vpop.permute.xlu1 %893  ;;  %1723 = vmatprep.mubr.bf16.mxu0 %v21325_v10  ;;  %v593_v20 = vsel %vm421_vm1, %v588_v39, %v16363_v3  ;;  %v21339_v53 = vshrl.u32 %v16287_v50, 16 }
  0xab   :  { %v857_v1 = vsel %vm814_vm3, %v21338_v21, %v21337_v38  ;;  %v1394_v42 = vsel %vm1386_vm7, %v1329_v32, %v894_v35  ;;  %1154 = vrot.lane.b32.xlu0 %v1046_v30, %s15682_s13  ;;  %v21096_v49 = vshrl.u32 %v16544_v27, 16  ;;  %v16611_v30 = vpack.c.bf16 %v273_v54, %v271_v24 }
  0xac   :  { %v596_v33 = vor.u32 %v21339_v53, %v16363_v3  ;;  %1291 = vrot.lane.b32.xlu1 %v1225_v18, %s15680_s16  ;;  %v16613_v39 = vrot.slane %v641_v41, 1  ;;  %v277_v38 = vsel %vm172_vm0, %v274_v63, %v276_v52  ;;  %v16623_v53 = vrot.slane %v641_v41, 2  ;;  %v100_v63 = vld [vmem:[%s21070_s0 + $0x1c0] sm:$0xff] }
  0xad   :  { %v1127_v35 = vpop.permute.xlu0 %1126  ;;  %v16621_v21 = vrot.slane %v21096_v49, 1  ;;  %v379_v24 = vsel %vm172_vm0, %v276_v52, 0.0  ;;  %v16632_v47 = vrot.slane %v21094_v2, 1  ;;  %v1050_v41 = vsel %vm951_vm2, %v16533_v22, %v16602_v59 }
  0xae   :  { %v1459_v3 = vsel %vm1451_vm8, %v1394_v42, %v1127_v35  ;;  %v1264_v18 = vpop.permute.xlu1 %1263  ;;  %v654_v52 = vshll.u32 %v16611_v30, 16  ;;  %v21095_v42 = vshrl.u32 %v16611_v30, 16  ;;  %v16654_v22 = vpack.c.bf16 %v379_v24, %v379_v24 }
  0xaf   :  { %v1524_v54 = vsel %vm1516_vm9, %v1459_v3, %v1264_v18  ;;  %746 = vrot.lane.b32.xlu0 %v593_v20, %s15681_s12  ;;  %v16643_v20 = vpack.c.bf16 %v277_v38, %v275_v56  ;;  %v21340_v3 = vrot.slane %v16287_v50, 2  ;;  %v21341_v18 = vrot.slane %v16239_v14, 2  ;;  %v16659_v56 = vld [vmem:[%s21070_s0 + $0x1c8] sm:$0xff] }
  0xb0   :  { %923 = vrot.lane.b32.xlu1 %v857_v1, %s15683_s19  ;;  %v16651_v1 = vrot.slane %v646_v57, 2  ;;  %v601_v32 = vsel %vm421_vm1, %v596_v33, %v16372_v23  ;;  %v1055_v24 = vor.u32 %v16394_v9, %v16399_v6  ;;  %v16677_v23 = vrot.slane %v21095_v42, 1 }
  0xb1   :  { %12762 = vmatmul.mubr.msk.bf16.gmra.mrb[12].mxu0 %vm1587_vm10, %v1524_v54  ;;  %v719_v35 = vpop.permute.xlu0 %718  ;;  %v1227_v2 = vsel %vm1184_vm4, %v21341_v18, %v21340_v3  ;;  %v662_v33 = vshll.u32 %v16643_v20, 16  ;;  %v21343_v9 = vrot.slane %v16287_v50, 1  ;;  %v16688_v19 = vrot.slane %v654_v52, 2 }
  0xb2   :  { %v1331_v38 = vsel %vm1321_vm6, %v15839_v25, %v719_v35  ;;  %v896_v54 = vpop.permute.xlu1 %895  ;;  %1733 = vmatprep.mubr.bf16.mxu0 %v21325_v10  ;;  %v16673_v25 = vrot.slane %v654_v52, 1  ;;  %v278_v35 = vrot.slane %v100_v63, 6  ;;  %v21099_v42 = vrot.slane %v16659_v56, 6 }
  0xb3   :  { %v1396_v57 = vsel %vm1386_vm7, %v1331_v38, %v896_v54  ;;  %1156 = vrot.lane.b32.xlu0 %v1050_v41, %s15682_s13  ;;  %v21342_v41 = vrot.slane %v16298_v4, 1  ;;  %v21344_v49 = vrot.slane %v16298_v4, 2  ;;  %v21345_v14 = vrot.slane %v16287_v50, 2 }
  0xb4   :  { %1293 = vrot.lane.b32.xlu1 %v1227_v2, %s15680_s16  ;;  %v670_v2 = vshll.u32 %v16654_v22, 16  ;;  %v1056_v52 = vsel %vm951_vm2, %v16602_v59, %v1055_v24  ;;  %v1093_v4 = vshrl.u32 %v16654_v22, 16  ;;  %v16721_v59 = vld [vmem:[%s21070_s0 + $0x1e0] sm:$0xff]  ;;  %v16724_v24 = vrot.slane %v662_v33, 1 }
  0xb5   :  { %v1129_v38 = vpop.permute.xlu0 %1128  ;;  %v859_v6 = vsel %vm814_vm3, %v21343_v9, %v21342_v41  ;;  %v1229_v41 = vsel %vm1184_vm4, %v21345_v14, %v21344_v49  ;;  %v16711_v14 = vld [vmem:[%s21070_s0 + $0x1d0] sm:$0xff]  ;;  %v16716_v49 = vld [vmem:[%s21070_s0 + $0x1d8] sm:$0xff]  ;;  %v372_v50 = vsel %vm172_vm0, 0.0, %v278_v35  ;;  %v1062_v44 = vor.u32 %v16477_v16, %v16473_v26 }
  0xb6   :  { %v1461_v18 = vsel %vm1451_vm8, %v1396_v57, %v1129_v38  ;;  %v1266_v3 = vpop.permute.xlu1 %1265  ;;  %v21346_v57 = vshrl.u32 %v16339_v28, 16  ;;  %v16737_v9 = vrot.slane %v670_v2, 2 }
  0xb7   :  { %v1526_v63 = vsel %vm1516_vm9, %v1461_v18, %v1266_v3  ;;  %748 = vrot.lane.b32.xlu0 %v601_v32, %s15681_s12  ;;  %v21347_v18 = vshrl.u32 %v16643_v20, 16 }
  0xb8   :  { %925 = vrot.lane.b32.xlu1 %v859_v6, %s15683_s19  ;;  %v608_v3 = vor.u32 %v16411_v31, %v21346_v57  ;;  %v16730_v6 = vrot.slane %v662_v33, 2  ;;  %v16732_v57 = vrot.slane %v670_v2, 1  ;;  %v16746_v33 = vld [vmem:[%s21070_s0 + $0x1e8] sm:$0xff]  ;;  %v21350_v2 = vrot.slane %v16339_v28, 1 }
  0xb9   :  { %12763 = vmatmul.mubr.msk.bf16.gmra.mrb[16].mxu0 %vm1587_vm10, %v1526_v63  ;;  %v721_v31 = vpop.permute.xlu0 %720  ;;  %v16728_v38 = vrot.slane %v21347_v18, 1  ;;  %v280_v63 = vsel %vm172_vm0, %v278_v35, %v21099_v42  ;;  %v1059_v42 = vor.u32 %v16427_v40, %v16419_v17  ;;  %v285_v40 = vrot.slane %v16721_v59, 6 }
  0xba   :  { %21348 = vst [vmem:[#allocation15_spill] sm:$0xff] %v16732_v57  ;;  %v1333_v32 = vsel %vm1321_vm6, %v15851_v37, %v721_v31  ;;  %v898_v54 = vpop.permute.xlu1 %897  ;;  %1743 = vmatprep.mubr.bf16.mxu0 %v21325_v10  ;;  %v21349_v37 = vrot.slane %v16376_v11, 1  ;;  %v613_v35 = vsel %vm421_vm1, %v608_v3, %v16452_v55  ;;  %v281_v57 = vrot.slane %v16711_v14, 6 }
  0xbb   :  { %v1398_v18 = vsel %vm1386_vm7, %v1333_v32, %v898_v54  ;;  %1158 = vrot.lane.b32.xlu0 %v1056_v52, %s15682_s13  ;;  %v16762_v54 = vrot.slane %v1093_v4, 1  ;;  %v287_v16 = vrot.slane %v16746_v33, 6  ;;  %v1063_v4 = vsel %vm951_vm2, %v1059_v42, %v1062_v44 }
  0xbc   :  { %v862_v31 = vsel %vm814_vm3, %v21350_v2, %v21349_v37  ;;  %1295 = vrot.lane.b32.xlu1 %v1229_v41, %s15680_s16  ;;  %v283_v37 = vrot.slane %v16716_v49, 6  ;;  %v16767_v2 = vpack.c.bf16 %v280_v63, %v372_v50  ;;  %v21351_v50 = vshrl.u32 %v16376_v11, 16  ;;  %v15213_v49 = vld [vmem:[#allocation3 + $0x28] sm:$0xff]  }
  0xbd   :  { %v1131_v32 = vpop.permute.xlu0 %1130 }
  0xbe   :  { %v1463_v17 = vsel %vm1451_vm8, %v1398_v18, %v1131_v32  ;;  %v1268_v41 = vpop.permute.xlu1 %1267  ;;  %v675_v26 = vshrl.u32 %v16767_v2, 16  ;;  %v616_v63 = vor.u32 %v21351_v50, %v16452_v55  ;;  %v21352_v32 = vrot.slane %v16376_v11, 2 }
  0xbf   :  { %v1528_v3 = vsel %vm1516_vm9, %v1463_v17, %v1268_v41  ;;  %750 = vrot.lane.b32.xlu0 %v613_v35, %s15681_s12  ;;  %v21353_v17 = vrot.slane %v16339_v28, 2  ;;  %v21354_v50 = vrot.slane %v16403_v61, 1 }
  0xc0   :  { %927 = vrot.lane.b32.xlu1 %v862_v31, %s15683_s19  ;;  %v621_v55 = vsel %vm421_vm1, %v616_v63, %v16479_v13  ;;  %v1066_v31 = vor.u32 %v16499_v46, %v16487_v8  ;;  %v21356_v8 = vshrl.u32 %v16403_v61, 16 }
  0xc1   :  { %12764 = vmatmul.mubr.msk.bf16.gmra.mrb[20].mxu0 %vm1587_vm10, %v1528_v3  ;;  %v723_v18 = vpop.permute.xlu0 %722  ;;  %v1232_v35 = vsel %vm1184_vm4, %v21353_v17, %v21352_v32 }
  0xc2   :  { %v1335_v41 = vsel %vm1321_vm6, %v15874_v60, %v723_v18  ;;  %v900_v52 = vpop.permute.xlu1 %899  ;;  %1753 = vmatprep.mubr.bf16.mxu0 %v21325_v10  ;;  %v21355_v60 = vrot.slane %v16376_v11, 1  ;;  %v1067_v63 = vsel %vm951_vm2, %v1062_v44, %v1066_v31  ;;  %v624_v46 = vor.u32 %v21356_v8, %v16479_v13 }
  0xc3   :  { %v1400_v42 = vsel %vm1386_vm7, %v1335_v41, %v900_v52  ;;  %1160 = vrot.lane.b32.xlu0 %v1063_v4, %s15682_s13  ;;  %v21358_v41 = vrot.slane %v16376_v11, 2 }
  0xc4   :  { %1297 = vrot.lane.b32.xlu1 %v1232_v35, %s15680_s16  ;;  %v864_v18 = vsel %vm814_vm3, %v21355_v60, %v21354_v50  ;;  %v21357_v35 = vrot.slane %v16403_v61, 2  ;;  %v629_v13 = vsel %vm421_vm1, %v624_v46, %v16522_v36  ;;  %v1070_v50 = vor.u32 %v16539_v58, %v16537_v34 }
  0xc5   :  { %v1133_v3 = vpop.permute.xlu0 %1132  ;;  %v21361_v58 = vshrl.u32 %v16465_v5, 16 }
  0xc6   :  { %v1465_v32 = vsel %vm1451_vm8, %v1400_v42, %v1133_v3  ;;  %v1270_v52 = vpop.permute.xlu1 %1269  ;;  %v1234_v42 = vsel %vm1184_vm4, %v21358_v41, %v21357_v35  ;;  %v1071_v8 = vsel %vm951_vm2, %v1066_v31, %v1070_v50 }
  0xc7   :  { %v1530_v4 = vsel %vm1516_vm9, %v1465_v32, %v1270_v52  ;;  %752 = vrot.lane.b32.xlu0 %v621_v55, %s15681_s12  ;;  %v632_v34 = vor.u32 %v21361_v58, %v16522_v36 }
  0xc8   :  { %929 = vrot.lane.b32.xlu1 %v864_v18, %s15683_s19  ;;  %v21359_v18 = vrot.slane %v16465_v5, 1 }
  0xc9   :  { %12765 = vmatmul.mubr.msk.bf16.gmra.mrb[24].mxu0 %vm1587_vm10, %v1530_v4  ;;  %v725_v17 = vpop.permute.xlu0 %724  ;;  %v637_v36 = vsel %vm421_vm1, %v632_v34, %v16560_v12 }
  0xca   :  { %v1337_v55 = vsel %vm1321_vm6, %v15891_v15, %v725_v17  ;;  %v902_v3 = vpop.permute.xlu1 %901  ;;  %1763 = vmatprep.mubr.bf16.mxu0 %v21325_v10  ;;  %v21360_v15 = vrot.slane %v16403_v61, 1  ;;  %v21362_v17 = vrot.slane %v16465_v5, 2 }
  0xcb   :  { %v1402_v44 = vsel %vm1386_vm7, %v1337_v55, %v902_v3  ;;  %1162 = vrot.lane.b32.xlu0 %v1067_v63, %s15682_s13  ;;  %v1076_v3 = vor.u32 %v16569_v0, %v16562_v45  ;;  %v21365_v0 = vshrl.u32 %v16544_v27, 16 }
  0xcc   :  { %1299 = vrot.lane.b32.xlu1 %v1234_v42, %s15680_s16  ;;  %v866_v32 = vsel %vm814_vm3, %v21360_v15, %v21359_v18  ;;  %v1236_v41 = vsel %vm1184_vm4, %v21357_v35, %v21362_v17  ;;  %v21367_v58 = vmov %v21362_v17 }
  0xcd   :  { %v1135_v60 = vpop.permute.xlu0 %1134  ;;  %v1077_v12 = vsel %vm951_vm2, %v1070_v50, %v1076_v3  ;;  %v644_v45 = vor.u32 %v16613_v39, %v21365_v0  ;;  %v21368_v50 = vrot.slane %v16659_v56, 6  ;;  %v284_v39 = vsel %vm172_vm0, %v281_v57, %v283_v37 }
  0xce   :  { %v1467_v52 = vsel %vm1451_vm8, %v1402_v44, %v1135_v60  ;;  %v1272_v4 = vpop.permute.xlu1 %1271  ;;  %v1080_v56 = vor.u32 %v16623_v53, %v16621_v21  ;;  %v21370_v21 = vrot.slane %v16544_v27, 1 }
  0xcf   :  { %v1532_v63 = vsel %vm1516_vm9, %v1467_v52, %v1272_v4  ;;  %754 = vrot.lane.b32.xlu0 %v629_v13, %s15681_s12  ;;  %v21363_v13 = vrot.slane %v16490_v43, 1  ;;  %v677_v52 = vshll.u32 %v16767_v2, 16  ;;  %v15208_v4 = vld [vmem:[#allocation3] sm:$0xff]   ;;  %v649_v14 = vsel %vm421_vm1, %v644_v45, %v16628_v48 }
  0xd0   :  { %931 = vrot.lane.b32.xlu1 %v866_v32, %s15683_s19  ;;  %5898 = vmatpush1.bf16.msra.mxu0 %v15208_v4 }
  0xd1   :  { %12766 = vmatmul.mubr.msk.bf16.gmra.mrb[28].mxu0 %vm1587_vm10, %v1532_v63  ;;  %v727_v46 = vpop.permute.xlu0 %726  ;;  %5899 = vmatprep.subr.bf16.mxu0 %v21325_v10 }
  0xd2   :  { %v1339_v42 = vsel %vm1321_vm6, %v15941_v62, %v727_v46  ;;  %v904_v55 = vpop.permute.xlu1 %903  ;;  %1773 = vmatprep.mubr.bf16.mxu0 %v21325_v10  ;;  %v21364_v62 = vmov %v21359_v18  ;;  %v282_v46 = vsel %vm172_vm0, %v21368_v50, %v281_v57 }
  0xd3   :  { %v1404_v31 = vsel %vm1386_vm7, %v1339_v42, %v904_v55  ;;  %1164 = vrot.lane.b32.xlu0 %v1071_v8, %s15682_s13  ;;  %v868_v60 = vsel %vm814_vm3, %v21364_v62, %v21363_v13  ;;  %v21366_v8 = vrot.slane %v16490_v43, 2  ;;  %v16897_v57 = vpack.c.bf16 %v284_v39, %v282_v46  ;;  %v15209_v42 = vld [vmem:[#allocation3 + $0x8] sm:$0xff]  }
  0xd4   :  { %1301 = vrot.lane.b32.xlu1 %v1236_v41, %s15680_s16  ;;  %v878_v41 = vrot.slane %v16767_v2, 1  ;;  %5900 = vmatpush1.bf16.msra.mxu0 %v15209_v42  ;;  %v21376_v39 = vshrl.u32 %v16611_v30, 16 }
  0xd5   :  { %v1137_v44 = vpop.permute.xlu0 %1136  ;;  %v1238_v34 = vsel %vm1184_vm4, %v21367_v58, %v21366_v8  ;;  %5901 = vmatprep.subr.bf16.mxu0 %v21325_v10  ;;  %v682_v62 = vshll.u32 %v16897_v57, 16  ;;  %v15211_v8 = vld [vmem:[#allocation3 + $0x18] sm:$0xff]  }
  0xd6   :  { %v1469_v18 = vsel %vm1451_vm8, %v1404_v31, %v1137_v44  ;;  %v1274_v15 = vpop.permute.xlu1 %1273  ;;  %v21369_v31 = vrot.slane %v16546_v51, 1 }
  0xd7   :  { %v1534_v32 = vsel %vm1516_vm9, %v1469_v18, %v1274_v15  ;;  %756 = vrot.lane.b32.xlu0 %v637_v36, %s15681_s12  ;;  %v21372_v15 = vrot.slane %v16546_v51, 2 }
  0xd8   :  { %933 = vrot.lane.b32.xlu1 %v868_v60, %s15683_s19  ;;  %v871_v53 = vsel %vm814_vm3, %v21370_v21, %v21369_v31  ;;  %v15210_v60 = vld [vmem:[#allocation3 + $0x10] sm:$0xff]   ;;  %v21375_v50 = vmov %v21369_v31  ;;  %v15212_v31 = vld [vmem:[#allocation3 + $0x20] sm:$0xff]  }
  0xd9   :  { %12767 = vmatmul.mubr.msk.bf16.gmra.mrb[32].mxu0 %vm1587_vm10, %v1534_v32  ;;  %v729_v63 = vpop.permute.xlu0 %728  ;;  %v21373_v32 = vrot.slane %v16544_v27, 2 }
  0xda   :  { %v1341_v17 = vsel %vm1321_vm6, %v15948_v7, %v729_v63  ;;  %v906_v43 = vpop.permute.xlu1 %905  ;;  %1783 = vmatprep.mubr.bf16.mxu0 %v21325_v10  ;;  %v1083_v7 = vor.u32 %v16651_v1, %v16632_v47  ;;  %v21371_v1 = vshrl.u32 %v16546_v51, 16  ;;  %5902 = vmatpush1.bf16.msra.mxu0 %v15210_v60  ;;  %v1087_v63 = vor.u32 %v16688_v19, %v16677_v23 }
  0xdb   :  { %v1406_v35 = vsel %vm1386_vm7, %v1341_v17, %v906_v43  ;;  %1166 = vrot.lane.b32.xlu0 %v1077_v12, %s15682_s13  ;;  %v1241_v12 = vsel %vm1184_vm4, %v21373_v32, %v21372_v15  ;;  %5903 = vmatprep.subr.bf16.mxu0 %v21325_v10  ;;  %v660_v17 = vor.u32 %v21376_v39, %v16673_v25  ;;  %v879_v23 = vrot.slane %v16897_v57, 1 }
  0xdc   :  { %1303 = vrot.lane.b32.xlu1 %v1238_v34, %s15680_s16  ;;  %v1084_v47 = vsel %vm951_vm2, %v1080_v56, %v1083_v7  ;;  %v652_v13 = vor.u32 %v21371_v1, %v16628_v48  ;;  %v21374_v34 = vrot.slane %v16611_v30, 1  ;;  %v1248_v56 = vrot.slane %v16767_v2, 2  ;;  %v21379_v1 = vld [vmem:[#allocation6_spill] sm:$0xff] }
  0xdd   :  { %v1139_v55 = vpop.permute.xlu0 %1138  ;;  %v1088_v42 = vsel %vm951_vm2, %v1083_v7, %v1087_v63  ;;  %v16970_v7 = vrot.slane %v675_v26, 1 }
  0xde   :  { %v1471_v36 = vsel %vm1451_vm8, %v1406_v35, %v1139_v55  ;;  %v1276_v3 = vpop.permute.xlu1 %1275  ;;  %v657_v4 = vsel %vm421_vm1, %v652_v13, %v16673_v25  ;;  %v873_v46 = vsel %vm814_vm3, %v21375_v50, %v21374_v34  ;;  %5904 = vmatpush1.bf16.msra.mxu0 %v15211_v8  ;;  %v107_v25 = vld [vmem:[%s21070_s0 + $0x1f8] sm:$0xff]  ;;  %v1249_v55 = vrot.slane %v16897_v57, 2 }
  0xdf   :  { %v1536_v44 = vsel %vm1516_vm9, %v1471_v36, %v1276_v3  ;;  %758 = vrot.lane.b32.xlu0 %v649_v14, %s15681_s12  ;;  %v106_v14 = vld [vmem:[%s21070_s0 + $0x1f0] sm:$0xff]  ;;  %5905 = vmatprep.subr.bf16.mxu0 %v21325_v10  ;;  %v21378_v36 = vmov %v21372_v15  ;;  %v16979_v15 = vrot.slane %v677_v52, 2  ;;  %v291_v8 = vrot.slane %v107_v25, 6 }
  0xe0   :  { %935 = vrot.lane.b32.xlu1 %v871_v53, %s15683_s19  ;;  %v21377_v53 = vrot.slane %v16611_v30, 2 }
  0xe1   :  { %12768 = vmatmul.mubr.msk.bf16.gmra.mrb[36].mxu0 %vm1587_vm10, %v1536_v44  ;;  %v731_v18 = vpop.permute.xlu0 %730  ;;  %v665_v44 = vsel %vm421_vm1, %v660_v17, %v16724_v24  ;;  %v17020_v17 = vsel %vm172_vm0, %v291_v8, 0.0 }
  0xe2   :  { %v1343_v0 = vsel %vm1321_vm6, %v15969_v29, %v731_v18  ;;  %v908_v45 = vpop.permute.xlu1 %907  ;;  %1793 = vmatprep.mubr.bf16.mxu0 %v21325_v10  ;;  %v686_v29 = vshrl.u32 %v16897_v57, 16  ;;  %v1243_v3 = vsel %vm1184_vm4, %v21378_v36, %v21377_v53  ;;  %v16975_v18 = vrot.slane %v682_v62, 1  ;;  %5906 = vmatpush1.bf16.msra.mxu0 %v15212_v31  ;;  %v15217_v36 = vld [vmem:[#allocation3 + $0x80] sm:$0xff]  }
  0xe3   :  { %v1408_v48 = vsel %vm1386_vm7, %v1343_v0, %v908_v45  ;;  %1168 = vrot.lane.b32.xlu0 %v1084_v47, %s15682_s13  ;;  %v16966_v47 = vrot.slane %v677_v52, 1  ;;  %v286_v0 = vsel %vm172_vm0, %v283_v37, %v285_v40  ;;  %v288_v52 = vsel %vm172_vm0, %v285_v40, %v287_v16  ;;  %5907 = vmatprep.subr.bf16.mxu0 %v21325_v10 }
  0xe4   :  { %1305 = vrot.lane.b32.xlu1 %v1241_v12, %s15680_s16  ;;  %v16983_v32 = vrot.slane %v686_v29, 1  ;;  %v1091_v45 = vor.u32 %v16730_v6, %v16728_v38  ;;  %v21380_v37 = vrot.slane %v16643_v20, 1  ;;  %14669 = vmatpush1.bf16.msra.mxu1 %v15217_v36  ;;  %v880_v36 = vsel %vm814_vm3, %v878_v41, %v879_v23 }
  0xe5   :  { %v1141_v58 = vpop.permute.xlu0 %1140  ;;  %14654 = vmatprep.subr.bf16.mxu1 %v21325_v10 }
  0xe6   :  { %v1473_v43 = vsel %vm1451_vm8, %v1408_v48, %v1141_v58  ;;  %v1278_v35 = vpop.permute.xlu1 %1277  ;;  %v17001_v48 = vrot.slane %v682_v62, 2  ;;  %v875_v59 = vsel %vm814_vm3, %v21374_v34, %v21380_v37  ;;  %5908 = vmatpush1.bf16.msra.mxu0 %v15213_v49  ;;  %v1092_v6 = vsel %vm951_vm2, %v1087_v63, %v1091_v45 }
  0xe7   :  { %v1538_v19 = vsel %vm1516_vm9, %v1473_v43, %v1278_v35  ;;  %760 = vrot.lane.b32.xlu0 %v657_v4, %s15681_s12  ;;  %v289_v4 = vrot.slane %v106_v14, 6  ;;  %5909 = vmatprep.subr.bf16.mxu0 %v21325_v10  ;;  %v21381_v62 = vshrl.u32 %v16643_v20, 16  ;;  %v15214_v43 = vld [vmem:[#allocation3 + $0x30] sm:$0xff]   ;;  %v21383_v14 = vmov %v21377_v53 }
  0xe8   :  { %937 = vrot.lane.b32.xlu1 %v873_v46, %s15683_s19  ;;  %v17009_v46 = vpack.c.bf16 %v288_v52, %v286_v0  ;;  %v21387_v0 = vmov %v21380_v37  ;;  %v15219_v37 = vld [vmem:[#allocation3 + $0x88] sm:$0xff]   ;;  %v680_v34 = vor.u32 %v16966_v47, %v675_v26  ;;  %v21390_v47 = vld [vmem:[#allocation8_spill] sm:$0xff] }
  0xe9   :  { %12769 = vmatmul.mubr.msk.bf16.gmra.mrb[40].mxu0 %vm1587_vm10, %v1538_v19  ;;  %v733_v21 = vpop.permute.xlu0 %732  ;;  %v668_v39 = vor.u32 %v21381_v62, %v16724_v24  ;;  %v21382_v19 = vrot.slane %v16643_v20, 2  ;;  %v292_v53 = vsel %vm172_vm0, %v289_v4, %v291_v8  ;;  %14670 = vmatpush1.bf16.msra.mxu1 %v15219_v37 }
  0xea   :  { %v1345_v13 = vsel %vm1321_vm6, %v21379_v1, %v733_v21  ;;  %v910_v60 = vpop.permute.xlu1 %909  ;;  %1803 = vmatprep.mubr.bf16.mxu0 %v21325_v10  ;;  %v690_v24 = vshll.u32 %v17009_v46, 16  ;;  %v290_v21 = vsel %vm172_vm0, %v287_v16, %v289_v4  ;;  %5910 = vmatpush1.bf16.msra.mxu0 %v15214_v43  ;;  %v21385_v1 = vld [vmem:[#allocation15_spill] sm:$0xff]  ;;  %v694_v16 = vshrl.u32 %v17009_v46, 16 }
  0xeb   :  { %v1410_v12 = vsel %vm1386_vm7, %v1345_v13, %v910_v60  ;;  %1170 = vrot.lane.b32.xlu0 %v1088_v42, %s15682_s13  ;;  %v1245_v25 = vsel %vm1184_vm4, %v21383_v14, %v21382_v19  ;;  %v21384_v42 = vld [vmem:[#allocation7_spill] sm:$0xff]  ;;  %5911 = vmatprep.subr.bf16.mxu0 %v21325_v10  ;;  %v673_v33 = vsel %vm421_vm1, %v668_v39, %v21385_v1  ;;  %v15215_v13 = vld [vmem:[#allocation3 + $0x38] sm:$0xff]   ;;  %vm8265_vm0 = vcmask 1046534  }
  0xec   :  { %1307 = vrot.lane.b32.xlu1 %v1243_v3, %s15680_s16  ;;  %v17050_v4 = vpack.c.bf16 %v292_v53, %v290_v21  ;;  %v21389_v62 = vmov %v21382_v19  ;;  %v1107_v43 = vrot.slane %v690_v24, 2  ;;  %v15218_v21 = vld [vmem:[#allocation3 + $0x48] sm:$0xff]   ;;  %14655 = vmatprep.subr.bf16.mxu1 %v21325_v10 }
  0xed   :  { %v1143_v58 = vpop.permute.xlu0 %1142 }
  0xee   :  { %v1475_v40 = vsel %vm1451_vm8, %v1410_v12, %v1143_v58  ;;  %v1280_v50 = vpop.permute.xlu1 %1279  ;;  %v21386_v12 = vrot.slane %v16654_v22, 1  ;;  %5912 = vmatpush1.bf16.msra.mxu0 %v15215_v13  ;;  %v881_v58 = vrot.slane %v17009_v46, 1  ;;  %v698_v26 = vshll.u32 %v17050_v4, 16 }
  0xef   :  { %v1540_v38 = vsel %vm1516_vm9, %v1475_v40, %v1280_v50  ;;  %762 = vrot.lane.b32.xlu0 %v665_v44, %s15681_s12  ;;  %v1097_v44 = vor.u32 %v16737_v9, %v16762_v54  ;;  %5913 = vmatprep.subr.bf16.mxu0 %v21325_v10  ;;  %v1106_v40 = vrot.slane %v694_v16, 1  ;;  %v1251_v50 = vrot.slane %v17009_v46, 2 }
  0xf0   :  { %939 = vrot.lane.b32.xlu1 %v875_v59, %s15683_s19  ;;  %v877_v52 = vsel %vm814_vm3, %v21387_v0, %v21386_v12  ;;  %v17063_v59 = vrot.slane %v690_v24, 1  ;;  %v702_v24 = vshrl.u32 %v17050_v4, 16  ;;  %v1111_v13 = vrot.slane %v698_v26, 2  ;;  %v15220_v12 = vld [vmem:[#allocation3 + $0x50] sm:$0xff]   ;;  %v21391_v0 = vld [vmem:[#allocation9_spill] sm:$0xff] }
  0xf1   :  { %12770 = vmatmul.mubr.msk.bf16.gmra.mrb[44].mxu0 %vm1587_vm10, %v1540_v38  ;;  %v735_v35 = vpop.permute.xlu0 %734  ;;  %v1098_v49 = vsel %vm951_vm2, %v1091_v45, %v1097_v44  ;;  %v15216_v38 = vld [vmem:[#allocation3 + $0x40] sm:$0xff]  }
  0xf2   :  { %v1347_v63 = vsel %vm1321_vm6, %v21384_v42, %v735_v35  ;;  %v912_v31 = vpop.permute.xlu1 %911  ;;  %1813 = vmatprep.mubr.bf16.mxu0 %v21325_v10  ;;  %5914 = vmatpush1.bf16.msra.mxu0 %v15216_v38  ;;  %v685_v42 = vsel %vm421_vm1, %v680_v34, %v16975_v18  ;;  %v15222_v34 = vld [vmem:[#allocation3 + $0x58] sm:$0xff]  }
  0xf3   :  { %v1412_v3 = vsel %vm1386_vm7, %v1347_v63, %v912_v31  ;;  %1172 = vrot.lane.b32.xlu0 %v1092_v6, %s15682_s13  ;;  %v21388_v6 = vrot.slane %v16654_v22, 2  ;;  %v883_v22 = vrot.slane %v17050_v4, 1  ;;  %5915 = vmatprep.subr.bf16.mxu0 %v21325_v10  ;;  %v1101_v63 = vor.u32 %v16979_v15, %v16970_v7 }
  0xf4   :  { %1309 = vrot.lane.b32.xlu1 %v1245_v25, %s15680_s16  ;;  %v15221_v25 = vld [vmem:[#allocation3 + $0x90] sm:$0xff]   ;;  %v1104_v31 = vor.u32 %v17001_v48, %v16983_v32  ;;  %v17100_v15 = vrot.slane %v698_v26, 1  ;;  %v15223_v32 = vld [vmem:[#allocation3 + $0x98] sm:$0xff]   ;;  %v688_v48 = vor.u32 %v686_v29, %v16975_v18  ;;  %v1252_v26 = vsel %vm1184_vm4, %v1249_v55, %v1251_v50 }
  0xf5   :  { %v1145_v60 = vpop.permute.xlu0 %1144  ;;  %v1247_v39 = vsel %vm1184_vm4, %v21389_v62, %v21388_v6  ;;  %14671 = vmatpush1.bf16.msra.mxu1 %v15221_v25  ;;  %v1110_v6 = vrot.slane %v702_v24, 1  ;;  %v15227_v62 = vld [vmem:[#allocation3 + $0xa8] sm:$0xff]  }
  0xf6   :  { %v1477_v9 = vsel %vm1451_vm8, %v1412_v3, %v1145_v60  ;;  %v1282_v54 = vpop.permute.xlu1 %1281  ;;  %5916 = vmatpush1.bf16.msra.mxu0 %v15218_v21  ;;  %14656 = vmatprep.subr.bf16.mxu1 %v21325_v10  ;;  %v1105_v41 = vsel %vm951_vm2, %v1101_v63, %v1104_v31  ;;  %v17116_v60 = vpack.c.bf16 %v17020_v17, %v17020_v17 }
  0xf7   :  { %v1542_v8 = vsel %vm1516_vm9, %v1477_v9, %v1282_v54  ;;  %764 = vrot.lane.b32.xlu0 %v673_v33, %s15681_s12  ;;  %5917 = vmatprep.subr.bf16.mxu0 %v21325_v10  ;;  %v1250_v33 = vsel %vm1184_vm4, %v1248_v56, %v1249_v55  ;;  %v1253_v56 = vrot.slane %v17050_v4, 2  ;;  %v15225_v9 = vld [vmem:[#allocation3 + $0xa0] sm:$0xff]   ;;  %v693_v17 = vsel %vm421_vm1, %v688_v48, %v17063_v59 }
  0xf8   :  { %941 = vrot.lane.b32.xlu1 %v877_v52, %s15683_s19  ;;  %v1108_v54 = vor.u32 %v1107_v43, %v1106_v40  ;;  %v706_v37 = vshll.u32 %v17116_v60, 16  ;;  %v1112_v63 = vor.u32 %v1111_v13, %v1110_v6  ;;  %v884_v21 = vsel %vm814_vm3, %v881_v58, %v883_v22 }
  0xf9   :  { %12771 = vmatmul.mubr.msk.bf16.gmra.mrb[48].mxu0 %vm1587_vm10, %v1542_v8  ;;  %v737_v45 = vpop.permute.xlu0 %736  ;;  %14672 = vmatpush1.bf16.msra.mxu1 %v15223_v32  ;;  %v885_v13 = vrot.slane %v17116_v60, 1 }
  0xfa   :  { %v1349_v35 = vsel %vm1321_vm6, %v21390_v47, %v737_v45  ;;  %v914_v19 = vpop.permute.xlu1 %913  ;;  %1823 = vmatprep.mubr.bf16.mxu0 %v21325_v10  ;;  %14657 = vmatprep.subr.bf16.mxu1 %v21325_v10  ;;  %v708_v47 = vrot.slane %v706_v37, 1  ;;  %v1113_v48 = vsel %vm951_vm2, %v1108_v54, %v1112_v63 }
  0xfb   :  { %v1414_v14 = vsel %vm1386_vm7, %v1349_v35, %v914_v19  ;;  %1174 = vrot.lane.b32.xlu0 %v1098_v49, %s15682_s13  ;;  %5918 = vmatpush1.bf16.msra.mxu0 %v15220_v12  ;;  %v882_v49 = vsel %vm814_vm3, %v879_v23, %v881_v58  ;;  %v1109_v23 = vsel %vm951_vm2, %v1104_v31, %v1108_v54  ;;  %v15224_v35 = vld [vmem:[#allocation3 + $0x60] sm:$0xff]   ;;  %v15228_v12 = vld [vmem:[#allocation3 + $0x70] sm:$0xff]   ;;  %v15230_v54 = vld [vmem:[#allocation3 + $0x78] sm:$0xff]  }
  0xfc   :  { %1311 = vrot.lane.b32.xlu1 %v1247_v39, %s15680_s16  ;;  %5919 = vmatprep.subr.bf16.mxu0 %v21325_v10  ;;  %v696_v39 = vor.u32 %v694_v16, %v17063_v59  ;;  %v21392_v19 = vld [vmem:[#allocation10_spill] sm:$0xff]  ;;  %v1114_v59 = vshrl.u32 %v17116_v60, 16  ;;  %v704_v58 = vor.u32 %v702_v24, %v17100_v15 }
  0xfd   :  { %v1147_v53 = vpop.permute.xlu0 %1146  ;;  %14673 = vmatpush1.bf16.msra.mxu1 %v15225_v9  ;;  %v886_v9 = vsel %vm814_vm3, %v883_v22, %v885_v13 }
  0xfe   :  { %v1479_v3 = vsel %vm1451_vm8, %v1414_v14, %v1147_v53  ;;  %v1284_v44 = vpop.permute.xlu1 %1283  ;;  %14658 = vmatprep.subr.bf16.mxu1 %v21325_v10  ;;  %v701_v55 = vsel %vm421_vm1, %v696_v39, %v17100_v15  ;;  %v1117_v53 = vrot.slane %v706_v37, 2  ;;  %v1116_v32 = vrot.slane %v1114_v59, 1  ;;  %v15232_v37 = vld [vmem:[#allocation3 + $0xc0] sm:$0xff]  }
  0xff   :  { %v1544_v7 = vsel %vm1516_vm9, %v1479_v3, %v1284_v44  ;;  %766 = vrot.lane.b32.xlu0 %v685_v42, %s15681_s12  ;;  %5920 = vmatpush1.bf16.msra.mxu0 %v15222_v34  ;;  %v15229_v42 = vld [vmem:[#allocation3 + $0xb0] sm:$0xff]  }
 0x100   :  { %943 = vrot.lane.b32.xlu1 %v880_v36, %s15683_s19  ;;  %5921 = vmatprep.subr.bf16.mxu0 %v21325_v10  ;;  %v15226_v36 = vld [vmem:[#allocation3 + $0x68] sm:$0xff]   ;;  %v1118_v15 = vor.u32 %v1117_v53, %v1116_v32 }
 0x101   :  { %12772 = vmatmul.mubr.msk.bf16.gmra.mrb[52].mxu0 %vm1587_vm10, %v1544_v7  ;;  %v739_v1 = vpop.permute.xlu0 %738  ;;  %14674 = vmatpush1.bf16.msra.mxu1 %v15227_v62  ;;  %v15233_v62 = vld [vmem:[#allocation3 + $0xc8] sm:$0xff]  }
 0x102   :  { %v1351_v52 = vsel %vm1321_vm6, %v21391_v0, %v739_v1  ;;  %v916_v29 = vpop.permute.xlu1 %915  ;;  %1833 = vmatprep.mubr.bf16.mxu0 %v21325_v10  ;;  %14659 = vmatprep.subr.bf16.mxu1 %v21325_v10  ;;  %v21393_v0 = vld [vmem:[#allocation11_spill] sm:$0xff] }
 0x103   :  { %v1416_v18 = vsel %vm1386_vm7, %v1351_v52, %v916_v29  ;;  %1176 = vrot.lane.b32.xlu0 %v1105_v41, %s15682_s13  ;;  %5922 = vmatpush1.bf16.msra.mxu0 %v15224_v35  ;;  %v15231_v41 = vld [vmem:[#allocation3 + $0xb8] sm:$0xff]  }
 0x104   :  { %1313 = vrot.lane.b32.xlu1 %v1250_v33, %s15680_s16  ;;  %5923 = vmatprep.subr.bf16.mxu0 %v21325_v10  ;;  %v1254_v33 = vsel %vm1184_vm4, %v1251_v50, %v1253_v56  ;;  %v709_v50 = vsel %vm421_vm1, %v704_v58, %v708_v47 }
 0x105   :  { %v1149_v8 = vpop.permute.xlu0 %1148  ;;  %14675 = vmatpush1.bf16.msra.mxu1 %v15229_v42 }
 0x106   :  { %v1481_v38 = vsel %vm1451_vm8, %v1416_v18, %v1149_v8  ;;  %v1286_v45 = vpop.permute.xlu1 %1285  ;;  %14660 = vmatprep.subr.bf16.mxu1 %v21325_v10 }
 0x107   :  { %v1546_v40 = vsel %vm1516_vm9, %v1481_v38, %v1286_v45  ;;  %768 = vrot.lane.b32.xlu0 %v693_v17, %s15681_s12  ;;  %5924 = vmatpush1.bf16.msra.mxu0 %v15226_v36  ;;  %v1255_v17 = vrot.slane %v17116_v60, 2  ;;  %v1119_v38 = vsel %vm951_vm2, %v1112_v63, %v1118_v15  ;;  %v21394_v45 = vld [vmem:[#allocation12_spill] sm:$0xff]  ;;  %v21396_v36 = vld [vmem:[#allocation14_spill] sm:$0xff] }
 0x108   :  { %945 = vrot.lane.b32.xlu1 %v882_v49, %s15683_s19  ;;  %5925 = vmatprep.subr.bf16.mxu0 %v21325_v10 }
 0x109   :  { %12773 = vmatmul.mubr.msk.bf16.gmra.mrb[56].mxu0 %vm1587_vm10, %v1546_v40  ;;  %v741_v43 = vpop.permute.xlu0 %740  ;;  %14676 = vmatpush1.bf16.msra.mxu1 %v15231_v41  ;;  %v1256_v60 = vsel %vm1184_vm4, %v1253_v56, %v1255_v17 }
 0x10a   :  { %v1353_v14 = vsel %vm1321_vm6, %v21392_v19, %v741_v43  ;;  %v918_v25 = vpop.permute.xlu1 %917  ;;  %1843 = vmatprep.mubr.bf16.mxu0 %v21325_v10  ;;  %14661 = vmatprep.subr.bf16.mxu1 %v21325_v10  ;;  %v21395_v19 = vld [vmem:[#allocation13_spill] sm:$0xff] }
 0x10b   :  { %v1418_v16 = vsel %vm1386_vm7, %v1353_v14, %v918_v25  ;;  %1178 = vrot.lane.b32.xlu0 %v1109_v23, %s15682_s13  ;;  %5926 = vmatpush1.bf16.msra.mxu0 %v15228_v12 }
 0x10c   :  { %1315 = vrot.lane.b32.xlu1 %v1252_v26, %s15680_s16  ;;  %5927 = vmatprep.subr.bf16.mxu0 %v21325_v10  ;;  %v15234_v26 = vld [vmem:[#allocation3 + $0xd0] sm:$0xff]  }
 0x10d   :  { %v1151_v31 = vpop.permute.xlu0 %1150  ;;  %14677 = vmatpush1.bf16.msra.mxu1 %v15232_v37 }
 0x10e   :  { %v1483_v3 = vsel %vm1451_vm8, %v1418_v16, %v1151_v31  ;;  %v1288_v44 = vpop.permute.xlu1 %1287  ;;  %14662 = vmatprep.subr.bf16.mxu1 %v21325_v10  ;;  %v15235_v16 = vld [vmem:[#allocation3 + $0xd8] sm:$0xff]   ;;  %v15236_v31 = vld [vmem:[#allocation3 + $0xe0] sm:$0xff]  }
 0x10f   :  { %v1548_v7 = vsel %vm1516_vm9, %v1483_v3, %v1288_v44  ;;  %770 = vrot.lane.b32.xlu0 %v701_v55, %s15681_s12  ;;  %5928 = vmatpush1.bf16.msra.mxu0 %v15230_v54 }
 0x110   :  { %947 = vrot.lane.b32.xlu1 %v884_v21, %s15683_s19  ;;  %6186 = vmatprep.subr.bf16.mxu0 %v21325_v10 }
 0x111   :  { %12774 = vmatmul.mubr.msk.bf16.gmra.mrb[60].mxu0 %vm1587_vm10, %v1548_v7  ;;  %v743_v1 = vpop.permute.xlu0 %742  ;;  %14678 = vmatpush1.bf16.msra.mxu1 %v15233_v62  ;;  %v15237_v7 = vld [vmem:[#allocation3 + $0xe8] sm:$0xff]  }
 0x112   :  { %v1355_v52 = vsel %vm1321_vm6, %v21393_v0, %v743_v1  ;;  %v920_v29 = vpop.permute.xlu1 %919  ;;  %1853 = vmatprep.mubr.bf16.mxu0 %v21325_v10  ;;  %14663 = vmatprep.subr.bf16.mxu1 %v21325_v10  ;;  %v15238_v1 = vld [vmem:[#allocation3 + $0xf0] sm:$0xff]  }
 0x113   :  { %v1420_v24 = vsel %vm1386_vm7, %v1355_v52, %v920_v29  ;;  %1180 = vrot.lane.b32.xlu0 %v1113_v48, %s15682_s13  ;;  %v15239_v52 = vld [vmem:[#allocation3 + $0xf8] sm:$0xff]  }
 0x114   :  { %1317 = vrot.lane.b32.xlu1 %v1254_v33, %s15680_s16 }
 0x115   :  { %v1153_v18 = vpop.permute.xlu0 %1152  ;;  %14679 = vmatpush1.bf16.msra.mxu1 %v15234_v26 }
 0x116   :  { %v1485_v8 = vsel %vm1451_vm8, %v1420_v24, %v1153_v18  ;;  %v1290_v49 = vpop.permute.xlu1 %1289  ;;  %14664 = vmatprep.subr.bf16.mxu1 %v21325_v10 }
 0x117   :  { %v1550_v34 = vsel %vm1516_vm9, %v1485_v8, %v1290_v49  ;;  %772 = vrot.lane.b32.xlu0 %v709_v50, %s15681_s12 }
 0x118   :  { %949 = vrot.lane.b32.xlu1 %v886_v9, %s15683_s19 }
 0x119   :  { %12775 = vmatmul.mubr.msk.bf16.gmra.mrb[64].mxu0 %vm1587_vm10, %v1550_v34  ;;  %v745_v22 = vpop.permute.xlu0 %744  ;;  %14680 = vmatpush1.bf16.msra.mxu1 %v15235_v16 }
 0x11a   :  { %v1357_v40 = vsel %vm1321_vm6, %v21394_v45, %v745_v22  ;;  %v922_v6 = vpop.permute.xlu1 %921  ;;  %1863 = vmatprep.mubr.bf16.mxu0 %v21325_v10  ;;  %14665 = vmatprep.subr.bf16.mxu1 %v21325_v10 }
 0x11b   :  { %v1422_v23 = vsel %vm1386_vm7, %v1357_v40, %v922_v6  ;;  %1182 = vrot.lane.b32.xlu0 %v1119_v38, %s15682_s13 }
 0x11c   :  { %1319 = vrot.lane.b32.xlu1 %v1256_v60, %s15680_s16 }
 0x11d   :  { %v1155_v39 = vpop.permute.xlu0 %1154  ;;  %14681 = vmatpush1.bf16.msra.mxu1 %v15236_v31 }
 0x11e   :  { %v1487_v56 = vsel %vm1451_vm8, %v1422_v23, %v1155_v39  ;;  %v1292_v43 = vpop.permute.xlu1 %1291  ;;  %14666 = vmatprep.subr.bf16.mxu1 %v21325_v10 }
 0x11f   :  { %v1552_v47 = vsel %vm1516_vm9, %v1487_v56, %v1292_v43 }
 0x121   :  { %12776 = vmatmul.mubr.msk.bf16.gmra.mrb[68].mxu0 %vm1587_vm10, %v1552_v47  ;;  %v747_v35 = vpop.permute.xlu0 %746  ;;  %14682 = vmatpush1.bf16.msra.mxu1 %v15237_v7 }
 0x122   :  { %v1359_v14 = vsel %vm1321_vm6, %v21395_v19, %v747_v35  ;;  %v924_v25 = vpop.permute.xlu1 %923  ;;  %1873 = vmatprep.mubr.bf16.mxu0 %v21325_v10  ;;  %14667 = vmatprep.subr.bf16.mxu1 %v21325_v10 }
 0x123   :  { %v1424_v59 = vsel %vm1386_vm7, %v1359_v14, %v924_v25 }
 0x125   :  { %v1157_v42 = vpop.permute.xlu0 %1156  ;;  %14683 = vmatpush1.bf16.msra.mxu1 %v15238_v1 }
 0x126   :  { %v1489_v55 = vsel %vm1451_vm8, %v1424_v59, %v1157_v42  ;;  %v1294_v63 = vpop.permute.xlu1 %1293  ;;  %14668 = vmatprep.subr.bf16.mxu1 %v21325_v10 }
 0x127   :  { %v1554_v21 = vsel %vm1516_vm9, %v1489_v55, %v1294_v63 }
 0x129   :  { %12777 = vmatmul.mubr.msk.bf16.gmra.mrb[72].mxu0 %vm1587_vm10, %v1554_v21  ;;  %v749_v53 = vpop.permute.xlu0 %748  ;;  %14684 = vmatpush1.bf16.msra.mxu1 %v15239_v52 }
 0x12a   :  { %v1361_v3 = vsel %vm1321_vm6, %v21396_v36, %v749_v53  ;;  %v926_v44 = vpop.permute.xlu1 %925  ;;  %1883 = vmatprep.mubr.bf16.mxu0 %v21325_v10  ;;  %6475 = vmatprep.subr.bf16.mxu1 %v21325_v10  ;;  %v2018_v36 = vlaneseq }
 0x12b   :  { %v1426_v32 = vsel %vm1386_vm7, %v1361_v3, %v926_v44 }
 0x12d   :  { %v1159_v41 = vpop.permute.xlu0 %1158 }
 0x12e   :  { %v1491_v48 = vsel %vm1451_vm8, %v1426_v32, %v1159_v41  ;;  %v1296_v58 = vpop.permute.xlu1 %1295  ;;  %v17282_v41 = vshrl.u32 %v2018_v36, 7 }
 0x12f   :  { %v1556_v33 = vsel %vm1516_vm9, %v1491_v48, %v1296_v58 }
 0x130   :  { %21397 = vst [vmem:[#allocation6_spill] sm:$0xff] %v17282_v41  ;;  %v2024_v52 = vsub.s32 1, %v17282_v41 }
 0x131   :  { %12778 = vmatmul.mubr.msk.bf16.gmra.mrb[76].mxu0 %vm1587_vm10, %v1556_v33  ;;  %v751_v13 = vpop.permute.xlu0 %750  ;;  %v2020_v33 = vsub.s32 0, %v17282_v41 }
 0x132   :  { %v1363_v12 = vsel %vm1321_vm6, %v16339_v28, %v751_v13  ;;  %v928_v0 = vpop.permute.xlu1 %927  ;;  %1893 = vmatprep.mubr.bf16.mxu0 %v21325_v10 }
 0x133   :  { %v1428_v29 = vsel %vm1386_vm7, %v1363_v12, %v928_v0  ;;  %v2014_v0 = vld [vmem:[%s21074_s4] ss:$2 sm:$0x3] }
 0x135   :  { %v1161_v24 = vpop.permute.xlu0 %1160 }
 0x136   :  { %v1493_v50 = vsel %vm1451_vm8, %v1428_v29, %v1161_v24  ;;  %v1298_v15 = vpop.permute.xlu1 %1297 }
 0x137   :  { %v1558_v18 = vsel %vm1516_vm9, %v1493_v50, %v1298_v15  ;;  %v17299_v50 = vrot.slane %v2014_v0, %v2020_v33 }
 0x139   :  { %12779 = vmatmul.mubr.msk.bf16.gmra.mrb[80].mxu0 %vm1587_vm10, %v1558_v18  ;;  %v753_v9 = vpop.permute.xlu0 %752 }
 0x13a   :  { %v1365_v28 = vsel %vm1321_vm6, %v16376_v11, %v753_v9  ;;  %v930_v17 = vpop.permute.xlu1 %929  ;;  %1903 = vmatprep.mubr.bf16.mxu0 %v21325_v10  ;;  %v17303_v9 = vrot.slane %v2014_v0, %v2024_v52 }
 0x13b   :  { %v1430_v54 = vsel %vm1386_vm7, %v1365_v28, %v930_v17 }
 0x13d   :  { %v1163_v8 = vpop.permute.xlu0 %1162 }
 0x13e   :  { %v1495_v49 = vsel %vm1451_vm8, %v1430_v54, %v1163_v8  ;;  %v1300_v37 = vpop.permute.xlu1 %1299 }
 0x13f   :  { %v1560_v34 = vsel %vm1516_vm9, %v1495_v49, %v1300_v37 }
 0x141   :  { %12780 = vmatmul.mubr.msk.bf16.gmra.mrb[84].mxu0 %vm1587_vm10, %v1560_v34  ;;  %v755_v38 = vpop.permute.xlu0 %754 }
 0x142   :  { %v1367_v22 = vsel %vm1321_vm6, %v16403_v61, %v755_v38  ;;  %v932_v60 = vpop.permute.xlu1 %931  ;;  %1913 = vmatprep.mubr.bf16.mxu0 %v21325_v10 }
 0x143   :  { %v1432_v11 = vsel %vm1386_vm7, %v1367_v22, %v932_v60 }
 0x145   :  { %v1165_v45 = vpop.permute.xlu0 %1164 }
 0x146   :  { %v1497_v40 = vsel %vm1451_vm8, %v1432_v11, %v1165_v45  ;;  %v1302_v6 = vpop.permute.xlu1 %1301 }
 0x147   :  { %v1562_v62 = vsel %vm1516_vm9, %v1497_v40, %v1302_v6 }
 0x149   :  { %12781 = vmatmul.mubr.msk.bf16.gmra.mrb[88].mxu0 %vm1587_vm10, %v1562_v62  ;;  %v757_v23 = vpop.permute.xlu0 %756 }
 0x14a   :  { %v1369_v39 = vsel %vm1321_vm6, %v16465_v5, %v757_v23  ;;  %v934_v56 = vpop.permute.xlu1 %933  ;;  %1923 = vmatprep.mubr.bf16.mxu0 %v21325_v10 }
 0x14b   :  { %v1434_v61 = vsel %vm1386_vm7, %v1369_v39, %v934_v56 }
 0x14d   :  { %v1167_v43 = vpop.permute.xlu0 %1166 }
 0x14e   :  { %v1499_v26 = vsel %vm1451_vm8, %v1434_v61, %v1167_v43  ;;  %v1304_v47 = vpop.permute.xlu1 %1303 }
 0x14f   :  { %v1564_v35 = vsel %vm1516_vm9, %v1499_v26, %v1304_v47 }
 0x151   :  { %12782 = vmatmul.mubr.msk.bf16.gmra.mrb[92].mxu0 %vm1587_vm10, %v1564_v35  ;;  %v759_v19 = vpop.permute.xlu0 %758 }
 0x152   :  { %v1371_v14 = vsel %vm1321_vm6, %v16544_v27, %v759_v19  ;;  %v936_v25 = vpop.permute.xlu1 %935  ;;  %1933 = vmatprep.mubr.bf16.mxu0 %v21325_v10 }
 0x153   :  { %v1436_v5 = vsel %vm1386_vm7, %v1371_v14, %v936_v25 }
 0x155   :  { %v1169_v16 = vpop.permute.xlu0 %1168 }
 0x156   :  { %v1501_v59 = vsel %vm1451_vm8, %v1436_v5, %v1169_v16  ;;  %v1306_v42 = vpop.permute.xlu1 %1305 }
 0x157   :  { %v1566_v55 = vsel %vm1516_vm9, %v1501_v59, %v1306_v42 }
 0x159   :  { %12783 = vmatmul.mubr.msk.bf16.gmra.mrb[96].mxu0 %vm1587_vm10, %v1566_v55  ;;  %v761_v63 = vpop.permute.xlu0 %760 }
 0x15a   :  { %v1373_v31 = vsel %vm1321_vm6, %v16546_v51, %v761_v63  ;;  %v938_v21 = vpop.permute.xlu1 %937  ;;  %1943 = vmatprep.mubr.bf16.mxu0 %v21325_v10 }
 0x15b   :  { %v1438_v27 = vsel %vm1386_vm7, %v1373_v31, %v938_v21 }
 0x15d   :  { %v1171_v53 = vpop.permute.xlu0 %1170 }
 0x15e   :  { %v1503_v3 = vsel %vm1451_vm8, %v1438_v27, %v1171_v53  ;;  %v1308_v44 = vpop.permute.xlu1 %1307 }
 0x15f   :  { %v1568_v7 = vsel %vm1516_vm9, %v1503_v3, %v1308_v44 }
 0x161   :  { %12784 = vmatmul.mubr.msk.bf16.gmra.mrb[100].mxu0 %vm1587_vm10, %v1568_v7  ;;  %v763_v32 = vpop.permute.xlu0 %762 }
 0x162   :  { %v1375_v51 = vsel %vm1321_vm6, %v16611_v30, %v763_v32  ;;  %v940_v48 = vpop.permute.xlu1 %939  ;;  %1953 = vmatprep.mubr.bf16.mxu0 %v21325_v10  ;;  %v12791_v30 = vld [vmem:[%s21074_s4 + $0x1] ss:$2 sm:$0x3] }
 0x163   :  { %v1440_v58 = vsel %vm1386_vm7, %v1375_v51, %v940_v48  ;;  %v17307_v17 = vrot.slane %v12791_v30, %v2020_v33  ;;  %v17309_v8 = vrot.slane %v12791_v30, %v2024_v52 }
 0x165   :  { %v1173_v1 = vpop.permute.xlu0 %1172 }
 0x166   :  { %v1505_v13 = vsel %vm1451_vm8, %v1440_v58, %v1173_v1  ;;  %v1310_v12 = vpop.permute.xlu1 %1309 }
 0x167   :  { %v1570_v29 = vsel %vm1516_vm9, %v1505_v13, %v1310_v12 }
 0x169   :  { %12785 = vmatmul.mubr.msk.bf16.gmra.mrb[104].mxu0 %vm1587_vm10, %v1570_v29  ;;  %v765_v24 = vpop.permute.xlu0 %764 }
 0x16a   :  { %v1377_v15 = vsel %vm1321_vm6, %v16643_v20, %v765_v24  ;;  %v942_v18 = vpop.permute.xlu1 %941  ;;  %1963 = vmatprep.mubr.bf16.mxu0 %v21325_v10 }
 0x16b   :  { %v1442_v28 = vsel %vm1386_vm7, %v1377_v15, %v942_v18 }
 0x16c   :  { %v1695_v54 = vpop.f32.mrb[0].mxu0 }
 0x16d   :  { %v2028_v49 = vmul.f32 %v17299_v50, %v1695_v54  ;;  %v1697_v37 = vpop.f32.mrb[1].mxu0  ;;  %v1175_v34 = vpop.permute.xlu0 %1174 }
 0x16e   :  { %v2029_v38 = vmul.f32 %v17303_v9, %v1697_v37  ;;  %v1507_v20 = vsel %vm1451_vm8, %v1442_v28, %v1175_v34  ;;  %v1312_v22 = vpop.permute.xlu1 %1311  ;;  %v1699_v60 = vpop.f32.mrb[2].mxu0 }
 0x16f   :  { %v2167_v11 = vadd.f32 %v17307_v17, %v2028_v49  ;;  %v1572_v45 = vsel %vm1516_vm9, %v1507_v20, %v1312_v22  ;;  %v2030_v40 = vmul.f32 %v17299_v50, %v1699_v60  ;;  %v1701_v6 = vpop.f32.mrb[3].mxu0 }
 0x170   :  { %v2168_v62 = vadd.f32 %v17309_v8, %v2029_v38  ;;  %v2031_v23 = vmul.f32 %v17303_v9, %v1701_v6 }
 0x171   :  { %v2295_v39 = vmax.f32 %v2167_v11, 0.0  ;;  %v2169_v56 = vadd.f32 %v17307_v17, %v2030_v40  ;;  %12786 = vmatmul.mubr.msk.bf16.gmra.mrb[108].mxu0 %vm1587_vm10, %v1572_v45  ;;  %v767_v61 = vpop.permute.xlu0 %766 }
 0x172   :  { %v2296_v43 = vmax.f32 %v2168_v62, 0.0  ;;  %v2170_v26 = vadd.f32 %v17309_v8, %v2031_v23  ;;  %v1379_v47 = vsel %vm1321_vm6, %v16767_v2, %v767_v61  ;;  %v944_v35 = vpop.permute.xlu1 %943  ;;  %1973 = vmatprep.mubr.bf16.mxu0 %v21325_v10 }
 0x173   :  { %v2297_v19 = vmax.f32 %v2169_v56, 0.0  ;;  %v1444_v14 = vsel %vm1386_vm7, %v1379_v47, %v944_v35 }
 0x174   :  { %v13769_v25 = vpack.c.bf16 %v2296_v43, %v2295_v39  ;;  %v2298_v5 = vmax.f32 %v2170_v26, 0.0  ;;  %v1705_v16 = vpop.f32.mrb[4].mxu0 }
 0x175   :  { %v2032_v59 = vmul.f32 %v17299_v50, %v1705_v16  ;;  %v1707_v42 = vpop.f32.mrb[5].mxu0  ;;  %v1177_v55 = vpop.permute.xlu0 %1176 }
 0x176   :  { %v2762_v63 = vrot.slane %v13769_v25, 7  ;;  %v13770_v31 = vpack.c.bf16 %v2298_v5, %v2297_v19  ;;  %v2033_v21 = vmul.f32 %v17303_v9, %v1707_v42  ;;  %v1509_v2 = vsel %vm1451_vm8, %v1444_v14, %v1177_v55  ;;  %v1314_v27 = vpop.permute.xlu1 %1313  ;;  %v1709_v53 = vpop.f32.mrb[6].mxu0 }
 0x177   :  { %v2171_v3 = vadd.f32 %v17307_v17, %v2032_v59  ;;  %v1574_v44 = vsel %vm1516_vm9, %v1509_v2, %v1314_v27  ;;  %v2034_v7 = vmul.f32 %v17299_v50, %v1709_v53  ;;  %v1711_v32 = vpop.f32.mrb[7].mxu0 }
 0x178   :  { %v2763_v51 = vrot.slane %v2762_v63, 4  ;;  %3018 = vst [vmem:[#allocation2] sm:$0xee] %v2762_v63  ;;  %v2764_v48 = vrot.slane %v13770_v31, 7  ;;  %v2172_v58 = vadd.f32 %v17309_v8, %v2033_v21  ;;  %v2035_v1 = vmul.f32 %v17303_v9, %v1711_v32 }
 0x179   :  { %v2299_v33 = vmax.f32 %v2171_v3, 0.0  ;;  %v2173_v13 = vadd.f32 %v17307_v17, %v2034_v7  ;;  %12787 = vmatmul.mubr.msk.bf16.gmra.mrb[112].mxu0 %vm1587_vm10, %v1574_v44  ;;  %v769_v12 = vpop.permute.xlu0 %768 }
 0x17a   :  { %v17343_v0 = vsel %vm17330_vm13, %v2763_v51, %v2764_v48  ;;  %v2300_v52 = vmax.f32 %v2172_v58, 0.0  ;;  %v2174_v29 = vadd.f32 %v17309_v8, %v2035_v1  ;;  %v946_v30 = vpop.permute.xlu1 %945  ;;  %1983 = vmatprep.mubr.bf16.mxu0 %v21325_v10  ;;  %v1381_v15 = vsel %vm1321_vm6, %v16897_v57, %v769_v12 }
 0x17b   :  { %21400 = vst [vmem:[#allocation7_spill] sm:$0xff] %v17343_v0  ;;  %3019 = vst [vmem:[#allocation2 + $0x8] sm:$0xff] %v17343_v0  ;;  %v2301_v24 = vmax.f32 %v2173_v13, 0.0  ;;  %v1446_v54 = vsel %vm1386_vm7, %v1381_v15, %v946_v30  ;;  %v2766_v37 = vrot.slane %v2764_v48, 4 }
 0x17c   :  { %7926 = vst [vmem:[#allocation2 + $0x8] sm:$0x2] %v21325_v10  ;;  %v13771_v18 = vpack.c.bf16 %v2300_v52, %v2299_v33  ;;  %v2302_v28 = vmax.f32 %v2174_v29, 0.0  ;;  %v1715_v49 = vpop.f32.mrb[8].mxu0 }
 0x17d   :  { %v2036_v34 = vmul.f32 %v17299_v50, %v1715_v49  ;;  %v1717_v38 = vpop.f32.mrb[9].mxu0  ;;  %v1179_v20 = vpop.permute.xlu0 %1178 }
 0x17e   :  { %v2767_v22 = vrot.slane %v13771_v18, 7  ;;  %v13772_v60 = vpack.c.bf16 %v2302_v28, %v2301_v24  ;;  %v2037_v11 = vmul.f32 %v17303_v9, %v1717_v38  ;;  %v1511_v45 = vsel %vm1451_vm8, %v1446_v54, %v1179_v20  ;;  %v1316_v40 = vpop.permute.xlu1 %1315  ;;  %v1719_v57 = vpop.f32.mrb[10].mxu0 }
 0x17f   :  { %v2175_v6 = vadd.f32 %v17307_v17, %v2036_v34  ;;  %v1576_v62 = vsel %vm1516_vm9, %v1511_v45, %v1316_v40  ;;  %v2038_v23 = vmul.f32 %v17299_v50, %v1719_v57  ;;  %v1721_v39 = vpop.f32.mrb[11].mxu0 }
 0x180   :  { %v2768_v56 = vsel %vm17330_vm13, %v2766_v37, %v2767_v22  ;;  %v2769_v61 = vrot.slane %v2767_v22, 4  ;;  %v2770_v43 = vrot.slane %v13772_v60, 7  ;;  %v2176_v26 = vadd.f32 %v17309_v8, %v2037_v11 }
 0x181   :  { %v2303_v47 = vmax.f32 %v2175_v6, 0.0  ;;  %v2177_v35 = vadd.f32 %v17307_v17, %v2038_v23  ;;  %v2039_v19 = vmul.f32 %v17303_v9, %v1721_v39  ;;  %12788 = vmatmul.mubr.msk.bf16.gmra.mrb[116].mxu0 %vm1587_vm10, %v1576_v62  ;;  %v771_v14 = vpop.permute.xlu0 %770  ;;  %v3090_v62 = vld [vmem:[#allocation2] sm:$0xff] }
 0x182   :  { %v2771_v25 = vsel %vm17330_vm13, %v2769_v61, %v2770_v43  ;;  %v2304_v5 = vmax.f32 %v2176_v26, 0.0  ;;  %v1383_v16 = vsel %vm1321_vm6, %v17009_v46, %v771_v14  ;;  %v948_v59 = vpop.permute.xlu1 %947  ;;  %1993 = vmatprep.mubr.bf16.mxu0 %v21325_v10  ;;  %v2772_v46 = vrot.slane %v2770_v43, 4 }
 0x183   :  { %v2305_v42 = vmax.f32 %v2177_v35, 0.0  ;;  %v2178_v55 = vadd.f32 %v17309_v8, %v2039_v19  ;;  %v1448_v63 = vsel %vm1386_vm7, %v1383_v16, %v948_v59  ;;  %v17371_v2 = vcombine.high %v2768_v56, %v2771_v25 }
 0x184   :  { %v13773_v31 = vpack.c.bf16 %v2304_v5, %v2303_v47  ;;  %v1725_v21 = vpop.f32.mrb[12].mxu0  ;;  %v17373_v27 = vcombine.low %v2768_v56, %v2771_v25 }
 0x185   :  { %21401 = vst [vmem:[#allocation15_spill] sm:$0xff] %v17371_v2  ;;  %v2306_v53 = vmax.f32 %v2178_v55, 0.0  ;;  %v2040_v3 = vmul.f32 %v17299_v50, %v1725_v21  ;;  %v1727_v44 = vpop.f32.mrb[13].mxu0  ;;  %v1181_v7 = vpop.permute.xlu0 %1180  ;;  %v17405_v55 = vcombine.high %v3090_v62, %v17343_v0 }
 0x186   :  { %21402 = vst [vmem:[#allocation8_spill] sm:$0xff] %v17373_v27  ;;  %v2773_v32 = vrot.slane %v13773_v31, 7  ;;  %v2041_v51 = vmul.f32 %v17303_v9, %v1727_v44  ;;  %v1513_v48 = vsel %vm1451_vm8, %v1448_v63, %v1181_v7  ;;  %v1318_v58 = vpop.permute.xlu1 %1317  ;;  %v1729_v1 = vpop.f32.mrb[14].mxu0 }
 0x187   :  { %v13774_v33 = vpack.c.bf16 %v2306_v53, %v2305_v42  ;;  %v2179_v13 = vadd.f32 %v17307_v17, %v2040_v3  ;;  %v1578_v12 = vsel %vm1516_vm9, %v1513_v48, %v1318_v58  ;;  %v2042_v52 = vmul.f32 %v17299_v50, %v1729_v1  ;;  %v1731_v29 = vpop.f32.mrb[15].mxu0 }
 0x188   :  { %v2774_v30 = vsel %vm17330_vm13, %v2772_v46, %v2773_v32  ;;  %v2775_v24 = vrot.slane %v2773_v32, 4  ;;  %v2180_v15 = vadd.f32 %v17309_v8, %v2041_v51  ;;  %v2043_v18 = vmul.f32 %v17303_v9, %v1731_v29 }
 0x189   :  { %v2776_v28 = vrot.slane %v13774_v33, 7  ;;  %v2307_v54 = vmax.f32 %v2179_v13, 0.0  ;;  %v2181_v49 = vadd.f32 %v17307_v17, %v2042_v52  ;;  %12789 = vmatmul.mubr.msk.bf16.gmra.mrb[120].mxu0 %vm1587_vm10, %v1578_v12  ;;  %v773_v37 = vpop.permute.xlu0 %772 }
 0x18a   :  { %v2308_v34 = vmax.f32 %v2180_v15, 0.0  ;;  %v2182_v38 = vadd.f32 %v17309_v8, %v2043_v18  ;;  %v1385_v20 = vsel %vm1321_vm6, %v17050_v4, %v773_v37  ;;  %v950_v22 = vpop.permute.xlu1 %949  ;;  %2003 = vmatprep.mubr.bf16.mxu0 %v21325_v10 }
 0x18b   :  { %v2777_v60 = vsel %vm17330_vm13, %v2775_v24, %v2776_v28  ;;  %v2309_v11 = vmax.f32 %v2181_v49, 0.0  ;;  %v1450_v45 = vsel %vm1386_vm7, %v1385_v20, %v950_v22  ;;  %v2778_v56 = vrot.slane %v2776_v28, 4 }
 0x18c   :  { %v13775_v40 = vpack.c.bf16 %v2308_v34, %v2307_v54  ;;  %v2310_v57 = vmax.f32 %v2182_v38, 0.0  ;;  %v1735_v6 = vpop.f32.mrb[16].mxu0  ;;  %v17394_v23 = vcombine.high %v2774_v30, %v2777_v60  ;;  %v17396_v39 = vcombine.low %v2774_v30, %v2777_v60 }
 0x18d   :  { %v2044_v4 = vmul.f32 %v17299_v50, %v1735_v6  ;;  %v1737_v61 = vpop.f32.mrb[17].mxu0  ;;  %v1183_v43 = vpop.permute.xlu0 %1182  ;;  %v17426_v34 = vcombine.low %v3090_v62, %v17343_v0  ;;  %v15628_v6 = vld [vmem:[#allocation3 + $0x80] sm:$0xff]  }
 0x18e   :  { %21403 = vst [vmem:[#allocation9_spill] sm:$0xff] %v17394_v23  ;;  %21404 = vst [vmem:[#allocation10_spill] sm:$0xff] %v17396_v39  ;;  %v2779_v26 = vrot.slane %v13775_v40, 7  ;;  %v13776_v47 = vpack.c.bf16 %v2310_v57, %v2309_v11  ;;  %v2045_v35 = vmul.f32 %v17303_v9, %v1737_v61  ;;  %v1515_v19 = vsel %vm1451_vm8, %v1450_v45, %v1183_v43  ;;  %v1320_v14 = vpop.permute.xlu1 %1319  ;;  %v1739_v25 = vpop.f32.mrb[18].mxu0 }
 0x18f   :  { %v2183_v5 = vadd.f32 %v17307_v17, %v2044_v4  ;;  %v1580_v16 = vsel %vm1516_vm9, %v1515_v19, %v1320_v14  ;;  %v2046_v59 = vmul.f32 %v17299_v50, %v1739_v25  ;;  %v1741_v42 = vpop.f32.mrb[19].mxu0 }
 0x190   :  { %v2780_v63 = vsel %vm17330_vm13, %v2778_v56, %v2779_v26  ;;  %v2781_v31 = vrot.slane %v2779_v26, 4  ;;  %v2782_v21 = vrot.slane %v13776_v47, 7  ;;  %v2184_v53 = vadd.f32 %v17309_v8, %v2045_v35 }
 0x191   :  { %v2311_v3 = vmax.f32 %v2183_v5, 0.0  ;;  %v2185_v44 = vadd.f32 %v17307_v17, %v2046_v59  ;;  %v2047_v7 = vmul.f32 %v17303_v9, %v1741_v42  ;;  %12790 = vmatmul.mubr.msk.bf16.gmra.mrb[124].mxu0 %vm1587_vm10, %v1580_v16  ;;  %v15629_v16 = vld [vmem:[#allocation3 + $0x88] sm:$0xff]  }
 0x192   :  { %v2783_v46 = vsel %vm17330_vm13, %v2781_v31, %v2782_v21  ;;  %v2784_v32 = vrot.slane %v2782_v21, 4  ;;  %v2312_v51 = vmax.f32 %v2184_v53, 0.0  ;;  %5929 = vmatprep.mubr.bf16.mxu0 %v17405_v55 }
 0x193   :  { %v2313_v48 = vmax.f32 %v2185_v44, 0.0  ;;  %v2186_v58 = vadd.f32 %v17309_v8, %v2047_v7  ;;  %v17417_v1 = vcombine.high %v2780_v63, %v2783_v46  ;;  %v17419_v33 = vcombine.low %v2780_v63, %v2783_v46 }
 0x194   :  { %3026 = vst [vmem:[#allocation2 + $0x40] sm:$0x11] %v2784_v32  ;;  %v13777_v13 = vpack.c.bf16 %v2312_v51, %v2311_v3  ;;  %v1745_v12 = vpop.f32.mrb[20].mxu0 }
 0x195   :  { %21405 = vst [vmem:[#allocation11_spill] sm:$0xff] %v17417_v1  ;;  %21406 = vst [vmem:[#allocation12_spill] sm:$0xff] %v17419_v33  ;;  %v2314_v52 = vmax.f32 %v2186_v58, 0.0  ;;  %v2048_v29 = vmul.f32 %v17299_v50, %v1745_v12  ;;  %v1747_v30 = vpop.f32.mrb[21].mxu0 }
 0x196   :  { %v2785_v24 = vrot.slane %v13777_v13, 7  ;;  %v2049_v15 = vmul.f32 %v17303_v9, %v1747_v30  ;;  %v1749_v18 = vpop.f32.mrb[22].mxu0 }
 0x197   :  { %v13778_v28 = vpack.c.bf16 %v2314_v52, %v2313_v48  ;;  %v2187_v54 = vadd.f32 %v17307_v17, %v2048_v29  ;;  %v2050_v49 = vmul.f32 %v17299_v50, %v1749_v18  ;;  %v1751_v37 = vpop.f32.mrb[23].mxu0  ;;  %v15630_v48 = vld [vmem:[#allocation3 + $0x90] sm:$0xff]  }
 0x198   :  { %v2786_v38 = vrot.slane %v2785_v24, 4  ;;  %3027 = vst [vmem:[#allocation2 + $0x48] sm:$0xee] %v2785_v24  ;;  %v2188_v20 = vadd.f32 %v17309_v8, %v2049_v15  ;;  %v2051_v22 = vmul.f32 %v17303_v9, %v1751_v37 }
 0x199   :  { %v2787_v60 = vrot.slane %v13778_v28, 7  ;;  %v2315_v11 = vmax.f32 %v2187_v54, 0.0  ;;  %v2189_v45 = vadd.f32 %v17307_v17, %v2050_v49  ;;  %5930 = vmatmul.mubr.bf16.vlgmr.msra.gmra.mrb[128].mxu0 %v17426_v34 }
 0x19a   :  { %v2316_v40 = vmax.f32 %v2188_v20, 0.0  ;;  %v2190_v57 = vadd.f32 %v17309_v8, %v2051_v22  ;;  %5937 = vmatprep.mubr.bf16.mxu0 %v17371_v2  ;;  %6187 = vmatpush1.bf16.msra.mxu0 %v15628_v6  ;;  %v15631_v22 = vld [vmem:[#allocation3 + $0x98] sm:$0xff]  }
 0x19b   :  { %v17436_v62 = vsel %vm17330_vm13, %v2786_v38, %v2787_v60  ;;  %v2317_v56 = vmax.f32 %v2189_v45, 0.0  ;;  %6188 = vmatprep.subr.bf16.mxu0 %v21325_v10  ;;  %v2789_v35 = vrot.slane %v2787_v60, 4 }
 0x19c   :  { %21407 = vst [vmem:[#allocation13_spill] sm:$0xff] %v17436_v62  ;;  %3028 = vst [vmem:[#allocation2 + $0x50] sm:$0xff] %v17436_v62  ;;  %v13779_v4 = vpack.c.bf16 %v2316_v40, %v2315_v11  ;;  %v2318_v61 = vmax.f32 %v2190_v57, 0.0  ;;  %v1755_v43 = vpop.f32.mrb[24].mxu0 }
 0x19d   :  { %7927 = vst [vmem:[#allocation2 + $0x50] sm:$0x2] %v21325_v10  ;;  %v2052_v26 = vmul.f32 %v17299_v50, %v1755_v43  ;;  %v1757_v47 = vpop.f32.mrb[25].mxu0 }
 0x19e   :  { %v2790_v19 = vrot.slane %v13779_v4, 7  ;;  %v13780_v14 = vpack.c.bf16 %v2318_v61, %v2317_v56  ;;  %v2053_v25 = vmul.f32 %v17303_v9, %v1757_v47  ;;  %v1759_v5 = vpop.f32.mrb[26].mxu0  ;;  %6189 = vmatpush1.bf16.msra.mxu0 %v15629_v16  ;;  %v15632_v16 = vld [vmem:[#allocation3 + $0xa0] sm:$0xff]  }
 0x19f   :  { %v2191_v59 = vadd.f32 %v17307_v17, %v2052_v26  ;;  %v2054_v42 = vmul.f32 %v17299_v50, %v1759_v5  ;;  %v1761_v63 = vpop.f32.mrb[27].mxu0  ;;  %6190 = vmatprep.subr.bf16.mxu0 %v21325_v10  ;;  %v17467_v57 = vld [vmem:[#allocation2 + $0x48] sm:$0xff] }
 0x1a0   :  { %v2791_v31 = vsel %vm17330_vm13, %v2789_v35, %v2790_v19  ;;  %v2792_v21 = vrot.slane %v2790_v19, 4  ;;  %v2793_v53 = vrot.slane %v13780_v14, 7  ;;  %v2192_v3 = vadd.f32 %v17309_v8, %v2053_v25 }
 0x1a1   :  { %v2319_v44 = vmax.f32 %v2191_v59, 0.0  ;;  %v2193_v7 = vadd.f32 %v17307_v17, %v2054_v42  ;;  %v2055_v46 = vmul.f32 %v17303_v9, %v1761_v63  ;;  %5938 = vmatmul.mubr.bf16.gmra.mrb[132].mxu0 %v17373_v27  ;;  %v17488_v5 = vcombine.high %v17467_v57, %v17436_v62 }
 0x1a2   :  { %v2794_v32 = vsel %vm17330_vm13, %v2792_v21, %v2793_v53  ;;  %v2320_v51 = vmax.f32 %v2192_v3, 0.0  ;;  %5945 = vmatprep.mubr.bf16.mxu0 %v17394_v23  ;;  %6191 = vmatpush1.bf16.msra.mxu0 %v15630_v48  ;;  %v2795_v54 = vrot.slane %v2793_v53, 4 }
 0x1a3   :  { %v2321_v58 = vmax.f32 %v2193_v7, 0.0  ;;  %v2194_v13 = vadd.f32 %v17309_v8, %v2055_v46  ;;  %v17456_v12 = vcombine.low %v2791_v31, %v2794_v32  ;;  %6192 = vmatprep.subr.bf16.mxu0 %v21325_v10  ;;  %v17459_v30 = vcombine.high %v2791_v31, %v2794_v32 }
 0x1a4   :  { %v13781_v52 = vpack.c.bf16 %v2320_v51, %v2319_v44  ;;  %v1765_v29 = vpop.f32.mrb[28].mxu0 }
 0x1a5   :  { %v2322_v24 = vmax.f32 %v2194_v13, 0.0  ;;  %v2056_v15 = vmul.f32 %v17299_v50, %v1765_v29  ;;  %v1767_v18 = vpop.f32.mrb[29].mxu0  ;;  %v21118_v28 = vshll.u32 %v17456_v12, 16  ;;  %v21122_v20 = vshll.u32 %v17459_v30, 16 }
 0x1a6   :  { %v2796_v49 = vrot.slane %v13781_v52, 7  ;;  %v2057_v37 = vmul.f32 %v17303_v9, %v1767_v18  ;;  %v1769_v38 = vpop.f32.mrb[30].mxu0  ;;  %6193 = vmatpush1.bf16.msra.mxu0 %v15631_v22  ;;  %v21123_v63 = vshrl.u32 %v17459_v30, 16  ;;  %v21121_v31 = vshrl.u32 %v17456_v12, 16  ;;  %v15633_v18 = vld [vmem:[#allocation3 + $0xa8] sm:$0xff]  }
 0x1a7   :  { %v13782_v60 = vpack.c.bf16 %v2322_v24, %v2321_v58  ;;  %v2195_v11 = vadd.f32 %v17307_v17, %v2056_v15  ;;  %v2058_v45 = vmul.f32 %v17299_v50, %v1769_v38  ;;  %v1771_v40 = vpop.f32.mrb[31].mxu0  ;;  %v17471_v6 = vrot.slane %v21118_v28, 1  ;;  %6194 = vmatprep.subr.bf16.mxu0 %v21325_v10  ;;  %v15261_v28 = vld [vmem:[#allocation3 + $0x158] sm:$0xff]  }
 0x1a8   :  { %v2797_v56 = vsel %vm17330_vm13, %v2795_v54, %v2796_v49  ;;  %v2798_v4 = vrot.slane %v2796_v49, 4  ;;  %v2196_v61 = vadd.f32 %v17309_v8, %v2057_v37  ;;  %v2059_v43 = vmul.f32 %v17303_v9, %v1771_v40 }
 0x1a9   :  { %v2799_v26 = vrot.slane %v13782_v60, 7  ;;  %v2323_v47 = vmax.f32 %v2195_v11, 0.0  ;;  %v2197_v35 = vadd.f32 %v17307_v17, %v2058_v45  ;;  %5946 = vmatmul.mubr.bf16.gmra.mrb[136].mxu0 %v17396_v39  ;;  %v17482_v19 = vrot.slane %v21122_v20, 1 }
 0x1aa   :  { %v2324_v14 = vmax.f32 %v2196_v61, 0.0  ;;  %v2198_v25 = vadd.f32 %v17309_v8, %v2059_v43  ;;  %5953 = vmatprep.mubr.bf16.mxu0 %v17417_v1  ;;  %6195 = vmatpush1.bf16.msra.mxu0 %v15632_v16  ;;  %v3644_v58 = vor.u32 %v21121_v31, %v17471_v6  ;;  %v15634_v16 = vld [vmem:[#allocation3 + $0xb0] sm:$0xff]  }
 0x1ab   :  { %v2800_v59 = vsel %vm17330_vm13, %v2798_v4, %v2799_v26  ;;  %v2325_v42 = vmax.f32 %v2197_v35, 0.0  ;;  %6196 = vmatprep.subr.bf16.mxu0 %v21325_v10  ;;  %v2801_v46 = vrot.slane %v2799_v26, 4  ;;  %v3652_v48 = vor.u32 %v21123_v63, %v17482_v19 }
 0x1ac   :  { %v13783_v21 = vpack.c.bf16 %v2324_v14, %v2323_v47  ;;  %v2326_v53 = vmax.f32 %v2198_v25, 0.0  ;;  %v1775_v3 = vpop.f32.mrb[32].mxu0  ;;  %v17495_v44 = vcombine.high %v2797_v56, %v2800_v59  ;;  %v17497_v7 = vcombine.low %v2797_v56, %v2800_v59  ;;  %v15240_v25 = vld [vmem:[#allocation3 + $0x100] sm:$0xff]  }
 0x1ad   :  { %v2060_v32 = vmul.f32 %v17299_v50, %v1775_v3  ;;  %v1777_v51 = vpop.f32.mrb[33].mxu0 }
 0x1ae   :  { %v2802_v13 = vrot.slane %v13783_v21, 7  ;;  %v13784_v52 = vpack.c.bf16 %v2326_v53, %v2325_v42  ;;  %v2061_v29 = vmul.f32 %v17303_v9, %v1777_v51  ;;  %v1779_v24 = vpop.f32.mrb[34].mxu0  ;;  %v21108_v15 = vshll.u32 %v17495_v44, 16  ;;  %6197 = vmatpush1.bf16.msra.mxu0 %v15633_v18 }
 0x1af   :  { %v2199_v54 = vadd.f32 %v17307_v17, %v2060_v32  ;;  %v2062_v49 = vmul.f32 %v17299_v50, %v1779_v24  ;;  %v1781_v37 = vpop.f32.mrb[35].mxu0  ;;  %v21106_v38 = vshll.u32 %v17497_v7, 16  ;;  %v21109_v22 = vshrl.u32 %v17495_v44, 16  ;;  %6198 = vmatprep.subr.bf16.mxu0 %v21325_v10 }
 0x1b0   :  { %v2803_v60 = vsel %vm17330_vm13, %v2801_v46, %v2802_v13  ;;  %v2804_v11 = vrot.slane %v2802_v13, 4  ;;  %v2805_v45 = vrot.slane %v13784_v52, 7  ;;  %v2200_v40 = vadd.f32 %v17309_v8, %v2061_v29 }
 0x1b1   :  { %v2327_v56 = vmax.f32 %v2199_v54, 0.0  ;;  %v2201_v4 = vadd.f32 %v17307_v17, %v2062_v49  ;;  %v2063_v61 = vmul.f32 %v17303_v9, %v1781_v37  ;;  %5954 = vmatmul.mubr.bf16.gmra.mrb[140].mxu0 %v17419_v33  ;;  %v3656_v43 = vrot.slane %v21108_v15, 1 }
 0x1b2   :  { %v2806_v26 = vsel %vm17330_vm13, %v2804_v11, %v2805_v45  ;;  %v2807_v47 = vrot.slane %v2805_v45, 4  ;;  %v2328_v35 = vmax.f32 %v2200_v40, 0.0  ;;  %5961 = vmatprep.mubr.bf16.mxu0 %v17488_v5  ;;  %v3648_v14 = vrot.slane %v21106_v38, 1  ;;  %6199 = vmatpush1.bf16.msra.mxu0 %v15634_v16 }
 0x1b3   :  { %v2329_v59 = vmax.f32 %v2201_v4, 0.0  ;;  %v2202_v42 = vadd.f32 %v17309_v8, %v2063_v61  ;;  %v3657_v21 = vsel %vm421_vm1, %v3652_v48, %v3656_v43  ;;  %v17528_v53 = vcombine.high %v2803_v60, %v2806_v26  ;;  %6200 = vmatprep.subr.bf16.mxu0 %v21325_v10  ;;  %v15242_v61 = vld [vmem:[#allocation3 + $0x108] sm:$0xff]  }
 0x1b4   :  { %3035 = vst [vmem:[#allocation2 + $0x88] sm:$0x11] %v2807_v47  ;;  %v13785_v3 = vpack.c.bf16 %v2328_v35, %v2327_v56  ;;  %v1785_v46 = vpop.f32.mrb[36].mxu0  ;;  %v17533_v32 = vcombine.low %v17467_v57, %v17436_v62  ;;  %6258 = vmatprep.mubr.bf16.mxu1 %v3657_v21  ;;  %v3649_v51 = vsel %vm421_vm1, %v3644_v58, %v3648_v14  ;;  %v21107_v37 = vshrl.u32 %v17497_v7, 16 }
 0x1b5   :  { %v17536_v13 = vcombine.low %v2803_v60, %v2806_v26  ;;  %v2330_v52 = vmax.f32 %v2202_v42, 0.0  ;;  %v2064_v29 = vmul.f32 %v17299_v50, %v1785_v46  ;;  %v1787_v48 = vpop.f32.mrb[37].mxu0  ;;  %6259 = vmatmul.mubr.bf16.vlgmr.msra.gmra.mrb[0].mxu1 %v3649_v51  ;;  %v3668_v24 = vor.u32 %v21109_v22, %v3656_v43  ;;  %v15635_v60 = vld [vmem:[#allocation3 + $0xb8] sm:$0xff]  }
 0x1b6   :  { %v21103_v18 = vshll.u32 %v17528_v53, 16  ;;  %v2808_v54 = vrot.slane %v13785_v3, 7  ;;  %v2065_v49 = vmul.f32 %v17303_v9, %v1787_v48  ;;  %v1789_v57 = vpop.f32.mrb[38].mxu0  ;;  %6476 = vmatpush1.bf16.msra.mxu1 %v15240_v25  ;;  %6201 = vmatpush1.bf16.msra.mxu0 %v15635_v60  ;;  %v21104_v35 = vshrl.u32 %v17528_v53, 16  ;;  %v15253_v22 = vld [vmem:[#allocation3 + $0x138] sm:$0xff]  }
 0x1b7   :  { %v21101_v58 = vshll.u32 %v17536_v13, 16  ;;  %v13786_v11 = vpack.c.bf16 %v2330_v52, %v2329_v59  ;;  %v2203_v45 = vadd.f32 %v17307_v17, %v2064_v29  ;;  %v2066_v40 = vmul.f32 %v17299_v50, %v1789_v57  ;;  %v1791_v56 = vpop.f32.mrb[39].mxu0  ;;  %6477 = vmatprep.subr.bf16.mxu1 %v21325_v10  ;;  %6202 = vmatprep.subr.bf16.mxu0 %v21325_v10 }
 0x1b8   :  { %v3672_v4 = vrot.slane %v21103_v18, 1  ;;  %v2809_v43 = vrot.slane %v2808_v54, 4  ;;  %3036 = vst [vmem:[#allocation2 + $0x90] sm:$0xee] %v2808_v54  ;;  %v2204_v26 = vadd.f32 %v17309_v8, %v2065_v49  ;;  %v2067_v47 = vmul.f32 %v17303_v9, %v1791_v56  ;;  %v15244_v54 = vld [vmem:[#allocation3 + $0x110] sm:$0xff]   ;;  %v15636_v49 = vld [vmem:[#allocation3 + $0xc0] sm:$0xff]  }
 0x1b9   :  { %v2810_v25 = vrot.slane %v13786_v11, 7  ;;  %v2331_v16 = vmax.f32 %v2203_v45, 0.0  ;;  %v2205_v59 = vadd.f32 %v17307_v17, %v2066_v40  ;;  %5962 = vmatmul.mubr.bf16.gmra.mrb[144].mxu0 %v17533_v32  ;;  %v3660_v46 = vor.u32 %v21107_v37, %v3648_v14 }
 0x1ba   :  { %v3673_v42 = vsel %vm421_vm1, %v3668_v24, %v3672_v4  ;;  %v2332_v21 = vmax.f32 %v2204_v26, 0.0  ;;  %v2206_v3 = vadd.f32 %v17309_v8, %v2067_v47  ;;  %5969 = vmatprep.mubr.bf16.mxu0 %v17459_v30  ;;  %v3664_v51 = vrot.slane %v21101_v58, 1  ;;  %6478 = vmatpush1.bf16.msra.mxu1 %v15242_v61 }
 0x1bb   :  { %6266 = vmatprep.mubr.bf16.mxu1 %v3673_v42  ;;  %v17565_v52 = vsel %vm17330_vm13, %v2809_v43, %v2810_v25  ;;  %v2333_v29 = vmax.f32 %v2205_v59, 0.0  ;;  %v3155_v48 = vld [vmem:[#allocation2 + $0x88] sm:$0x11]  ;;  %v3684_v24 = vor.u32 %v21104_v35, %v3672_v4  ;;  %6203 = vmatpush1.bf16.msra.mxu0 %v15636_v49  ;;  %v2812_v40 = vrot.slane %v2810_v25, 4  ;;  %v15246_v49 = vld [vmem:[#allocation3 + $0x118] sm:$0xff]  }
 0x1bc   :  { %21408 = vst [vmem:[#allocation14_spill] sm:$0xff] %v17565_v52  ;;  %3037 = vst [vmem:[#allocation2 + $0x98] sm:$0xff] %v17565_v52  ;;  %v13787_v57 = vpack.c.bf16 %v2332_v21, %v2331_v16  ;;  %v2334_v14 = vmax.f32 %v2206_v3, 0.0  ;;  %v1795_v60 = vpop.f32.mrb[40].mxu0  ;;  %v3665_v11 = vsel %vm421_vm1, %v3660_v46, %v3664_v51  ;;  %v17571_v45 = vcombine.high %v3155_v48, %v3155_v48  ;;  %v15639_v35 = vld [vmem:[#allocation3 + $0xd8] sm:$0xff]  }
 0x1bd   :  { %6479 = vmatprep.subr.bf16.mxu1 %v21325_v10  ;;  %6204 = vmatprep.subr.bf16.mxu0 %v21325_v10  ;;  %7928 = vst [vmem:[#allocation2 + $0x98] sm:$0x2] %v21325_v10  ;;  %v2068_v56 = vmul.f32 %v17299_v50, %v1795_v60  ;;  %v1797_v4 = vpop.f32.mrb[41].mxu0  ;;  %v17577_v61 = vcombine.low %v3155_v48, %v3155_v48  ;;  %v21102_v43 = vshrl.u32 %v17536_v13, 16  ;;  %v15637_v60 = vld [vmem:[#allocation3 + $0xc8] sm:$0xff]  }
 0x1be   :  { %6267 = vmatmul.mubr.bf16.gmra.mrb[4].mxu1 %v3665_v11  ;;  %v2813_v26 = vrot.slane %v13787_v57, 7  ;;  %v13788_v47 = vpack.c.bf16 %v2334_v14, %v2333_v29  ;;  %v2069_v16 = vmul.f32 %v17303_v9, %v1797_v4  ;;  %v1799_v59 = vpop.f32.mrb[42].mxu0  ;;  %v3686_v42 = vshll.u32 %v17571_v45, 16 }
 0x1bf   :  { %v2207_v21 = vadd.f32 %v17307_v17, %v2068_v56  ;;  %v2070_v25 = vmul.f32 %v17299_v50, %v1799_v59  ;;  %v1801_v3 = vpop.f32.mrb[43].mxu0  ;;  %v3676_v46 = vor.u32 %v21102_v43, %v3664_v51  ;;  %v3678_v48 = vshll.u32 %v17577_v61, 16  ;;  %6480 = vmatpush1.bf16.msra.mxu1 %v15244_v54  ;;  %6205 = vmatpush1.bf16.msra.mxu0 %v15637_v60  ;;  %v3106_v56 = vld [vmem:[#allocation2 + $0x90] sm:$0xff] }
 0x1c0   :  { %v2814_v29 = vsel %vm17330_vm13, %v2812_v40, %v2813_v26  ;;  %v2815_v57 = vrot.slane %v2813_v26, 4  ;;  %v2816_v14 = vrot.slane %v13788_v47, 7  ;;  %v2208_v11 = vadd.f32 %v17309_v8, %v2069_v16  ;;  %6481 = vmatprep.subr.bf16.mxu1 %v21325_v10  ;;  %6206 = vmatprep.subr.bf16.mxu0 %v21325_v10  ;;  %v15638_v43 = vld [vmem:[#allocation3 + $0xd0] sm:$0xff]  }
 0x1c1   :  { %v2335_v4 = vmax.f32 %v2207_v21, 0.0  ;;  %v2209_v51 = vadd.f32 %v17307_v17, %v2070_v25  ;;  %v2071_v54 = vmul.f32 %v17303_v9, %v1801_v3  ;;  %5970 = vmatmul.mubr.bf16.gmra.mrb[148].mxu0 %v17456_v12  ;;  %v3688_v59 = vrot.slane %v3686_v42, 1  ;;  %v15248_v3 = vld [vmem:[#allocation3 + $0x120] sm:$0xff]  }
 0x1c2   :  { %v2817_v40 = vsel %vm17330_vm13, %v2815_v57, %v2816_v14  ;;  %v2818_v26 = vrot.slane %v2816_v14, 4  ;;  %v2336_v47 = vmax.f32 %v2208_v11, 0.0  ;;  %5977 = vmatprep.mubr.bf16.mxu0 %v17495_v44  ;;  %v3680_v16 = vrot.slane %v3678_v48, 1 }
 0x1c3   :  { %v2337_v60 = vmax.f32 %v2209_v51, 0.0  ;;  %v2210_v58 = vadd.f32 %v17309_v8, %v2071_v54  ;;  %v3689_v21 = vsel %vm421_vm1, %v3684_v24, %v3688_v59  ;;  %v17601_v25 = vcombine.high %v3106_v56, %v17565_v52  ;;  %6482 = vmatpush1.bf16.msra.mxu1 %v15246_v49  ;;  %6207 = vmatpush1.bf16.msra.mxu0 %v15638_v43 }
 0x1c4   :  { %v13789_v42 = vpack.c.bf16 %v2336_v47, %v2335_v4  ;;  %v1805_v18 = vpop.f32.mrb[44].mxu0  ;;  %6274 = vmatprep.mubr.bf16.mxu1 %v3689_v21  ;;  %v3681_v57 = vsel %vm421_vm1, %v3676_v46, %v3680_v16  ;;  %v17604_v14 = vcombine.high %v2814_v29, %v2817_v40  ;;  %v17607_v48 = vcombine.low %v3106_v56, %v17565_v52 }
 0x1c5   :  { %v2338_v11 = vmax.f32 %v2210_v58, 0.0  ;;  %v2072_v24 = vmul.f32 %v17299_v50, %v1805_v18  ;;  %v1807_v51 = vpop.f32.mrb[45].mxu0  ;;  %v3705_v49 = vshll.u32 %v17601_v25, 16  ;;  %v3703_v54 = vshrl.u32 %v17601_v25, 16  ;;  %6483 = vmatprep.subr.bf16.mxu1 %v21325_v10  ;;  %6208 = vmatprep.subr.bf16.mxu0 %v21325_v10 }
 0x1c6   :  { %6275 = vmatmul.mubr.bf16.gmra.mrb[8].mxu1 %v3681_v57  ;;  %v2819_v43 = vrot.slane %v13789_v42, 7  ;;  %v2073_v4 = vmul.f32 %v17303_v9, %v1807_v51  ;;  %v1809_v46 = vpop.f32.mrb[46].mxu0  ;;  %v21105_v59 = vshll.u32 %v17604_v14, 16  ;;  %v17615_v47 = vcombine.low %v2814_v29, %v2817_v40  ;;  %v15249_v57 = vld [vmem:[#allocation3 + $0x128] sm:$0xff]  }
 0x1c7   :  { %v13790_v58 = vpack.c.bf16 %v2338_v11, %v2337_v60  ;;  %v2211_v18 = vadd.f32 %v17307_v17, %v2072_v24  ;;  %v2074_v56 = vmul.f32 %v17299_v50, %v1809_v46  ;;  %v1811_v16 = vpop.f32.mrb[47].mxu0  ;;  %v3707_v21 = vrot.slane %v3705_v49, 1  ;;  %6484 = vmatpush1.bf16.msra.mxu1 %v15248_v3  ;;  %6209 = vmatpush1.bf16.msra.mxu0 %v15639_v35 }
 0x1c8   :  { %v17622_v42 = vsel %vm17330_vm13, %v2818_v26, %v2819_v43  ;;  %v2821_v51 = vrot.slane %v2819_v43, 4  ;;  %v2212_v29 = vadd.f32 %v17309_v8, %v2073_v4  ;;  %v2075_v40 = vmul.f32 %v17303_v9, %v1811_v16  ;;  %6485 = vmatprep.subr.bf16.mxu1 %v21325_v10  ;;  %6210 = vmatprep.subr.bf16.mxu0 %v21325_v10 }
 0x1c9   :  { %v2822_v60 = vrot.slane %v13790_v58, 7  ;;  %v2339_v11 = vmax.f32 %v2211_v18, 0.0  ;;  %v2213_v3 = vadd.f32 %v17307_v17, %v2074_v56  ;;  %5978 = vmatmul.mubr.bf16.gmra.mrb[152].mxu0 %v17497_v7  ;;  %v3708_v35 = vor.u32 %v3707_v21, %v3703_v54  ;;  %v15252_v56 = vld [vmem:[#allocation3 + $0x130] sm:$0xff]   ;;  %v15640_v54 = vld [vmem:[#allocation3 + $0xe0] sm:$0xff]  }
 0x1ca   :  { %v2340_v24 = vmax.f32 %v2212_v29, 0.0  ;;  %v2214_v26 = vadd.f32 %v17309_v8, %v2075_v40  ;;  %5985 = vmatprep.mubr.bf16.mxu0 %v17528_v53  ;;  %v3712_v49 = vrot.slane %v21105_v59, 1  ;;  %v3691_v43 = vshrl.u32 %v17607_v48, 16 }
 0x1cb   :  { %v2823_v4 = vsel %vm17330_vm13, %v2821_v51, %v2822_v60  ;;  %v2824_v46 = vrot.slane %v2822_v60, 4  ;;  %v2341_v58 = vmax.f32 %v2213_v3, 0.0  ;;  %v3693_v18 = vshll.u32 %v17607_v48, 16  ;;  %6486 = vmatpush1.bf16.msra.mxu1 %v15249_v57  ;;  %6211 = vmatpush1.bf16.msra.mxu0 %v15640_v54 }
 0x1cc   :  { %v13791_v16 = vpack.c.bf16 %v2340_v24, %v2339_v11  ;;  %v2342_v21 = vmax.f32 %v2214_v26, 0.0  ;;  %v1815_v29 = vpop.f32.mrb[48].mxu0  ;;  %v3713_v40 = vsel %vm421_vm1, %v3708_v35, %v3712_v49  ;;  %v21111_v59 = vshll.u32 %v17615_v47, 16  ;;  %6487 = vmatprep.subr.bf16.mxu1 %v21325_v10  ;;  %6212 = vmatprep.subr.bf16.mxu0 %v21325_v10 }
 0x1cd   :  { %v2076_v51 = vmul.f32 %v17299_v50, %v1815_v29  ;;  %v1817_v60 = vpop.f32.mrb[49].mxu0  ;;  %6282 = vmatprep.mubr.bf16.mxu1 %v3713_v40  ;;  %v3695_v3 = vrot.slane %v3693_v18, 1  ;;  %v17644_v57 = vcombine.high %v17622_v42, %v2823_v4  ;;  %v21112_v11 = vshrl.u32 %v17604_v14, 16 }
 0x1ce   :  { %v2825_v24 = vrot.slane %v13791_v16, 7  ;;  %v13792_v26 = vpack.c.bf16 %v2342_v21, %v2341_v58  ;;  %v2077_v35 = vmul.f32 %v17303_v9, %v1817_v60  ;;  %v1819_v54 = vpop.f32.mrb[50].mxu0  ;;  %v3700_v38 = vrot.slane %v21111_v59, 1 }
 0x1cf   :  { %v2215_v37 = vadd.f32 %v17307_v17, %v2076_v51  ;;  %v2078_v29 = vmul.f32 %v17299_v50, %v1819_v54  ;;  %v1821_v15 = vpop.f32.mrb[51].mxu0  ;;  %v3696_v40 = vor.u32 %v3695_v3, %v3691_v43  ;;  %v3724_v18 = vor.u32 %v21112_v11, %v3712_v49  ;;  %6488 = vmatpush1.bf16.msra.mxu1 %v15252_v56  ;;  %v15641_v51 = vld [vmem:[#allocation3 + $0xe8] sm:$0xff]  }
 0x1d0   :  { %v17656_v58 = vsel %vm17330_vm13, %v2824_v46, %v2825_v24  ;;  %v2827_v16 = vrot.slane %v2825_v24, 4  ;;  %v2828_v21 = vrot.slane %v13792_v26, 7  ;;  %v2216_v60 = vadd.f32 %v17309_v8, %v2077_v35  ;;  %6489 = vmatprep.subr.bf16.mxu1 %v21325_v10  ;;  %6213 = vmatpush1.bf16.msra.mxu0 %v15641_v51 }
 0x1d1   :  { %v2343_v54 = vmax.f32 %v2215_v37, 0.0  ;;  %v2217_v43 = vadd.f32 %v17307_v17, %v2078_v29  ;;  %v2079_v3 = vmul.f32 %v17303_v9, %v1821_v15  ;;  %5986 = vmatmul.mubr.bf16.gmra.mrb[156].mxu0 %v17536_v13  ;;  %v3701_v49 = vsel %vm421_vm1, %v3696_v40, %v3700_v38  ;;  %6214 = vmatprep.subr.bf16.mxu0 %v21325_v10  ;;  %v15255_v40 = vld [vmem:[#allocation3 + $0x140] sm:$0xff]  }
 0x1d2   :  { %v2829_v46 = vsel %vm17330_vm13, %v2827_v16, %v2828_v21  ;;  %v2830_v56 = vrot.slane %v2828_v21, 4  ;;  %v2344_v24 = vmax.f32 %v2216_v60, 0.0  ;;  %5993 = vmatprep.mubr.bf16.mxu0 %v17601_v25  ;;  %6283 = vmatmul.mubr.bf16.gmra.mrb[12].mxu1 %v3701_v49  ;;  %v21110_v37 = vshll.u32 %v17644_v57, 16 }
 0x1d3   :  { %v2345_v26 = vmax.f32 %v2217_v43, 0.0  ;;  %v2218_v35 = vadd.f32 %v17309_v8, %v2079_v3  ;;  %v17671_v15 = vcombine.low %v17622_v42, %v2823_v4  ;;  %v21113_v29 = vshrl.u32 %v17615_v47, 16  ;;  %6490 = vmatpush1.bf16.msra.mxu1 %v15253_v22  ;;  %v15642_v43 = vld [vmem:[#allocation3 + $0xf0] sm:$0xff]  }
 0x1d4   :  { %3044 = vst [vmem:[#allocation2 + $0xd0] sm:$0x11] %v2830_v56  ;;  %v13793_v51 = vpack.c.bf16 %v2344_v24, %v2343_v54  ;;  %v1825_v16 = vpop.f32.mrb[52].mxu0  ;;  %v3728_v21 = vrot.slane %v21110_v37, 1  ;;  %v17677_v25 = vcombine.high %v17656_v58, %v2829_v46  ;;  %v21116_v60 = vshrl.u32 %v17644_v57, 16  ;;  %6491 = vmatprep.subr.bf16.mxu1 %v21325_v10  ;;  %6215 = vmatpush1.bf16.msra.mxu0 %v15642_v43 }
 0x1d5   :  { %v2346_v42 = vmax.f32 %v2218_v35, 0.0  ;;  %v2080_v4 = vmul.f32 %v17299_v50, %v1825_v16  ;;  %v1827_v22 = vpop.f32.mrb[53].mxu0  ;;  %v3716_v54 = vor.u32 %v21113_v29, %v3700_v38  ;;  %v21115_v3 = vshll.u32 %v17671_v15, 16  ;;  %6216 = vmatprep.subr.bf16.mxu0 %v21325_v10 }
 0x1d6   :  { %21409 = vst [vmem:[#allocation16_spill] sm:$0xff] %v17677_v25  ;;  %v2831_v49 = vrot.slane %v13793_v51, 7  ;;  %v2081_v56 = vmul.f32 %v17303_v9, %v1827_v22  ;;  %v1829_v24 = vpop.f32.mrb[54].mxu0  ;;  %v3729_v37 = vsel %vm421_vm1, %v3724_v18, %v3728_v21  ;;  %v3740_v43 = vor.u32 %v21116_v60, %v3728_v21  ;;  %v15257_v51 = vld [vmem:[#allocation3 + $0x148] sm:$0xff]  }
 0x1d7   :  { %v13794_v35 = vpack.c.bf16 %v2346_v42, %v2345_v26  ;;  %v2219_v16 = vadd.f32 %v17307_v17, %v2080_v4  ;;  %v2082_v59 = vmul.f32 %v17299_v50, %v1829_v24  ;;  %v1831_v11 = vpop.f32.mrb[55].mxu0  ;;  %6290 = vmatprep.mubr.bf16.mxu1 %v3729_v37  ;;  %v3720_v38 = vrot.slane %v21115_v3, 1  ;;  %6492 = vmatpush1.bf16.msra.mxu1 %v15255_v40  ;;  %v15643_v26 = vld [vmem:[#allocation3 + $0xf8] sm:$0xff]  }
 0x1d8   :  { %v2832_v29 = vrot.slane %v2831_v49, 4  ;;  %3045 = vst [vmem:[#allocation2 + $0xd8] sm:$0xee] %v2831_v49  ;;  %v2220_v22 = vadd.f32 %v17309_v8, %v2081_v56  ;;  %v2083_v18 = vmul.f32 %v17303_v9, %v1831_v11  ;;  %v21114_v21 = vshll.u32 %v17677_v25, 16  ;;  %6493 = vmatprep.subr.bf16.mxu1 %v21325_v10  ;;  %6217 = vmatpush1.bf16.msra.mxu0 %v15643_v26 }
 0x1d9   :  { %v2833_v42 = vrot.slane %v13794_v35, 7  ;;  %v2347_v4 = vmax.f32 %v2219_v16, 0.0  ;;  %v2221_v37 = vadd.f32 %v17307_v17, %v2082_v59  ;;  %5994 = vmatmul.mubr.bf16.gmra.mrb[160].mxu0 %v17607_v48  ;;  %v3721_v40 = vsel %vm421_vm1, %v3716_v54, %v3720_v38 }
 0x1da   :  { %v2348_v24 = vmax.f32 %v2220_v22, 0.0  ;;  %v2222_v49 = vadd.f32 %v17309_v8, %v2083_v18  ;;  %6001 = vmatprep.mubr.bf16.mxu0 %v17604_v14  ;;  %6291 = vmatmul.mubr.bf16.gmra.mrb[16].mxu1 %v3721_v40  ;;  %v3744_v11 = vrot.slane %v21114_v21, 1  ;;  %v17706_v56 = vcombine.low %v17656_v58, %v2829_v46  ;;  %v15258_v22 = vld [vmem:[#allocation3 + $0x150] sm:$0xff]  }
 0x1db   :  { %v17710_v35 = vsel %vm17330_vm13, %v2832_v29, %v2833_v42  ;;  %v2835_v59 = vrot.slane %v2833_v42, 4  ;;  %v2349_v48 = vmax.f32 %v2221_v37, 0.0  ;;  %v21117_v54 = vshrl.u32 %v17671_v15, 16  ;;  %v3156_v16 = vld [vmem:[#allocation2 + $0xd0] sm:$0x11]  ;;  %6494 = vmatpush1.bf16.msra.mxu1 %v15257_v51 }
 0x1dc   :  { %21410 = vst [vmem:[#allocation17_spill] sm:$0xff] %v17706_v56  ;;  %21411 = vst [vmem:[#allocation18_spill] sm:$0xff] %v17710_v35  ;;  %v13795_v18 = vpack.c.bf16 %v2348_v24, %v2347_v4  ;;  %v2350_v26 = vmax.f32 %v2222_v49, 0.0  ;;  %v1835_v40 = vpop.f32.mrb[56].mxu0  ;;  %v3745_v21 = vsel %vm421_vm1, %v3740_v43, %v3744_v11  ;;  %v21119_v58 = vshll.u32 %v17706_v56, 16  ;;  %6495 = vmatprep.subr.bf16.mxu1 %v21325_v10 }
 0x1dd   :  { %3046 = vst [vmem:[#allocation2 + $0xe0] sm:$0xff] %v17710_v35  ;;  %v2084_v46 = vmul.f32 %v17299_v50, %v1835_v40  ;;  %v1837_v29 = vpop.f32.mrb[57].mxu0  ;;  %6298 = vmatprep.mubr.bf16.mxu1 %v3745_v21  ;;  %v3732_v51 = vor.u32 %v21117_v54, %v3720_v38  ;;  %v17721_v42 = vcombine.high %v3156_v16, %v3156_v16  ;;  %v21120_v4 = vshrl.u32 %v17677_v25, 16 }
 0x1de   :  { %7929 = vst [vmem:[#allocation2 + $0xe0] sm:$0x2] %v21325_v10  ;;  %v2836_v37 = vrot.slane %v13795_v18, 7  ;;  %v13796_v24 = vpack.c.bf16 %v2350_v26, %v2349_v48  ;;  %v2085_v43 = vmul.f32 %v17303_v9, %v1837_v29  ;;  %v1839_v49 = vpop.f32.mrb[58].mxu0  ;;  %v3736_v3 = vrot.slane %v21119_v58, 1 }
 0x1df   :  { %21412 = vst [vmem:[#allocation19_spill] sm:$0xff] %v17721_v42  ;;  %v2223_v60 = vadd.f32 %v17307_v17, %v2084_v46  ;;  %v2086_v40 = vmul.f32 %v17299_v50, %v1839_v49  ;;  %v1841_v21 = vpop.f32.mrb[59].mxu0  ;;  %v3756_v38 = vor.u32 %v21120_v4, %v3744_v11  ;;  %v3758_v54 = vshll.u32 %v17721_v42, 16  ;;  %6496 = vmatpush1.bf16.msra.mxu1 %v15258_v22  ;;  %v3114_v22 = vld [vmem:[#allocation2 + $0xd8] sm:$0xff] }
 0x1e0   :  { %v17734_v48 = vsel %vm17330_vm13, %v2835_v59, %v2836_v37  ;;  %v2838_v18 = vrot.slane %v2836_v37, 4  ;;  %v2839_v26 = vrot.slane %v13796_v24, 7  ;;  %v2224_v29 = vadd.f32 %v17309_v8, %v2085_v43  ;;  %6497 = vmatprep.subr.bf16.mxu1 %v21325_v10 }
 0x1e1   :  { %v2351_v46 = vmax.f32 %v2223_v60, 0.0  ;;  %v2225_v49 = vadd.f32 %v17307_v17, %v2086_v40  ;;  %v2087_v58 = vmul.f32 %v17303_v9, %v1841_v21  ;;  %6002 = vmatmul.mubr.bf16.gmra.mrb[164].mxu0 %v17615_v47  ;;  %v3737_v11 = vsel %vm421_vm1, %v3732_v51, %v3736_v3 }
 0x1e2   :  { %v2840_v59 = vsel %vm17330_vm13, %v2838_v18, %v2839_v26  ;;  %v2841_v4 = vrot.slane %v2839_v26, 4  ;;  %v2352_v37 = vmax.f32 %v2224_v29, 0.0  ;;  %6009 = vmatprep.mubr.bf16.mxu0 %v17644_v57  ;;  %6299 = vmatmul.mubr.bf16.gmra.mrb[20].mxu1 %v3737_v11  ;;  %v3760_v24 = vrot.slane %v3758_v54, 1 }
 0x1e3   :  { %v2353_v43 = vmax.f32 %v2225_v49, 0.0  ;;  %v2226_v60 = vadd.f32 %v17309_v8, %v2087_v58  ;;  %v17746_v40 = vcombine.low %v3156_v16, %v3156_v16  ;;  %v21124_v21 = vshrl.u32 %v17706_v56, 16  ;;  %6498 = vmatpush1.bf16.msra.mxu1 %v15261_v28 }
 0x1e4   :  { %v13797_v31 = vpack.c.bf16 %v2352_v37, %v2351_v46  ;;  %v1845_v51 = vpop.f32.mrb[60].mxu0  ;;  %v3761_v20 = vsel %vm421_vm1, %v3756_v38, %v3760_v24  ;;  %v17751_v18 = vcombine.high %v3114_v22, %v17710_v35  ;;  %v17754_v26 = vcombine.high %v17734_v48, %v2840_v59  ;;  %6499 = vmatprep.subr.bf16.mxu1 %v21325_v10 }
 0x1e5   :  { %21413 = vst [vmem:[#allocation20_spill] sm:$0xff] %v17746_v40  ;;  %v2354_v54 = vmax.f32 %v2226_v60, 0.0  ;;  %v2088_v58 = vmul.f32 %v17299_v50, %v1845_v51  ;;  %6306 = vmatprep.mubr.bf16.mxu1 %v3761_v20  ;;  %v1847_v16 = vpop.f32.mrb[61].mxu0  ;;  %v3748_v28 = vor.u32 %v21124_v21, %v3736_v3  ;;  %v3750_v29 = vshll.u32 %v17746_v40, 16 }
 0x1e6   :  { %21414 = vst [vmem:[#allocation21_spill] sm:$0xff] %v17754_v26  ;;  %v2842_v46 = vrot.slane %v13797_v31, 7  ;;  %v2089_v38 = vmul.f32 %v17303_v9, %v1847_v16  ;;  %v1849_v49 = vpop.f32.mrb[62].mxu0  ;;  %v3777_v11 = vshll.u32 %v17751_v18, 16  ;;  %v3775_v37 = vshrl.u32 %v17751_v18, 16 }
 0x1e7   :  { %v13798_v24 = vpack.c.bf16 %v2354_v54, %v2353_v43  ;;  %v2227_v60 = vadd.f32 %v17307_v17, %v2088_v58  ;;  %v2090_v51 = vmul.f32 %v17299_v50, %v1849_v49  ;;  %v1851_v20 = vpop.f32.mrb[63].mxu0  ;;  %v3752_v63 = vrot.slane %v3750_v29, 1  ;;  %v15262_v54 = vld [vmem:[#allocation3 + $0x160] sm:$0xff]  }
 0x1e8   :  { %v17768_v3 = vsel %vm17330_vm13, %v2841_v4, %v2842_v46  ;;  %v2844_v21 = vrot.slane %v2842_v46, 4  ;;  %v2228_v31 = vadd.f32 %v17309_v8, %v2089_v38  ;;  %v2091_v16 = vmul.f32 %v17303_v9, %v1851_v20  ;;  %6500 = vmatpush1.bf16.msra.mxu1 %v15262_v54 }
 0x1e9   :  { %v2845_v41 = vrot.slane %v13798_v24, 7  ;;  %v2355_v40 = vmax.f32 %v2227_v60, 0.0  ;;  %v2229_v42 = vadd.f32 %v17307_v17, %v2090_v51  ;;  %6010 = vmatmul.mubr.bf16.gmra.mrb[168].mxu0 %v17671_v15  ;;  %v3753_v43 = vsel %vm421_vm1, %v3748_v28, %v3752_v63  ;;  %6501 = vmatprep.subr.bf16.mxu1 %v21325_v10 }
 0x1ea   :  { %v2356_v58 = vmax.f32 %v2228_v31, 0.0  ;;  %v2230_v29 = vadd.f32 %v17309_v8, %v2091_v16  ;;  %6017 = vmatprep.mubr.bf16.mxu0 %v17677_v25  ;;  %6307 = vmatmul.mubr.bf16.gmra.mrb[24].mxu1 %v3753_v43  ;;  %v3779_v4 = vrot.slane %v3777_v11, 1  ;;  %v21128_v46 = vshll.u32 %v17754_v26, 16 }
 0x1eb   :  { %v2846_v38 = vsel %vm17330_vm13, %v2844_v21, %v2845_v41  ;;  %v2847_v49 = vrot.slane %v2845_v41, 4  ;;  %v2357_v24 = vmax.f32 %v2229_v42, 0.0  ;;  %v17781_v60 = vcombine.low %v3114_v22, %v17710_v35 }
 0x1ec   :  { %v13799_v63 = vpack.c.bf16 %v2356_v58, %v2355_v40  ;;  %v2358_v28 = vmax.f32 %v2230_v29, 0.0  ;;  %v1855_v51 = vpop.f32.mrb[64].mxu0  ;;  %v3780_v20 = vor.u32 %v3779_v4, %v3775_v37  ;;  %v3784_v31 = vrot.slane %v21128_v46, 1 }
 0x1ed   :  { %v2092_v11 = vmul.f32 %v17299_v50, %v1855_v51  ;;  %v1857_v16 = vpop.f32.mrb[65].mxu0  ;;  %v17788_v21 = vcombine.low %v17734_v48, %v2840_v59  ;;  %v3763_v41 = vshrl.u32 %v17781_v60, 16  ;;  %v3765_v42 = vshll.u32 %v17781_v60, 16 }
 0x1ee   :  { %v2848_v22 = vrot.slane %v13799_v63, 7  ;;  %v13800_v40 = vpack.c.bf16 %v2358_v28, %v2357_v24  ;;  %v2093_v43 = vmul.f32 %v17303_v9, %v1857_v16  ;;  %v1859_v37 = vpop.f32.mrb[66].mxu0  ;;  %v3785_v54 = vsel %vm421_vm1, %v3780_v20, %v3784_v31 }
 0x1ef   :  { %21415 = vst [vmem:[#allocation22_spill] sm:$0xff] %v17788_v21  ;;  %v2231_v58 = vadd.f32 %v17307_v17, %v2092_v11  ;;  %v2094_v29 = vmul.f32 %v17299_v50, %v1859_v37  ;;  %v1861_v4 = vpop.f32.mrb[67].mxu0  ;;  %6314 = vmatprep.mubr.bf16.mxu1 %v3785_v54  ;;  %v3767_v51 = vrot.slane %v3765_v42, 1  ;;  %v21129_v48 = vshll.u32 %v17788_v21, 16 }
 0x1f0   :  { %v17799_v59 = vsel %vm17330_vm13, %v2847_v49, %v2848_v22  ;;  %v2850_v63 = vrot.slane %v2848_v22, 4  ;;  %v2851_v24 = vrot.slane %v13800_v40, 7  ;;  %v2232_v28 = vadd.f32 %v17309_v8, %v2093_v43 }
 0x1f1   :  { %v2359_v16 = vmax.f32 %v2231_v58, 0.0  ;;  %v2233_v20 = vadd.f32 %v17307_v17, %v2094_v29  ;;  %v2095_v11 = vmul.f32 %v17303_v9, %v1861_v4  ;;  %6018 = vmatmul.mubr.bf16.gmra.mrb[172].mxu0 %v17706_v56  ;;  %v3768_v37 = vor.u32 %v3767_v51, %v3763_v41 }
 0x1f2   :  { %v2852_v42 = vsel %vm17330_vm13, %v2850_v63, %v2851_v24  ;;  %v2853_v54 = vrot.slane %v2851_v24, 4  ;;  %v2360_v46 = vmax.f32 %v2232_v28, 0.0  ;;  %6025 = vmatprep.mubr.bf16.mxu0 %v17751_v18  ;;  %v3772_v49 = vrot.slane %v21129_v48, 1  ;;  %v15265_v48 = vld [vmem:[#allocation3 + $0x168] sm:$0xff]  }
 0x1f3   :  { %v2361_v22 = vmax.f32 %v2233_v20, 0.0  ;;  %v2234_v40 = vadd.f32 %v17309_v8, %v2095_v11  ;;  %v17812_v43 = vcombine.high %v17768_v3, %v2846_v38  ;;  %v21130_v58 = vshrl.u32 %v17754_v26, 16  ;;  %6502 = vmatpush1.bf16.msra.mxu1 %v15265_v48 }
 0x1f4   :  { %3053 = vst [vmem:[#allocation2 + $0x118] sm:$0x11] %v2853_v54  ;;  %v13801_v41 = vpack.c.bf16 %v2360_v46, %v2359_v16  ;;  %v3773_v29 = vsel %vm421_vm1, %v3768_v37, %v3772_v49  ;;  %v1865_v4 = vpop.f32.mrb[68].mxu0  ;;  %v17817_v51 = vcombine.low %v17768_v3, %v2846_v38  ;;  %v21131_v18 = vshrl.u32 %v17788_v21, 16  ;;  %6503 = vmatprep.subr.bf16.mxu1 %v21325_v10 }
 0x1f5   :  { %21416 = vst [vmem:[#allocation23_spill] sm:$0xff] %v17812_v43  ;;  %v2362_v63 = vmax.f32 %v2234_v40, 0.0  ;;  %6315 = vmatmul.mubr.bf16.gmra.mrb[28].mxu1 %v3773_v29  ;;  %v2096_v24 = vmul.f32 %v17299_v50, %v1865_v4  ;;  %v1867_v28 = vpop.f32.mrb[69].mxu0  ;;  %v3796_v20 = vor.u32 %v21130_v58, %v3784_v31  ;;  %v21132_v11 = vshll.u32 %v17812_v43, 16 }
 0x1f6   :  { %21417 = vst [vmem:[#allocation24_spill] sm:$0xff] %v17817_v51  ;;  %v2854_v54 = vrot.slane %v13801_v41, 7  ;;  %v2097_v46 = vmul.f32 %v17303_v9, %v1867_v28  ;;  %v1869_v16 = vpop.f32.mrb[70].mxu0  ;;  %v3788_v3 = vor.u32 %v21131_v18, %v3772_v49  ;;  %v21133_v38 = vshll.u32 %v17817_v51, 16 }
 0x1f7   :  { %v13802_v37 = vpack.c.bf16 %v2362_v63, %v2361_v22  ;;  %v2235_v40 = vadd.f32 %v17307_v17, %v2096_v24  ;;  %v2098_v29 = vmul.f32 %v17299_v50, %v1869_v16  ;;  %v1871_v4 = vpop.f32.mrb[71].mxu0  ;;  %v3800_v31 = vrot.slane %v21132_v11, 1 }
 0x1f8   :  { %v2855_v58 = vrot.slane %v2854_v54, 4  ;;  %3054 = vst [vmem:[#allocation2 + $0x120] sm:$0xee] %v2854_v54  ;;  %v2236_v41 = vadd.f32 %v17309_v8, %v2097_v46  ;;  %v2099_v28 = vmul.f32 %v17303_v9, %v1871_v4  ;;  %v3792_v49 = vrot.slane %v21133_v38, 1 }
 0x1f9   :  { %v2856_v18 = vrot.slane %v13802_v37, 7  ;;  %v2363_v22 = vmax.f32 %v2235_v40, 0.0  ;;  %v2237_v63 = vadd.f32 %v17307_v17, %v2098_v29  ;;  %6026 = vmatmul.mubr.bf16.gmra.mrb[176].mxu0 %v17781_v60  ;;  %v3801_v24 = vsel %vm421_vm1, %v3796_v20, %v3800_v31 }
 0x1fa   :  { %v2364_v16 = vmax.f32 %v2236_v41, 0.0  ;;  %v2238_v11 = vadd.f32 %v17309_v8, %v2099_v28  ;;  %6033 = vmatprep.mubr.bf16.mxu0 %v17754_v26  ;;  %6322 = vmatprep.mubr.bf16.mxu1 %v3801_v24  ;;  %v3793_v54 = vsel %vm421_vm1, %v3788_v3, %v3792_v49  ;;  %v17843_v46 = vcombine.high %v17799_v59, %v2852_v42 }
 0x1fb   :  { %v17847_v37 = vsel %vm17330_vm13, %v2855_v58, %v2856_v18  ;;  %v2858_v40 = vrot.slane %v2856_v18, 4  ;;  %v2365_v60 = vmax.f32 %v2237_v63, 0.0  ;;  %v21138_v20 = vshrl.u32 %v17812_v43, 16  ;;  %v3157_v48 = vld [vmem:[#allocation2 + $0x118] sm:$0x11] }
 0x1fc   :  { %21418 = vst [vmem:[#allocation25_spill] sm:$0xff] %v17843_v46  ;;  %21419 = vst [vmem:[#allocation26_spill] sm:$0xff] %v17847_v37  ;;  %v13803_v29 = vpack.c.bf16 %v2364_v16, %v2363_v22  ;;  %v2366_v4 = vmax.f32 %v2238_v11, 0.0  ;;  %v1875_v41 = vpop.f32.mrb[72].mxu0  ;;  %v17854_v28 = vcombine.low %v17799_v59, %v2852_v42  ;;  %v21139_v24 = vshrl.u32 %v17817_v51, 16  ;;  %v15266_v11 = vld [vmem:[#allocation3 + $0x170] sm:$0xff]  }
 0x1fd   :  { %3055 = vst [vmem:[#allocation2 + $0x128] sm:$0xff] %v17847_v37  ;;  %6323 = vmatmul.mubr.bf16.gmra.mrb[32].mxu1 %v3793_v54  ;;  %v2100_v58 = vmul.f32 %v17299_v50, %v1875_v41  ;;  %v1877_v18 = vpop.f32.mrb[73].mxu0  ;;  %v3812_v63 = vor.u32 %v21138_v20, %v3800_v31  ;;  %v17861_v38 = vcombine.high %v3157_v48, %v3157_v48  ;;  %v21422_v42 = vshll.u32 %v17843_v46, 16 }
 0x1fe   :  { %21420 = vst [vmem:[#allocation27_spill] sm:$0xff] %v17854_v28  ;;  %7930 = vst [vmem:[#allocation2 + $0x128] sm:$0x2] %v21325_v10  ;;  %v2859_v22 = vrot.slane %v13803_v29, 7  ;;  %v13804_v16 = vpack.c.bf16 %v2366_v4, %v2365_v60  ;;  %v2101_v3 = vmul.f32 %v17303_v9, %v1877_v18  ;;  %v1879_v59 = vpop.f32.mrb[74].mxu0  ;;  %v3804_v31 = vor.u32 %v21139_v24, %v3792_v49 }
 0x1ff   :  { %21421 = vst [vmem:[#allocation28_spill] sm:$0xff] %v17861_v38  ;;  %v3816_v26 = vrot.slane %v21422_v42, 1  ;;  %v2239_v54 = vadd.f32 %v17307_v17, %v2100_v58  ;;  %v2102_v41 = vmul.f32 %v17299_v50, %v1879_v59  ;;  %v1881_v35 = vpop.f32.mrb[75].mxu0  ;;  %v21142_v20 = vshll.u32 %v17854_v28, 16  ;;  %6504 = vmatpush1.bf16.msra.mxu1 %v15266_v11 }
 0x200   :  { %v17873_v60 = vsel %vm17330_vm13, %v2858_v40, %v2859_v22  ;;  %v2861_v29 = vrot.slane %v2859_v22, 4  ;;  %v2862_v4 = vrot.slane %v13804_v16, 7  ;;  %v2240_v18 = vadd.f32 %v17309_v8, %v2101_v3  ;;  %6505 = vmatprep.subr.bf16.mxu1 %v21325_v10 }
 0x201   :  { %v2367_v58 = vmax.f32 %v2239_v54, 0.0  ;;  %v2241_v59 = vadd.f32 %v17307_v17, %v2102_v41  ;;  %v2103_v42 = vmul.f32 %v17303_v9, %v1881_v35  ;;  %6034 = vmatmul.mubr.bf16.gmra.mrb[180].mxu0 %v17788_v21  ;;  %v3817_v49 = vsel %vm421_vm1, %v3812_v63, %v3816_v26 }
 0x202   :  { %v2863_v11 = vsel %vm17330_vm13, %v2861_v29, %v2862_v4  ;;  %v2864_v40 = vrot.slane %v2862_v4, 4  ;;  %v2368_v24 = vmax.f32 %v2240_v18, 0.0  ;;  %6041 = vmatprep.mubr.bf16.mxu0 %v17812_v43  ;;  %6330 = vmatprep.mubr.bf16.mxu1 %v3817_v49  ;;  %v3808_v3 = vrot.slane %v21142_v20, 1 }
 0x203   :  { %v2369_v22 = vmax.f32 %v2241_v59, 0.0  ;;  %v2242_v16 = vadd.f32 %v17309_v8, %v2103_v42  ;;  %v21149_v35 = vshrl.u32 %v17843_v46, 16  ;;  %v3830_v54 = vshll.u32 %v17861_v38, 16 }
 0x204   :  { %v13805_v41 = vpack.c.bf16 %v2368_v24, %v2367_v58  ;;  %v3809_v63 = vsel %vm421_vm1, %v3804_v31, %v3808_v3  ;;  %v1885_v21 = vpop.f32.mrb[76].mxu0  ;;  %v17890_v29 = vcombine.low %v3157_v48, %v3157_v48  ;;  %v21148_v4 = vshrl.u32 %v17854_v28, 16 }
 0x205   :  { %v2370_v18 = vmax.f32 %v2242_v16, 0.0  ;;  %6331 = vmatmul.mubr.bf16.gmra.mrb[36].mxu1 %v3809_v63  ;;  %v2104_v49 = vmul.f32 %v17299_v50, %v1885_v21  ;;  %v3828_v59 = vor.u32 %v21149_v35, %v3816_v26  ;;  %v3832_v42 = vrot.slane %v3830_v54, 1  ;;  %v1887_v20 = vpop.f32.mrb[77].mxu0  ;;  %v3122_v26 = vld [vmem:[#allocation2 + $0x120] sm:$0xff] }
 0x206   :  { %21423 = vst [vmem:[#allocation29_spill] sm:$0xff] %v17890_v29  ;;  %v2865_v43 = vrot.slane %v13805_v41, 7  ;;  %v2105_v38 = vmul.f32 %v17303_v9, %v1887_v20  ;;  %v1889_v24 = vpop.f32.mrb[78].mxu0  ;;  %v3820_v31 = vor.u32 %v21148_v4, %v3808_v3  ;;  %v3822_v48 = vshll.u32 %v17890_v29, 16 }
 0x207   :  { %v13806_v58 = vpack.c.bf16 %v2370_v18, %v2369_v22  ;;  %v2243_v16 = vadd.f32 %v17307_v17, %v2104_v49  ;;  %v3833_v63 = vsel %vm421_vm1, %v3828_v59, %v3832_v42  ;;  %v2106_v21 = vmul.f32 %v17299_v50, %v1889_v24  ;;  %v1891_v56 = vpop.f32.mrb[79].mxu0 }
 0x208   :  { %v17905_v54 = vsel %vm17330_vm13, %v2864_v40, %v2865_v43  ;;  %v2867_v20 = vrot.slane %v2865_v43, 4  ;;  %6338 = vmatprep.mubr.bf16.mxu1 %v3833_v63  ;;  %v2244_v41 = vadd.f32 %v17309_v8, %v2105_v38  ;;  %v2107_v3 = vmul.f32 %v17303_v9, %v1891_v56 }
 0x209   :  { %v2868_v4 = vrot.slane %v13806_v58, 7  ;;  %v2371_v22 = vmax.f32 %v2243_v16, 0.0  ;;  %v2245_v18 = vadd.f32 %v17307_v17, %v2106_v21  ;;  %6042 = vmatmul.mubr.bf16.gmra.mrb[184].mxu0 %v17817_v51  ;;  %v3824_v49 = vrot.slane %v3822_v48, 1 }
 0x20a   :  { %v2372_v59 = vmax.f32 %v2244_v41, 0.0  ;;  %v2246_v42 = vadd.f32 %v17309_v8, %v2107_v3  ;;  %6049 = vmatprep.mubr.bf16.mxu0 %v17843_v46  ;;  %v12889_v40 = vcombine.high %v3122_v26, %v17847_v37  ;;  %v17915_v43 = vcombine.high %v17873_v60, %v2863_v11 }
 0x20b   :  { %v2869_v56 = vsel %vm17330_vm13, %v2867_v20, %v2868_v4  ;;  %v2870_v38 = vrot.slane %v2868_v4, 4  ;;  %v2373_v24 = vmax.f32 %v2245_v18, 0.0  ;;  %v3825_v58 = vsel %vm421_vm1, %v3820_v31, %v3824_v49 }
 0x20c   :  { %21424 = vst [vmem:[#allocation30_spill] sm:$0xff] %v17915_v43  ;;  %v13807_v16 = vpack.c.bf16 %v2372_v59, %v2371_v22  ;;  %v2374_v63 = vmax.f32 %v2246_v42, 0.0  ;;  %v1895_v48 = vpop.f32.mrb[80].mxu0  ;;  %v3849_v21 = vshll.u32 %v12889_v40, 16  ;;  %v3847_v41 = vshrl.u32 %v12889_v40, 16  ;;  %v15268_v59 = vld [vmem:[#allocation3 + $0x178] sm:$0xff]  }
 0x20d   :  { %6339 = vmatmul.mubr.bf16.gmra.mrb[40].mxu1 %v3825_v58  ;;  %v2108_v3 = vmul.f32 %v17299_v50, %v1895_v48  ;;  %v1897_v35 = vpop.f32.mrb[81].mxu0  ;;  %v21155_v29 = vshll.u32 %v17915_v43, 16  ;;  %v17923_v46 = vcombine.low %v3122_v26, %v17847_v37  ;;  %v17926_v20 = vcombine.low %v17873_v60, %v2863_v11 }
 0x20e   :  { %v2871_v4 = vrot.slane %v13807_v16, 7  ;;  %v13808_v18 = vpack.c.bf16 %v2374_v63, %v2373_v24  ;;  %v2109_v31 = vmul.f32 %v17303_v9, %v1897_v35  ;;  %v1899_v22 = vpop.f32.mrb[82].mxu0  ;;  %v3851_v49 = vrot.slane %v3849_v21, 1  ;;  %6506 = vmatpush1.bf16.msra.mxu1 %v15268_v59 }
 0x20f   :  { %21425 = vst [vmem:[#allocation31_spill] sm:$0xff] %v17926_v20  ;;  %v2247_v42 = vadd.f32 %v17307_v17, %v2108_v3  ;;  %v2110_v58 = vmul.f32 %v17299_v50, %v1899_v22  ;;  %v1901_v48 = vpop.f32.mrb[83].mxu0  ;;  %v3856_v51 = vrot.slane %v21155_v29, 1  ;;  %v3835_v26 = vshrl.u32 %v17923_v46, 16  ;;  %6764 = vmatprep.subr.bf16.mxu1 %v21325_v10 }
 0x210   :  { %v17936_v60 = vsel %vm17330_vm13, %v2870_v38, %v2871_v4  ;;  %v2873_v11 = vrot.slane %v2871_v4, 4  ;;  %v2874_v24 = vrot.slane %v13808_v18, 7  ;;  %v2248_v35 = vadd.f32 %v17309_v8, %v2109_v31 }
 0x211   :  { %v2375_v16 = vmax.f32 %v2247_v42, 0.0  ;;  %v2249_v63 = vadd.f32 %v17307_v17, %v2110_v58  ;;  %v2111_v21 = vmul.f32 %v17303_v9, %v1901_v48  ;;  %6050 = vmatmul.mubr.bf16.gmra.mrb[188].mxu0 %v17854_v28  ;;  %v3852_v3 = vor.u32 %v3851_v49, %v3847_v41 }
 0x212   :  { %v17945_v22 = vsel %vm17330_vm13, %v2873_v11, %v2874_v24  ;;  %v2876_v38 = vrot.slane %v2874_v24, 4  ;;  %v2376_v4 = vmax.f32 %v2248_v35, 0.0  ;;  %6057 = vmatprep.mubr.bf16.mxu0 %v12889_v40  ;;  %v3837_v18 = vshll.u32 %v17923_v46, 16 }
 0x213   :  { %v2377_v31 = vmax.f32 %v2249_v63, 0.0  ;;  %v2250_v59 = vadd.f32 %v17309_v8, %v2111_v21  ;;  %v3857_v42 = vsel %vm421_vm1, %v3852_v3, %v3856_v51  ;;  %v21158_v58 = vshll.u32 %v17926_v20, 16 }
 0x214   :  { %3062 = vst [vmem:[#allocation2 + $0x160] sm:$0x11] %v2876_v38  ;;  %v13809_v41 = vpack.c.bf16 %v2376_v4, %v2375_v16  ;;  %6346 = vmatprep.mubr.bf16.mxu1 %v3857_v42  ;;  %v3839_v49 = vrot.slane %v3837_v18, 1  ;;  %v1905_v48 = vpop.f32.mrb[84].mxu0  ;;  %v17952_v11 = vcombine.high %v17905_v54, %v2869_v56  ;;  %v21166_v24 = vshrl.u32 %v17915_v43, 16 }
 0x215   :  { %v2378_v40 = vmax.f32 %v2250_v59, 0.0  ;;  %v3844_v35 = vrot.slane %v21158_v58, 1  ;;  %v2112_v63 = vmul.f32 %v17299_v50, %v1905_v48  ;;  %v1907_v21 = vpop.f32.mrb[85].mxu0  ;;  %v17959_v3 = vcombine.low %v17905_v54, %v2869_v56 }
 0x216   :  { %21426 = vst [vmem:[#allocation32_spill] sm:$0xff] %v17952_v11  ;;  %v2877_v38 = vrot.slane %v13809_v41, 7  ;;  %v3840_v16 = vor.u32 %v3839_v49, %v3835_v26  ;;  %v2113_v4 = vmul.f32 %v17303_v9, %v1907_v21  ;;  %v1909_v18 = vpop.f32.mrb[86].mxu0  ;;  %v3868_v42 = vor.u32 %v21166_v24, %v3856_v51 }
 0x217   :  { %21427 = vst [vmem:[#allocation33_spill] sm:$0xff] %v17959_v3  ;;  %v13810_v29 = vpack.c.bf16 %v2378_v40, %v2377_v31  ;;  %v2251_v59 = vadd.f32 %v17307_v17, %v2112_v63  ;;  %v2114_v37 = vmul.f32 %v17299_v50, %v1909_v18  ;;  %v1911_v58 = vpop.f32.mrb[87].mxu0  ;;  %v21162_v48 = vshll.u32 %v17952_v11, 16 }
 0x218   :  { %v2878_v28 = vrot.slane %v2877_v38, 4  ;;  %3063 = vst [vmem:[#allocation2 + $0x168] sm:$0xee] %v2877_v38  ;;  %v3845_v54 = vsel %vm421_vm1, %v3840_v16, %v3844_v35  ;;  %v2252_v56 = vadd.f32 %v17309_v8, %v2113_v4  ;;  %v2115_v26 = vmul.f32 %v17303_v9, %v1911_v58 }
 0x219   :  { %v2879_v41 = vrot.slane %v13810_v29, 7  ;;  %6347 = vmatmul.mubr.bf16.gmra.mrb[44].mxu1 %v3845_v54  ;;  %v2379_v49 = vmax.f32 %v2251_v59, 0.0  ;;  %v2253_v51 = vadd.f32 %v17307_v17, %v2114_v37  ;;  %6058 = vmatmul.mubr.bf16.gmra.mrb[192].mxu0 %v17923_v46  ;;  %v3872_v31 = vrot.slane %v21162_v48, 1 }
 0x21a   :  { %v2380_v40 = vmax.f32 %v2252_v56, 0.0  ;;  %v2254_v63 = vadd.f32 %v17309_v8, %v2115_v26  ;;  %6065 = vmatprep.mubr.bf16.mxu0 %v17915_v43  ;;  %v21163_v21 = vshrl.u32 %v17926_v20, 16  ;;  %v21161_v38 = vshll.u32 %v17959_v3, 16 }
 0x21b   :  { %v17980_v29 = vsel %vm17330_vm13, %v2878_v28, %v2879_v41  ;;  %v2881_v58 = vrot.slane %v2879_v41, 4  ;;  %v2381_v37 = vmax.f32 %v2253_v51, 0.0  ;;  %v3873_v46 = vsel %vm421_vm1, %v3868_v42, %v3872_v31 }
 0x21c   :  { %21428 = vst [vmem:[#allocation34_spill] sm:$0xff] %v17980_v29  ;;  %3064 = vst [vmem:[#allocation2 + $0x170] sm:$0xff] %v17980_v29  ;;  %v13811_v16 = vpack.c.bf16 %v2380_v40, %v2379_v49  ;;  %v2382_v4 = vmax.f32 %v2254_v63, 0.0  ;;  %6354 = vmatprep.mubr.bf16.mxu1 %v3873_v46  ;;  %v3860_v18 = vor.u32 %v21163_v21, %v3844_v35  ;;  %v3864_v59 = vrot.slane %v21161_v38, 1  ;;  %v1915_v54 = vpop.f32.mrb[88].mxu0 }
 0x21d   :  { %7931 = vst [vmem:[#allocation2 + $0x170] sm:$0x2] %v21325_v10  ;;  %v2116_v28 = vmul.f32 %v17299_v50, %v1915_v54  ;;  %v1917_v56 = vpop.f32.mrb[89].mxu0  ;;  %v17992_v42 = vcombine.high %v17936_v60, %v17945_v22  ;;  %v21165_v26 = vshrl.u32 %v17952_v11, 16  ;;  %v17997_v41 = vcombine.low %v17936_v60, %v17945_v22 }
 0x21e   :  { %v2882_v35 = vrot.slane %v13811_v16, 7  ;;  %v13812_v49 = vpack.c.bf16 %v2382_v4, %v2381_v37  ;;  %v3865_v51 = vsel %vm421_vm1, %v3860_v18, %v3864_v59  ;;  %v2117_v40 = vmul.f32 %v17303_v9, %v1917_v56  ;;  %v1919_v63 = vpop.f32.mrb[90].mxu0  ;;  %v3158_v56 = vld [vmem:[#allocation2 + $0x160] sm:$0x11] }
 0x21f   :  { %21429 = vst [vmem:[#allocation35_spill] sm:$0xff] %v17992_v42  ;;  %21430 = vst [vmem:[#allocation36_spill] sm:$0xff] %v17997_v41  ;;  %v2255_v46 = vadd.f32 %v17307_v17, %v2116_v28  ;;  %v2118_v54 = vmul.f32 %v17299_v50, %v1919_v63  ;;  %v1921_v38 = vpop.f32.mrb[91].mxu0  ;;  %v3884_v48 = vor.u32 %v21165_v26, %v3872_v31  ;;  %v21164_v21 = vshll.u32 %v17992_v42, 16 }
 0x220   :  { %v18008_v60 = vsel %vm17330_vm13, %v2881_v58, %v2882_v35  ;;  %v2884_v22 = vrot.slane %v2882_v35, 4  ;;  %v2885_v37 = vrot.slane %v13812_v49, 7  ;;  %v2256_v16 = vadd.f32 %v17309_v8, %v2117_v40 }
 0x221   :  { %6355 = vmatmul.mubr.bf16.gmra.mrb[48].mxu1 %v3865_v51  ;;  %v2383_v4 = vmax.f32 %v2255_v46, 0.0  ;;  %v2257_v18 = vadd.f32 %v17307_v17, %v2118_v54  ;;  %v2119_v28 = vmul.f32 %v17303_v9, %v1921_v38  ;;  %6066 = vmatmul.mubr.bf16.gmra.mrb[196].mxu0 %v17926_v20  ;;  %v3888_v31 = vrot.slane %v21164_v21, 1 }
 0x222   :  { %v18018_v58 = vsel %vm17330_vm13, %v2884_v22, %v2885_v37  ;;  %v2887_v35 = vrot.slane %v2885_v37, 4  ;;  %v2384_v49 = vmax.f32 %v2256_v16, 0.0  ;;  %6073 = vmatprep.mubr.bf16.mxu0 %v17952_v11  ;;  %v21169_v51 = vshrl.u32 %v17959_v3, 16 }
 0x223   :  { %v2385_v40 = vmax.f32 %v2257_v18, 0.0  ;;  %v2258_v63 = vadd.f32 %v17309_v8, %v2119_v28  ;;  %v3889_v38 = vsel %vm421_vm1, %v3884_v48, %v3888_v31  ;;  %v21172_v46 = vshll.u32 %v17997_v41, 16 }
 0x224   :  { %v13813_v54 = vpack.c.bf16 %v2384_v49, %v2383_v4  ;;  %6362 = vmatprep.mubr.bf16.mxu1 %v3889_v38  ;;  %v3876_v21 = vor.u32 %v21169_v51, %v3864_v59  ;;  %v1925_v22 = vpop.f32.mrb[92].mxu0  ;;  %v18027_v26 = vcombine.high %v3158_v56, %v3158_v56  ;;  %v21175_v37 = vshrl.u32 %v17992_v42, 16 }
 0x225   :  { %v2386_v16 = vmax.f32 %v2258_v63, 0.0  ;;  %v3880_v18 = vrot.slane %v21172_v46, 1  ;;  %v2120_v28 = vmul.f32 %v17299_v50, %v1925_v22  ;;  %v1927_v24 = vpop.f32.mrb[93].mxu0  ;;  %v18033_v48 = vcombine.low %v3158_v56, %v3158_v56 }
 0x226   :  { %21431 = vst [vmem:[#allocation37_spill] sm:$0xff] %v18027_v26  ;;  %v2888_v11 = vrot.slane %v13813_v54, 7  ;;  %v3900_v4 = vor.u32 %v21175_v37, %v3888_v31  ;;  %v3902_v59 = vshll.u32 %v18027_v26, 16  ;;  %v2121_v49 = vmul.f32 %v17303_v9, %v1927_v24  ;;  %v1929_v38 = vpop.f32.mrb[94].mxu0 }
 0x227   :  { %21432 = vst [vmem:[#allocation38_spill] sm:$0xff] %v18033_v48  ;;  %v13814_v51 = vpack.c.bf16 %v2386_v16, %v2385_v40  ;;  %v3881_v63 = vsel %vm421_vm1, %v3876_v21, %v3880_v18  ;;  %v2259_v20 = vadd.f32 %v17307_v17, %v2120_v28  ;;  %v2122_v46 = vmul.f32 %v17299_v50, %v1929_v38  ;;  %v1931_v22 = vpop.f32.mrb[95].mxu0  ;;  %v3130_v16 = vld [vmem:[#allocation2 + $0x168] sm:$0xff] }
 0x228   :  { %v18044_v56 = vsel %vm17330_vm13, %v2887_v35, %v2888_v11  ;;  %v2890_v54 = vrot.slane %v2888_v11, 4  ;;  %v3904_v43 = vrot.slane %v3902_v59, 1  ;;  %v2260_v31 = vadd.f32 %v17309_v8, %v2121_v49 }
 0x229   :  { %v2891_v37 = vrot.slane %v13814_v51, 7  ;;  %6363 = vmatmul.mubr.bf16.gmra.mrb[52].mxu1 %v3881_v63  ;;  %v2387_v24 = vmax.f32 %v2259_v20, 0.0  ;;  %v2261_v40 = vadd.f32 %v17307_v17, %v2122_v46  ;;  %v2123_v21 = vmul.f32 %v17303_v9, %v1931_v22  ;;  %6074 = vmatmul.mubr.bf16.gmra.mrb[200].mxu0 %v17959_v3 }
 0x22a   :  { %v3905_v28 = vsel %vm421_vm1, %v3900_v4, %v3904_v43  ;;  %v2388_v38 = vmax.f32 %v2260_v31, 0.0  ;;  %6081 = vmatprep.mubr.bf16.mxu0 %v17992_v42  ;;  %v21178_v11 = vshrl.u32 %v17997_v41, 16  ;;  %v3894_v35 = vshll.u32 %v18033_v48, 16 }
 0x22b   :  { %v18056_v51 = vsel %vm17330_vm13, %v2890_v54, %v2891_v37  ;;  %v2893_v20 = vrot.slane %v2891_v37, 4  ;;  %6370 = vmatprep.mubr.bf16.mxu1 %v3905_v28  ;;  %v2389_v46 = vmax.f32 %v2261_v40, 0.0  ;;  %v2262_v59 = vadd.f32 %v17309_v8, %v2123_v21 }
 0x22c   :  { %v13815_v49 = vpack.c.bf16 %v2388_v38, %v2387_v24  ;;  %v3892_v43 = vor.u32 %v21178_v11, %v3880_v18  ;;  %v3896_v4 = vrot.slane %v3894_v35, 1  ;;  %v1935_v63 = vpop.f32.mrb[96].mxu0  ;;  %v12897_v22 = vcombine.high %v3130_v16, %v17980_v29 }
 0x22d   :  { %v2390_v31 = vmax.f32 %v2262_v59, 0.0  ;;  %v2124_v48 = vmul.f32 %v17299_v50, %v1935_v63  ;;  %v1937_v26 = vpop.f32.mrb[97].mxu0  ;;  %v18065_v54 = vcombine.high %v18008_v60, %v18018_v58  ;;  %v12896_v37 = vcombine.low %v3130_v16, %v17980_v29 }
 0x22e   :  { %v2894_v40 = vrot.slane %v13815_v49, 7  ;;  %v3897_v24 = vsel %vm421_vm1, %v3892_v43, %v3896_v4  ;;  %v2125_v21 = vmul.f32 %v17303_v9, %v1937_v26  ;;  %v1939_v18 = vpop.f32.mrb[98].mxu0  ;;  %v3921_v28 = vshll.u32 %v12897_v22, 16 }
 0x22f   :  { %21433 = vst [vmem:[#allocation39_spill] sm:$0xff] %v18065_v54  ;;  %v13816_v38 = vpack.c.bf16 %v2390_v31, %v2389_v46  ;;  %v2263_v35 = vadd.f32 %v17307_v17, %v2124_v48  ;;  %v2126_v59 = vmul.f32 %v17299_v50, %v1939_v18  ;;  %v1941_v63 = vpop.f32.mrb[99].mxu0  ;;  %v3919_v11 = vshrl.u32 %v12897_v22, 16 }
 0x230   :  { %v18074_v42 = vsel %vm17330_vm13, %v2893_v20, %v2894_v40  ;;  %v2896_v3 = vrot.slane %v2894_v40, 4  ;;  %v2264_v16 = vadd.f32 %v17309_v8, %v2125_v21  ;;  %v2127_v49 = vmul.f32 %v17303_v9, %v1941_v63 }
 0x231   :  { %v2897_v43 = vrot.slane %v13816_v38, 7  ;;  %6371 = vmatmul.mubr.bf16.gmra.mrb[56].mxu1 %v3897_v24  ;;  %v2391_v26 = vmax.f32 %v2263_v35, 0.0  ;;  %v2265_v46 = vadd.f32 %v17307_v17, %v2126_v59  ;;  %6082 = vmatmul.mubr.bf16.gmra.mrb[204].mxu0 %v17997_v41  ;;  %v3923_v48 = vrot.slane %v3921_v28, 1 }
 0x232   :  { %v2392_v4 = vmax.f32 %v2264_v16, 0.0  ;;  %v2266_v31 = vadd.f32 %v17309_v8, %v2127_v49  ;;  %6089 = vmatprep.mubr.bf16.mxu0 %v12897_v22  ;;  %v21183_v20 = vshll.u32 %v18065_v54, 16  ;;  %v18084_v40 = vcombine.low %v18008_v60, %v18018_v58 }
 0x233   :  { %v18088_v21 = vsel %vm17330_vm13, %v2896_v3, %v2897_v43  ;;  %v2899_v24 = vrot.slane %v2897_v43, 4  ;;  %v2393_v18 = vmax.f32 %v2265_v46, 0.0  ;;  %v3924_v38 = vor.u32 %v3923_v48, %v3919_v11 }
 0x234   :  { %21434 = vst [vmem:[#allocation40_spill] sm:$0xff] %v18084_v40  ;;  %v13817_v35 = vpack.c.bf16 %v2392_v4, %v2391_v26  ;;  %v2394_v59 = vmax.f32 %v2266_v31, 0.0  ;;  %v3928_v28 = vrot.slane %v21183_v20, 1  ;;  %v3907_v63 = vshrl.u32 %v12896_v37, 16  ;;  %v1945_v22 = vpop.f32.mrb[100].mxu0 }
 0x235   :  { %3071 = vst [vmem:[#allocation2 + $0x1a8] sm:$0x11] %v2899_v24  ;;  %v3909_v16 = vshll.u32 %v12896_v37, 16  ;;  %v21189_v49 = vshll.u32 %v18084_v40, 16  ;;  %v2128_v60 = vmul.f32 %v17299_v50, %v1945_v22  ;;  %v1947_v58 = vpop.f32.mrb[101].mxu0  ;;  %v18096_v3 = vcombine.high %v18044_v56, %v18056_v51 }
 0x236   :  { %v2900_v43 = vrot.slane %v13817_v35, 7  ;;  %v13818_v11 = vpack.c.bf16 %v2394_v59, %v2393_v18  ;;  %v3929_v26 = vsel %vm421_vm1, %v3924_v38, %v3928_v28  ;;  %v2129_v46 = vmul.f32 %v17303_v9, %v1947_v58  ;;  %v1949_v48 = vpop.f32.mrb[102].mxu0 }
 0x237   :  { %21435 = vst [vmem:[#allocation41_spill] sm:$0xff] %v18096_v3  ;;  %6378 = vmatprep.mubr.bf16.mxu1 %v3929_v26  ;;  %v3911_v4 = vrot.slane %v3909_v16, 1  ;;  %v3916_v31 = vrot.slane %v21189_v49, 1  ;;  %v2267_v24 = vadd.f32 %v17307_v17, %v2128_v60  ;;  %v2130_v22 = vmul.f32 %v17299_v50, %v1949_v48  ;;  %v1951_v20 = vpop.f32.mrb[103].mxu0 }
 0x238   :  { %v2901_v29 = vrot.slane %v2900_v43, 4  ;;  %3072 = vst [vmem:[#allocation2 + $0x1b0] sm:$0xee] %v2900_v43  ;;  %v2902_v41 = vrot.slane %v13818_v11, 7  ;;  %v2268_v18 = vadd.f32 %v17309_v8, %v2129_v46  ;;  %v2131_v38 = vmul.f32 %v17303_v9, %v1951_v20 }
 0x239   :  { %v3912_v35 = vor.u32 %v3911_v4, %v3907_v63  ;;  %v2395_v59 = vmax.f32 %v2267_v24, 0.0  ;;  %v2269_v58 = vadd.f32 %v17307_v17, %v2130_v22  ;;  %6090 = vmatmul.mubr.bf16.gmra.mrb[208].mxu0 %v12896_v37  ;;  %v21190_v16 = vshrl.u32 %v18065_v54, 16 }
 0x23a   :  { %v18110_v60 = vsel %vm17330_vm13, %v2901_v29, %v2902_v41  ;;  %v2904_v26 = vrot.slane %v2902_v41, 4  ;;  %v2396_v48 = vmax.f32 %v2268_v18, 0.0  ;;  %v2270_v43 = vadd.f32 %v17309_v8, %v2131_v38  ;;  %6097 = vmatprep.mubr.bf16.mxu0 %v18065_v54 }
 0x23b   :  { %21436 = vst [vmem:[#allocation42_spill] sm:$0xff] %v18110_v60  ;;  %3073 = vst [vmem:[#allocation2 + $0x1b8] sm:$0xff] %v18110_v60  ;;  %v3917_v20 = vsel %vm421_vm1, %v3912_v35, %v3916_v31  ;;  %v2397_v63 = vmax.f32 %v2269_v58, 0.0  ;;  %v3940_v37 = vor.u32 %v21190_v16, %v3928_v28  ;;  %v21188_v11 = vshll.u32 %v18096_v3, 16 }
 0x23c   :  { %7932 = vst [vmem:[#allocation2 + $0x1b8] sm:$0x2] %v21325_v10  ;;  %6379 = vmatmul.mubr.bf16.gmra.mrb[60].mxu1 %v3917_v20  ;;  %v13819_v29 = vpack.c.bf16 %v2396_v48, %v2395_v59  ;;  %v2398_v41 = vmax.f32 %v2270_v43, 0.0  ;;  %v18122_v46 = vcombine.low %v18044_v56, %v18056_v51  ;;  %v21192_v4 = vshrl.u32 %v18084_v40, 16  ;;  %v1955_v24 = vpop.f32.mrb[104].mxu0 }
 0x23d   :  { %v3944_v22 = vrot.slane %v21188_v11, 1  ;;  %v2132_v18 = vmul.f32 %v17299_v50, %v1955_v24  ;;  %v1957_v28 = vpop.f32.mrb[105].mxu0  ;;  %v18130_v38 = vcombine.high %v18074_v42, %v18088_v21  ;;  %v21195_v35 = vshrl.u32 %v18096_v3, 16 }
 0x23e   :  { %21437 = vst [vmem:[#allocation43_spill] sm:$0xff] %v18122_v46  ;;  %v2905_v59 = vrot.slane %v13819_v29, 7  ;;  %v13820_v58 = vpack.c.bf16 %v2398_v41, %v2397_v63  ;;  %v3932_v56 = vor.u32 %v21192_v4, %v3916_v31  ;;  %v21191_v51 = vshll.u32 %v18122_v46, 16  ;;  %v1959_v48 = vpop.f32.mrb[106].mxu0 }
 0x23f   :  { %21438 = vst [vmem:[#allocation44_spill] sm:$0xff] %v18130_v38  ;;  %v3945_v43 = vsel %vm421_vm1, %v3940_v37, %v3944_v22  ;;  %v2271_v20 = vadd.f32 %v17307_v17, %v2132_v18  ;;  %v2133_v24 = vmul.f32 %v17303_v9, %v1957_v28  ;;  %v2134_v11 = vmul.f32 %v17299_v50, %v1959_v48  ;;  %v1961_v49 = vpop.f32.mrb[107].mxu0  ;;  %v3159_v48 = vld [vmem:[#allocation2 + $0x1a8] sm:$0x11] }
 0x240   :  { %v18142_v16 = vsel %vm17330_vm13, %v2904_v26, %v2905_v59  ;;  %v2907_v63 = vrot.slane %v2905_v59, 4  ;;  %v2908_v29 = vrot.slane %v13820_v58, 7  ;;  %6386 = vmatprep.mubr.bf16.mxu1 %v3945_v43  ;;  %v3936_v31 = vrot.slane %v21191_v51, 1 }
 0x241   :  { %v2399_v41 = vmax.f32 %v2271_v20, 0.0  ;;  %v2272_v37 = vadd.f32 %v17309_v8, %v2133_v24  ;;  %v2273_v18 = vadd.f32 %v17307_v17, %v2134_v11  ;;  %v2135_v28 = vmul.f32 %v17303_v9, %v1961_v49  ;;  %6098 = vmatmul.mubr.bf16.gmra.mrb[212].mxu0 %v18084_v40 }
 0x242   :  { %v18152_v26 = vsel %vm17330_vm13, %v2907_v63, %v2908_v29  ;;  %v2910_v59 = vrot.slane %v2908_v29, 4  ;;  %v3937_v58 = vsel %vm421_vm1, %v3932_v56, %v3936_v31  ;;  %6105 = vmatprep.mubr.bf16.mxu0 %v18096_v3  ;;  %v3956_v43 = vor.u32 %v21195_v35, %v3944_v22 }
 0x243   :  { %v2400_v20 = vmax.f32 %v2272_v37, 0.0  ;;  %v2401_v24 = vmax.f32 %v2273_v18, 0.0  ;;  %v2274_v11 = vadd.f32 %v17309_v8, %v2135_v28  ;;  %v21200_v49 = vshll.u32 %v18130_v38, 16 }
 0x244   :  { %6387 = vmatmul.mubr.bf16.gmra.mrb[64].mxu1 %v3937_v58  ;;  %v18162_v51 = vcombine.low %v18074_v42, %v18088_v21  ;;  %v21201_v63 = vshrl.u32 %v18122_v46, 16  ;;  %v1965_v29 = vpop.f32.mrb[108].mxu0  ;;  %v18165_v56 = vcombine.high %v3159_v48, %v3159_v48 }
 0x245   :  { %v13821_v3 = vpack.c.bf16 %v2400_v20, %v2399_v41  ;;  %v2402_v22 = vmax.f32 %v2274_v11, 0.0  ;;  %v3960_v37 = vrot.slane %v21200_v49, 1  ;;  %v2136_v18 = vmul.f32 %v17299_v50, %v1965_v29  ;;  %v1967_v28 = vpop.f32.mrb[109].mxu0 }
 0x246   :  { %21439 = vst [vmem:[#allocation45_spill] sm:$0xff] %v18162_v51  ;;  %21440 = vst [vmem:[#allocation46_spill] sm:$0xff] %v18165_v56  ;;  %v3948_v58 = vor.u32 %v21201_v63, %v3936_v31  ;;  %v21203_v42 = vshll.u32 %v18162_v51, 16  ;;  %v3974_v21 = vshll.u32 %v18165_v56, 16  ;;  %v2137_v35 = vmul.f32 %v17303_v9, %v1967_v28  ;;  %v1969_v40 = vpop.f32.mrb[110].mxu0 }
 0x247   :  { %v2911_v54 = vrot.slane %v13821_v3, 7  ;;  %v13822_v4 = vpack.c.bf16 %v2402_v22, %v2401_v24  ;;  %v3961_v41 = vsel %vm421_vm1, %v3956_v43, %v3960_v37  ;;  %v2275_v20 = vadd.f32 %v17307_v17, %v2136_v18  ;;  %v1971_v11 = vpop.f32.mrb[111].mxu0  ;;  %v3138_v22 = vld [vmem:[#allocation2 + $0x1b0] sm:$0xff] }
 0x248   :  { %6394 = vmatprep.mubr.bf16.mxu1 %v3961_v41  ;;  %v3952_v29 = vrot.slane %v21203_v42, 1  ;;  %v21441_v31 = vshrl.u32 %v18130_v38, 16  ;;  %v3976_v63 = vrot.slane %v3974_v21, 1  ;;  %v2276_v56 = vadd.f32 %v17309_v8, %v2137_v35 }
 0x249   :  { %v18185_v28 = vsel %vm17330_vm13, %v2910_v59, %v2911_v54  ;;  %v2913_v3 = vrot.slane %v2911_v54, 4  ;;  %v2914_v24 = vrot.slane %v13822_v4, 7  ;;  %v2403_v43 = vmax.f32 %v2275_v20, 0.0  ;;  %6106 = vmatmul.mubr.bf16.gmra.mrb[216].mxu0 %v18122_v46 }
 0x24a   :  { %v3972_v49 = vor.u32 %v21441_v31, %v3960_v37  ;;  %v3953_v18 = vsel %vm421_vm1, %v3948_v58, %v3952_v29  ;;  %v2404_v42 = vmax.f32 %v2276_v56, 0.0  ;;  %v2138_v37 = vmul.f32 %v17299_v50, %v1969_v40  ;;  %6113 = vmatprep.mubr.bf16.mxu0 %v18130_v38 }
 0x24b   :  { %v18194_v35 = vsel %vm17330_vm13, %v2913_v3, %v2914_v24  ;;  %v2916_v59 = vrot.slane %v2914_v24, 4  ;;  %v2139_v54 = vmul.f32 %v17303_v9, %v1971_v11  ;;  %v18197_v4 = vcombine.low %v3159_v48, %v3159_v48 }
 0x24c   :  { %v3977_v41 = vsel %vm421_vm1, %v3972_v49, %v3976_v63  ;;  %6395 = vmatmul.mubr.bf16.gmra.mrb[68].mxu1 %v3953_v18  ;;  %v13823_v21 = vpack.c.bf16 %v2404_v42, %v2403_v43  ;;  %v2277_v58 = vadd.f32 %v17307_v17, %v2138_v37  ;;  %v21209_v49 = vshrl.u32 %v18162_v51, 16  ;;  %v1975_v63 = vpop.f32.mrb[112].mxu0 }
 0x24d   :  { %21442 = vst [vmem:[#allocation47_spill] sm:$0xff] %v18197_v4  ;;  %v12905_v40 = vcombine.high %v3138_v22, %v18110_v60  ;;  %6402 = vmatprep.mubr.bf16.mxu1 %v3977_v41  ;;  %v2278_v56 = vadd.f32 %v17309_v8, %v2139_v54  ;;  %v3966_v20 = vshll.u32 %v18197_v4, 16  ;;  %v2140_v31 = vmul.f32 %v17299_v50, %v1975_v63  ;;  %v1977_v3 = vpop.f32.mrb[113].mxu0 }
 0x24e   :  { %v18207_v48 = vcombine.high %v18142_v16, %v18152_v26  ;;  %v2917_v42 = vrot.slane %v13823_v21, 7  ;;  %v2405_v11 = vmax.f32 %v2277_v58, 0.0  ;;  %v3964_v24 = vor.u32 %v21209_v49, %v3952_v29  ;;  %v1979_v18 = vpop.f32.mrb[114].mxu0 }
 0x24f   :  { %v2141_v43 = vmul.f32 %v17303_v9, %v1977_v3  ;;  %v2406_v41 = vmax.f32 %v2278_v56, 0.0  ;;  %v3968_v37 = vrot.slane %v3966_v20, 1  ;;  %v2279_v54 = vadd.f32 %v17307_v17, %v2140_v31  ;;  %v1981_v63 = vpop.f32.mrb[115].mxu0 }
 0x250   :  { %21443 = vst [vmem:[#allocation48_spill] sm:$0xff] %v18207_v48  ;;  %v2142_v4 = vmul.f32 %v17299_v50, %v1979_v18  ;;  %v18216_v38 = vsel %vm17330_vm13, %v2916_v59, %v2917_v42  ;;  %v2919_v46 = vrot.slane %v2917_v42, 4  ;;  %v2143_v58 = vmul.f32 %v17303_v9, %v1981_v63 }
 0x251   :  { %v2280_v21 = vadd.f32 %v17309_v8, %v2141_v43  ;;  %v13824_v29 = vpack.c.bf16 %v2406_v41, %v2405_v11  ;;  %v3969_v3 = vsel %vm421_vm1, %v3964_v24, %v3968_v37  ;;  %v2407_v49 = vmax.f32 %v2279_v54, 0.0  ;;  %6114 = vmatmul.mubr.bf16.gmra.mrb[220].mxu0 %v18162_v51 }
 0x252   :  { %v2281_v56 = vadd.f32 %v17307_v17, %v2142_v4  ;;  %v2282_v31 = vadd.f32 %v17309_v8, %v2143_v58  ;;  %v3993_v18 = vshll.u32 %v12905_v40, 16  ;;  %6121 = vmatprep.mubr.bf16.mxu0 %v12905_v40  ;;  %v3991_v59 = vshrl.u32 %v12905_v40, 16 }
 0x253   :  { %v2408_v20 = vmax.f32 %v2280_v21, 0.0  ;;  %v2920_v25 = vrot.slane %v13824_v29, 7  ;;  %v21212_v43 = vshll.u32 %v18207_v48, 16  ;;  %v12904_v63 = vcombine.low %v3138_v22, %v18110_v60 }
 0x254   :  { %v2409_v42 = vmax.f32 %v2281_v56, 0.0  ;;  %6403 = vmatmul.mubr.bf16.gmra.mrb[72].mxu1 %v3969_v3  ;;  %v2410_v24 = vmax.f32 %v2282_v31, 0.0  ;;  %v3995_v41 = vrot.slane %v3993_v18, 1  ;;  %v18228_v4 = vcombine.low %v18142_v16, %v18152_v26  ;;  %v1985_v37 = vpop.f32.mrb[116].mxu0 }
 0x255   :  { %v13825_v11 = vpack.c.bf16 %v2408_v20, %v2407_v49  ;;  %v18232_v54 = vsel %vm17330_vm13, %v2919_v46, %v2920_v25  ;;  %v2922_v40 = vrot.slane %v2920_v25, 4  ;;  %v4000_v21 = vrot.slane %v21212_v43, 1  ;;  %v1987_v29 = vpop.f32.mrb[117].mxu0 }
 0x256   :  { %21444 = vst [vmem:[#allocation49_spill] sm:$0xff] %v18228_v4  ;;  %v3979_v58 = vshrl.u32 %v12904_v63, 16  ;;  %v13826_v3 = vpack.c.bf16 %v2410_v24, %v2409_v42  ;;  %v3996_v49 = vor.u32 %v3995_v41, %v3991_v59  ;;  %v3981_v56 = vshll.u32 %v12904_v63, 16  ;;  %v1989_v20 = vpop.f32.mrb[118].mxu0 }
 0x257   :  { %v2923_v22 = vrot.slane %v13825_v11, 7  ;;  %3080 = vst [vmem:[#allocation2 + $0x1f0] sm:$0x11] %v2922_v40  ;;  %v21215_v16 = vshll.u32 %v18228_v4, 16  ;;  %v2144_v26 = vmul.f32 %v17299_v50, %v1985_v37  ;;  %v2145_v31 = vmul.f32 %v17303_v9, %v1987_v29  ;;  %v1991_v25 = vpop.f32.mrb[119].mxu0 }
 0x258   :  { %v2146_v46 = vmul.f32 %v17299_v50, %v1989_v20  ;;  %v2925_v43 = vrot.slane %v13826_v3, 7  ;;  %v4001_v60 = vsel %vm421_vm1, %v3996_v49, %v4000_v21  ;;  %v3983_v11 = vrot.slane %v3981_v56, 1 }
 0x259   :  { %v2924_v18 = vrot.slane %v2923_v22, 4  ;;  %3081 = vst [vmem:[#allocation2 + $0x1f8] sm:$0xee] %v2923_v22  ;;  %6410 = vmatprep.mubr.bf16.mxu1 %v4001_v60  ;;  %v3988_v59 = vrot.slane %v21215_v16, 1  ;;  %v2283_v42 = vadd.f32 %v17307_v17, %v2144_v26  ;;  %v2284_v24 = vadd.f32 %v17309_v8, %v2145_v31  ;;  %6122 = vmatmul.mubr.bf16.gmra.mrb[224].mxu0 %v12904_v63 }
 0x25a   :  { %v2285_v41 = vadd.f32 %v17307_v17, %v2146_v46  ;;  %v2927_v40 = vrot.slane %v2925_v43, 4  ;;  %v3984_v29 = vor.u32 %v3983_v11, %v3979_v58  ;;  %v2147_v22 = vmul.f32 %v17303_v9, %v1991_v25  ;;  %6129 = vmatprep.mubr.bf16.mxu0 %v18207_v48 }
 0x25b   :  { %v18248_v37 = vsel %vm17330_vm13, %v2924_v18, %v2925_v43  ;;  %v2411_v60 = vmax.f32 %v2283_v42, 0.0  ;;  %v2412_v3 = vmax.f32 %v2284_v24, 0.0  ;;  %v18255_v56 = vcombine.high %v18185_v28, %v18194_v35 }
 0x25c   :  { %21445 = vst [vmem:[#allocation50_spill] sm:$0xff] %v18248_v37  ;;  %3082 = vst [vmem:[#allocation2 + $0x200] sm:$0xff] %v18248_v37  ;;  %v2413_v49 = vmax.f32 %v2285_v41, 0.0  ;;  %v3989_v63 = vsel %vm421_vm1, %v3984_v29, %v3988_v59  ;;  %v2286_v43 = vadd.f32 %v17309_v8, %v2147_v22  ;;  %v21217_v58 = vshrl.u32 %v18207_v48, 16  ;;  %v1995_v26 = vpop.f32.mrb[120].mxu0 }
 0x25d   :  { %21446 = vst [vmem:[#allocation51_spill] sm:$0xff] %v18255_v56  ;;  %7933 = vst [vmem:[#allocation2 + $0x200] sm:$0x2] %v21325_v10  ;;  %v18263_v20 = vcombine.low %v18185_v28, %v18194_v35  ;;  %6411 = vmatmul.mubr.bf16.gmra.mrb[76].mxu1 %v3989_v63  ;;  %v13827_v31 = vpack.c.bf16 %v2412_v3, %v2411_v60  ;;  %v21216_v46 = vshll.u32 %v18255_v56, 16  ;;  %v21219_v25 = vshrl.u32 %v18228_v4, 16  ;;  %v1997_v11 = vpop.f32.mrb[121].mxu0 }
 0x25e   :  { %v2148_v18 = vmul.f32 %v17299_v50, %v1995_v26  ;;  %v2414_v42 = vmax.f32 %v2286_v43, 0.0  ;;  %v4012_v24 = vor.u32 %v21217_v58, %v4000_v21  ;;  %v2149_v29 = vmul.f32 %v17303_v9, %v1997_v11  ;;  %v1999_v28 = vpop.f32.mrb[122].mxu0 }
 0x25f   :  { %v21218_v41 = vshll.u32 %v18263_v20, 16  ;;  %v2928_v35 = vrot.slane %v13827_v31, 7  ;;  %v4016_v22 = vrot.slane %v21216_v46, 1  ;;  %v4004_v60 = vor.u32 %v21219_v25, %v3988_v59  ;;  %v2001_v63 = vpop.f32.mrb[123].mxu0 }
 0x260   :  { %v2287_v3 = vadd.f32 %v17307_v17, %v2148_v18  ;;  %v13828_v26 = vpack.c.bf16 %v2414_v42, %v2413_v49  ;;  %v2288_v21 = vadd.f32 %v17309_v8, %v2149_v29  ;;  %v2150_v16 = vmul.f32 %v17299_v50, %v1999_v28 }
 0x261   :  { %v4008_v43 = vrot.slane %v21218_v41, 1  ;;  %v18283_v31 = vsel %vm17330_vm13, %v2927_v40, %v2928_v35  ;;  %v2930_v11 = vrot.slane %v2928_v35, 4  ;;  %v4017_v46 = vsel %vm421_vm1, %v4012_v24, %v4016_v22  ;;  %6130 = vmatmul.mubr.bf16.gmra.mrb[228].mxu0 %v18228_v4 }
 0x262   :  { %v2415_v58 = vmax.f32 %v2287_v3, 0.0  ;;  %v2931_v59 = vrot.slane %v13828_v26, 7  ;;  %6418 = vmatprep.mubr.bf16.mxu1 %v4017_v46  ;;  %v2416_v18 = vmax.f32 %v2288_v21, 0.0  ;;  %v2289_v42 = vadd.f32 %v17307_v17, %v2150_v16  ;;  %6137 = vmatprep.mubr.bf16.mxu0 %v18255_v56  ;;  %v3160_v46 = vld [vmem:[#allocation2 + $0x1f0] sm:$0x11] }
 0x263   :  { %v4009_v49 = vsel %vm421_vm1, %v4004_v60, %v4008_v43  ;;  %v2151_v29 = vmul.f32 %v17303_v9, %v2001_v63  ;;  %v18293_v40 = vcombine.high %v18216_v38, %v18232_v54  ;;  %v21222_v24 = vshrl.u32 %v18255_v56, 16 }
 0x264   :  { %v18298_v28 = vcombine.low %v18216_v38, %v18232_v54  ;;  %v2932_v35 = vsel %vm17330_vm13, %v2930_v11, %v2931_v59  ;;  %v2933_v60 = vrot.slane %v2931_v59, 4  ;;  %v13829_v16 = vpack.c.bf16 %v2416_v18, %v2415_v58  ;;  %v2005_v26 = vpop.f32.mrb[124].mxu0 }
 0x265   :  { %21447 = vst [vmem:[#allocation52_spill] sm:$0xff] %v18293_v40  ;;  %v2417_v3 = vmax.f32 %v2289_v42, 0.0  ;;  %6419 = vmatmul.mubr.bf16.gmra.mrb[80].mxu1 %v4009_v49  ;;  %v2290_v63 = vadd.f32 %v17309_v8, %v2151_v29  ;;  %v4028_v21 = vor.u32 %v21222_v24, %v4016_v22  ;;  %v21227_v41 = vshll.u32 %v18293_v40, 16  ;;  %v2007_v38 = vpop.f32.mrb[125].mxu0 }
 0x266   :  { %21448 = vst [vmem:[#allocation53_spill] sm:$0xff] %v18298_v28  ;;  %v21228_v25 = vshrl.u32 %v18263_v20, 16  ;;  %v2934_v54 = vrot.slane %v13829_v16, 7  ;;  %v21231_v4 = vshll.u32 %v18298_v28, 16  ;;  %v2152_v11 = vmul.f32 %v17299_v50, %v2005_v26  ;;  %v2009_v58 = vpop.f32.mrb[126].mxu0 }
 0x267   :  { %v18309_v59 = vcombine.high %v3160_v46, %v3160_v46  ;;  %v2418_v18 = vmax.f32 %v2290_v63, 0.0  ;;  %v4032_v49 = vrot.slane %v21227_v41, 1  ;;  %v21232_v42 = vshrl.u32 %v18293_v40, 16  ;;  %v2011_v29 = vpop.f32.mrb[127].mxu0 }
 0x268   :  { %v4020_v22 = vor.u32 %v21228_v25, %v4008_v43  ;;  %v18318_v16 = vsel %vm17330_vm13, %v2933_v60, %v2934_v54  ;;  %v2936_v24 = vrot.slane %v2934_v54, 4  ;;  %v4024_v26 = vrot.slane %v21231_v4, 1  ;;  %v3146_v25 = vld [vmem:[#allocation2 + $0x1f8] sm:$0xff] }
 0x269   :  { %v2291_v56 = vadd.f32 %v17307_v17, %v2152_v11  ;;  %v13830_v63 = vpack.c.bf16 %v2418_v18, %v2417_v3  ;;  %v4033_v48 = vsel %vm421_vm1, %v4028_v21, %v4032_v49  ;;  %v4044_v41 = vor.u32 %v21232_v42, %v4032_v49  ;;  %6138 = vmatmul.mubr.bf16.gmra.mrb[232].mxu0 %v18263_v20 }
 0x26a   :  { %v4046_v43 = vshll.u32 %v18309_v59, 16  ;;  %6426 = vmatprep.mubr.bf16.mxu1 %v4033_v48  ;;  %v4025_v60 = vsel %vm421_vm1, %v4020_v22, %v4024_v26  ;;  %v2153_v51 = vmul.f32 %v17303_v9, %v2007_v38  ;;  %v2154_v4 = vmul.f32 %v17299_v50, %v2009_v58  ;;  %6145 = vmatprep.mubr.bf16.mxu0 %v18293_v40 }
 0x26b   :  { %v2419_v54 = vmax.f32 %v2291_v56, 0.0  ;;  %v2937_v3 = vrot.slane %v13830_v63, 7  ;;  %v2155_v11 = vmul.f32 %v17303_v9, %v2011_v29  ;;  %v18333_v18 = vcombine.low %v3160_v46, %v3160_v46 }
 0x26c   :  { %v4048_v21 = vrot.slane %v4046_v43, 1  ;;  %v2292_v49 = vadd.f32 %v17309_v8, %v2153_v51  ;;  %v2293_v42 = vadd.f32 %v17307_v17, %v2154_v4  ;;  %v21245_v48 = vshrl.u32 %v18298_v28, 16 }
 0x26d   :  { %v12913_v56 = vcombine.high %v3146_v25, %v18248_v37  ;;  %v2938_v38 = vsel %vm17330_vm13, %v2936_v24, %v2937_v3  ;;  %6427 = vmatmul.mubr.bf16.gmra.mrb[84].mxu1 %v4025_v60  ;;  %v2294_v58 = vadd.f32 %v17309_v8, %v2155_v11  ;;  %v4038_v17 = vshll.u32 %v18333_v18, 16 }
 0x26e   :  { %v4049_v50 = vsel %vm421_vm1, %v4044_v41, %v4048_v21  ;;  %v2420_v9 = vmax.f32 %v2292_v49, 0.0  ;;  %v2421_v46 = vmax.f32 %v2293_v42, 0.0  ;;  %v4036_v51 = vor.u32 %v21245_v48, %v4024_v26  ;;  %v15270_v48 = vld [vmem:[#allocation3 + $0x180] sm:$0xff]  }
 0x26f   :  { %6434 = vmatprep.mubr.bf16.mxu1 %v4049_v50  ;;  %v2422_v4 = vmax.f32 %v2294_v58, 0.0  ;;  %v4065_v22 = vshll.u32 %v12913_v56, 16  ;;  %v18347_v29 = vcombine.high %v18283_v31, %v2932_v35  ;;  %v4063_v63 = vshrl.u32 %v12913_v56, 16 }
 0x270   :  { %v13831_v24 = vpack.c.bf16 %v2420_v9, %v2419_v54  ;;  %v4040_v43 = vrot.slane %v4038_v17, 1  ;;  %v12912_v41 = vcombine.low %v3146_v25, %v18248_v37  ;;  %v18351_v8 = vcombine.low %v18283_v31, %v2932_v35 }
 0x271   :  { %21449 = vst [vmem:[#allocation54_spill] sm:$0xff] %v18347_v29  ;;  %v13832_v60 = vpack.c.bf16 %v2422_v4, %v2421_v46  ;;  %6146 = vmatmul.mubr.bf16.gmra.mrb[236].mxu0 %v18298_v28  ;;  %v4067_v42 = vrot.slane %v4065_v22, 1  ;;  %v21243_v26 = vshll.u32 %v18347_v29, 16  ;;  %v18356_v21 = vcombine.high %v18318_v16, %v2938_v38 }
 0x272   :  { %21450 = vst [vmem:[#allocation55_spill] sm:$0xff] %v18351_v8  ;;  %v2939_v11 = vrot.slane %v2937_v3, 4  ;;  %v2940_v49 = vrot.slane %v13831_v24, 7  ;;  %v4041_v50 = vsel %vm421_vm1, %v4036_v51, %v4040_v43  ;;  %6153 = vmatprep.mubr.bf16.mxu0 %v12913_v56  ;;  %v4053_v54 = vshll.u32 %v12912_v41, 16 }
 0x273   :  { %21451 = vst [vmem:[#allocation56_spill] sm:$0xff] %v18356_v21  ;;  %v2943_v58 = vrot.slane %v13832_v60, 7  ;;  %v4068_v25 = vor.u32 %v4067_v42, %v4063_v63  ;;  %v4072_v31 = vrot.slane %v21243_v26, 1  ;;  %v21240_v17 = vshll.u32 %v18351_v8, 16 }
 0x274   :  { %v2941_v35 = vsel %vm17330_vm13, %v2939_v11, %v2940_v49  ;;  %v2942_v9 = vrot.slane %v2940_v49, 4  ;;  %v4055_v46 = vrot.slane %v4053_v54, 1  ;;  %v21236_v51 = vshll.u32 %v18356_v21, 16 }
 0x275   :  { %v2945_v4 = vrot.slane %v2943_v58, 4  ;;  %6435 = vmatmul.mubr.bf16.gmra.mrb[88].mxu1 %v4041_v50  ;;  %v4073_v3 = vsel %vm421_vm1, %v4068_v25, %v4072_v31  ;;  %v4051_v22 = vshrl.u32 %v12912_v41, 16  ;;  %v18369_v63 = vcombine.low %v18318_v16, %v2938_v38 }
 0x276   :  { %v2944_v56 = vsel %vm17330_vm13, %v2942_v9, %v2943_v58  ;;  %6442 = vmatprep.mubr.bf16.mxu1 %v4073_v3  ;;  %v21244_v24 = vshrl.u32 %v18347_v29, 16  ;;  %v4088_v43 = vrot.slane %v21236_v51, 1  ;;  %v4060_v11 = vrot.slane %v21240_v17, 1  ;;  %v3162_v51 = vld [vmem:[#allocation2] sm:$0xee] }
 0x277   :  { %21452 = vst [vmem:[#allocation57_spill] sm:$0xff] %v18369_v63  ;;  %3089 = vst [vmem:[#allocation2 + $0x238] sm:$0x11] %v2945_v4  ;;  %v18374_v60 = vcombine.high %v2941_v35, %v2944_v56  ;;  %v4056_v42 = vor.u32 %v4055_v46, %v4051_v22  ;;  %v18378_v49 = vcombine.low %v2941_v35, %v2944_v56  ;;  %v21234_v54 = vshll.u32 %v18369_v63, 16 }
 0x278   :  { %v4084_v36 = vor.u32 %v21244_v24, %v4072_v31  ;;  %v21239_v25 = vshrl.u32 %v18356_v21, 16  ;;  %v21242_v31 = vshrl.u32 %v18351_v8, 16  ;;  %v3154_v24 = vld [vmem:[#allocation2 + $0x40] sm:$0x11] }
 0x279   :  { %21453 = vst [vmem:[#allocation58_spill] sm:$0xff] %v18374_v60  ;;  %21454 = vst [vmem:[#allocation59_spill] sm:$0xff] %v18378_v49  ;;  %6154 = vmatmul.mubr.bf16.gmra.mrb[240].mxu0 %v12912_v41  ;;  %v21233_v38 = vshll.u32 %v18374_v60, 16  ;;  %v4061_v50 = vsel %vm421_vm1, %v4056_v42, %v4060_v11  ;;  %v4080_v9 = vrot.slane %v21234_v54, 1  ;;  %v21235_v42 = vshll.u32 %v18378_v49, 16 }
 0x27a   :  { %6161 = vmatprep.mubr.bf16.mxu0 %v18347_v29  ;;  %v4089_v16 = vsel %vm421_vm1, %v4084_v36, %v4088_v43  ;;  %v4100_v46 = vor.u32 %v21239_v25, %v4088_v43  ;;  %v4076_v4 = vor.u32 %v21242_v31, %v4060_v11  ;;  %v3561_v36 = vshll.u32 %v17405_v55, 16 }
 0x27b   :  { %v4104_v41 = vrot.slane %v21233_v38, 1  ;;  %v21237_v43 = vshrl.u32 %v18374_v60, 16  ;;  %v21238_v11 = vshrl.u32 %v18369_v63, 16  ;;  %v21246_v54 = vshll.u32 %v17371_v2, 16 }
 0x27c   :  { %v4081_v22 = vsel %vm421_vm1, %v4076_v4, %v4080_v9  ;;  %v3563_v4 = vrot.slane %v3561_v36, 1  ;;  %v18428_v25 = vcombine.high %v3162_v51, %v17343_v0 }
 0x27d   :  { %6443 = vmatmul.mubr.bf16.gmra.mrb[92].mxu1 %v4061_v50  ;;  %v4105_v3 = vsel %vm421_vm1, %v4100_v46, %v4104_v41  ;;  %v4096_v46 = vrot.slane %v21235_v42, 1  ;;  %v4116_v38 = vor.u32 %v21237_v43, %v4104_v41  ;;  %v3549_v41 = vshll.u32 %v17426_v34, 16 }
 0x27e   :  { %6450 = vmatprep.mubr.bf16.mxu1 %v4089_v16  ;;  %v3161_v58 = vld [vmem:[#allocation2 + $0x238] sm:$0x11]  ;;  %v3568_v43 = vrot.slane %v21246_v54, 1  ;;  %21457 = vst [vmem:[#allocation62_spill] sm:$0xff] %v18428_v25 }
 0x27f   :  { %v18390_v35 = vcombine.high %v3161_v58, %v3161_v58  ;;  %v18406_v16 = vcombine.low %v3161_v58, %v3161_v58  ;;  %v4092_v58 = vor.u32 %v21238_v11, %v4080_v9  ;;  %v21241_v9 = vshrl.u32 %v18378_v49, 16 }
 0x281   :  { %21455 = vst [vmem:[#allocation60_spill] sm:$0xff] %v18390_v35  ;;  %6162 = vmatmul.mubr.bf16.gmra.mrb[244].mxu0 %v18351_v8  ;;  %v4118_v56 = vshll.u32 %v18390_v35, 16  ;;  %21456 = vst [vmem:[#allocation61_spill] sm:$0xff] %v18406_v16  ;;  %v4097_v42 = vsel %vm421_vm1, %v4092_v58, %v4096_v46  ;;  %v4230_v58 = vrot.slane %v17371_v2, 1  ;;  %v15274_v35 = vld [vmem:[#allocation3 + $0x190] sm:$0xff]  }
 0x282   :  { %6169 = vmatprep.mubr.bf16.mxu0 %v18356_v21 }
 0x283   :  { %v4120_v50 = vrot.slane %v4118_v56, 1 }
 0x285   :  { %6451 = vmatmul.mubr.bf16.gmra.mrb[96].mxu1 %v4081_v22  ;;  %v4121_v56 = vsel %vm421_vm1, %v4116_v38, %v4120_v50  ;;  %v3559_v22 = vshrl.u32 %v17405_v55, 16  ;;  %v4108_v55 = vor.u32 %v21241_v9, %v4096_v46  ;;  %v3551_v38 = vrot.slane %v3549_v41, 1 }
 0x286   :  { %6458 = vmatprep.mubr.bf16.mxu1 %v4105_v3  ;;  %v4110_v3 = vshll.u32 %v18406_v16, 16  ;;  %v21249_v50 = vshll.u32 %v17373_v27, 16 }
 0x287   :  { %v3564_v36 = vor.u32 %v3563_v4, %v3559_v22  ;;  %v21248_v4 = vshll.u32 %v17394_v23, 16  ;;  %v4229_v22 = vrot.slane %v18428_v25, 1  ;;  %v3633_v25 = vshll.u32 %v17488_v5, 16 }
 0x288   :  { %v4112_v11 = vrot.slane %v4110_v3, 1  ;;  %v3547_v3 = vshrl.u32 %v17426_v34, 16  ;;  %v3556_v41 = vrot.slane %v21249_v50, 1  ;;  %v3594_v50 = vshrl.u32 %v17394_v23, 16 }
 0x289   :  { %6170 = vmatmul.mubr.bf16.gmra.mrb[248].mxu0 %v18369_v63  ;;  %v4231_v9 = vsel %vm814_vm3, %v4229_v22, %v4230_v58  ;;  %v3584_v34 = vrot.slane %v21248_v4, 1  ;;  %v4234_v22 = vrot.slane %v17394_v23, 1  ;;  %v18467_v4 = vcombine.high %v3154_v24, %v3154_v24 }
 0x28a   :  { %6177 = vmatprep.mubr.bf16.mxu0 %v18374_v60  ;;  %v3552_v46 = vor.u32 %v3551_v38, %v3547_v3  ;;  %v4227_v38 = vrot.slane %v17373_v27, 1 }
 0x28c   :  { %v3557_v3 = vsel %vm421_vm1, %v3552_v46, %v3556_v41  ;;  %v3570_v46 = vshrl.u32 %v17373_v27, 16 }
 0x28d   :  { %6459 = vmatmul.mubr.bf16.gmra.mrb[100].mxu1 %v4097_v42  ;;  %v3569_v42 = vsel %vm421_vm1, %v3564_v36, %v3568_v43  ;;  %v18446_v36 = vcombine.low %v3162_v51, %v17343_v0  ;;  %v3574_v51 = vshll.u32 %v17396_v39, 16 }
 0x28e   :  { %6466 = vmatprep.mubr.bf16.mxu1 %v4121_v56  ;;  %v4113_v56 = vsel %vm421_vm1, %v4108_v55, %v4112_v11  ;;  %v21247_v11 = vshrl.u32 %v17371_v2, 16  ;;  %v4482_v16 = vrot.slane %v3570_v46, 1  ;;  %v4502_v2 = vrot.slane %v3594_v50, 1 }
 0x28f   :  { %21459 = vst [vmem:[#allocation64_spill] sm:$0xff] %v18446_v36 }
 0x291   :  { %6178 = vmatmul.mubr.bf16.gmra.mrb[252].mxu0 %v18378_v49  ;;  %v4499_v49 = vrot.slane %v3574_v51, 2 }
 0x292   :  { %6218 = vmatprep.mubr.bf16.mxu0 %v3569_v42 }
 0x294   :  { %v18440_v17 = vpop.f32.mrb[148].mxu0 }
 0x295   :  { %21458 = vst [vmem:[#allocation63_spill] sm:$0xff] %v18440_v17  ;;  %6467 = vmatmul.mubr.bf16.gmra.mrb[104].mxu1 %v4113_v56  ;;  %v5973_v31 = vpop.f32.mrb[149].mxu0  ;;  %v3580_v56 = vor.u32 %v21247_v11, %v3568_v43  ;;  %v3576_v11 = vrot.slane %v3574_v51, 1  ;;  %v15271_v43 = vld [vmem:[#allocation3 + $0x188] sm:$0xff]  }
 0x296   :  { %6507 = vmatprep.mubr.bf16.mxu1 %v4231_v9  ;;  %v18451_v55 = vpop.f32.mrb[150].mxu0  ;;  %v4226_v31 = vrot.slane %v18446_v36, 1  ;;  %v3598_v9 = vshll.u32 %v17417_v1, 16  ;;  %v3596_v36 = vor.u32 %v3594_v50, %v3584_v34 }
 0x297   :  { %21460 = vst [vmem:[#allocation65_spill] sm:$0xff] %v18451_v55  ;;  %v5976_v42 = vpop.f32.mrb[151].mxu0  ;;  %v3585_v26 = vsel %vm421_vm1, %v3580_v56, %v3584_v34  ;;  %v21464_v34 = vshll.u32 %v17373_v27, 16 }
 0x298   :  { %v4228_v42 = vsel %vm814_vm3, %v4226_v31, %v4227_v38  ;;  %v3600_v55 = vrot.slane %v3598_v9, 1  ;;  %v3572_v31 = vor.u32 %v3570_v46, %v3556_v41  ;;  %v3614_v41 = vshll.u32 %v18467_v4, 16 }
 0x299   :  { %6219 = vmatmul.mubr.bf16.vlgmr.msra.gmra.mrb[128].mxu0 %v3557_v3  ;;  %v4235_v3 = vsel %vm814_vm3, %v4230_v58, %v4234_v22  ;;  %v3590_v58 = vshll.u32 %v17419_v33, 16  ;;  %v4483_v17 = vrot.slane %v21464_v34, 2  ;;  %v4511_v34 = vrot.slane %v3598_v9, 2 }
 0x29a   :  { %6226 = vmatprep.mubr.bf16.mxu0 %v3585_v26  ;;  %v3616_v27 = vrot.slane %v3614_v41, 1 }
 0x29b   :  { %v18500_v60 = vor.u32 %v4483_v17, %v4482_v16  ;;  %v4236_v16 = vrot.slane %v17419_v33, 1 }
 0x29c   :  { %v18464_v54 = vpop.f32.mrb[152].mxu0 }
 0x29d   :  { %21461 = vst [vmem:[#allocation66_spill] sm:$0xff] %v18464_v54  ;;  %6508 = vmatmul.mubr.bf16.vlgmr.msra.gmra.mrb[108].mxu1 %v4228_v42  ;;  %v5981_v56 = vpop.f32.mrb[153].mxu0  ;;  %v3586_v54 = vshrl.u32 %v17396_v39, 16  ;;  %v3610_v42 = vshrl.u32 %v17417_v1, 16 }
 0x29e   :  { %6765 = vmatpush1.bf16.msra.mxu1 %v15270_v48  ;;  %6515 = vmatprep.mubr.bf16.mxu1 %v4235_v3  ;;  %v18471_v26 = vpop.f32.mrb[154].mxu0  ;;  %v21463_v56 = vrot.slane %v17396_v39, 1  ;;  %v3577_v3 = vsel %vm421_vm1, %v3572_v31, %v3576_v11 }
 0x29f   :  { %21462 = vst [vmem:[#allocation67_spill] sm:$0xff] %v18471_v26  ;;  %v5984_v0 = vpop.f32.mrb[155].mxu0  ;;  %6766 = vmatprep.subr.bf16.mxu1 %v21325_v10  ;;  %v21466_v26 = vrot.slane %v17417_v1, 1 }
 0x2a0   :  { %v4233_v48 = vsel %vm814_vm3, %v4227_v38, %v21463_v56  ;;  %v3601_v0 = vsel %vm421_vm1, %v3596_v36, %v3600_v55  ;;  %v21465_v38 = vshll.u32 %v17394_v23, 16  ;;  %v4498_v56 = vrot.slane %v3586_v54, 1 }
 0x2a1   :  { %6227 = vmatmul.mubr.bf16.gmra.mrb[132].mxu0 %v3577_v3  ;;  %v4239_v46 = vsel %vm814_vm3, %v4234_v22, %v21466_v26  ;;  %v3592_v3 = vrot.slane %v3590_v58, 1  ;;  %v4510_v36 = vrot.slane %v3610_v42, 1  ;;  %v21468_v23 = vshrl.u32 %v17419_v33, 16 }
 0x2a2   :  { %6234 = vmatprep.mubr.bf16.mxu0 %v3601_v0  ;;  %6767 = vmatpush1.bf16.msra.mxu1 %v15271_v43  ;;  %v4503_v31 = vrot.slane %v21465_v38, 2  ;;  %v18496_v0 = vcombine.low %v3154_v24, %v3154_v24  ;;  %v4500_v43 = vor.u32 %v4499_v49, %v4498_v56  ;;  %v4507_v26 = vrot.slane %v3590_v58, 2  ;;  %v15275_v24 = vld [vmem:[#allocation3 + $0x198] sm:$0xff]  }
 0x2a3   :  { %6768 = vmatprep.subr.bf16.mxu1 %v21325_v10  ;;  %v4506_v38 = vrot.slane %v21468_v23, 1  ;;  %v18504_v22 = vor.u32 %v4511_v34, %v4510_v36  ;;  %v3612_v49 = vor.u32 %v3610_v42, %v3600_v55  ;;  %v3635_v58 = vrot.slane %v3633_v25, 1 }
 0x2a4   :  { %v18494_v50 = vpop.f32.mrb[156].mxu0  ;;  %v18502_v63 = vor.u32 %v4503_v31, %v4502_v2  ;;  %v18511_v23 = vsel %vm951_vm2, %v18500_v60, %v4500_v43  ;;  %v3631_v31 = vshrl.u32 %v17488_v5, 16  ;;  %v3621_v56 = vshll.u32 %v17533_v32, 16 }
 0x2a5   :  { %21467 = vst [vmem:[#allocation68_spill] sm:$0xff] %v18494_v50  ;;  %6516 = vmatmul.mubr.bf16.gmra.mrb[112].mxu1 %v4233_v48  ;;  %v5989_v51 = vpop.f32.mrb[157].mxu0  ;;  %v3588_v50 = vor.u32 %v3586_v54, %v3576_v11  ;;  %v18518_v17 = vor.u32 %v4507_v26, %v4506_v38  ;;  %v4242_v11 = vrot.slane %v18467_v4, 1  ;;  %v3617_v55 = vsel %vm421_vm1, %v3612_v49, %v3616_v27  ;;  %v15276_v48 = vld [vmem:[#allocation3 + $0x1a0] sm:$0xff]   ;;  %v3163_v27 = vld [vmem:[#allocation2 + $0x48] sm:$0xee] }
 0x2a6   :  { %6523 = vmatprep.mubr.bf16.mxu1 %v4239_v46  ;;  %v18506_v9 = vpop.f32.mrb[158].mxu0  ;;  %6769 = vmatpush1.bf16.msra.mxu1 %v15274_v35  ;;  %v18516_v2 = vsel %vm951_vm2, %v18502_v63, %v18504_v22  ;;  %v3606_v35 = vshll.u32 %v18496_v0, 16  ;;  %v21470_v46 = vrot.slane %v17396_v39, 1  ;;  %v21472_v34 = vrot.slane %v17417_v1, 1 }
 0x2a7   :  { %21469 = vst [vmem:[#allocation69_spill] sm:$0xff] %v18506_v9  ;;  %v5992_v41 = vpop.f32.mrb[159].mxu0  ;;  %6770 = vmatprep.subr.bf16.mxu1 %v21325_v10  ;;  %v3593_v54 = vsel %vm421_vm1, %v3588_v50, %v3592_v3  ;;  %v18527_v42 = vsel %vm951_vm2, %v4500_v43, %v18518_v17  ;;  %v3636_v38 = vor.u32 %v3635_v58, %v3631_v31  ;;  %v21474_v51 = vshrl.u32 %v17419_v33, 16 }
 0x2a8   :  { %v4237_v4 = vsel %vm814_vm3, %v21470_v46, %v4236_v16  ;;  %v3608_v25 = vrot.slane %v3606_v35, 1  ;;  %v4243_v50 = vsel %vm814_vm3, %v21472_v34, %v4242_v11  ;;  %v18545_v41 = vcombine.high %v3163_v27, %v17436_v62  ;;  %v15279_v34 = vld [vmem:[#allocation3 + $0x1b8] sm:$0xff]  }
 0x2a9   :  { %6235 = vmatmul.mubr.bf16.gmra.mrb[136].mxu0 %v3593_v54  ;;  %v3604_v26 = vor.u32 %v21474_v51, %v3592_v3  ;;  %v4240_v54 = vrot.slane %v18496_v0, 1  ;;  %v3623_v11 = vrot.slane %v3621_v56, 1  ;;  %v3641_v58 = vsel %vm421_vm1, %v3636_v38, %v17482_v19 }
 0x2aa   :  { %6242 = vmatprep.mubr.bf16.mxu0 %v3617_v55  ;;  %6771 = vmatpush1.bf16.msra.mxu1 %v15275_v24  ;;  %v15277_v24 = vld [vmem:[#allocation3 + $0x1a8] sm:$0xff]   ;;  %v4248_v55 = vrot.slane %v17459_v30, 1  ;;  %v3619_v3 = vshrl.u32 %v17533_v32, 16  ;;  %v4247_v31 = vrot.slane %v18545_v41, 1  ;;  %v18561_v19 = vcombine.low %v3163_v27, %v17436_v62  ;;  %v15280_v27 = vld [vmem:[#allocation3 + $0x1c0] sm:$0xff]  }
 0x2ab   :  { %6772 = vmatprep.subr.bf16.mxu1 %v21325_v10  ;;  %v3609_v35 = vsel %vm421_vm1, %v3604_v26, %v3608_v25  ;;  %v4241_v0 = vsel %vm814_vm3, %v4236_v16, %v4240_v54  ;;  %v4245_v16 = vrot.slane %v17456_v12, 1  ;;  %v4252_v38 = vrot.slane %v17495_v44, 1 }
 0x2ac   :  { %v18535_v36 = vpop.f32.mrb[160].mxu0  ;;  %v3624_v56 = vor.u32 %v3623_v11, %v3619_v3  ;;  %v4244_v51 = vrot.slane %v18561_v19, 1  ;;  %v4256_v3 = vrot.slane %v17528_v53, 1 }
 0x2ad   :  { %21471 = vst [vmem:[#allocation70_spill] sm:$0xff] %v18535_v36  ;;  %6524 = vmatmul.mubr.bf16.gmra.mrb[116].mxu1 %v4237_v4  ;;  %v5997_v43 = vpop.f32.mrb[161].mxu0  ;;  %v4249_v4 = vsel %vm814_vm3, %v4247_v31, %v4248_v55  ;;  %v3166_v36 = vld [vmem:[#allocation2 + $0x120] sm:$0xee] }
 0x2ae   :  { %6531 = vmatprep.mubr.bf16.mxu1 %v4243_v50  ;;  %v18540_v5 = vpop.f32.mrb[162].mxu0  ;;  %6773 = vmatpush1.bf16.msra.mxu1 %v15276_v48  ;;  %v15278_v48 = vld [vmem:[#allocation3 + $0x1b0] sm:$0xff]   ;;  %v3629_v43 = vsel %vm421_vm1, %v3624_v56, %v17471_v6  ;;  %v4246_v26 = vsel %vm814_vm3, %v4244_v51, %v4245_v16  ;;  %v15281_v6 = vld [vmem:[#allocation3 + $0x1c8] sm:$0xff]   ;;  %vm8267_vm1 = vcmask 1047559  }
 0x2af   :  { %21473 = vst [vmem:[#allocation71_spill] sm:$0xff] %v18540_v5  ;;  %v6000_v49 = vpop.f32.mrb[163].mxu0  ;;  %6774 = vmatprep.subr.bf16.mxu1 %v21325_v10  ;;  %v3164_v51 = vld [vmem:[#allocation2 + $0x90] sm:$0xee] }
 0x2b0   :  { %v4253_v49 = vsel %vm814_vm3, %v4248_v55, %v4252_v38 }
 0x2b1   :  { %6243 = vmatmul.mubr.bf16.gmra.mrb[140].mxu0 %v3609_v35 }
 0x2b2   :  { %6250 = vmatprep.mubr.bf16.mxu0 %v3641_v58  ;;  %6775 = vmatpush1.bf16.msra.mxu1 %v15277_v24  ;;  %v4250_v58 = vrot.slane %v17497_v7, 1 }
 0x2b3   :  { %6776 = vmatprep.subr.bf16.mxu1 %v21325_v10 }
 0x2b4   :  { %v18557_v46 = vpop.f32.mrb[164].mxu0  ;;  %v4251_v31 = vsel %vm814_vm3, %v4245_v16, %v4250_v58 }
 0x2b5   :  { %21475 = vst [vmem:[#allocation72_spill] sm:$0xff] %v18557_v46  ;;  %6532 = vmatmul.mubr.bf16.gmra.mrb[120].mxu1 %v4241_v0  ;;  %v6005_v25 = vpop.f32.mrb[165].mxu0  ;;  %v4257_v0 = vsel %vm814_vm3, %v4252_v38, %v4256_v3 }
 0x2b6   :  { %6539 = vmatprep.mubr.bf16.mxu1 %v4249_v4  ;;  %v18563_v32 = vpop.f32.mrb[166].mxu0  ;;  %6777 = vmatpush1.bf16.msra.mxu1 %v15278_v48  ;;  %v15282_v48 = vld [vmem:[#allocation3 + $0x1d0] sm:$0xff]  }
 0x2b7   :  { %21476 = vst [vmem:[#allocation73_spill] sm:$0xff] %v18563_v32  ;;  %v6008_v50 = vpop.f32.mrb[167].mxu0  ;;  %6778 = vmatprep.subr.bf16.mxu1 %v21325_v10 }
 0x2b8   :  { %v4260_v50 = vrot.slane %v17571_v45, 1  ;;  %v4258_v45 = vrot.slane %v17577_v61, 1 }
 0x2b9   :  { %6251 = vmatmul.mubr.bf16.gmra.mrb[144].mxu0 %v3629_v43 }
 0x2ba   :  { %6779 = vmatpush1.bf16.msra.mxu1 %v15279_v34  ;;  %v4254_v34 = vrot.slane %v17536_v13, 1  ;;  %v4261_v38 = vsel %vm814_vm3, %v4256_v3, %v4260_v50  ;;  %v4263_v50 = vrot.slane %v17615_v47, 1 }
 0x2bb   :  { %6780 = vmatprep.subr.bf16.mxu1 %v21325_v10 }
 0x2bc   :  { %v18573_v24 = vpop.f32.mrb[168].mxu0  ;;  %v4255_v43 = vsel %vm814_vm3, %v4250_v58, %v4254_v34  ;;  %v4259_v3 = vsel %vm814_vm3, %v4254_v34, %v4258_v45  ;;  %v15284_v45 = vld [vmem:[#allocation3 + $0x1e0] sm:$0xff]  }
 0x2bd   :  { %21477 = vst [vmem:[#allocation74_spill] sm:$0xff] %v18573_v24  ;;  %6540 = vmatmul.mubr.bf16.gmra.mrb[124].mxu1 %v4246_v26  ;;  %v6013_v54 = vpop.f32.mrb[169].mxu0  ;;  %v15283_v26 = vld [vmem:[#allocation3 + $0x1d8] sm:$0xff]  }
 0x2be   :  { %6547 = vmatprep.mubr.bf16.mxu1 %v4253_v49  ;;  %v18576_v35 = vpop.f32.mrb[170].mxu0  ;;  %6781 = vmatpush1.bf16.msra.mxu1 %v15280_v27  ;;  %v18598_v54 = vcombine.high %v3164_v51, %v17565_v52 }
 0x2bf   :  { %21478 = vst [vmem:[#allocation75_spill] sm:$0xff] %v18576_v35  ;;  %v6016_v11 = vpop.f32.mrb[171].mxu0  ;;  %6782 = vmatprep.subr.bf16.mxu1 %v21325_v10 }
 0x2c0   :  { %v4266_v11 = vrot.slane %v17604_v14, 1  ;;  %v4265_v58 = vrot.slane %v18598_v54, 1 }
 0x2c2   :  { %6783 = vmatpush1.bf16.msra.mxu1 %v15281_v6 }
 0x2c3   :  { %6784 = vmatprep.subr.bf16.mxu1 %v21325_v10 }
 0x2c4   :  { %v18583_v55 = vpop.f32.mrb[172].mxu0 }
 0x2c5   :  { %21479 = vst [vmem:[#allocation76_spill] sm:$0xff] %v18583_v55  ;;  %6548 = vmatmul.mubr.bf16.gmra.mrb[0].mxu1 %v4251_v31  ;;  %v6021_v56 = vpop.f32.mrb[173].mxu0  ;;  %v4267_v31 = vsel %vm814_vm3, %v4265_v58, %v4266_v11 }
 0x2c6   :  { %6555 = vmatprep.mubr.bf16.mxu1 %v4257_v0  ;;  %v18586_v4 = vpop.f32.mrb[174].mxu0  ;;  %6785 = vmatpush1.bf16.msra.mxu1 %v15282_v48  ;;  %v18609_v56 = vcombine.low %v3164_v51, %v17565_v52 }
 0x2c7   :  { %21480 = vst [vmem:[#allocation77_spill] sm:$0xff] %v18586_v4  ;;  %v6024_v25 = vpop.f32.mrb[175].mxu0  ;;  %6786 = vmatprep.subr.bf16.mxu1 %v21325_v10  ;;  %v21500_v4 = vld [vmem:[#allocation23_spill] sm:$0xff] }
 0x2c8   :  { %v4288_v55 = vrot.slane %v21500_v4, 1 }
 0x2ca   :  { %6787 = vmatpush1.bf16.msra.mxu1 %v15283_v26 }
 0x2cb   :  { %6788 = vmatprep.subr.bf16.mxu1 %v21325_v10 }
 0x2cc   :  { %v18592_v16 = vpop.f32.mrb[176].mxu0 }
 0x2cd   :  { %21481 = vst [vmem:[#allocation78_spill] sm:$0xff] %v18592_v16  ;;  %6556 = vmatmul.mubr.bf16.gmra.mrb[4].mxu1 %v4255_v43  ;;  %v6029_v27 = vpop.f32.mrb[177].mxu0  ;;  %v4270_v43 = vrot.slane %v17644_v57, 1 }
 0x2ce   :  { %6563 = vmatprep.mubr.bf16.mxu1 %v4261_v38  ;;  %v18595_v49 = vpop.f32.mrb[178].mxu0  ;;  %v4262_v38 = vrot.slane %v18609_v56, 1  ;;  %6789 = vmatpush1.bf16.msra.mxu1 %v15284_v45 }
 0x2cf   :  { %21482 = vst [vmem:[#allocation79_spill] sm:$0xff] %v18595_v49  ;;  %v6032_v6 = vpop.f32.mrb[179].mxu0  ;;  %v4271_v26 = vsel %vm814_vm3, %v4266_v11, %v4270_v43  ;;  %6790 = vmatprep.subr.bf16.mxu1 %v21325_v10  ;;  %v3165_v49 = vld [vmem:[#allocation2 + $0xd8] sm:$0xee] }
 0x2d0   :  { %v4264_v34 = vsel %vm814_vm3, %v4262_v38, %v4263_v50 }
 0x2d4   :  { %v18605_v48 = vpop.f32.mrb[180].mxu0 }
 0x2d5   :  { %21483 = vst [vmem:[#allocation80_spill] sm:$0xff] %v18605_v48  ;;  %6564 = vmatmul.mubr.bf16.gmra.mrb[8].mxu1 %v4259_v3  ;;  %v6037_v0 = vpop.f32.mrb[181].mxu0  ;;  %v4268_v3 = vrot.slane %v17671_v15, 1 }
 0x2d6   :  { %6571 = vmatprep.mubr.bf16.mxu1 %v4267_v31  ;;  %v18611_v25 = vpop.f32.mrb[182].mxu0  ;;  %v21487_v31 = vld [vmem:[#allocation16_spill] sm:$0xff] }
 0x2d7   :  { %21484 = vst [vmem:[#allocation81_spill] sm:$0xff] %v18611_v25  ;;  %v6040_v61 = vpop.f32.mrb[183].mxu0  ;;  %v4274_v0 = vrot.slane %v21487_v31, 1 }
 0x2d8   :  { %v4269_v61 = vsel %vm814_vm3, %v4263_v50, %v4268_v3 }
 0x2d9   :  { %v4275_v11 = vsel %vm814_vm3, %v4270_v43, %v4274_v0 }
 0x2dc   :  { %v18617_v27 = vpop.f32.mrb[184].mxu0 }
 0x2dd   :  { %21485 = vst [vmem:[#allocation82_spill] sm:$0xff] %v18617_v27  ;;  %6572 = vmatmul.mubr.bf16.gmra.mrb[12].mxu1 %v4264_v34  ;;  %v6045_v6 = vpop.f32.mrb[185].mxu0 }
 0x2de   :  { %6579 = vmatprep.mubr.bf16.mxu1 %v4271_v26  ;;  %v18620_v51 = vpop.f32.mrb[186].mxu0 }
 0x2df   :  { %21486 = vst [vmem:[#allocation83_spill] sm:$0xff] %v18620_v51  ;;  %v6048_v58 = vpop.f32.mrb[187].mxu0  ;;  %v21491_v51 = vld [vmem:[#allocation19_spill] sm:$0xff] }
 0x2e0   :  { %v21490_v58 = vld [vmem:[#allocation17_spill] sm:$0xff]  ;;  %v4278_v27 = vrot.slane %v21491_v51, 1 }
 0x2e1   :  { %v4272_v45 = vrot.slane %v21490_v58, 1 }
 0x2e2   :  { %v4279_v50 = vsel %vm814_vm3, %v4274_v0, %v4278_v27 }
 0x2e3   :  { %v4273_v25 = vsel %vm814_vm3, %v4268_v3, %v4272_v45  ;;  %v21496_v3 = vld [vmem:[#allocation21_spill] sm:$0xff] }
 0x2e4   :  { %v18626_v38 = vpop.f32.mrb[188].mxu0 }
 0x2e5   :  { %21488 = vst [vmem:[#allocation16_spill] sm:$0xff] %v18626_v38  ;;  %6580 = vmatmul.mubr.bf16.gmra.mrb[16].mxu1 %v4269_v61  ;;  %v6053_v34 = vpop.f32.mrb[189].mxu0  ;;  %v15285_v38 = vld [vmem:[#allocation3 + $0x1e8] sm:$0xff]  }
 0x2e6   :  { %6587 = vmatprep.mubr.bf16.mxu1 %v4275_v11  ;;  %v18629_v26 = vpop.f32.mrb[190].mxu0  ;;  %v21494_v11 = vld [vmem:[#allocation18_spill] sm:$0xff]  ;;  %6791 = vmatpush1.bf16.msra.mxu1 %v15285_v38 }
 0x2e7   :  { %21489 = vst [vmem:[#allocation84_spill] sm:$0xff] %v18629_v26  ;;  %v6056_v6 = vpop.f32.mrb[191].mxu0  ;;  %v18640_v34 = vcombine.high %v3165_v49, %v21494_v11  ;;  %v21495_v26 = vld [vmem:[#allocation20_spill] sm:$0xff]  ;;  %6792 = vmatprep.subr.bf16.mxu1 %v21325_v10 }
 0x2e8   :  { %v4276_v51 = vrot.slane %v21495_v26, 1 }
 0x2ea   :  { %v4277_v27 = vsel %vm814_vm3, %v4272_v45, %v4276_v51 }
 0x2ec   :  { %v18634_v48 = vpop.f32.mrb[192].mxu0 }
 0x2ed   :  { %21492 = vst [vmem:[#allocation17_spill] sm:$0xff] %v18634_v48  ;;  %6588 = vmatmul.mubr.bf16.gmra.mrb[20].mxu1 %v4273_v25  ;;  %v6061_v61 = vpop.f32.mrb[193].mxu0  ;;  %v4284_v48 = vrot.slane %v21496_v3, 1  ;;  %v4283_v25 = vrot.slane %v18640_v34, 1 }
 0x2ee   :  { %6595 = vmatprep.mubr.bf16.mxu1 %v4279_v50  ;;  %v18637_v43 = vpop.f32.mrb[194].mxu0 }
 0x2ef   :  { %21493 = vst [vmem:[#allocation19_spill] sm:$0xff] %v18637_v43  ;;  %v6064_v6 = vpop.f32.mrb[195].mxu0  ;;  %v4285_v50 = vsel %vm814_vm3, %v4283_v25, %v4284_v48  ;;  %v21499_v43 = vld [vmem:[#allocation22_spill] sm:$0xff]  ;;  %v4289_v25 = vsel %vm814_vm3, %v4284_v48, %v4288_v55 }
 0x2f0   :  { %v18651_v6 = vcombine.low %v3165_v49, %v21494_v11  ;;  %v4281_v16 = vrot.slane %v21499_v43, 1  ;;  %v21517_v11 = vld [vmem:[#allocation32_spill] sm:$0xff] }
 0x2f1   :  { %v4306_v52 = vrot.slane %v21517_v11, 1 }
 0x2f2   :  { %v4280_v35 = vrot.slane %v18651_v6, 1 }
 0x2f4   :  { %v18647_v0 = vpop.f32.mrb[196].mxu0  ;;  %v4282_v45 = vsel %vm814_vm3, %v4280_v35, %v4281_v16 }
 0x2f5   :  { %21497 = vst [vmem:[#allocation20_spill] sm:$0xff] %v18647_v0  ;;  %6596 = vmatmul.mubr.bf16.gmra.mrb[24].mxu1 %v4277_v27  ;;  %v6069_v61 = vpop.f32.mrb[197].mxu0  ;;  %v21504_v0 = vld [vmem:[#allocation25_spill] sm:$0xff] }
 0x2f6   :  { %6603 = vmatprep.mubr.bf16.mxu1 %v4285_v50  ;;  %v18653_v38 = vpop.f32.mrb[198].mxu0  ;;  %v15286_v50 = vld [vmem:[#allocation3 + $0x1f0] sm:$0xff]   ;;  %v4292_v24 = vrot.slane %v21504_v0, 1 }
 0x2f7   :  { %21498 = vst [vmem:[#allocation21_spill] sm:$0xff] %v18653_v38  ;;  %v6072_v26 = vpop.f32.mrb[199].mxu0  ;;  %6793 = vmatpush1.bf16.msra.mxu1 %v15286_v50 }
 0x2f8   :  { %v21503_v26 = vld [vmem:[#allocation24_spill] sm:$0xff]  ;;  %6794 = vmatprep.subr.bf16.mxu1 %v21325_v10  ;;  %v4293_v48 = vsel %vm814_vm3, %v4288_v55, %v4292_v24 }
 0x2f9   :  { %v4286_v38 = vrot.slane %v21503_v26, 1 }
 0x2fb   :  { %v4287_v35 = vsel %vm814_vm3, %v4281_v16, %v4286_v38 }
 0x2fc   :  { %v18659_v51 = vpop.f32.mrb[200].mxu0 }
 0x2fd   :  { %21501 = vst [vmem:[#allocation22_spill] sm:$0xff] %v18659_v51  ;;  %6604 = vmatmul.mubr.bf16.gmra.mrb[28].mxu1 %v4282_v45  ;;  %v6077_v27 = vpop.f32.mrb[201].mxu0 }
 0x2fe   :  { %6611 = vmatprep.mubr.bf16.mxu1 %v4289_v25  ;;  %v18662_v49 = vpop.f32.mrb[202].mxu0 }
 0x2ff   :  { %21502 = vst [vmem:[#allocation23_spill] sm:$0xff] %v18662_v49  ;;  %v6080_v61 = vpop.f32.mrb[203].mxu0  ;;  %v21508_v49 = vld [vmem:[#allocation28_spill] sm:$0xff] }
 0x300   :  { %v21507_v61 = vld [vmem:[#allocation27_spill] sm:$0xff]  ;;  %v4296_v51 = vrot.slane %v21508_v49, 1 }
 0x301   :  { %v4290_v50 = vrot.slane %v21507_v61, 1 }
 0x302   :  { %v4297_v16 = vsel %vm814_vm3, %v4292_v24, %v4296_v51 }
 0x303   :  { %v4291_v46 = vsel %vm814_vm3, %v4286_v38, %v4290_v50  ;;  %v21513_v38 = vld [vmem:[#allocation30_spill] sm:$0xff] }
 0x304   :  { %v18668_v32 = vpop.f32.mrb[204].mxu0 }
 0x305   :  { %21505 = vst [vmem:[#allocation24_spill] sm:$0xff] %v18668_v32  ;;  %6612 = vmatmul.mubr.bf16.gmra.mrb[32].mxu1 %v4287_v35  ;;  %v6085_v45 = vpop.f32.mrb[205].mxu0  ;;  %v15287_v32 = vld [vmem:[#allocation3 + $0x1f8] sm:$0xff]  }
 0x306   :  { %6619 = vmatprep.mubr.bf16.mxu1 %v4293_v48  ;;  %v18671_v25 = vpop.f32.mrb[206].mxu0  ;;  %v21511_v48 = vld [vmem:[#allocation26_spill] sm:$0xff]  ;;  %6795 = vmatpush1.bf16.msra.mxu1 %v15287_v32 }
 0x307   :  { %21506 = vst [vmem:[#allocation25_spill] sm:$0xff] %v18671_v25  ;;  %v6088_v27 = vpop.f32.mrb[207].mxu0  ;;  %v18682_v45 = vcombine.high %v3166_v36, %v21511_v48  ;;  %v21512_v25 = vld [vmem:[#allocation29_spill] sm:$0xff]  ;;  %7053 = vmatprep.subr.bf16.mxu1 %v21325_v10 }
 0x308   :  { %v4294_v49 = vrot.slane %v21512_v25, 1 }
 0x30a   :  { %v4295_v24 = vsel %vm814_vm3, %v4290_v50, %v4294_v49 }
 0x30c   :  { %v18676_v5 = vpop.f32.mrb[208].mxu0 }
 0x30d   :  { %21509 = vst [vmem:[#allocation27_spill] sm:$0xff] %v18676_v5  ;;  %6620 = vmatmul.mubr.bf16.gmra.mrb[36].mxu1 %v4291_v46  ;;  %v6093_v35 = vpop.f32.mrb[209].mxu0  ;;  %v4302_v5 = vrot.slane %v21513_v38, 1  ;;  %v4301_v46 = vrot.slane %v18682_v45, 1 }
 0x30e   :  { %6627 = vmatprep.mubr.bf16.mxu1 %v4297_v16  ;;  %v18679_v55 = vpop.f32.mrb[210].mxu0 }
 0x30f   :  { %21510 = vst [vmem:[#allocation28_spill] sm:$0xff] %v18679_v55  ;;  %v6096_v27 = vpop.f32.mrb[211].mxu0  ;;  %v4303_v16 = vsel %vm814_vm3, %v4301_v46, %v4302_v5  ;;  %v21516_v55 = vld [vmem:[#allocation31_spill] sm:$0xff]  ;;  %v4307_v46 = vsel %vm814_vm3, %v4302_v5, %v4306_v52 }
 0x310   :  { %v18693_v27 = vcombine.low %v3166_v36, %v21511_v48  ;;  %v4299_v9 = vrot.slane %v21516_v55, 1 }
 0x312   :  { %v4298_v62 = vrot.slane %v18693_v27, 1 }
 0x314   :  { %v18689_v51 = vpop.f32.mrb[212].mxu0  ;;  %v4300_v50 = vsel %vm814_vm3, %v4298_v62, %v4299_v9 }
 0x315   :  { %21514 = vst [vmem:[#allocation29_spill] sm:$0xff] %v18689_v51  ;;  %6628 = vmatmul.mubr.bf16.gmra.mrb[40].mxu1 %v4295_v24  ;;  %v6101_v35 = vpop.f32.mrb[213].mxu0 }
 0x316   :  { %6635 = vmatprep.mubr.bf16.mxu1 %v4303_v16  ;;  %v18695_v32 = vpop.f32.mrb[214].mxu0  ;;  %v21520_v35 = vld [vmem:[#allocation33_spill] sm:$0xff] }
 0x317   :  { %21515 = vst [vmem:[#allocation30_spill] sm:$0xff] %v18695_v32  ;;  %v6104_v25 = vpop.f32.mrb[215].mxu0  ;;  %v21521_v32 = vld [vmem:[#allocation35_spill] sm:$0xff] }
 0x318   :  { %v4304_v25 = vrot.slane %v21520_v35, 1  ;;  %v4310_v51 = vrot.slane %v21521_v32, 1  ;;  %v3167_v32 = vld [vmem:[#allocation2 + $0x168] sm:$0xee] }
 0x31a   :  { %v4305_v48 = vsel %vm814_vm3, %v4299_v9, %v4304_v25  ;;  %v4311_v62 = vsel %vm814_vm3, %v4306_v52, %v4310_v51 }
 0x31c   :  { %v18701_v49 = vpop.f32.mrb[216].mxu0 }
 0x31d   :  { %21518 = vst [vmem:[#allocation31_spill] sm:$0xff] %v18701_v49  ;;  %6636 = vmatmul.mubr.bf16.gmra.mrb[44].mxu1 %v4300_v50  ;;  %v6109_v24 = vpop.f32.mrb[217].mxu0 }
 0x31e   :  { %6643 = vmatprep.mubr.bf16.mxu1 %v4307_v46  ;;  %v18704_v36 = vpop.f32.mrb[218].mxu0  ;;  %v21524_v46 = vld [vmem:[#allocation36_spill] sm:$0xff] }
 0x31f   :  { %21519 = vst [vmem:[#allocation32_spill] sm:$0xff] %v18704_v36  ;;  %v6112_v16 = vpop.f32.mrb[219].mxu0  ;;  %v4308_v24 = vrot.slane %v21524_v46, 1  ;;  %v21525_v36 = vld [vmem:[#allocation37_spill] sm:$0xff]  ;;  %v21531_v46 = vld [vmem:[#allocation39_spill] sm:$0xff] }
 0x320   :  { %v4314_v16 = vrot.slane %v21525_v36, 1  ;;  %v4320_v36 = vrot.slane %v21531_v46, 1 }
 0x321   :  { %v4309_v1 = vsel %vm814_vm3, %v4304_v25, %v4308_v24 }
 0x322   :  { %v4315_v9 = vsel %vm814_vm3, %v4310_v51, %v4314_v16 }
 0x324   :  { %v18709_v33 = vpop.f32.mrb[220].mxu0 }
 0x325   :  { %21522 = vst [vmem:[#allocation85_spill] sm:$0xff] %v18709_v33  ;;  %6644 = vmatmul.mubr.bf16.gmra.mrb[48].mxu1 %v4305_v48  ;;  %v6117_v49 = vpop.f32.mrb[221].mxu0 }
 0x326   :  { %6651 = vmatprep.mubr.bf16.mxu1 %v4311_v62  ;;  %v18712_v50 = vpop.f32.mrb[222].mxu0  ;;  %v21528_v49 = vld [vmem:[#allocation34_spill] sm:$0xff] }
 0x327   :  { %21523 = vst [vmem:[#allocation86_spill] sm:$0xff] %v18712_v50  ;;  %v6120_v5 = vpop.f32.mrb[223].mxu0  ;;  %v18723_v62 = vcombine.high %v3167_v32, %v21528_v49  ;;  %v21530_v50 = vld [vmem:[#allocation38_spill] sm:$0xff]  ;;  %v18733_v16 = vcombine.low %v3167_v32, %v21528_v49 }
 0x328   :  { %v4312_v33 = vrot.slane %v21530_v50, 1  ;;  %v21535_v50 = vld [vmem:[#allocation40_spill] sm:$0xff] }
 0x329   :  { %21529 = vst [vmem:[#allocation88_spill] sm:$0xff] %v18723_v62  ;;  %v4319_v25 = vrot.slane %v18723_v62, 1  ;;  %21533 = vst [vmem:[#allocation89_spill] sm:$0xff] %v18733_v16  ;;  %v4316_v62 = vrot.slane %v18733_v16, 1 }
 0x32c   :  { %v18717_v39 = vpop.f32.mrb[224].mxu0 }
 0x32d   :  { %21526 = vst [vmem:[#allocation37_spill] sm:$0xff] %v18717_v39  ;;  %6652 = vmatmul.mubr.bf16.gmra.mrb[52].mxu1 %v4309_v1  ;;  %v6125_v48 = vpop.f32.mrb[225].mxu0  ;;  %v4313_v39 = vsel %vm814_vm3, %v4308_v24, %v4312_v33  ;;  %v4321_v1 = vsel %vm814_vm3, %v4319_v25, %v4320_v36 }
 0x32e   :  { %6659 = vmatprep.mubr.bf16.mxu1 %v4315_v9  ;;  %v18720_v52 = vpop.f32.mrb[226].mxu0 }
 0x32f   :  { %21527 = vst [vmem:[#allocation87_spill] sm:$0xff] %v18720_v52  ;;  %v6128_v5 = vpop.f32.mrb[227].mxu0  ;;  %v21536_v52 = vld [vmem:[#allocation41_spill] sm:$0xff] }
 0x330   :  { %v4317_v5 = vrot.slane %v21535_v50, 1  ;;  %v4324_v46 = vrot.slane %v21536_v52, 1 }
 0x332   :  { %v4318_v33 = vsel %vm814_vm3, %v4316_v62, %v4317_v5 }
 0x334   :  { %v18729_v35 = vpop.f32.mrb[228].mxu0 }
 0x335   :  { %21532 = vst [vmem:[#allocation38_spill] sm:$0xff] %v18729_v35  ;;  %6660 = vmatmul.mubr.bf16.gmra.mrb[56].mxu1 %v4313_v39  ;;  %v6133_v51 = vpop.f32.mrb[229].mxu0  ;;  %v4325_v39 = vsel %vm814_vm3, %v4320_v36, %v4324_v46 }
 0x336   :  { %6667 = vmatprep.mubr.bf16.mxu1 %v4321_v1  ;;  %v18735_v9 = vpop.f32.mrb[230].mxu0  ;;  %v21539_v51 = vld [vmem:[#allocation43_spill] sm:$0xff] }
 0x337   :  { %21534 = vst [vmem:[#allocation90_spill] sm:$0xff] %v18735_v9  ;;  %v6136_v48 = vpop.f32.mrb[231].mxu0  ;;  %v21540_v9 = vld [vmem:[#allocation44_spill] sm:$0xff] }
 0x338   :  { %v4322_v48 = vrot.slane %v21539_v51, 1  ;;  %v4328_v35 = vrot.slane %v21540_v9, 1  ;;  %v3168_v9 = vld [vmem:[#allocation2 + $0x1b0] sm:$0xee] }
 0x33a   :  { %v4323_v49 = vsel %vm814_vm3, %v4317_v5, %v4322_v48  ;;  %v4329_v62 = vsel %vm814_vm3, %v4324_v46, %v4328_v35 }
 0x33c   :  { %v18741_v24 = vpop.f32.mrb[232].mxu0 }
 0x33d   :  { %21537 = vst [vmem:[#allocation91_spill] sm:$0xff] %v18741_v24  ;;  %6668 = vmatmul.mubr.bf16.gmra.mrb[60].mxu1 %v4318_v33  ;;  %v6141_v25 = vpop.f32.mrb[233].mxu0 }
 0x33e   :  { %6675 = vmatprep.mubr.bf16.mxu1 %v4325_v39  ;;  %v18744_v32 = vpop.f32.mrb[234].mxu0  ;;  %v21543_v39 = vld [vmem:[#allocation45_spill] sm:$0xff] }
 0x33f   :  { %21538 = vst [vmem:[#allocation92_spill] sm:$0xff] %v18744_v32  ;;  %v6144_v1 = vpop.f32.mrb[235].mxu0  ;;  %v4326_v25 = vrot.slane %v21543_v39, 1  ;;  %v21544_v32 = vld [vmem:[#allocation46_spill] sm:$0xff]  ;;  %v21550_v39 = vld [vmem:[#allocation48_spill] sm:$0xff] }
 0x340   :  { %v4332_v1 = vrot.slane %v21544_v32, 1  ;;  %v4338_v32 = vrot.slane %v21550_v39, 1 }
 0x341   :  { %v4327_v51 = vsel %vm814_vm3, %v4322_v48, %v4326_v25 }
 0x342   :  { %v4333_v5 = vsel %vm814_vm3, %v4328_v35, %v4332_v1 }
 0x344   :  { %v18749_v52 = vpop.f32.mrb[236].mxu0 }
 0x345   :  { %21541 = vst [vmem:[#allocation93_spill] sm:$0xff] %v18749_v52  ;;  %6676 = vmatmul.mubr.bf16.gmra.mrb[64].mxu1 %v4323_v49  ;;  %v6149_v24 = vpop.f32.mrb[237].mxu0 }
 0x346   :  { %6683 = vmatprep.mubr.bf16.mxu1 %v4329_v62  ;;  %v18752_v33 = vpop.f32.mrb[238].mxu0  ;;  %v21547_v24 = vld [vmem:[#allocation42_spill] sm:$0xff] }
 0x347   :  { %21542 = vst [vmem:[#allocation94_spill] sm:$0xff] %v18752_v33  ;;  %v6152_v36 = vpop.f32.mrb[239].mxu0  ;;  %v18763_v62 = vcombine.high %v3168_v9, %v21547_v24  ;;  %v21549_v33 = vld [vmem:[#allocation47_spill] sm:$0xff]  ;;  %v18773_v1 = vcombine.low %v3168_v9, %v21547_v24  ;;  %v3169_v24 = vld [vmem:[#allocation2 + $0x1f8] sm:$0xee] }
 0x348   :  { %v4330_v52 = vrot.slane %v21549_v33, 1  ;;  %v21553_v33 = vld [vmem:[#allocation49_spill] sm:$0xff] }
 0x349   :  { %21548 = vst [vmem:[#allocation96_spill] sm:$0xff] %v18763_v62  ;;  %v4337_v48 = vrot.slane %v18763_v62, 1  ;;  %v4334_v62 = vrot.slane %v18773_v1, 1 }
 0x34b   :  { %v4339_v35 = vsel %vm814_vm3, %v4337_v48, %v4338_v32 }
 0x34c   :  { %v18757_v50 = vpop.f32.mrb[240].mxu0 }
 0x34d   :  { %21545 = vst [vmem:[#allocation46_spill] sm:$0xff] %v18757_v50  ;;  %6684 = vmatmul.mubr.bf16.gmra.mrb[68].mxu1 %v4327_v51  ;;  %v6157_v49 = vpop.f32.mrb[241].mxu0  ;;  %v4331_v50 = vsel %vm814_vm3, %v4326_v25, %v4330_v52 }
 0x34e   :  { %6691 = vmatprep.mubr.bf16.mxu1 %v4333_v5  ;;  %v18760_v46 = vpop.f32.mrb[242].mxu0 }
 0x34f   :  { %21546 = vst [vmem:[#allocation95_spill] sm:$0xff] %v18760_v46  ;;  %v6160_v36 = vpop.f32.mrb[243].mxu0  ;;  %v21554_v46 = vld [vmem:[#allocation51_spill] sm:$0xff] }
 0x350   :  { %v4335_v36 = vrot.slane %v21553_v33, 1  ;;  %v4342_v39 = vrot.slane %v21554_v46, 1 }
 0x352   :  { %v4336_v52 = vsel %vm814_vm3, %v4334_v62, %v4335_v36 }
 0x354   :  { %v18769_v16 = vpop.f32.mrb[244].mxu0 }
 0x355   :  { %21551 = vst [vmem:[#allocation47_spill] sm:$0xff] %v18769_v16  ;;  %6692 = vmatmul.mubr.bf16.gmra.mrb[72].mxu1 %v4331_v50  ;;  %v6165_v51 = vpop.f32.mrb[245].mxu0  ;;  %v4343_v50 = vsel %vm814_vm3, %v4338_v32, %v4342_v39 }
 0x356   :  { %6699 = vmatprep.mubr.bf16.mxu1 %v4339_v35  ;;  %v18775_v5 = vpop.f32.mrb[246].mxu0  ;;  %v4340_v51 = vrot.slane %v18263_v20, 1 }
 0x357   :  { %21552 = vst [vmem:[#allocation97_spill] sm:$0xff] %v18775_v5  ;;  %v6168_v49 = vpop.f32.mrb[247].mxu0 }
 0x358   :  { %v4346_v49 = vrot.slane %v18293_v40, 1  ;;  %v4341_v5 = vsel %vm814_vm3, %v4335_v36, %v4340_v51 }
 0x35a   :  { %v4347_v62 = vsel %vm814_vm3, %v4342_v39, %v4346_v49 }
 0x35c   :  { %v18781_v25 = vpop.f32.mrb[248].mxu0 }
 0x35d   :  { %21555 = vst [vmem:[#allocation49_spill] sm:$0xff] %v18781_v25  ;;  %6700 = vmatmul.mubr.bf16.gmra.mrb[76].mxu1 %v4336_v52  ;;  %v6173_v48 = vpop.f32.mrb[249].mxu0 }
 0x35e   :  { %6707 = vmatprep.mubr.bf16.mxu1 %v4343_v50  ;;  %v18784_v9 = vpop.f32.mrb[250].mxu0  ;;  %v4344_v50 = vrot.slane %v18298_v28, 1  ;;  %v4350_v48 = vrot.slane %v18309_v59, 1  ;;  %v4356_v59 = vrot.slane %v18347_v29, 1  ;;  %v21579_v29 = vld [vmem:[#allocation61_spill] sm:$0xff] }
 0x35f   :  { %21556 = vst [vmem:[#allocation51_spill] sm:$0xff] %v18784_v9  ;;  %v6176_v35 = vpop.f32.mrb[251].mxu0 }
 0x360   :  { %v4345_v35 = vsel %vm814_vm3, %v4340_v51, %v4344_v50  ;;  %v4351_v36 = vsel %vm814_vm3, %v4346_v49, %v4350_v48 }
 0x364   :  { %v18789_v16 = vpop.f32.mrb[252].mxu0 }
 0x365   :  { %21557 = vst [vmem:[#allocation98_spill] sm:$0xff] %v18789_v16  ;;  %6708 = vmatmul.mubr.bf16.gmra.mrb[80].mxu1 %v4341_v5  ;;  %v6181_v25 = vpop.f32.mrb[253].mxu0 }
 0x366   :  { %6715 = vmatprep.mubr.bf16.mxu1 %v4347_v62  ;;  %v18792_v52 = vpop.f32.mrb[254].mxu0  ;;  %v18803_v25 = vcombine.high %v3169_v24, %v18248_v37 }
 0x367   :  { %21558 = vst [vmem:[#allocation99_spill] sm:$0xff] %v18792_v52  ;;  %v6184_v32 = vpop.f32.mrb[255].mxu0 }
 0x368   :  { %21561 = vst [vmem:[#allocation102_spill] sm:$0xff] %v18803_v25  ;;  %v4348_v32 = vrot.slane %v18333_v18, 1  ;;  %v4355_v51 = vrot.slane %v18803_v25, 1  ;;  %v4353_v18 = vrot.slane %v18351_v8, 1 }
 0x36a   :  { %v4349_v52 = vsel %vm814_vm3, %v4344_v50, %v4348_v32  ;;  %v4357_v49 = vsel %vm814_vm3, %v4355_v51, %v4356_v59 }
 0x36c   :  { %v18797_v9 = vpop.f32.mrb[128].mxu0 }
 0x36d   :  { %21559 = vst [vmem:[#allocation100_spill] sm:$0xff] %v18797_v9  ;;  %6716 = vmatmul.mubr.bf16.gmra.mrb[84].mxu1 %v4345_v35  ;;  %v6222_v5 = vpop.f32.mrb[129].mxu0  ;;  %v18813_v35 = vcombine.low %v3169_v24, %v18248_v37 }
 0x36e   :  { %6723 = vmatprep.mubr.bf16.mxu1 %v4351_v36  ;;  %v18800_v39 = vpop.f32.mrb[130].mxu0 }
 0x36f   :  { %21560 = vst [vmem:[#allocation101_spill] sm:$0xff] %v18800_v39  ;;  %v6225_v62 = vpop.f32.mrb[131].mxu0  ;;  %21563 = vst [vmem:[#allocation104_spill] sm:$0xff] %v18813_v35  ;;  %v4352_v39 = vrot.slane %v18813_v35, 1 }
 0x370   :  { %v4360_v62 = vrot.slane %v18356_v21, 1  ;;  %v21573_v21 = vld [vmem:[#allocation62_spill] sm:$0xff] }
 0x371   :  { %v4354_v50 = vsel %vm814_vm3, %v4352_v39, %v4353_v18 }
 0x374   :  { %v18809_v16 = vpop.f32.mrb[132].mxu0 }
 0x375   :  { %21562 = vst [vmem:[#allocation103_spill] sm:$0xff] %v18809_v16  ;;  %6724 = vmatmul.mubr.bf16.gmra.mrb[88].mxu1 %v4349_v52  ;;  %v6230_v48 = vpop.f32.mrb[133].mxu0  ;;  %v4361_v52 = vsel %vm814_vm3, %v4356_v59, %v4360_v62 }
 0x376   :  { %6731 = vmatprep.mubr.bf16.mxu1 %v4357_v49  ;;  %v18815_v36 = vpop.f32.mrb[134].mxu0  ;;  %v21567_v48 = vld [vmem:[#allocation57_spill] sm:$0xff] }
 0x377   :  { %21564 = vst [vmem:[#allocation105_spill] sm:$0xff] %v18815_v36  ;;  %v6233_v5 = vpop.f32.mrb[135].mxu0  ;;  %v21568_v36 = vld [vmem:[#allocation58_spill] sm:$0xff] }
 0x378   :  { %v4358_v5 = vrot.slane %v21567_v48, 1  ;;  %v4364_v16 = vrot.slane %v21568_v36, 1  ;;  %v4487_v48 = vshrl.u32 %v21573_v21, 16  ;;  %v4490_v36 = vshll.u32 %v21573_v21, 16 }
 0x37a   :  { %v4359_v37 = vsel %vm814_vm3, %v4353_v18, %v4358_v5  ;;  %v4365_v39 = vsel %vm814_vm3, %v4360_v62, %v4364_v16  ;;  %v21575_v62 = vld [vmem:[#allocation15_spill] sm:$0xff]  ;;  %v4492_v35 = vrot.slane %v4490_v36, 2  ;;  %v3170_v36 = vld [vmem:[#allocation2 + $0x40] sm:$0x33] }
 0x37c   :  { %v18821_v32 = vpop.f32.mrb[136].mxu0 }
 0x37d   :  { %21565 = vst [vmem:[#allocation106_spill] sm:$0xff] %v18821_v32  ;;  %6732 = vmatmul.mubr.bf16.gmra.mrb[92].mxu1 %v4354_v50  ;;  %v6238_v51 = vpop.f32.mrb[137].mxu0 }
 0x37e   :  { %6739 = vmatprep.mubr.bf16.mxu1 %v4361_v52  ;;  %v18824_v24 = vpop.f32.mrb[138].mxu0  ;;  %v21571_v52 = vld [vmem:[#allocation59_spill] sm:$0xff] }
 0x37f   :  { %21566 = vst [vmem:[#allocation107_spill] sm:$0xff] %v18824_v24  ;;  %v6241_v49 = vpop.f32.mrb[139].mxu0  ;;  %v4362_v51 = vrot.slane %v21571_v52, 1  ;;  %v21572_v24 = vld [vmem:[#allocation60_spill] sm:$0xff]  ;;  %v4489_v52 = vrot.slane %v4487_v48, 1  ;;  %v15288_v48 = vld [vmem:[#allocation3 + $0x200] sm:$0xff]  }
 0x380   :  { %v4368_v49 = vrot.slane %v21572_v24, 1 }
 0x381   :  { %v4363_v18 = vsel %vm814_vm3, %v4358_v5, %v4362_v51  ;;  %v4366_v5 = vrot.slane %v21579_v29, 1 }
 0x384   :  { %v18829_v9 = vpop.f32.mrb[140].mxu0 }
 0x385   :  { %21569 = vst [vmem:[#allocation108_spill] sm:$0xff] %v18829_v9  ;;  %6740 = vmatmul.mubr.bf16.gmra.mrb[96].mxu1 %v4359_v37  ;;  %v6246_v32 = vpop.f32.mrb[141].mxu0  ;;  %v4369_v37 = vsel %vm814_vm3, %v4364_v16, %v4368_v49  ;;  %v4493_v49 = vor.u32 %v4492_v35, %v4489_v52  ;;  %v15289_v35 = vld [vmem:[#allocation3 + $0x208] sm:$0xff]  }
 0x386   :  { %6747 = vmatprep.mubr.bf16.mxu1 %v4365_v39  ;;  %v18832_v50 = vpop.f32.mrb[142].mxu0  ;;  %v21576_v32 = vshrl.u32 %v21575_v62, 16 }
 0x387   :  { %21570 = vst [vmem:[#allocation109_spill] sm:$0xff] %v18832_v50  ;;  %v6249_v59 = vpop.f32.mrb[143].mxu0 }
 0x388   :  { %v4494_v39 = vrot.slane %v21576_v32, 1  ;;  %v21577_v59 = vshll.u32 %v21575_v62, 16  ;;  %v4367_v32 = vsel %vm814_vm3, %v4362_v51, %v4366_v5  ;;  %vm12739_vm3 = vcmask 48128  }
 0x38a   :  { %v4495_v50 = vrot.slane %v21577_v59, 2 }
 0x38c   :  { %v18839_v8 = vpop.f32.mrb[144].mxu0  ;;  %v4496_v25 = vor.u32 %v4495_v50, %v4494_v39  ;;  %v15292_v39 = vld [vmem:[#allocation3 + $0x210] sm:$0xff]  }
 0x38d   :  { %21574 = vst [vmem:[#allocation60_spill] sm:$0xff] %v18839_v8  ;;  %6748 = vmatmul.mubr.bf16.gmra.mrb[100].mxu1 %v4363_v18  ;;  %v6254_v9 = vpop.f32.mrb[145].mxu0  ;;  %v21580_v8 = vld [vmem:[#allocation64_spill] sm:$0xff] }
 0x38e   :  { %6755 = vmatprep.mubr.bf16.mxu1 %v4369_v37  ;;  %v18846_v24 = vpop.f32.mrb[146].mxu0  ;;  %v4475_v18 = vshrl.u32 %v21580_v8, 16  ;;  %v4478_v16 = vshll.u32 %v21580_v8, 16  ;;  %v4497_v59 = vsel %vm951_vm2, %v4493_v49, %v4496_v25  ;;  %v4505_v50 = vsel %vm951_vm2, %v4496_v25, %v18502_v63 }
 0x38f   :  { %21578 = vst [vmem:[#allocation62_spill] sm:$0xff] %v18846_v24  ;;  %v6257_v21 = vpop.f32.mrb[147].mxu0  ;;  %v18857_v8 = vcombine.high %v3170_v36, %v3170_v36  ;;  %v4545_v49 = vshrl.u32 %v18545_v41, 16 }
 0x390   :  { %v4477_v9 = vrot.slane %v4475_v18, 1  ;;  %v4480_v37 = vrot.slane %v4478_v16, 2  ;;  %v15296_v16 = vld [vmem:[#allocation3 + $0x220] sm:$0xff]  }
 0x391   :  { %v4524_v52 = vshrl.u32 %v18857_v8, 16  ;;  %v4527_v51 = vshll.u32 %v18857_v8, 16 }
 0x392   :  { %v4481_v24 = vor.u32 %v4480_v37, %v4477_v9  ;;  %v21581_v9 = vshrl.u32 %v17459_v30, 16 }
 0x393   :  { %v4526_v63 = vrot.slane %v4524_v52, 1  ;;  %v4529_v25 = vrot.slane %v4527_v51, 2  ;;  %v4536_v51 = vshll.u32 %v18561_v19, 16 }
 0x394   :  { %v4485_v29 = vsel %vm951_vm2, %v4481_v24, %v18500_v60  ;;  %v18863_v60 = vcombine.low %v3170_v36, %v3170_v36  ;;  %v15293_v24 = vld [vmem:[#allocation3 + $0x218] sm:$0xff]   ;;  %v4552_v37 = vrot.slane %v21581_v9, 1 }
 0x395   :  { %6756 = vmatmul.mubr.bf16.gmra.mrb[104].mxu1 %v4367_v32  ;;  %v4530_v18 = vor.u32 %v4529_v25, %v4526_v63  ;;  %v4548_v32 = vshll.u32 %v18545_v41, 16  ;;  %v21583_v25 = vshrl.u32 %v17456_v12, 16 }
 0x396   :  { %6796 = vmatprep.mubr.bf16.mxu1 %v4497_v59  ;;  %v4515_v21 = vshrl.u32 %v18863_v60, 16  ;;  %v4518_v5 = vshll.u32 %v18863_v60, 16 }
 0x397   :  { %v4550_v41 = vrot.slane %v4548_v32, 2 }
 0x398   :  { %v4520_v59 = vrot.slane %v4518_v5, 2 }
 0x39d   :  { %6797 = vmatmul.mubr.bf16.vlgmr.msra.gmra.mrb[108].mxu1 %v4485_v29  ;;  %v15297_v29 = vld [vmem:[#allocation3 + $0x228] sm:$0xff]  }
 0x39e   :  { %7054 = vmatpush1.bf16.msra.mxu1 %v15288_v48  ;;  %6804 = vmatprep.mubr.bf16.mxu1 %v4505_v50  ;;  %v21582_v48 = vshll.u32 %v17459_v30, 16  ;;  %v4547_v50 = vrot.slane %v4545_v49, 1  ;;  %v21586_v49 = vshll.u32 %v17495_v44, 16 }
 0x39f   :  { %7055 = vmatprep.subr.bf16.mxu1 %v21325_v10 }
 0x3a0   :  { %v4553_v36 = vrot.slane %v21582_v48, 2  ;;  %v4561_v32 = vrot.slane %v21586_v49, 2  ;;  %v3171_v48 = vld [vmem:[#allocation2 + $0x88] sm:$0x33] }
 0x3a2   :  { %7056 = vmatpush1.bf16.msra.mxu1 %v15289_v35  ;;  %v4554_v52 = vor.u32 %v4553_v36, %v4552_v37  ;;  %v15304_v36 = vld [vmem:[#allocation3 + $0x240] sm:$0xff]  }
 0x3a3   :  { %7057 = vmatprep.subr.bf16.mxu1 %v21325_v10 }
 0x3a5   :  { %6805 = vmatmul.mubr.bf16.gmra.mrb[112].mxu1 %v18511_v23  ;;  %v4517_v23 = vrot.slane %v4515_v21, 1  ;;  %v21584_v21 = vshll.u32 %v17456_v12, 16 }
 0x3a6   :  { %6812 = vmatprep.mubr.bf16.mxu1 %v18516_v2  ;;  %7058 = vmatpush1.bf16.msra.mxu1 %v15292_v39  ;;  %v4531_v2 = vsel %vm951_vm2, %v18504_v22, %v4530_v18  ;;  %v15300_v22 = vld [vmem:[#allocation3 + $0x230] sm:$0xff]   ;;  %v4551_v39 = vor.u32 %v4550_v41, %v4547_v50  ;;  %v21587_v50 = vshrl.u32 %v17497_v7, 16 }
 0x3a7   :  { %7059 = vmatprep.subr.bf16.mxu1 %v21325_v10  ;;  %v4521_v35 = vor.u32 %v4520_v59, %v4517_v23  ;;  %v4541_v5 = vrot.slane %v21584_v21, 2  ;;  %v4538_v59 = vrot.slane %v4536_v51, 2  ;;  %v15305_v21 = vld [vmem:[#allocation3 + $0x248] sm:$0xff]  }
 0x3a8   :  { %v4555_v18 = vsel %vm951_vm2, %v4551_v39, %v4554_v52  ;;  %v4556_v41 = vrot.slane %v21587_v50, 1 }
 0x3a9   :  { %v4522_v63 = vsel %vm951_vm2, %v18518_v17, %v4521_v35  ;;  %v15301_v17 = vld [vmem:[#allocation3 + $0x238] sm:$0xff]   ;;  %v21588_v35 = vshll.u32 %v17497_v7, 16 }
 0x3aa   :  { %7060 = vmatpush1.bf16.msra.mxu1 %v15293_v24  ;;  %v4540_v24 = vrot.slane %v21583_v25, 1 }
 0x3ab   :  { %7061 = vmatprep.subr.bf16.mxu1 %v21325_v10 }
 0x3ad   :  { %6813 = vmatmul.mubr.bf16.gmra.mrb[116].mxu1 %v18527_v42  ;;  %v4533_v42 = vshrl.u32 %v18561_v19, 16 }
 0x3ae   :  { %6820 = vmatprep.mubr.bf16.mxu1 %v4531_v2  ;;  %7062 = vmatpush1.bf16.msra.mxu1 %v15296_v16  ;;  %v21585_v16 = vshrl.u32 %v17495_v44, 16  ;;  %v4542_v2 = vor.u32 %v4541_v5, %v4540_v24  ;;  %v18907_v24 = vcombine.high %v3171_v48, %v3171_v48 }
 0x3af   :  { %7063 = vmatprep.subr.bf16.mxu1 %v21325_v10  ;;  %v4535_v23 = vrot.slane %v4533_v42, 1  ;;  %v4557_v42 = vrot.slane %v21588_v35, 2 }
 0x3b0   :  { %v4560_v19 = vrot.slane %v21585_v16, 1  ;;  %v4582_v16 = vshrl.u32 %v18907_v24, 16 }
 0x3b1   :  { %v4539_v37 = vor.u32 %v4538_v59, %v4535_v23  ;;  %v4558_v5 = vor.u32 %v4557_v42, %v4556_v41  ;;  %v21592_v59 = vshll.u32 %v17536_v13, 16 }
 0x3b2   :  { %7064 = vmatpush1.bf16.msra.mxu1 %v15297_v29  ;;  %v4562_v9 = vor.u32 %v4561_v32, %v4560_v19  ;;  %v4585_v19 = vshll.u32 %v18907_v24, 16  ;;  %v21591_v32 = vshrl.u32 %v17536_v13, 16 }
 0x3b3   :  { %7065 = vmatprep.subr.bf16.mxu1 %v21325_v10  ;;  %v4543_v29 = vsel %vm951_vm2, %v4539_v37, %v4542_v2  ;;  %v4559_v49 = vsel %vm951_vm2, %v4542_v2, %v4558_v5  ;;  %v18918_v37 = vcombine.low %v3171_v48, %v3171_v48  ;;  %v4606_v48 = vshll.u32 %v18598_v54, 16 }
 0x3b4   :  { %v4563_v51 = vsel %vm951_vm2, %v4554_v52, %v4562_v9  ;;  %v15308_v52 = vld [vmem:[#allocation3 + $0x250] sm:$0xff]   ;;  %v4564_v23 = vrot.slane %v21591_v32, 1  ;;  %v4587_v50 = vrot.slane %v4585_v19, 2 }
 0x3b5   :  { %6821 = vmatmul.mubr.bf16.gmra.mrb[120].mxu1 %v4522_v63  ;;  %v21590_v63 = vshll.u32 %v17528_v53, 16  ;;  %v4573_v2 = vshrl.u32 %v18918_v37, 16  ;;  %v4576_v35 = vshll.u32 %v18918_v37, 16  ;;  %v4608_v32 = vrot.slane %v4606_v48, 2 }
 0x3b6   :  { %6828 = vmatprep.mubr.bf16.mxu1 %v4555_v18  ;;  %7066 = vmatpush1.bf16.msra.mxu1 %v15300_v22  ;;  %v21589_v22 = vshrl.u32 %v17528_v53, 16  ;;  %v21598_v48 = vshll.u32 %v17644_v57, 16 }
 0x3b7   :  { %7067 = vmatprep.subr.bf16.mxu1 %v21325_v10  ;;  %v4569_v25 = vrot.slane %v21590_v63, 2 }
 0x3b8   :  { %v4568_v39 = vrot.slane %v21589_v22, 1 }
 0x3ba   :  { %7068 = vmatpush1.bf16.msra.mxu1 %v15301_v17  ;;  %v4570_v18 = vor.u32 %v4569_v25, %v4568_v39  ;;  %v4565_v17 = vrot.slane %v21592_v59, 2  ;;  %v4575_v39 = vrot.slane %v4573_v2, 1  ;;  %v21593_v25 = vshrl.u32 %v17604_v14, 16 }
 0x3bb   :  { %7069 = vmatprep.subr.bf16.mxu1 %v21325_v10  ;;  %v4594_v59 = vshll.u32 %v18609_v56, 16 }
 0x3bc   :  { %v4566_v41 = vor.u32 %v4565_v17, %v4564_v23 }
 0x3bd   :  { %6829 = vmatmul.mubr.bf16.gmra.mrb[124].mxu1 %v4543_v29  ;;  %v4584_v29 = vrot.slane %v4582_v16, 1  ;;  %v21594_v16 = vshll.u32 %v17604_v14, 16 }
 0x3be   :  { %6836 = vmatprep.mubr.bf16.mxu1 %v4563_v51  ;;  %7070 = vmatpush1.bf16.msra.mxu1 %v15304_v36  ;;  %v4571_v36 = vsel %vm951_vm2, %v4562_v9, %v4570_v18  ;;  %v4603_v51 = vshrl.u32 %v18598_v54, 16  ;;  %v4567_v22 = vsel %vm951_vm2, %v4558_v5, %v4566_v41  ;;  %v4578_v9 = vrot.slane %v4576_v35, 2 }
 0x3bf   :  { %7071 = vmatprep.subr.bf16.mxu1 %v21325_v10  ;;  %v4588_v42 = vor.u32 %v4587_v50, %v4584_v29  ;;  %v4611_v19 = vrot.slane %v21594_v16, 2  ;;  %v4591_v5 = vshrl.u32 %v18609_v56, 16  ;;  %v21596_v50 = vshll.u32 %v17615_v47, 16 }
 0x3c0   :  { %v4579_v23 = vor.u32 %v4578_v9, %v4575_v39  ;;  %v4596_v39 = vrot.slane %v4594_v59, 2  ;;  %v21599_v16 = vshrl.u32 %v17671_v15, 16 }
 0x3c1   :  { %v4589_v63 = vsel %vm951_vm2, %v4570_v18, %v4588_v42  ;;  %v4599_v2 = vrot.slane %v21596_v50, 2  ;;  %v21597_v42 = vshrl.u32 %v17644_v57, 16  ;;  %v4593_v56 = vrot.slane %v4591_v5, 1 }
 0x3c2   :  { %7072 = vmatpush1.bf16.msra.mxu1 %v15305_v21  ;;  %v4610_v21 = vrot.slane %v21593_v25, 1  ;;  %v4580_v17 = vsel %vm951_vm2, %v4566_v41, %v4579_v23  ;;  %v3172_v25 = vld [vmem:[#allocation2 + $0xd0] sm:$0x33]  ;;  %v21601_v23 = vshrl.u32 %v21487_v31, 16  ;;  %v21602_v5 = vshll.u32 %v21487_v31, 16 }
 0x3c3   :  { %7073 = vmatprep.subr.bf16.mxu1 %v21325_v10 }
 0x3c4   :  { %v4612_v54 = vor.u32 %v4611_v19, %v4610_v21  ;;  %v4614_v19 = vrot.slane %v21599_v16, 1  ;;  %v4627_v59 = vrot.slane %v21602_v5, 2  ;;  %v21605_v5 = vshrl.u32 %v21496_v3, 16 }
 0x3c5   :  { %6837 = vmatmul.mubr.bf16.gmra.mrb[0].mxu1 %v4559_v49  ;;  %v4605_v49 = vrot.slane %v4603_v51, 1  ;;  %v4618_v51 = vrot.slane %v21597_v42, 1  ;;  %v21603_v42 = vshrl.u32 %v21490_v58, 16 }
 0x3c6   :  { %6844 = vmatprep.mubr.bf16.mxu1 %v4571_v36  ;;  %7074 = vmatpush1.bf16.msra.mxu1 %v15308_v52  ;;  %v15309_v52 = vld [vmem:[#allocation3 + $0x258] sm:$0xff]   ;;  %v21595_v36 = vshrl.u32 %v17615_v47, 16 }
 0x3c7   :  { %7075 = vmatprep.subr.bf16.mxu1 %v21325_v10  ;;  %v4609_v18 = vor.u32 %v4608_v32, %v4605_v49 }
 0x3c8   :  { %v4598_v29 = vrot.slane %v21595_v36, 1  ;;  %v15312_v36 = vld [vmem:[#allocation3 + $0x260] sm:$0xff]  }
 0x3c9   :  { %v4613_v35 = vsel %vm951_vm2, %v4609_v18, %v4612_v54  ;;  %v4626_v18 = vrot.slane %v21601_v23, 1 }
 0x3ca   :  { %7076 = vmatpush1.bf16.msra.mxu1 %v15309_v52  ;;  %v4600_v9 = vor.u32 %v4599_v2, %v4598_v29  ;;  %v21600_v52 = vshll.u32 %v17671_v15, 16 }
 0x3cb   :  { %7077 = vmatprep.subr.bf16.mxu1 %v21325_v10  ;;  %v4628_v50 = vor.u32 %v4627_v59, %v4626_v18  ;;  %v4668_v59 = vrot.slane %v21605_v5, 1  ;;  %v3173_v5 = vld [vmem:[#allocation2 + $0x118] sm:$0x33] }
 0x3cc   :  { %v4615_v49 = vrot.slane %v21600_v52, 2 }
 0x3cd   :  { %6845 = vmatmul.mubr.bf16.gmra.mrb[4].mxu1 %v4567_v22  ;;  %v4619_v22 = vrot.slane %v21598_v48, 2  ;;  %v21604_v48 = vshll.u32 %v21490_v58, 16 }
 0x3ce   :  { %6852 = vmatprep.mubr.bf16.mxu1 %v4589_v63  ;;  %v4597_v63 = vor.u32 %v4596_v39, %v4593_v56  ;;  %7078 = vmatpush1.bf16.msra.mxu1 %v15312_v36  ;;  %v4616_v29 = vor.u32 %v4615_v49, %v4614_v19  ;;  %v18965_v56 = vcombine.low %v3172_v25, %v3172_v25  ;;  %v4661_v49 = vshrl.u32 %v18640_v34, 16 }
 0x3cf   :  { %v4620_v41 = vor.u32 %v4619_v22, %v4618_v51  ;;  %7079 = vmatprep.subr.bf16.mxu1 %v21325_v10  ;;  %v4622_v51 = vrot.slane %v21603_v42, 1  ;;  %v4623_v22 = vrot.slane %v21604_v48, 2  ;;  %v21606_v36 = vshll.u32 %v21496_v3, 16 }
 0x3d0   :  { %v4601_v21 = vsel %vm951_vm2, %v4597_v63, %v4600_v9  ;;  %v4631_v19 = vshrl.u32 %v18965_v56, 16  ;;  %v4634_v52 = vshll.u32 %v18965_v56, 16  ;;  %v4652_v48 = vshll.u32 %v18651_v6, 16 }
 0x3d1   :  { %v4621_v32 = vsel %vm951_vm2, %v4612_v54, %v4620_v41  ;;  %v4617_v54 = vsel %vm951_vm2, %v4600_v9, %v4616_v29  ;;  %v4629_v39 = vsel %vm951_vm2, %v4620_v41, %v4628_v50  ;;  %v4624_v16 = vor.u32 %v4623_v22, %v4622_v51 }
 0x3d2   :  { %v4636_v18 = vrot.slane %v4634_v52, 2 }
 0x3d3   :  { %v4625_v23 = vsel %vm951_vm2, %v4616_v29, %v4624_v16  ;;  %v4649_v29 = vshrl.u32 %v18651_v6, 16 }
 0x3d5   :  { %6853 = vmatmul.mubr.bf16.gmra.mrb[8].mxu1 %v4580_v17  ;;  %v18955_v17 = vcombine.high %v3172_v25, %v3172_v25  ;;  %v4633_v25 = vrot.slane %v4631_v19, 1  ;;  %v4651_v6 = vrot.slane %v4649_v29, 1  ;;  %v21614_v29 = vshll.u32 %v21504_v0, 16 }
 0x3d6   :  { %6860 = vmatprep.mubr.bf16.mxu1 %v4613_v35 }
 0x3d7   :  { %v4640_v2 = vshrl.u32 %v18955_v17, 16  ;;  %v4643_v35 = vshll.u32 %v18955_v17, 16  ;;  %v4637_v51 = vor.u32 %v4636_v18, %v4633_v25  ;;  %v4654_v25 = vrot.slane %v4652_v48, 2 }
 0x3d8   :  { %v4685_v48 = vrot.slane %v21614_v29, 2 }
 0x3d9   :  { %v4642_v63 = vrot.slane %v4640_v2, 1  ;;  %v4669_v2 = vrot.slane %v21606_v36, 2  ;;  %v4638_v22 = vsel %vm951_vm2, %v4624_v16, %v4637_v51  ;;  %v21611_v36 = vshrl.u32 %v21503_v26, 16 }
 0x3da   :  { %v21613_v51 = vshrl.u32 %v21504_v0, 16 }
 0x3dd   :  { %6861 = vmatmul.mubr.bf16.gmra.mrb[12].mxu1 %v4601_v21  ;;  %v4645_v21 = vrot.slane %v4643_v35, 2  ;;  %v15313_v35 = vld [vmem:[#allocation3 + $0x268] sm:$0xff]  }
 0x3de   :  { %6868 = vmatprep.mubr.bf16.mxu1 %v4621_v32  ;;  %v4664_v32 = vshll.u32 %v18640_v34, 16  ;;  %7080 = vmatpush1.bf16.msra.mxu1 %v15313_v35  ;;  %v4670_v34 = vor.u32 %v4669_v2, %v4668_v59  ;;  %v4672_v2 = vrot.slane %v21611_v36, 1  ;;  %v21612_v35 = vshll.u32 %v21503_v26, 16 }
 0x3df   :  { %v4646_v9 = vor.u32 %v4645_v21, %v4642_v63  ;;  %7081 = vmatprep.subr.bf16.mxu1 %v21325_v10  ;;  %v21608_v21 = vshll.u32 %v21499_v43, 16 }
 0x3e0   :  { %v4666_v42 = vrot.slane %v4664_v32, 2  ;;  %v21610_v32 = vshll.u32 %v21500_v4, 16 }
 0x3e1   :  { %v4647_v41 = vsel %vm951_vm2, %v4628_v50, %v4646_v9  ;;  %v4657_v19 = vrot.slane %v21608_v21, 2  ;;  %v21609_v9 = vshrl.u32 %v21500_v4, 16 }
 0x3e5   :  { %6869 = vmatmul.mubr.bf16.gmra.mrb[16].mxu1 %v4617_v54  ;;  %v4663_v54 = vrot.slane %v4661_v49, 1  ;;  %v4676_v49 = vrot.slane %v21609_v9, 1  ;;  %v21615_v9 = vshrl.u32 %v21507_v61, 16 }
 0x3e6   :  { %6876 = vmatprep.mubr.bf16.mxu1 %v4629_v39  ;;  %v21607_v39 = vshrl.u32 %v21499_v43, 16 }
 0x3e7   :  { %v4667_v50 = vor.u32 %v4666_v42, %v4663_v54  ;;  %v4673_v54 = vrot.slane %v21612_v35, 2  ;;  %v4719_v35 = vshrl.u32 %v18682_v45, 16 }
 0x3e8   :  { %v4656_v63 = vrot.slane %v21607_v39, 1  ;;  %v15316_v39 = vld [vmem:[#allocation3 + $0x270] sm:$0xff]  }
 0x3e9   :  { %v4671_v52 = vsel %vm951_vm2, %v4667_v50, %v4670_v34  ;;  %v4684_v50 = vrot.slane %v21613_v51, 1  ;;  %7082 = vmatpush1.bf16.msra.mxu1 %v15316_v39 }
 0x3ea   :  { %v4658_v18 = vor.u32 %v4657_v19, %v4656_v63  ;;  %v4674_v63 = vor.u32 %v4673_v54, %v4672_v2  ;;  %7083 = vmatprep.subr.bf16.mxu1 %v21325_v10  ;;  %v4722_v54 = vshll.u32 %v18682_v45, 16 }
 0x3eb   :  { %v4686_v21 = vor.u32 %v4685_v48, %v4684_v50  ;;  %v21617_v50 = vshrl.u32 %v21513_v38, 16  ;;  %v21618_v48 = vshll.u32 %v21513_v38, 16 }
 0x3ed   :  { %6877 = vmatmul.mubr.bf16.gmra.mrb[20].mxu1 %v4625_v23  ;;  %v4677_v23 = vrot.slane %v21610_v32, 2  ;;  %v21616_v32 = vshll.u32 %v21507_v61, 16  ;;  %v4726_v29 = vrot.slane %v21617_v50, 1  ;;  %v4727_v39 = vrot.slane %v21618_v48, 2 }
 0x3ee   :  { %6884 = vmatprep.mubr.bf16.mxu1 %v4647_v41  ;;  %v4655_v41 = vor.u32 %v4654_v25, %v4651_v6  ;;  %v19011_v6 = vcombine.low %v3173_v5, %v3173_v5 }
 0x3ef   :  { %v4678_v16 = vor.u32 %v4677_v23, %v4676_v49  ;;  %v4680_v49 = vrot.slane %v21615_v9, 1  ;;  %v4681_v23 = vrot.slane %v21616_v32, 2  ;;  %v4728_v45 = vor.u32 %v4727_v39, %v4726_v29  ;;  %v21623_v29 = vld [vmem:[#allocation33_spill] sm:$0xff] }
 0x3f0   :  { %v4659_v59 = vsel %vm951_vm2, %v4655_v41, %v4658_v18  ;;  %v4689_v36 = vshrl.u32 %v19011_v6, 16  ;;  %v4692_v2 = vshll.u32 %v19011_v6, 16  ;;  %v21624_v48 = vshrl.u32 %v21623_v29, 16 }
 0x3f1   :  { %v4679_v42 = vsel %vm951_vm2, %v4670_v34, %v4678_v16  ;;  %v4675_v34 = vsel %vm951_vm2, %v4658_v18, %v4674_v63  ;;  %v4687_v25 = vsel %vm951_vm2, %v4678_v16, %v4686_v21 }
 0x3f2   :  { %v4694_v51 = vrot.slane %v4692_v2, 2  ;;  %v21621_v2 = vshrl.u32 %v21517_v11, 16  ;;  %v4730_v39 = vrot.slane %v21624_v48, 1 }
 0x3f5   :  { %6885 = vmatmul.mubr.bf16.gmra.mrb[24].mxu1 %v4638_v22  ;;  %v19001_v22 = vcombine.high %v3173_v5, %v3173_v5  ;;  %v4691_v5 = vrot.slane %v4689_v36, 1 }
 0x3f6   :  { %6892 = vmatprep.mubr.bf16.mxu1 %v4671_v52 }
 0x3f7   :  { %v4698_v19 = vshrl.u32 %v19001_v22, 16  ;;  %v4701_v52 = vshll.u32 %v19001_v22, 16  ;;  %v4695_v9 = vor.u32 %v4694_v51, %v4691_v5 }
 0x3f9   :  { %v4700_v41 = vrot.slane %v4698_v19, 1  ;;  %v4703_v10 = vrot.slane %v4701_v52, 2  ;;  %v15317_v19 = vld [vmem:[#allocation3 + $0x278] sm:$0xff]   ;;  %v4721_v52 = vrot.slane %v4719_v35, 1  ;;  %v21622_v35 = vshll.u32 %v21517_v11, 16 }
 0x3fa   :  { %7084 = vmatpush1.bf16.msra.mxu1 %v15317_v19  ;;  %v21625_v19 = vshll.u32 %v21623_v29, 16 }
 0x3fb   :  { %v4704_v18 = vor.u32 %v4703_v10, %v4700_v41  ;;  %v21620_v41 = vshll.u32 %v21516_v55, 16 }
 0x3fd   :  { %6893 = vmatmul.mubr.bf16.gmra.mrb[28].mxu1 %v4659_v59  ;;  %v4682_v59 = vor.u32 %v4681_v23, %v4680_v49  ;;  %v4705_v16 = vsel %vm951_vm2, %v4686_v21, %v4704_v18  ;;  %v4710_v49 = vshll.u32 %v18693_v27, 16  ;;  %v21619_v23 = vshrl.u32 %v21516_v55, 16 }
 0x3fe   :  { %6900 = vmatprep.mubr.bf16.mxu1 %v4679_v42  ;;  %v4715_v10 = vrot.slane %v21620_v41, 2  ;;  %v4734_v18 = vrot.slane %v21621_v2, 1 }
 0x3ff   :  { %v4683_v42 = vsel %vm951_vm2, %v4674_v63, %v4682_v59  ;;  %v4707_v63 = vshrl.u32 %v18693_v27, 16  ;;  %v4696_v21 = vsel %vm951_vm2, %v4682_v59, %v4695_v9  ;;  %v21626_v9 = vld [vmem:[#allocation35_spill] sm:$0xff] }
 0x401   :  { %v4709_v27 = vrot.slane %v4707_v63, 1  ;;  %v21628_v63 = vshll.u32 %v21626_v9, 16 }
 0x405   :  { %6901 = vmatmul.mubr.bf16.gmra.mrb[32].mxu1 %v4675_v34  ;;  %v4724_v34 = vrot.slane %v4722_v54, 2  ;;  %v4735_v54 = vrot.slane %v21622_v35, 2 }
 0x406   :  { %6908 = vmatprep.mubr.bf16.mxu1 %v4687_v25  ;;  %v4714_v25 = vrot.slane %v21619_v23, 1 }
 0x407   :  { %v4725_v32 = vor.u32 %v4724_v34, %v4721_v52  ;;  %v4736_v59 = vor.u32 %v4735_v54, %v4734_v18  ;;  %v4731_v52 = vrot.slane %v21625_v19, 2  ;;  %v21629_v18 = vld [vmem:[#allocation36_spill] sm:$0xff] }
 0x408   :  { %v4716_v5 = vor.u32 %v4715_v10, %v4714_v25  ;;  %v21630_v35 = vshrl.u32 %v21629_v18, 16  ;;  %v21631_v54 = vshll.u32 %v21629_v18, 16 }
 0x409   :  { %v4729_v36 = vsel %vm951_vm2, %v4725_v32, %v4728_v45  ;;  %v4737_v34 = vsel %vm951_vm2, %v4728_v45, %v4736_v59  ;;  %v21627_v32 = vshrl.u32 %v21626_v9, 16  ;;  %v4732_v25 = vor.u32 %v4731_v52, %v4730_v39 }
 0x40a   :  { %v4738_v45 = vrot.slane %v21630_v35, 1 }
 0x40b   :  { %v4733_v2 = vsel %vm951_vm2, %v4716_v5, %v4732_v25 }
 0x40d   :  { %6909 = vmatmul.mubr.bf16.gmra.mrb[36].mxu1 %v4683_v42  ;;  %v4712_v42 = vrot.slane %v4710_v49, 2  ;;  %v4743_v49 = vrot.slane %v21628_v63, 2 }
 0x40e   :  { %6916 = vmatprep.mubr.bf16.mxu1 %v4705_v16  ;;  %v3174_v16 = vld [vmem:[#allocation2 + $0x160] sm:$0x33] }
 0x40f   :  { %v4713_v51 = vor.u32 %v4712_v42, %v4709_v27  ;;  %v19046_v23 = vcombine.high %v3174_v16, %v3174_v16  ;;  %v4739_v27 = vrot.slane %v21631_v54, 2  ;;  %v19055_v42 = vcombine.low %v3174_v16, %v3174_v16 }
 0x411   :  { %v4717_v50 = vsel %vm951_vm2, %v4713_v51, %v4716_v5  ;;  %v4756_v10 = vshrl.u32 %v19046_v23, 16  ;;  %21632 = vst [vmem:[#allocation15_spill] sm:$0xff] %v19055_v42  ;;  %v4740_v39 = vor.u32 %v4739_v27, %v4738_v45  ;;  %v4747_v19 = vshrl.u32 %v19055_v42, 16 }
 0x412   :  { %v4750_v52 = vshll.u32 %v19055_v42, 16 }
 0x413   :  { %v4741_v63 = vsel %vm951_vm2, %v4732_v25, %v4740_v39  ;;  %v4749_v16 = vrot.slane %v4747_v19, 1 }
 0x415   :  { %6917 = vmatmul.mubr.bf16.gmra.mrb[40].mxu1 %v4696_v21  ;;  %v4742_v21 = vrot.slane %v21627_v32, 1 }
 0x416   :  { %6924 = vmatprep.mubr.bf16.mxu1 %v4729_v36  ;;  %v4759_v36 = vshll.u32 %v19046_v23, 16 }
 0x417   :  { %v4744_v41 = vor.u32 %v4743_v49, %v4742_v21  ;;  %v4752_v49 = vrot.slane %v4750_v52, 2 }
 0x418   :  { %v4761_v48 = vrot.slane %v4759_v36, 2 }
 0x419   :  { %v4745_v51 = vsel %vm951_vm2, %v4736_v59, %v4744_v41 }
 0x41d   :  { %6925 = vmatmul.mubr.bf16.gmra.mrb[44].mxu1 %v4717_v50  ;;  %v4758_v50 = vrot.slane %v4756_v10, 1  ;;  %v21634_v10 = vld [vmem:[#allocation39_spill] sm:$0xff] }
 0x41e   :  { %6932 = vmatprep.mubr.bf16.mxu1 %v4737_v34  ;;  %v21633_v34 = vld [vmem:[#allocation88_spill] sm:$0xff]  ;;  %v21635_v36 = vshrl.u32 %v21634_v10, 16  ;;  %v21636_v35 = vshll.u32 %v21634_v10, 16 }
 0x41f   :  { %v4762_v5 = vor.u32 %v4761_v48, %v4758_v50  ;;  %v4777_v32 = vshrl.u32 %v21633_v34, 16  ;;  %v4780_v21 = vshll.u32 %v21633_v34, 16  ;;  %v21637_v48 = vld [vmem:[#allocation89_spill] sm:$0xff] }
 0x420   :  { %v4785_v45 = vrot.slane %v21636_v35, 2  ;;  %v4765_v34 = vshrl.u32 %v21637_v48, 16  ;;  %v4768_v25 = vshll.u32 %v21637_v48, 16 }
 0x421   :  { %v4763_v59 = vsel %vm951_vm2, %v4744_v41, %v4762_v5  ;;  %v4779_v54 = vrot.slane %v4777_v32, 1  ;;  %v4782_v27 = vrot.slane %v4780_v21, 2  ;;  %v21641_v32 = vld [vmem:[#allocation41_spill] sm:$0xff] }
 0x422   :  { %v21642_v21 = vshrl.u32 %v21641_v32, 16  ;;  %v4767_v35 = vrot.slane %v4765_v34, 1 }
 0x423   :  { %v4783_v19 = vor.u32 %v4782_v27, %v4779_v54 }
 0x425   :  { %6933 = vmatmul.mubr.bf16.gmra.mrb[48].mxu1 %v4733_v2  ;;  %v4784_v2 = vrot.slane %v21635_v36, 1 }
 0x426   :  { %6940 = vmatprep.mubr.bf16.mxu1 %v4745_v51  ;;  %v4753_v51 = vor.u32 %v4752_v49, %v4749_v16  ;;  %v4792_v16 = vrot.slane %v21642_v21, 1  ;;  %v21643_v49 = vshll.u32 %v21641_v32, 16  ;;  %v21647_v32 = vld [vmem:[#allocation44_spill] sm:$0xff] }
 0x427   :  { %v4786_v50 = vor.u32 %v4785_v45, %v4784_v2  ;;  %v4770_v45 = vrot.slane %v4768_v25, 2  ;;  %v21649_v34 = vshll.u32 %v21647_v32, 16 }
 0x428   :  { %v4754_v52 = vsel %vm951_vm2, %v4740_v39, %v4753_v51  ;;  %v4793_v2 = vrot.slane %v21643_v49, 2  ;;  %v3175_v51 = vld [vmem:[#allocation2 + $0x1a8] sm:$0x33]  ;;  %v21648_v49 = vshrl.u32 %v21647_v32, 16 }
 0x429   :  { %v4771_v27 = vor.u32 %v4770_v45, %v4767_v35  ;;  %v19090_v25 = vcombine.high %v3175_v51, %v3175_v51 }
 0x42a   :  { %v4794_v39 = vor.u32 %v4793_v2, %v4792_v16 }
 0x42b   :  { %21650 = vst [vmem:[#allocation61_spill] sm:$0xff] %v19090_v25  ;;  %v4814_v2 = vshrl.u32 %v19090_v25, 16  ;;  %v4817_v35 = vshll.u32 %v19090_v25, 16  ;;  %v21655_v25 = vld [vmem:[#allocation96_spill] sm:$0xff] }
 0x42c   :  { %v4795_v21 = vsel %vm951_vm2, %v4786_v50, %v4794_v39  ;;  %v4835_v32 = vshrl.u32 %v21655_v25, 16 }
 0x42d   :  { %6941 = vmatmul.mubr.bf16.gmra.mrb[52].mxu1 %v4741_v63  ;;  %v21638_v63 = vld [vmem:[#allocation40_spill] sm:$0xff] }
 0x42e   :  { %6948 = vmatprep.mubr.bf16.mxu1 %v4763_v59  ;;  %v21639_v41 = vshrl.u32 %v21638_v63, 16  ;;  %v21640_v36 = vshll.u32 %v21638_v63, 16  ;;  %v4787_v59 = vsel %vm951_vm2, %v4783_v19, %v4786_v50 }
 0x430   :  { %v4772_v5 = vrot.slane %v21639_v41, 1  ;;  %v4773_v42 = vrot.slane %v21640_v36, 2  ;;  %v21644_v41 = vld [vmem:[#allocation43_spill] sm:$0xff] }
 0x431   :  { %v21645_v36 = vshrl.u32 %v21644_v41, 16  ;;  %v21646_v19 = vshll.u32 %v21644_v41, 16 }
 0x432   :  { %v4774_v54 = vor.u32 %v4773_v42, %v4772_v5  ;;  %v4801_v42 = vrot.slane %v21649_v34, 2 }
 0x433   :  { %v4789_v63 = vrot.slane %v21646_v19, 2 }
 0x434   :  { %v4775_v48 = vsel %vm951_vm2, %v4771_v27, %v4774_v54  ;;  %v21651_v27 = vld [vmem:[#allocation45_spill] sm:$0xff] }
 0x435   :  { %6949 = vmatmul.mubr.bf16.gmra.mrb[56].mxu1 %v4754_v52  ;;  %v4788_v52 = vrot.slane %v21645_v36, 1  ;;  %v21653_v36 = vshll.u32 %v21651_v27, 16 }
 0x436   :  { %6956 = vmatprep.mubr.bf16.mxu1 %v4787_v59  ;;  %v4800_v59 = vrot.slane %v21648_v49, 1  ;;  %v19099_v49 = vcombine.low %v3175_v51, %v3175_v51 }
 0x437   :  { %v4790_v5 = vor.u32 %v4789_v63, %v4788_v52  ;;  %v4797_v19 = vrot.slane %v21653_v36, 2  ;;  %v4819_v63 = vrot.slane %v4817_v35, 2 }
 0x438   :  { %v4802_v16 = vor.u32 %v4801_v42, %v4800_v59  ;;  %21654 = vst [vmem:[#allocation64_spill] sm:$0xff] %v19099_v49  ;;  %v4805_v59 = vshrl.u32 %v19099_v49, 16  ;;  %v4808_v42 = vshll.u32 %v19099_v49, 16 }
 0x439   :  { %v4791_v45 = vsel %vm951_vm2, %v4774_v54, %v4790_v5 }
 0x43a   :  { %v4803_v34 = vsel %vm951_vm2, %v4794_v39, %v4802_v16  ;;  %v4807_v51 = vrot.slane %v4805_v59, 1 }
 0x43d   :  { %6957 = vmatmul.mubr.bf16.gmra.mrb[60].mxu1 %v4775_v48  ;;  %v21652_v48 = vshrl.u32 %v21651_v27, 16  ;;  %v4810_v27 = vrot.slane %v4808_v42, 2 }
 0x43e   :  { %6964 = vmatprep.mubr.bf16.mxu1 %v4795_v21  ;;  %v4816_v21 = vrot.slane %v4814_v2, 1  ;;  %v21656_v2 = vld [vmem:[#allocation48_spill] sm:$0xff] }
 0x43f   :  { %v4796_v50 = vrot.slane %v21652_v48, 1  ;;  %v4838_v48 = vshll.u32 %v21655_v25, 16  ;;  %v21657_v35 = vshrl.u32 %v21656_v2, 16  ;;  %v4823_v25 = vshrl.u32 %v18773_v1, 16 }
 0x440   :  { %v4820_v54 = vor.u32 %v4819_v63, %v4816_v21  ;;  %v4811_v63 = vor.u32 %v4810_v27, %v4807_v51 }
 0x441   :  { %v4798_v52 = vor.u32 %v4797_v19, %v4796_v50  ;;  %v21658_v50 = vshll.u32 %v21656_v2, 16  ;;  %v4840_v21 = vrot.slane %v4838_v48, 2  ;;  %v21662_v48 = vshll.u32 %v21554_v46, 16 }
 0x442   :  { %v4821_v39 = vsel %vm951_vm2, %v4802_v16, %v4820_v54  ;;  %v21659_v16 = vshrl.u32 %v21553_v33, 16 }
 0x443   :  { %v4799_v36 = vsel %vm951_vm2, %v4790_v5, %v4798_v52  ;;  %v4843_v19 = vrot.slane %v21658_v50, 2  ;;  %v4826_v5 = vshll.u32 %v18773_v1, 16  ;;  %v4812_v42 = vsel %vm951_vm2, %v4798_v52, %v4811_v63 }
 0x444   :  { %v4830_v54 = vrot.slane %v21659_v16, 1  ;;  %v4851_v51 = vrot.slane %v21662_v48, 2  ;;  %v4825_v1 = vrot.slane %v4823_v25, 1  ;;  %v21663_v63 = vshrl.u32 %v18263_v20, 16 }
 0x445   :  { %6965 = vmatmul.mubr.bf16.gmra.mrb[64].mxu1 %v4791_v45  ;;  %v4842_v45 = vrot.slane %v21657_v35, 1  ;;  %v21666_v25 = vshll.u32 %v18293_v40, 16 }
 0x446   :  { %6972 = vmatprep.mubr.bf16.mxu1 %v4803_v34  ;;  %v4837_v34 = vrot.slane %v4835_v32, 1  ;;  %v21661_v32 = vshrl.u32 %v21554_v46, 16 }
 0x447   :  { %v4844_v49 = vor.u32 %v4843_v19, %v4842_v45  ;;  %v4828_v45 = vrot.slane %v4826_v5, 2  ;;  %v4859_v5 = vrot.slane %v21666_v25, 2  ;;  %v21671_v25 = vld [vmem:[#allocation102_spill] sm:$0xff] }
 0x448   :  { %v4841_v59 = vor.u32 %v4840_v21, %v4837_v34  ;;  %v4850_v27 = vrot.slane %v21661_v32, 1  ;;  %v3176_v34 = vld [vmem:[#allocation2 + $0x1f0] sm:$0x33]  ;;  %v21665_v32 = vshrl.u32 %v18293_v40, 16 }
 0x449   :  { %v4829_v19 = vor.u32 %v4828_v45, %v4825_v1  ;;  %v21668_v45 = vshrl.u32 %v18298_v28, 16 }
 0x44a   :  { %v4852_v52 = vor.u32 %v4851_v51, %v4850_v27 }
 0x44d   :  { %6973 = vmatmul.mubr.bf16.gmra.mrb[68].mxu1 %v4799_v36  ;;  %v21660_v36 = vshll.u32 %v21553_v33, 16 }
 0x44e   :  { %6980 = vmatprep.mubr.bf16.mxu1 %v4821_v39  ;;  %v4845_v39 = vsel %vm951_vm2, %v4841_v59, %v4844_v49  ;;  %v21664_v59 = vshll.u32 %v18263_v20, 16 }
 0x44f   :  { %v4831_v35 = vrot.slane %v21660_v36, 2  ;;  %v4853_v36 = vsel %vm951_vm2, %v4844_v49, %v4852_v52  ;;  %v4854_v49 = vrot.slane %v21668_v45, 1  ;;  %v4896_v45 = vshll.u32 %v21671_v25, 16 }
 0x450   :  { %v4847_v16 = vrot.slane %v21664_v59, 2 }
 0x451   :  { %v4832_v50 = vor.u32 %v4831_v35, %v4830_v54  ;;  %v19134_v54 = vcombine.high %v3176_v34, %v3176_v34 }
 0x453   :  { %v4833_v21 = vsel %vm951_vm2, %v4829_v19, %v4832_v50  ;;  %21667 = vst [vmem:[#allocation33_spill] sm:$0xff] %v19134_v54  ;;  %v4872_v48 = vshrl.u32 %v19134_v54, 16  ;;  %v4875_v51 = vshll.u32 %v19134_v54, 16  ;;  %v21669_v19 = vshll.u32 %v18298_v28, 16  ;;  %v21675_v28 = vld [vmem:[#allocation104_spill] sm:$0xff] }
 0x455   :  { %6981 = vmatmul.mubr.bf16.gmra.mrb[72].mxu1 %v4812_v42  ;;  %v4846_v42 = vrot.slane %v21663_v63, 1  ;;  %v19143_v63 = vcombine.low %v3176_v34, %v3176_v34 }
 0x456   :  { %6988 = vmatprep.mubr.bf16.mxu1 %v4845_v39  ;;  %v4858_v39 = vrot.slane %v21665_v32, 1 }
 0x457   :  { %v4848_v35 = vor.u32 %v4847_v16, %v4846_v42  ;;  %21670 = vst [vmem:[#allocation35_spill] sm:$0xff] %v19143_v63  ;;  %v4877_v42 = vrot.slane %v4875_v51, 2  ;;  %v4863_v32 = vshrl.u32 %v19143_v63, 16 }
 0x458   :  { %v4860_v27 = vor.u32 %v4859_v5, %v4858_v39  ;;  %v4866_v39 = vshll.u32 %v19143_v63, 16  ;;  %v4893_v5 = vshrl.u32 %v21671_v25, 16  ;;  %v4881_v25 = vshrl.u32 %v21675_v28, 16 }
 0x459   :  { %v4849_v1 = vsel %vm951_vm2, %v4832_v50, %v4848_v35  ;;  %v4865_v34 = vrot.slane %v4863_v32, 1 }
 0x45a   :  { %v4861_v59 = vsel %vm951_vm2, %v4852_v52, %v4860_v27  ;;  %v4868_v54 = vrot.slane %v4866_v39, 2 }
 0x45d   :  { %6989 = vmatmul.mubr.bf16.gmra.mrb[76].mxu1 %v4833_v21  ;;  %v4855_v21 = vrot.slane %v21669_v19, 2 }
 0x45e   :  { %6996 = vmatprep.mubr.bf16.mxu1 %v4853_v36  ;;  %v4874_v36 = vrot.slane %v4872_v48, 1  ;;  %v21672_v48 = vld [vmem:[#allocation54_spill] sm:$0xff] }
 0x45f   :  { %v4856_v16 = vor.u32 %v4855_v21, %v4854_v49  ;;  %v21673_v51 = vshrl.u32 %v21672_v48, 16  ;;  %v21674_v49 = vshll.u32 %v21672_v48, 16 }
 0x460   :  { %v4878_v50 = vor.u32 %v4877_v42, %v4874_v36  ;;  %v4898_v36 = vrot.slane %v4896_v45, 2  ;;  %v4869_v42 = vor.u32 %v4868_v54, %v4865_v34 }
 0x461   :  { %v4857_v19 = vsel %vm951_vm2, %v4848_v35, %v4856_v16  ;;  %v4901_v21 = vrot.slane %v21674_v49, 2  ;;  %v4884_v35 = vshll.u32 %v21675_v28, 16  ;;  %v4883_v28 = vrot.slane %v4881_v25, 1 }
 0x462   :  { %v4879_v52 = vsel %vm951_vm2, %v4860_v27, %v4878_v50  ;;  %v4870_v39 = vsel %vm951_vm2, %v4856_v16, %v4869_v42 }
 0x463   :  { %v4886_v49 = vrot.slane %v4884_v35, 2 }
 0x465   :  { %6997 = vmatmul.mubr.bf16.gmra.mrb[80].mxu1 %v4849_v1  ;;  %v4900_v1 = vrot.slane %v21673_v51, 1 }
 0x466   :  { %7004 = vmatprep.mubr.bf16.mxu1 %v4861_v59  ;;  %v4895_v59 = vrot.slane %v4893_v5, 1  ;;  %v21679_v5 = vld [vmem:[#allocation56_spill] sm:$0xff] }
 0x467   :  { %v4902_v63 = vor.u32 %v4901_v21, %v4900_v1  ;;  %v21680_v45 = vshrl.u32 %v21679_v5, 16  ;;  %v21681_v34 = vshll.u32 %v21679_v5, 16  ;;  %v21685_v5 = vld [vmem:[#allocation58_spill] sm:$0xff] }
 0x468   :  { %v4899_v32 = vor.u32 %v4898_v36, %v4895_v59  ;;  %v4887_v59 = vor.u32 %v4886_v49, %v4883_v28  ;;  %v3177_v36 = vld [vmem:[#allocation2 + $0x238] sm:$0x33]  ;;  %v21687_v25 = vshll.u32 %v21685_v5, 16 }
 0x469   :  { %v4908_v54 = vrot.slane %v21680_v45, 1  ;;  %v4909_v1 = vrot.slane %v21681_v34, 2  ;;  %v21686_v34 = vshrl.u32 %v21685_v5, 16  ;;  %v19178_v35 = vcombine.high %v3177_v36, %v3177_v36 }
 0x46b   :  { %v4910_v16 = vor.u32 %v4909_v1, %v4908_v54  ;;  %21688 = vst [vmem:[#allocation36_spill] sm:$0xff] %v19178_v35  ;;  %v4930_v1 = vshrl.u32 %v19178_v35, 16  ;;  %v4933_v28 = vshll.u32 %v19178_v35, 16 }
 0x46d   :  { %7005 = vmatmul.mubr.bf16.gmra.mrb[84].mxu1 %v4857_v19  ;;  %v21676_v19 = vld [vmem:[#allocation55_spill] sm:$0xff]  ;;  %v4911_v45 = vsel %vm951_vm2, %v4902_v63, %v4910_v16 }
 0x46e   :  { %7012 = vmatprep.mubr.bf16.mxu1 %v4879_v52  ;;  %v21677_v27 = vshrl.u32 %v21676_v19, 16  ;;  %v21678_v51 = vshll.u32 %v21676_v19, 16  ;;  %v4903_v52 = vsel %vm951_vm2, %v4899_v32, %v4902_v63 }
 0x470   :  { %v4888_v50 = vrot.slane %v21677_v27, 1  ;;  %v4889_v40 = vrot.slane %v21678_v51, 2  ;;  %v21682_v27 = vld [vmem:[#allocation57_spill] sm:$0xff] }
 0x471   :  { %v21683_v51 = vshrl.u32 %v21682_v27, 16  ;;  %v21684_v32 = vshll.u32 %v21682_v27, 16 }
 0x472   :  { %v4890_v21 = vor.u32 %v4889_v40, %v4888_v50  ;;  %v4917_v40 = vrot.slane %v21687_v25, 2 }
 0x473   :  { %v4905_v19 = vrot.slane %v21684_v32, 2 }
 0x474   :  { %v4891_v42 = vsel %vm951_vm2, %v4887_v59, %v4890_v21  ;;  %v21689_v59 = vld [vmem:[#allocation59_spill] sm:$0xff] }
 0x475   :  { %7013 = vmatmul.mubr.bf16.gmra.mrb[88].mxu1 %v4870_v39  ;;  %v4904_v39 = vrot.slane %v21683_v51, 1  ;;  %v21691_v51 = vshll.u32 %v21689_v59, 16 }
 0x476   :  { %7020 = vmatprep.mubr.bf16.mxu1 %v4903_v52  ;;  %v4916_v52 = vrot.slane %v21686_v34, 1  ;;  %v19187_v34 = vcombine.low %v3177_v36, %v3177_v36 }
 0x477   :  { %v4906_v50 = vor.u32 %v4905_v19, %v4904_v39  ;;  %v4913_v32 = vrot.slane %v21691_v51, 2  ;;  %v4935_v19 = vrot.slane %v4933_v28, 2  ;;  %v5046_v28 = vrot.slane %v21575_v62, 2  ;;  %v21695_v62 = vld [vmem:[#allocation10_spill] sm:$0xff] }
 0x478   :  { %v4918_v54 = vor.u32 %v4917_v40, %v4916_v52  ;;  %v4921_v52 = vshrl.u32 %v19187_v34, 16  ;;  %v4924_v40 = vshll.u32 %v19187_v34, 16 }
 0x479   :  { %v4907_v49 = vsel %vm951_vm2, %v4890_v21, %v4906_v50 }
 0x47a   :  { %v4919_v25 = vsel %vm951_vm2, %v4910_v16, %v4918_v54  ;;  %v4926_v5 = vrot.slane %v4924_v40, 2  ;;  %v5048_v40 = vrot.slane %v21695_v62, 2 }
 0x47d   :  { %7021 = vmatmul.mubr.bf16.gmra.mrb[92].mxu1 %v4891_v42  ;;  %v21690_v42 = vshrl.u32 %v21689_v59, 16  ;;  %v3178_v59 = vld [vmem:[#allocation2] sm:$0xcc] }
 0x47e   :  { %7028 = vmatprep.mubr.bf16.mxu1 %v4911_v45  ;;  %v4932_v45 = vrot.slane %v4930_v1, 1 }
 0x47f   :  { %v4912_v63 = vrot.slane %v21690_v42, 1  ;;  %v4923_v42 = vrot.slane %v4921_v52, 1 }
 0x480   :  { %v4936_v21 = vor.u32 %v4935_v19, %v4932_v45 }
 0x481   :  { %v4914_v39 = vor.u32 %v4913_v32, %v4912_v63  ;;  %v4927_v1 = vor.u32 %v4926_v5, %v4923_v42 }
 0x482   :  { %v4937_v36 = vsel %vm951_vm2, %v4918_v54, %v4936_v21 }
 0x483   :  { %v4915_v35 = vsel %vm951_vm2, %v4906_v50, %v4914_v39  ;;  %v4928_v51 = vsel %vm951_vm2, %v4914_v39, %v4927_v1  ;;  %v21696_v39 = vld [vmem:[#allocation11_spill] sm:$0xff]  ;;  %vm8269_vm2 = vcmask 1041409  }
 0x484   :  { %v5054_v21 = vrot.slane %v21696_v39, 2 }
 0x485   :  { %7029 = vmatmul.mubr.bf16.gmra.mrb[96].mxu1 %v4907_v49  ;;  %v21692_v49 = vld [vmem:[#allocation7_spill] sm:$0xff] }
 0x486   :  { %7036 = vmatprep.mubr.bf16.mxu1 %v4919_v25  ;;  %v12969_v16 = vcombine.high %v3178_v59, %v21692_v49  ;;  %v12968_v50 = vcombine.low %v3178_v59, %v21692_v49  ;;  %v21693_v25 = vld [vmem:[#allocation8_spill] sm:$0xff] }
 0x487   :  { %v5043_v45 = vrot.slane %v21693_v25, 2  ;;  %v5064_v25 = vrot.slane %v17459_v30, 2  ;;  %v5066_v30 = vrot.slane %v17497_v7, 2  ;;  %v21699_v7 = vld [vmem:[#allocation14_spill] sm:$0xff] }
 0x488   :  { %v5045_v63 = vrot.slane %v12969_v16, 2  ;;  %v5042_v54 = vrot.slane %v12968_v50, 2  ;;  %v5058_v16 = vrot.slane %v18857_v8, 2  ;;  %v5056_v50 = vrot.slane %v18863_v60, 2 }
 0x489   :  { %v5049_v42 = vsel %vm1184_vm4, %v5043_v45, %v5048_v40 }
 0x48a   :  { %v5047_v32 = vsel %vm1184_vm4, %v5045_v63, %v5046_v28  ;;  %v5044_v52 = vsel %vm1184_vm4, %v5042_v54, %v5043_v45  ;;  %v3179_v63 = vld [vmem:[#allocation2 + $0x48] sm:$0xcc]  ;;  %v5061_v54 = vrot.slane %v17456_v12, 2  ;;  %v5070_v12 = vrot.slane %v17536_v13, 2 }
 0x48c   :  { %v5067_v39 = vsel %vm1184_vm4, %v5061_v54, %v5066_v30 }
 0x48d   :  { %7037 = vmatmul.mubr.bf16.gmra.mrb[100].mxu1 %v4915_v35  ;;  %v21694_v35 = vld [vmem:[#allocation9_spill] sm:$0xff] }
 0x48e   :  { %7044 = vmatprep.mubr.bf16.mxu1 %v4937_v36  ;;  %v5050_v19 = vrot.slane %v21694_v35, 2  ;;  %v21697_v36 = vld [vmem:[#allocation12_spill] sm:$0xff] }
 0x48f   :  { %v5052_v49 = vrot.slane %v21697_v36, 2 }
 0x490   :  { %v5051_v5 = vsel %vm1184_vm4, %v5046_v28, %v5050_v19  ;;  %v5055_v59 = vsel %vm1184_vm4, %v5050_v19, %v5054_v21  ;;  %v5059_v28 = vsel %vm1184_vm4, %v5054_v21, %v5058_v16  ;;  %v5082_v16 = vrot.slane %v17604_v14, 2 }
 0x491   :  { %v5053_v1 = vsel %vm1184_vm4, %v5048_v40, %v5052_v49  ;;  %v5057_v35 = vsel %vm1184_vm4, %v5052_v49, %v5056_v50  ;;  %v5072_v40 = vrot.slane %v17528_v53, 2  ;;  %v5074_v53 = vrot.slane %v18918_v37, 2 }
 0x492   :  { %v5084_v14 = vrot.slane %v17671_v15, 2  ;;  %v21700_v15 = vld [vmem:[#allocation18_spill] sm:$0xff] }
 0x495   :  { %7045 = vmatmul.mubr.bf16.gmra.mrb[104].mxu1 %v4928_v51  ;;  %v21698_v51 = vld [vmem:[#allocation13_spill] sm:$0xff] }
 0x496   :  { %7085 = vmatprep.mubr.bf16.mxu1 %v5047_v32  ;;  %v12971_v32 = vcombine.high %v3179_v63, %v21698_v51  ;;  %v12970_v8 = vcombine.low %v3179_v63, %v21698_v51  ;;  %v5075_v63 = vsel %vm1184_vm4, %v5070_v12, %v5074_v53  ;;  %v5086_v51 = vrot.slane %v17644_v57, 2 }
 0x497   :  { %v5094_v57 = vrot.slane %v18955_v17, 2  ;;  %v5118_v53 = vrot.slane %v21513_v38, 2  ;;  %v5120_v38 = vrot.slane %v21623_v29, 2  ;;  %v21702_v29 = vld [vmem:[#allocation34_spill] sm:$0xff] }
 0x498   :  { %v5063_v45 = vrot.slane %v12971_v32, 2  ;;  %v5087_v37 = vsel %vm1184_vm4, %v5082_v16, %v5086_v51 }
 0x49a   :  { %v5065_v19 = vsel %vm1184_vm4, %v5063_v45, %v5064_v25 }
 0x49d   :  { %7086 = vmatmul.mubr.bf16.vlgmr.msra.gmra.mrb[108].mxu1 %v5044_v52  ;;  %v5068_v52 = vrot.slane %v17495_v44, 2  ;;  %v5076_v44 = vrot.slane %v18907_v24, 2 }
 0x49e   :  { %7093 = vmatprep.mubr.bf16.mxu1 %v5051_v5  ;;  %v5060_v5 = vrot.slane %v12970_v8, 2  ;;  %v3181_v8 = vld [vmem:[#allocation2 + $0xd8] sm:$0xcc] }
 0x49f   :  { %v5069_v60 = vsel %vm1184_vm4, %v5064_v25, %v5068_v52  ;;  %v5073_v21 = vsel %vm1184_vm4, %v5068_v52, %v5072_v40  ;;  %v5077_v36 = vsel %vm1184_vm4, %v5072_v40, %v5076_v44  ;;  %v5090_v25 = vrot.slane %v21487_v31, 2 }
 0x4a0   :  { %v5062_v62 = vsel %vm1184_vm4, %v5060_v5, %v5061_v54  ;;  %v12975_v52 = vcombine.high %v3181_v8, %v21700_v15  ;;  %v5092_v31 = vrot.slane %v18965_v56, 2  ;;  %v5100_v5 = vrot.slane %v21496_v3, 2 }
 0x4a1   :  { %v5095_v54 = vsel %vm1184_vm4, %v5090_v25, %v5094_v57  ;;  %v12974_v17 = vcombine.low %v3181_v8, %v21700_v15  ;;  %v5104_v40 = vrot.slane %v21500_v4, 2  ;;  %v5102_v3 = vrot.slane %v21503_v26, 2  ;;  %v21701_v26 = vld [vmem:[#allocation26_spill] sm:$0xff]  ;;  %v21704_v8 = vld [vmem:[#allocation40_spill] sm:$0xff]  ;;  %v21705_v15 = vld [vmem:[#allocation41_spill] sm:$0xff] }
 0x4a2   :  { %v5112_v4 = vrot.slane %v19001_v22, 2 }
 0x4a3   :  { %v5105_v56 = vsel %vm1184_vm4, %v5100_v5, %v5104_v40 }
 0x4a5   :  { %7094 = vmatmul.mubr.bf16.gmra.mrb[112].mxu1 %v5049_v42  ;;  %v5071_v42 = vsel %vm1184_vm4, %v5066_v30, %v5070_v12  ;;  %v5097_v30 = vrot.slane %v21499_v43, 2  ;;  %v5108_v12 = vrot.slane %v21504_v0, 2  ;;  %v5106_v43 = vrot.slane %v21507_v61, 2 }
 0x4a6   :  { %7101 = vmatprep.mubr.bf16.mxu1 %v5055_v59  ;;  %v3180_v59 = vld [vmem:[#allocation2 + $0x90] sm:$0xcc]  ;;  %v5110_v0 = vrot.slane %v19011_v6, 2 }
 0x4a7   :  { %v12973_v49 = vcombine.high %v3180_v59, %v21699_v7  ;;  %v12972_v24 = vcombine.low %v3180_v59, %v21699_v7  ;;  %v5103_v44 = vsel %vm1184_vm4, %v5097_v30, %v5102_v3  ;;  %v5107_v59 = vsel %vm1184_vm4, %v5102_v3, %v5106_v43 }
 0x4a8   :  { %v5113_v7 = vsel %vm1184_vm4, %v5108_v12, %v5112_v4 }
 0x4a9   :  { %v5078_v32 = vrot.slane %v12972_v24, 2 }
 0x4ad   :  { %7102 = vmatmul.mubr.bf16.gmra.mrb[116].mxu1 %v5053_v1  ;;  %v5081_v1 = vrot.slane %v12973_v49, 2 }
 0x4ae   :  { %7109 = vmatprep.mubr.bf16.mxu1 %v5059_v28  ;;  %v5079_v28 = vrot.slane %v17615_v47, 2  ;;  %v5088_v47 = vrot.slane %v21490_v58, 2 }
 0x4af   :  { %v5083_v13 = vsel %vm1184_vm4, %v5081_v1, %v5082_v16  ;;  %v5111_v1 = vsel %vm1184_vm4, %v5106_v43, %v5110_v0  ;;  %v21710_v43 = vld [vmem:[#allocation64_spill] sm:$0xff]  ;;  %v15322_v0 = vld [vmem:[%s21073_s3 + $0x48] sm:$0xff]  }
 0x4b0   :  { %v5080_v50 = vsel %vm1184_vm4, %v5078_v32, %v5079_v28  ;;  %v5085_v45 = vsel %vm1184_vm4, %v5079_v28, %v5084_v14  ;;  %v5146_v4 = vrot.slane %v21710_v43, 2 }
 0x4b5   :  { %7110 = vmatmul.mubr.bf16.gmra.mrb[120].mxu1 %v5057_v35  ;;  %v5091_v35 = vsel %vm1184_vm4, %v5086_v51, %v5090_v25  ;;  %v5126_v51 = vrot.slane %v21626_v9, 2  ;;  %v21703_v9 = vld [vmem:[#allocation15_spill] sm:$0xff] }
 0x4b6   :  { %7117 = vmatprep.mubr.bf16.mxu1 %v5065_v19  ;;  %v5089_v19 = vsel %vm1184_vm4, %v5084_v14, %v5088_v47  ;;  %v3183_v14 = vld [vmem:[#allocation2 + $0x168] sm:$0xcc] }
 0x4bd   :  { %7118 = vmatmul.mubr.bf16.gmra.mrb[124].mxu1 %v5062_v62  ;;  %v5099_v62 = vrot.slane %v12975_v52, 2  ;;  %v5140_v52 = vrot.slane %v21705_v15, 2  ;;  %v21715_v15 = vld [vmem:[#allocation50_spill] sm:$0xff] }
 0x4be   :  { %7125 = vmatprep.mubr.bf16.mxu1 %v5069_v60  ;;  %v5093_v60 = vsel %vm1184_vm4, %v5088_v47, %v5092_v31  ;;  %v5136_v47 = vrot.slane %v21634_v10, 2  ;;  %v5138_v10 = vrot.slane %v21644_v41, 2  ;;  %v21709_v41 = vld [vmem:[#allocation42_spill] sm:$0xff] }
 0x4bf   :  { %v5101_v58 = vsel %vm1184_vm4, %v5099_v62, %v5100_v5 }
 0x4c0   :  { %v5141_v62 = vsel %vm1184_vm4, %v5136_v47, %v5140_v52 }
 0x4c5   :  { %7126 = vmatmul.mubr.bf16.gmra.mrb[0].mxu1 %v5067_v39  ;;  %v5096_v39 = vrot.slane %v12974_v17, 2 }
 0x4c6   :  { %7133 = vmatprep.mubr.bf16.mxu1 %v5073_v21 }
 0x4c7   :  { %v5098_v21 = vsel %vm1184_vm4, %v5096_v39, %v5097_v30 }
 0x4cd   :  { %7134 = vmatmul.mubr.bf16.gmra.mrb[4].mxu1 %v5071_v42  ;;  %v5109_v42 = vsel %vm1184_vm4, %v5104_v40, %v5108_v12  ;;  %v21707_v40 = vld [vmem:[#allocation45_spill] sm:$0xff]  ;;  %v3184_v12 = vld [vmem:[#allocation2 + $0x1b0] sm:$0xcc] }
 0x4ce   :  { %7141 = vmatprep.mubr.bf16.mxu1 %v5077_v36  ;;  %v3182_v36 = vld [vmem:[#allocation2 + $0x120] sm:$0xcc]  ;;  %v5142_v39 = vrot.slane %v21707_v40, 2  ;;  %v5172_v40 = vrot.slane %v21672_v48, 2 }
 0x4cf   :  { %v12977_v49 = vcombine.high %v3182_v36, %v21701_v26  ;;  %v12976_v22 = vcombine.low %v3182_v36, %v21701_v26  ;;  %v15320_v36 = vld [vmem:[%s21073_s3 + $0x40] sm:$0xff]  }
 0x4d0   :  { %v5143_v3 = vsel %vm1184_vm4, %v5138_v10, %v5142_v39  ;;  %v5147_v26 = vsel %vm1184_vm4, %v5142_v39, %v5146_v4  ;;  %13921 = vmatprep.subr.bf16.mxu0 %v15320_v36  ;;  %v19382_v39 = vld [vmem:[%s21075_s5 + $0x1] ss:$0 sm:$0xff]  ;;  %v21718_v36 = vld [vmem:[#allocation103_spill] sm:$0xff] }
 0x4d1   :  { %v5117_v16 = vrot.slane %v12977_v49, 2  ;;  %v5114_v24 = vrot.slane %v12976_v22, 2  ;;  %v15321_v49 = vld [vmem:[%s21073_s3] sm:$0xff]   ;;  %v15324_v22 = vld [vmem:[%s21073_s3 + $0x50] sm:$0xff]  }
 0x4d2   :  { %13922 = vmatpush3.bf16.msra.mxu0 %v15321_v49 }
 0x4d3   :  { %v5119_v61 = vsel %vm1184_vm4, %v5117_v16, %v5118_v53  ;;  %v15323_v16 = vld [vmem:[%s21073_s3 + $0x8] sm:$0xff]   ;;  %13923 = vmatprep.subr.bf16.mxu0 %v15322_v0 }
 0x4d5   :  { %7142 = vmatmul.mubr.bf16.gmra.mrb[8].mxu1 %v5075_v63  ;;  %v5115_v63 = vrot.slane %v21516_v55, 2  ;;  %v5124_v55 = vrot.slane %v21629_v18, 2 }
 0x4d6   :  { %7149 = vmatprep.mubr.bf16.mxu1 %v5083_v13  ;;  %v5122_v13 = vrot.slane %v21517_v11, 2  ;;  %v5130_v11 = vrot.slane %v19046_v23, 2  ;;  %v12978_v23 = vcombine.low %v3183_v14, %v21702_v29  ;;  %13924 = vmatpush3.bf16.msra.mxu0 %v15323_v16  ;;  %v21720_v16 = vld [vmem:[#allocation56_spill] sm:$0xff] }
 0x4d7   :  { %v5116_v28 = vsel %vm1184_vm4, %v5114_v24, %v5115_v63  ;;  %v5121_v32 = vsel %vm1184_vm4, %v5115_v63, %v5120_v38  ;;  %13925 = vmatprep.subr.bf16.mxu0 %v15324_v22 }
 0x4d8   :  { %v5123_v6 = vsel %vm1184_vm4, %v5118_v53, %v5122_v13  ;;  %v5131_v25 = vsel %vm1184_vm4, %v5126_v51, %v5130_v11  ;;  %v5132_v31 = vrot.slane %v12978_v23, 2  ;;  %v15330_v11 = vld [vmem:[%s21073_s3 + $0x68] sm:$0xff]   ;;  %v19367_v23 = vld [vmem:[%s21075_s5] ss:$0 sm:$0xff] }
 0x4dd   :  { %7150 = vmatmul.mubr.bf16.gmra.mrb[12].mxu1 %v5080_v50  ;;  %v5127_v50 = vsel %vm1184_vm4, %v5122_v13, %v5126_v51 }
 0x4de   :  { %7157 = vmatprep.mubr.bf16.mxu1 %v5087_v37  ;;  %v5125_v37 = vsel %vm1184_vm4, %v5120_v38, %v5124_v55  ;;  %v21711_v38 = vld [vmem:[#allocation52_spill] sm:$0xff] }
 0x4df   :  { %v5162_v51 = vrot.slane %v21711_v38, 2 }
 0x4e5   :  { %7158 = vmatmul.mubr.bf16.gmra.mrb[16].mxu1 %v5085_v45  ;;  %v12979_v45 = vcombine.high %v3183_v14, %v21702_v29  ;;  %v21713_v29 = vld [vmem:[#allocation33_spill] sm:$0xff] }
 0x4e6   :  { %7165 = vmatprep.mubr.bf16.mxu1 %v5091_v35  ;;  %v5128_v35 = vrot.slane %v21703_v9, 2  ;;  %v15332_v9 = vld [vmem:[%s21073_s3 + $0x70] sm:$0xff]  }
 0x4e7   :  { %v5135_v57 = vrot.slane %v12979_v45, 2  ;;  %v5166_v45 = vrot.slane %v21713_v29, 2 }
 0x4e9   :  { %v5137_v18 = vsel %vm1184_vm4, %v5135_v57, %v5136_v47  ;;  %v3185_v47 = vld [vmem:[#allocation2 + $0x1f8] sm:$0xcc]  ;;  %v15333_v57 = vld [vmem:[%s21073_s3 + $0x30] sm:$0xff]  }
 0x4ed   :  { %7166 = vmatmul.mubr.bf16.gmra.mrb[20].mxu1 %v5089_v19  ;;  %v5129_v19 = vsel %vm1184_vm4, %v5124_v55, %v5128_v35 }
 0x4ee   :  { %7173 = vmatprep.mubr.bf16.mxu1 %v5095_v54  ;;  %v5133_v54 = vrot.slane %v21704_v8, 2  ;;  %v21714_v8 = vld [vmem:[#allocation100_spill] sm:$0xff] }
 0x4f0   :  { %v5134_v5 = vsel %vm1184_vm4, %v5132_v31, %v5133_v54  ;;  %v5139_v17 = vsel %vm1184_vm4, %v5133_v54, %v5138_v10  ;;  %v14685_v54 = vadd.f32 %v19367_v23, %v21714_v8  ;;  %v15335_v10 = vld [vmem:[%s21073_s3 + $0x38] sm:$0xff]   ;;  %v21723_v8 = vld [vmem:[#allocation58_spill] sm:$0xff] }
 0x4f5   :  { %7174 = vmatmul.mubr.bf16.gmra.mrb[24].mxu1 %v5093_v60  ;;  %v21706_v60 = vld [vmem:[#allocation44_spill] sm:$0xff] }
 0x4f6   :  { %7181 = vmatprep.mubr.bf16.mxu1 %v5101_v58  ;;  %v5144_v58 = vrot.slane %v21706_v60, 2  ;;  %v21717_v60 = vld [vmem:[#allocation101_spill] sm:$0xff] }
 0x4f8   :  { %v5145_v30 = vsel %vm1184_vm4, %v5140_v52, %v5144_v58  ;;  %v12983_v52 = vcombine.high %v3185_v47, %v21715_v15 }
 0x4fd   :  { %7182 = vmatmul.mubr.bf16.gmra.mrb[28].mxu1 %v5098_v21  ;;  %v21708_v21 = vld [vmem:[#allocation61_spill] sm:$0xff] }
 0x4fe   :  { %7189 = vmatprep.mubr.bf16.mxu1 %v5105_v56  ;;  %v5148_v56 = vrot.slane %v21708_v21, 2 }
 0x505   :  { %7190 = vmatmul.mubr.bf16.gmra.mrb[32].mxu1 %v5103_v44  ;;  %v5149_v44 = vsel %vm1184_vm4, %v5144_v58, %v5148_v56  ;;  %v14687_v58 = vadd.f32 %v19367_v23, %v21717_v60 }
 0x506   :  { %7197 = vmatprep.mubr.bf16.mxu1 %v5109_v42  ;;  %v12981_v42 = vcombine.high %v3184_v12, %v21709_v41 }
 0x50d   :  { %7198 = vmatmul.mubr.bf16.gmra.mrb[36].mxu1 %v5107_v59  ;;  %v5154_v59 = vrot.slane %v21656_v2, 2  ;;  %v12980_v2 = vcombine.low %v3184_v12, %v21709_v41  ;;  %v19387_v41 = vld [vmem:[%s21075_s5 + $0x2] ss:$0 sm:$0xff] }
 0x50e   :  { %7205 = vmatprep.mubr.bf16.mxu1 %v5113_v7  ;;  %v5153_v7 = vrot.slane %v12981_v42, 2 }
 0x50f   :  { %v5150_v63 = vrot.slane %v12980_v2, 2 }
 0x510   :  { %v5155_v53 = vsel %vm1184_vm4, %v5153_v7, %v5154_v59  ;;  %v14689_v7 = vadd.f32 %v19367_v23, %v21718_v36 }
 0x515   :  { %7206 = vmatmul.mubr.bf16.gmra.mrb[40].mxu1 %v5111_v1  ;;  %v5151_v1 = vrot.slane %v21553_v33, 2  ;;  %v5156_v33 = vrot.slane %v18263_v20, 2  ;;  %v15329_v20 = vld [vmem:[%s21073_s3 + $0x20] sm:$0xff]  }
 0x516   :  { %7213 = vmatprep.mubr.bf16.mxu1 %v5119_v61  ;;  %v5158_v61 = vrot.slane %v21554_v46, 2  ;;  %v15326_v46 = vld [vmem:[%s21073_s3 + $0x58] sm:$0xff]  }
 0x517   :  { %v5152_v13 = vsel %vm1184_vm4, %v5150_v63, %v5151_v1 }
 0x518   :  { %v5159_v24 = vsel %vm1184_vm4, %v5154_v59, %v5158_v61  ;;  %v5163_v55 = vsel %vm1184_vm4, %v5158_v61, %v5162_v51  ;;  %v12982_v59 = vcombine.low %v3185_v47, %v21715_v15  ;;  %v21721_v61 = vld [vmem:[#allocation105_spill] sm:$0xff]  ;;  %v21722_v47 = vld [vmem:[#allocation106_spill] sm:$0xff] }
 0x519   :  { %v14691_v22 = vadd.f32 %v19367_v23, %v21721_v61 }
 0x51d   :  { %7214 = vmatmul.mubr.bf16.gmra.mrb[44].mxu1 %v5116_v28  ;;  %v15325_v28 = vld [vmem:[%s21073_s3 + $0x10] sm:$0xff]  }
 0x51e   :  { %7221 = vmatprep.mubr.bf16.mxu1 %v5123_v6  ;;  %13926 = vmatpush3.bf16.msra.mxu0 %v15325_v28  ;;  %v15327_v6 = vld [vmem:[%s21073_s3 + $0x18] sm:$0xff]  }
 0x51f   :  { %13927 = vmatprep.subr.bf16.mxu0 %v15326_v46 }
 0x522   :  { %13928 = vmatpush3.bf16.msra.mxu0 %v15327_v6 }
 0x525   :  { %7222 = vmatmul.mubr.bf16.gmra.mrb[48].mxu1 %v5121_v32  ;;  %v15328_v32 = vld [vmem:[%s21073_s3 + $0x60] sm:$0xff]  }
 0x526   :  { %7229 = vmatprep.mubr.bf16.mxu1 %v5127_v50  ;;  %v5157_v50 = vsel %vm1184_vm4, %v5151_v1, %v5156_v33  ;;  %13929 = vmatprep.subr.bf16.mxu0 %v15328_v32  ;;  %v5176_v1 = vrot.slane %v21720_v16, 2  ;;  %v21727_v16 = vld [vmem:[#allocation108_spill] sm:$0xff] }
 0x527   :  { %13930 = vmatpush3.bf16.msra.mxu0 %v15329_v20  ;;  %v14697_v61 = vadd.f32 %v19367_v23, %v21727_v16 }
 0x528   :  { %13931 = vmatprep.subr.bf16.mxu0 %v15330_v11  ;;  %v5177_v20 = vsel %vm1184_vm4, %v5172_v40, %v5176_v1 }
 0x52d   :  { %7230 = vmatmul.mubr.bf16.gmra.mrb[52].mxu1 %v5125_v37  ;;  %v21712_v37 = vld [vmem:[#allocation53_spill] sm:$0xff] }
 0x52e   :  { %7237 = vmatprep.mubr.bf16.mxu1 %v5131_v25  ;;  %v5160_v14 = vrot.slane %v21712_v37, 2  ;;  %v15331_v25 = vld [vmem:[%s21073_s3 + $0x28] sm:$0xff]  }
 0x52f   :  { %13932 = vmatpush3.bf16.msra.mxu0 %v15331_v25 }
 0x530   :  { %v5161_v35 = vsel %vm1184_vm4, %v5156_v33, %v5160_v14  ;;  %13933 = vmatprep.subr.bf16.mxu0 %v15332_v9  ;;  %v5168_v33 = vrot.slane %v12982_v59, 2 }
 0x533   :  { %13934 = vmatpush3.bf16.msra.mxu0 %v15333_v57  ;;  %v14693_v57 = vadd.f32 %v19367_v23, %v21722_v47 }
 0x535   :  { %7238 = vmatmul.mubr.bf16.gmra.mrb[56].mxu1 %v5129_v19  ;;  %v5167_v19 = vsel %vm1184_vm4, %v5162_v51, %v5166_v45 }
 0x536   :  { %7245 = vmatprep.mubr.bf16.mxu1 %v5137_v18  ;;  %v15334_v18 = vld [vmem:[%s21073_s3 + $0x78] sm:$0xff]  }
 0x537   :  { %13935 = vmatprep.subr.bf16.mxu0 %v15334_v18  ;;  %v5174_v18 = vrot.slane %v21682_v27, 2 }
 0x538   :  { %13936 = vmatpush3.bf16.msra.mxu0 %v15335_v10  ;;  %v21724_v10 = vld [vmem:[#allocation107_spill] sm:$0xff] }
 0x539   :  { %v14695_v60 = vadd.f32 %v19367_v23, %v21724_v10 }
 0x53d   :  { %7246 = vmatmul.mubr.bf16.gmra.mrb[60].mxu1 %v5134_v5  ;;  %v21716_v5 = vld [vmem:[#allocation35_spill] sm:$0xff] }
 0x53e   :  { %7253 = vmatprep.mubr.bf16.mxu1 %v5141_v62  ;;  %v5164_v62 = vrot.slane %v21716_v5, 2 }
 0x540   :  { %v5165_v42 = vsel %vm1184_vm4, %v5160_v14, %v5164_v62 }
 0x545   :  { %7254 = vmatmul.mubr.bf16.gmra.mrb[64].mxu1 %v5139_v17 }
 0x546   :  { %7261 = vmatprep.mubr.bf16.mxu1 %v5145_v30 }
 0x54d   :  { %7262 = vmatmul.mubr.bf16.gmra.mrb[68].mxu1 %v5143_v3 }
 0x54e   :  { %7269 = vmatprep.mubr.bf16.mxu1 %v5149_v44  ;;  %v5171_v44 = vrot.slane %v12983_v52, 2 }
 0x550   :  { %v5173_v4 = vsel %vm1184_vm4, %v5171_v44, %v5172_v40 }
 0x555   :  { %7270 = vmatmul.mubr.bf16.gmra.mrb[72].mxu1 %v5147_v26 }
 0x556   :  { %7277 = vmatprep.mubr.bf16.mxu1 %v5155_v53  ;;  %v21719_v53 = vld [vmem:[#allocation55_spill] sm:$0xff] }
 0x557   :  { %v5169_v2 = vrot.slane %v21719_v53, 2 }
 0x559   :  { %v5175_v44 = vsel %vm1184_vm4, %v5169_v2, %v5174_v18 }
 0x55d   :  { %7278 = vmatmul.mubr.bf16.gmra.mrb[76].mxu1 %v5152_v13 }
 0x55e   :  { %7285 = vmatprep.mubr.bf16.mxu1 %v5159_v24 }
 0x565   :  { %7286 = vmatmul.mubr.bf16.gmra.mrb[80].mxu1 %v5157_v50 }
 0x566   :  { %7293 = vmatprep.mubr.bf16.mxu1 %v5163_v55  ;;  %v5170_v55 = vsel %vm1184_vm4, %v5168_v33, %v5169_v2 }
 0x56d   :  { %7294 = vmatmul.mubr.bf16.gmra.mrb[84].mxu1 %v5161_v35 }
 0x56e   :  { %7301 = vmatprep.mubr.bf16.mxu1 %v5167_v19 }
 0x570   :  { %v7087_v31 = vpop.f32.mrb[108].mxu1 }
 0x571   :  { %v14686_v17 = vadd.f32 %v14685_v54, %v7087_v31  ;;  %v7089_v30 = vpop.f32.mrb[109].mxu1  ;;  %v5180_v54 = vrot.slane %v21723_v8, 2 }
 0x572   :  { %v7090_v21 = vpop.f32.mrb[110].mxu1 }
 0x573   :  { %v7342_v56 = vmax.f32 %v14686_v17, 0.0  ;;  %v14688_v3 = vadd.f32 %v14687_v58, %v7090_v21  ;;  %v7092_v12 = vpop.f32.mrb[111].mxu1 }
 0x575   :  { %v7410_v48 = vmul.f32 %v19382_v39, %v7342_v56  ;;  %v7343_v43 = vmax.f32 %v14688_v3, 0.0  ;;  %7302 = vmatmul.mubr.bf16.gmra.mrb[88].mxu1 %v5165_v42  ;;  %v5181_v42 = vsel %vm1184_vm4, %v5176_v1, %v5180_v54 }
 0x576   :  { %7309 = vmatprep.mubr.bf16.mxu1 %v5173_v4 }
 0x577   :  { %v7478_v26 = vadd.f32 %v19387_v41, %v7410_v48  ;;  %v7411_v49 = vmul.f32 %v19382_v39, %v7343_v43 }
 0x578   :  { %v7095_v0 = vpop.f32.mrb[112].mxu1 }
 0x579   :  { %v7542_v63 = vrot.slane %v7478_v26, 4  ;;  %v7479_v13 = vadd.f32 %v19387_v41, %v7411_v49  ;;  %v14690_v24 = vadd.f32 %v14689_v7, %v7095_v0  ;;  %v7097_v28 = vpop.f32.mrb[113].mxu1  ;;  %v21726_v0 = vld [vmem:[#allocation36_spill] sm:$0xff] }
 0x57a   :  { %v7098_v46 = vpop.f32.mrb[114].mxu1  ;;  %v5184_v53 = vrot.slane %v21726_v0, 2 }
 0x57b   :  { %v7543_v6 = vmax.f32 %v7478_v26, %v7542_v63  ;;  %v7548_v38 = vrot.slane %v7479_v13, 4  ;;  %v7344_v51 = vmax.f32 %v14690_v24, 0.0  ;;  %v14692_v32 = vadd.f32 %v14691_v22, %v7098_v46  ;;  %v7100_v50 = vpop.f32.mrb[115].mxu1  ;;  %v21725_v26 = vld [vmem:[#allocation59_spill] sm:$0xff] }
 0x57c   :  { %v5178_v49 = vrot.slane %v21725_v26, 2 }
 0x57d   :  { %v7544_v11 = vrot.slane %v7543_v6, 2  ;;  %v7549_v37 = vmax.f32 %v7479_v13, %v7548_v38  ;;  %v7412_v14 = vmul.f32 %v19382_v39, %v7344_v51  ;;  %v7345_v25 = vmax.f32 %v14692_v32, 0.0  ;;  %7310 = vmatmul.mubr.bf16.gmra.mrb[92].mxu1 %v5170_v55  ;;  %v21728_v32 = vld [vmem:[#allocation109_spill] sm:$0xff] }
 0x57e   :  { %7317 = vmatprep.mubr.bf16.mxu1 %v5177_v20  ;;  %v14699_v50 = vadd.f32 %v19367_v23, %v21728_v32 }
 0x57f   :  { %v7545_v29 = vmax.f32 %v7543_v6, %v7544_v11  ;;  %v7550_v45 = vrot.slane %v7549_v37, 2  ;;  %v7480_v9 = vadd.f32 %v19387_v41, %v7412_v14  ;;  %v7413_v35 = vmul.f32 %v19382_v39, %v7345_v25 }
 0x580   :  { %v7103_v19 = vpop.f32.mrb[116].mxu1 }
 0x581   :  { %v7546_v15 = vrot.slane %v7545_v29, 1  ;;  %v7551_v52 = vmax.f32 %v7549_v37, %v7550_v45  ;;  %v7554_v31 = vrot.slane %v7480_v9, 4  ;;  %v7481_v5 = vadd.f32 %v19387_v41, %v7413_v35  ;;  %v7105_v62 = vpop.f32.mrb[117].mxu1 }
 0x582   :  { %v14694_v58 = vadd.f32 %v14693_v57, %v7103_v19  ;;  %v7106_v17 = vpop.f32.mrb[118].mxu1  ;;  %v5179_v37 = vsel %vm1184_vm4, %v5174_v18, %v5178_v49  ;;  %v5182_v19 = vrot.slane %v19187_v34, 2 }
 0x583   :  { %v7547_v30 = vmax.f32 %v7545_v29, %v7546_v15  ;;  %v7552_v40 = vrot.slane %v7551_v52, 1  ;;  %v7555_v21 = vmax.f32 %v7480_v9, %v7554_v31  ;;  %v7560_v56 = vrot.slane %v7481_v5, 4  ;;  %v7108_v3 = vpop.f32.mrb[119].mxu1 }
 0x584   :  { %v7346_v12 = vmax.f32 %v14694_v58, 0.0  ;;  %v14696_v27 = vadd.f32 %v14695_v60, %v7106_v17  ;;  %v5185_v31 = vsel %vm1184_vm4, %v5180_v54, %v5184_v53  ;;  %v21730_v58 = vld [vmem:[#allocation62_spill] sm:$0xff] }
 0x585   :  { %v13833_v48 = vpack.c.bf16 %v7547_v30, %v7547_v30  ;;  %v7553_v43 = vmax.f32 %v7551_v52, %v7552_v40  ;;  %v7556_v4 = vrot.slane %v7555_v21, 2  ;;  %v7561_v59 = vmax.f32 %v7481_v5, %v7560_v56  ;;  %7318 = vmatmul.mubr.bf16.gmra.mrb[96].mxu1 %v5175_v44  ;;  %v21729_v5 = vld [vmem:[#allocation60_spill] sm:$0xff] }
 0x586   :  { %v7414_v36 = vmul.f32 %v19382_v39, %v7346_v12  ;;  %v7347_v7 = vmax.f32 %v14696_v27, 0.0  ;;  %7325 = vmatprep.mubr.bf16.mxu1 %v5181_v42  ;;  %v14701_v18 = vadd.f32 %v19367_v23, %v21729_v5  ;;  %v14703_v17 = vadd.f32 %v19367_v23, %v21730_v58 }
 0x587   :  { %v13834_v22 = vpack.c.bf16 %v7553_v43, %v7553_v43  ;;  %v7557_v2 = vmax.f32 %v7555_v21, %v7556_v4  ;;  %v7562_v63 = vrot.slane %v7561_v59, 2  ;;  %v8195_v1 = vunpack.c.l.b16 %v13833_v48 }
 0x588   :  { %v7482_v13 = vadd.f32 %v19387_v41, %v7414_v36  ;;  %v7415_v24 = vmul.f32 %v19382_v39, %v7347_v7  ;;  %v7111_v28 = vpop.f32.mrb[120].mxu1 }
 0x589   :  { %v8196_v46 = vunpack.c.l.b16 %v13834_v22  ;;  %v7558_v33 = vrot.slane %v7557_v2, 1  ;;  %v7563_v6 = vmax.f32 %v7561_v59, %v7562_v63  ;;  %v14698_v38 = vadd.f32 %v14697_v61, %v7111_v28  ;;  %v7113_v51 = vpop.f32.mrb[121].mxu1 }
 0x58a   :  { %v7566_v55 = vrot.slane %v7482_v13, 4  ;;  %v7483_v20 = vadd.f32 %v19387_v41, %v7415_v24  ;;  %v7114_v11 = vpop.f32.mrb[122].mxu1 }
 0x58b   :  { %v8260_v14 = vsel %vm8259_vm14, %v8196_v46, %v8195_v1  ;;  %v7559_v25 = vmax.f32 %v7557_v2, %v7558_v33  ;;  %v7564_v29 = vrot.slane %v7563_v6, 1  ;;  %v7348_v45 = vmax.f32 %v14698_v38, 0.0  ;;  %v7116_v9 = vpop.f32.mrb[123].mxu1  ;;  %v21731_v38 = vld [vmem:[#allocation63_spill] sm:$0xff] }
 0x58c   :  { %v7567_v35 = vmax.f32 %v7482_v13, %v7566_v55  ;;  %v7572_v47 = vrot.slane %v7483_v20, 4  ;;  %v14700_v57 = vadd.f32 %v14699_v50, %v7114_v11  ;;  %v5183_v1 = vsel %vm1184_vm4, %v5178_v49, %v5182_v19 }
 0x58d   :  { %v13835_v8 = vpack.c.bf16 %v7559_v25, %v7559_v25  ;;  %v7565_v15 = vmax.f32 %v7563_v6, %v7564_v29  ;;  %v7416_v52 = vmul.f32 %v19382_v39, %v7348_v45  ;;  %7326 = vmatmul.mubr.bf16.gmra.mrb[100].mxu1 %v5179_v37  ;;  %v5972_v51 = vadd.f32 %v19367_v23, %v21731_v38 }
 0x58e   :  { %v7568_v62 = vrot.slane %v7567_v35, 2  ;;  %v7573_v10 = vmax.f32 %v7483_v20, %v7572_v47  ;;  %v7349_v60 = vmax.f32 %v14700_v57, 0.0  ;;  %7333 = vmatprep.mubr.bf16.mxu1 %v5185_v31  ;;  %v21732_v57 = vld [vmem:[#allocation65_spill] sm:$0xff] }
 0x58f   :  { %v8197_v30 = vunpack.c.l.b16 %v13835_v8  ;;  %v13836_v40 = vpack.c.bf16 %v7565_v15, %v7565_v15  ;;  %v7484_v34 = vadd.f32 %v19387_v41, %v7416_v52  ;;  %v5975_v19 = vadd.f32 %v19367_v23, %v21732_v57 }
 0x590   :  { %v7569_v21 = vmax.f32 %v7567_v35, %v7568_v62  ;;  %v7574_v56 = vrot.slane %v7573_v10, 2  ;;  %v7417_v3 = vmul.f32 %v19382_v39, %v7349_v60  ;;  %v7119_v54 = vpop.f32.mrb[124].mxu1 }
 0x591   :  { %v8262_v12 = vsel %vm2760_vm12, %v8197_v30, %v8260_v14  ;;  %v8198_v27 = vunpack.c.l.b16 %v13836_v40  ;;  %v7578_v44 = vrot.slane %v7484_v34, 4  ;;  %v14702_v42 = vadd.f32 %v14701_v18, %v7119_v54  ;;  %v7121_v48 = vpop.f32.mrb[125].mxu1 }
 0x592   :  { %v7570_v43 = vrot.slane %v7569_v21, 1  ;;  %v7575_v4 = vmax.f32 %v7573_v10, %v7574_v56  ;;  %v7485_v59 = vadd.f32 %v19387_v41, %v7417_v3  ;;  %v7122_v36 = vpop.f32.mrb[126].mxu1 }
 0x593   :  { %v8264_v7 = vsel %vm8263_vm15, %v8198_v27, %v8262_v12  ;;  %v7579_v0 = vmax.f32 %v7484_v34, %v7578_v44  ;;  %v7350_v53 = vmax.f32 %v14702_v42, 0.0  ;;  %v14704_v16 = vadd.f32 %v14703_v17, %v7122_v36  ;;  %v7124_v61 = vpop.f32.mrb[127].mxu1  ;;  %v21733_v12 = vld [vmem:[#allocation66_spill] sm:$0xff] }
 0x594   :  { %v7571_v22 = vmax.f32 %v7569_v21, %v7570_v43  ;;  %v7576_v2 = vrot.slane %v7575_v4, 1  ;;  %v7584_v63 = vrot.slane %v7485_v59, 4  ;;  %v5980_v27 = vadd.f32 %v19367_v23, %v21733_v12 }
 0x595   :  { %v7580_v13 = vrot.slane %v7579_v0, 2  ;;  %v7418_v24 = vmul.f32 %v19382_v39, %v7350_v53  ;;  %v7351_v28 = vmax.f32 %v14704_v16, 0.0  ;;  %7334 = vmatmul.mubr.bf16.gmra.mrb[104].mxu1 %v5183_v1 }
 0x596   :  { %v13837_v46 = vpack.c.bf16 %v7571_v22, %v7571_v22  ;;  %v7577_v33 = vmax.f32 %v7575_v4, %v7576_v2  ;;  %v7585_v6 = vmax.f32 %v7485_v59, %v7584_v63  ;;  %v21734_v4 = vld [vmem:[#allocation67_spill] sm:$0xff] }
 0x597   :  { %v7581_v32 = vmax.f32 %v7579_v0, %v7580_v13  ;;  %v7486_v50 = vadd.f32 %v19387_v41, %v7418_v24  ;;  %v7419_v55 = vmul.f32 %v19382_v39, %v7351_v28  ;;  %v5983_v59 = vadd.f32 %v19367_v23, %v21734_v4 }
 0x598   :  { %v8199_v26 = vunpack.c.l.b16 %v13837_v46  ;;  %v13838_v20 = vpack.c.bf16 %v7577_v33, %v7577_v33  ;;  %v7586_v49 = vrot.slane %v7585_v6, 2  ;;  %v7127_v11 = vpop.f32.mrb[0].mxu1 }
 0x599   :  { %v7582_v37 = vrot.slane %v7581_v32, 1  ;;  %v7590_v14 = vrot.slane %v7486_v50, 4  ;;  %v7487_v25 = vadd.f32 %v19387_v41, %v7419_v55  ;;  %v14706_v29 = vadd.f32 %v7127_v11, %v5972_v51  ;;  %v7129_v45 = vpop.f32.mrb[1].mxu1 }
 0x59a   :  { %v8266_v9 = vsel %vm8265_vm0, %v8199_v26, %v8264_v7  ;;  %v8200_v35 = vunpack.c.l.b16 %v13838_v20  ;;  %v7587_v47 = vmax.f32 %v7585_v6, %v7586_v49  ;;  %v7130_v8 = vpop.f32.mrb[2].mxu1 }
 0x59b   :  { %v7583_v15 = vmax.f32 %v7581_v32, %v7582_v37  ;;  %v7591_v52 = vmax.f32 %v7486_v50, %v7590_v14  ;;  %v7596_v31 = vrot.slane %v7487_v25, 4  ;;  %v7352_v5 = vmax.f32 %v14706_v29, 0.0  ;;  %v7132_v18 = vpop.f32.mrb[3].mxu1  ;;  %v21735_v14 = vld [vmem:[#allocation68_spill] sm:$0xff] }
 0x59c   :  { %v8268_v62 = vsel %vm8267_vm1, %v8200_v35, %v8266_v9  ;;  %v7588_v10 = vrot.slane %v7587_v47, 1  ;;  %v14708_v60 = vadd.f32 %v7130_v8, %v5975_v19 }
 0x59d   :  { %v8313_v58 = vpack.c.b16 %v8268_v62, %v8268_v62  ;;  %v7592_v17 = vrot.slane %v7591_v52, 2  ;;  %v7597_v30 = vmax.f32 %v7487_v25, %v7596_v31  ;;  %v13839_v40 = vpack.c.bf16 %v7583_v15, %v7583_v15 }
 0x59e   :  { %v7589_v34 = vmax.f32 %v7587_v47, %v7588_v10  ;;  %v7420_v21 = vmul.f32 %v19382_v39, %v7352_v5  ;;  %v7353_v56 = vmax.f32 %v14708_v60, 0.0  ;;  %v5988_v25 = vadd.f32 %v19367_v23, %v21735_v14  ;;  %v21736_v47 = vld [vmem:[#allocation69_spill] sm:$0xff] }
 0x59f   :  { %8345 = vst [vmem:[#allocation2] sm:$0xe] %v8313_v58  ;;  %v7593_v3 = vmax.f32 %v7591_v52, %v7592_v17  ;;  %v7598_v54 = vrot.slane %v7597_v30, 2  ;;  %v8201_v16 = vunpack.c.l.b16 %v13839_v40  ;;  %v5991_v57 = vadd.f32 %v19367_v23, %v21736_v47 }
 0x5a0   :  { %v13840_v44 = vpack.c.bf16 %v7589_v34, %v7589_v34  ;;  %v7488_v42 = vadd.f32 %v19387_v41, %v7420_v21  ;;  %v7421_v48 = vmul.f32 %v19382_v39, %v7353_v56  ;;  %v7135_v43 = vpop.f32.mrb[4].mxu1 }
 0x5a1   :  { %v7594_v36 = vrot.slane %v7593_v3, 1  ;;  %v7599_v7 = vmax.f32 %v7597_v30, %v7598_v54  ;;  %v14710_v0 = vadd.f32 %v7135_v43, %v5980_v27  ;;  %v7137_v53 = vpop.f32.mrb[5].mxu1 }
 0x5a2   :  { %v8202_v61 = vunpack.c.l.b16 %v13840_v44  ;;  %v7602_v22 = vrot.slane %v7488_v42, 4  ;;  %v7489_v2 = vadd.f32 %v19387_v41, %v7421_v48  ;;  %v7138_v63 = vpop.f32.mrb[6].mxu1 }
 0x5a3   :  { %v7595_v1 = vmax.f32 %v7593_v3, %v7594_v36  ;;  %v7600_v13 = vrot.slane %v7599_v7, 1  ;;  %v7354_v24 = vmax.f32 %v14710_v0, 0.0  ;;  %v14712_v28 = vadd.f32 %v7138_v63, %v5983_v59  ;;  %v7140_v46 = vpop.f32.mrb[7].mxu1  ;;  %v21737_v59 = vld [vmem:[#allocation70_spill] sm:$0xff] }
 0x5a4   :  { %v8270_v33 = vsel %vm8269_vm2, %v8202_v61, %v8201_v16  ;;  %v7603_v6 = vmax.f32 %v7488_v42, %v7602_v22  ;;  %v7608_v38 = vrot.slane %v7489_v2, 4  ;;  %v5996_v36 = vadd.f32 %v19367_v23, %v21737_v59  ;;  %v21738_v46 = vld [vmem:[#allocation71_spill] sm:$0xff] }
 0x5a5   :  { %v8314_v51 = vpack.c.b16 %v8270_v33, %v8270_v33  ;;  %v13841_v32 = vpack.c.bf16 %v7595_v1, %v7595_v1  ;;  %v7601_v50 = vmax.f32 %v7599_v7, %v7600_v13  ;;  %v7422_v55 = vmul.f32 %v19382_v39, %v7354_v24 }
 0x5a6   :  { %v7604_v26 = vrot.slane %v7603_v6, 2  ;;  %v7609_v20 = vmax.f32 %v7489_v2, %v7608_v38  ;;  %v7355_v49 = vmax.f32 %v14712_v28, 0.0  ;;  %v5999_v33 = vadd.f32 %v19367_v23, %v21738_v46 }
 0x5a7   :  { %8346 = vst [vmem:[#allocation2 + $0x8] sm:$0x1] %v8314_v51  ;;  %v13842_v11 = vpack.c.bf16 %v7601_v50, %v7601_v50  ;;  %v7490_v37 = vadd.f32 %v19387_v41, %v7422_v55  ;;  %v8203_v19 = vunpack.c.l.b16 %v13841_v32 }
 0x5a8   :  { %v7605_v29 = vmax.f32 %v7603_v6, %v7604_v26  ;;  %v7610_v45 = vrot.slane %v7609_v20, 2  ;;  %v7423_v9 = vmul.f32 %v19382_v39, %v7355_v49  ;;  %v7143_v35 = vpop.f32.mrb[8].mxu1 }
 0x5a9   :  { %v8204_v8 = vunpack.c.l.b16 %v13842_v11  ;;  %v7614_v15 = vrot.slane %v7490_v37, 4  ;;  %v14714_v52 = vadd.f32 %v7143_v35, %v5988_v25  ;;  %v7145_v31 = vpop.f32.mrb[9].mxu1 }
 0x5aa   :  { %v7606_v5 = vrot.slane %v7605_v29, 1  ;;  %v7611_v18 = vmax.f32 %v7609_v20, %v7610_v45  ;;  %v7491_v62 = vadd.f32 %v19387_v41, %v7423_v9  ;;  %v7146_v10 = vpop.f32.mrb[10].mxu1 }
 0x5ab   :  { %v8271_v60 = vsel %vm8259_vm14, %v8204_v8, %v8203_v19  ;;  %v7615_v58 = vmax.f32 %v7490_v37, %v7614_v15  ;;  %v7356_v17 = vmax.f32 %v14714_v52, 0.0  ;;  %v14716_v30 = vadd.f32 %v7146_v10, %v5991_v57  ;;  %v7148_v40 = vpop.f32.mrb[11].mxu1  ;;  %v21739_v15 = vld [vmem:[#allocation72_spill] sm:$0xff] }
 0x5ac   :  { %v7607_v34 = vmax.f32 %v7605_v29, %v7606_v5  ;;  %v7612_v21 = vrot.slane %v7611_v18, 1  ;;  %v7620_v56 = vrot.slane %v7491_v62, 4  ;;  %v6004_v52 = vadd.f32 %v19367_v23, %v21739_v15  ;;  %v21740_v5 = vld [vmem:[#allocation73_spill] sm:$0xff] }
 0x5ad   :  { %v7616_v3 = vrot.slane %v7615_v58, 2  ;;  %v7424_v54 = vmul.f32 %v19382_v39, %v7356_v17  ;;  %v7357_v12 = vmax.f32 %v14716_v30, 0.0 }
 0x5ae   :  { %v13843_v27 = vpack.c.bf16 %v7607_v34, %v7607_v34  ;;  %v7613_v44 = vmax.f32 %v7611_v18, %v7612_v21  ;;  %v7621_v42 = vmax.f32 %v7491_v62, %v7620_v56  ;;  %v6007_v18 = vadd.f32 %v19367_v23, %v21740_v5 }
 0x5af   :  { %v7617_v48 = vmax.f32 %v7615_v58, %v7616_v3  ;;  %v7492_v43 = vadd.f32 %v19387_v41, %v7424_v54  ;;  %v7425_v4 = vmul.f32 %v19382_v39, %v7357_v12 }
 0x5b0   :  { %v8205_v7 = vunpack.c.l.b16 %v13843_v27  ;;  %v13844_v0 = vpack.c.bf16 %v7613_v44, %v7613_v44  ;;  %v7622_v53 = vrot.slane %v7621_v42, 2  ;;  %v7151_v16 = vpop.f32.mrb[12].mxu1 }
 0x5b1   :  { %v7618_v61 = vrot.slane %v7617_v48, 1  ;;  %v7626_v22 = vrot.slane %v7492_v43, 4  ;;  %v7493_v2 = vadd.f32 %v19387_v41, %v7425_v4  ;;  %v14718_v63 = vadd.f32 %v7151_v16, %v5996_v36  ;;  %v7153_v1 = vpop.f32.mrb[13].mxu1 }
 0x5b2   :  { %v8272_v13 = vsel %vm2760_vm12, %v8205_v7, %v8271_v60  ;;  %v8206_v24 = vunpack.c.l.b16 %v13844_v0  ;;  %v7623_v28 = vmax.f32 %v7621_v42, %v7622_v53  ;;  %v7154_v6 = vpop.f32.mrb[14].mxu1  ;;  %v8369_v7 = vld [vmem:[#allocation2 + $0x8] sm:$0x1] }
 0x5b3   :  { %v7619_v38 = vmax.f32 %v7617_v48, %v7618_v61  ;;  %v7627_v51 = vmax.f32 %v7492_v43, %v7626_v22  ;;  %v7632_v32 = vrot.slane %v7493_v2, 4  ;;  %v7358_v50 = vmax.f32 %v14718_v63, 0.0  ;;  %v7156_v55 = vpop.f32.mrb[15].mxu1  ;;  %v21742_v1 = vld [vmem:[#allocation75_spill] sm:$0xff] }
 0x5b4   :  { %v8273_v26 = vsel %vm8263_vm15, %v8206_v24, %v8272_v13  ;;  %v7624_v20 = vrot.slane %v7623_v28, 1  ;;  %v14720_v49 = vadd.f32 %v7154_v6, %v5999_v33  ;;  %v6015_v13 = vadd.f32 %v19367_v23, %v21742_v1  ;;  %v19498_v24 = vld [vmem:[#allocation2] sm:$0xf] }
 0x5b5   :  { %v13845_v11 = vpack.c.bf16 %v7619_v38, %v7619_v38  ;;  %v7628_v37 = vrot.slane %v7627_v51, 2  ;;  %v7633_v14 = vmax.f32 %v7493_v2, %v7632_v32  ;;  %v7426_v25 = vmul.f32 %v19382_v39, %v7358_v50  ;;  %v21741_v2 = vld [vmem:[#allocation74_spill] sm:$0xff] }
 0x5b6   :  { %v7625_v29 = vmax.f32 %v7623_v28, %v7624_v20  ;;  %v7359_v45 = vmax.f32 %v14720_v49, 0.0  ;;  %v6012_v63 = vadd.f32 %v19367_v23, %v21741_v2  ;;  %v19503_v38 = vcombine.low %v19498_v24, %v8369_v7 }
 0x5b7   :  { %v8207_v9 = vunpack.c.l.b16 %v13845_v11  ;;  %v7629_v35 = vmax.f32 %v7627_v51, %v7628_v37  ;;  %v7634_v47 = vrot.slane %v7633_v14, 2  ;;  %v7494_v57 = vadd.f32 %v19387_v41, %v7426_v25 }
 0x5b8   :  { %v13846_v19 = vpack.c.bf16 %v7625_v29, %v7625_v29  ;;  %v7427_v8 = vmul.f32 %v19382_v39, %v7359_v45  ;;  %v7159_v31 = vpop.f32.mrb[16].mxu1  ;;  %v8444_v5 = vshll.u32 %v19503_v38, 16 }
 0x5b9   :  { %v8274_v62 = vsel %vm8265_vm0, %v8207_v9, %v8273_v26  ;;  %v7630_v10 = vrot.slane %v7629_v35, 1  ;;  %v7635_v60 = vmax.f32 %v7633_v14, %v7634_v47  ;;  %v7638_v58 = vrot.slane %v7494_v57, 4  ;;  %v7161_v17 = vpop.f32.mrb[17].mxu1 }
 0x5ba   :  { %v8208_v30 = vunpack.c.l.b16 %v13846_v19  ;;  %v7495_v40 = vadd.f32 %v19387_v41, %v7427_v8  ;;  %v14722_v34 = vadd.f32 %v7159_v31, %v6004_v52  ;;  %v7162_v21 = vpop.f32.mrb[18].mxu1  ;;  %v21743_v52 = vld [vmem:[#allocation76_spill] sm:$0xff] }
 0x5bb   :  { %v7631_v56 = vmax.f32 %v7629_v35, %v7630_v10  ;;  %v7636_v3 = vrot.slane %v7635_v60, 1  ;;  %v7639_v54 = vmax.f32 %v7494_v57, %v7638_v58  ;;  %v14724_v12 = vadd.f32 %v7162_v21, %v6007_v18  ;;  %v7164_v27 = vpop.f32.mrb[19].mxu1 }
 0x5bc   :  { %v8275_v44 = vsel %vm8267_vm1, %v8208_v30, %v8274_v62  ;;  %v7644_v42 = vrot.slane %v7495_v40, 4  ;;  %v7360_v48 = vmax.f32 %v14722_v34, 0.0  ;;  %v6020_v31 = vadd.f32 %v19367_v23, %v21743_v52  ;;  %v21744_v30 = vld [vmem:[#allocation77_spill] sm:$0xff]  ;;  %v21745_v34 = vld [vmem:[#allocation78_spill] sm:$0xff]  ;;  %v21746_v27 = vld [vmem:[#allocation79_spill] sm:$0xff] }
 0x5bd   :  { %v8315_v43 = vpack.c.b16 %v8275_v44, %v8275_v44  ;;  %v13847_v4 = vpack.c.bf16 %v7631_v56, %v7631_v56  ;;  %v7637_v59 = vmax.f32 %v7635_v60, %v7636_v3  ;;  %v7640_v36 = vrot.slane %v7639_v54, 2 }
 0x5be   :  { %v7645_v0 = vmax.f32 %v7495_v40, %v7644_v42  ;;  %v7428_v53 = vmul.f32 %v19382_v39, %v7360_v48  ;;  %v7361_v16 = vmax.f32 %v14724_v12, 0.0  ;;  %v6023_v40 = vadd.f32 %v19367_v23, %v21744_v30 }
 0x5bf   :  { %8347 = vst [vmem:[#allocation2 + $0x48] sm:$0xe] %v8315_v43  ;;  %v13848_v61 = vpack.c.bf16 %v7637_v59, %v7637_v59  ;;  %v7641_v22 = vmax.f32 %v7639_v54, %v7640_v36  ;;  %v8209_v51 = vunpack.c.l.b16 %v13847_v4  ;;  %v6028_v21 = vadd.f32 %v19367_v23, %v21745_v34 }
 0x5c0   :  { %v7646_v28 = vrot.slane %v7645_v0, 2  ;;  %v7496_v46 = vadd.f32 %v19387_v41, %v7428_v53  ;;  %v7429_v33 = vmul.f32 %v19382_v39, %v7361_v16  ;;  %v7167_v6 = vpop.f32.mrb[20].mxu1  ;;  %v6031_v44 = vadd.f32 %v19367_v23, %v21746_v27 }
 0x5c1   :  { %v8210_v32 = vunpack.c.l.b16 %v13848_v61  ;;  %v7642_v50 = vrot.slane %v7641_v22, 1  ;;  %v14726_v55 = vadd.f32 %v7167_v6, %v6012_v63  ;;  %v7169_v26 = vpop.f32.mrb[21].mxu1  ;;  %v8446_v59 = vrot.slane %v8444_v5, 1 }
 0x5c2   :  { %v7647_v20 = vmax.f32 %v7645_v0, %v7646_v28  ;;  %v7650_v49 = vrot.slane %v7496_v46, 4  ;;  %v7497_v11 = vadd.f32 %v19387_v41, %v7429_v33  ;;  %v7170_v37 = vpop.f32.mrb[22].mxu1  ;;  %v8442_v33 = vshrl.u32 %v19503_v38, 16 }
 0x5c3   :  { %v8276_v14 = vsel %vm8269_vm2, %v8210_v32, %v8209_v51  ;;  %v7643_v25 = vmax.f32 %v7641_v22, %v7642_v50  ;;  %v7362_v29 = vmax.f32 %v14726_v55, 0.0  ;;  %v14728_v45 = vadd.f32 %v7170_v37, %v6015_v13  ;;  %v7172_v9 = vpop.f32.mrb[23].mxu1 }
 0x5c4   :  { %v8316_v35 = vpack.c.b16 %v8276_v14, %v8276_v14  ;;  %v7648_v47 = vrot.slane %v7647_v20, 1  ;;  %v7651_v57 = vmax.f32 %v7496_v46, %v7650_v49  ;;  %v7656_v19 = vrot.slane %v7497_v11, 4 }
 0x5c5   :  { %v7430_v8 = vmul.f32 %v19382_v39, %v7362_v29  ;;  %v7363_v15 = vmax.f32 %v14728_v45, 0.0  ;;  %v13849_v18 = vpack.c.bf16 %v7643_v25, %v7643_v25  ;;  %v8447_v37 = vor.u32 %v8446_v59, %v8442_v33 }
 0x5c6   :  { %8348 = vst [vmem:[#allocation2 + $0x50] sm:$0x1] %v8316_v35  ;;  %v7649_v62 = vmax.f32 %v7647_v20, %v7648_v47  ;;  %v7652_v10 = vrot.slane %v7651_v57, 2  ;;  %v7657_v60 = vmax.f32 %v7497_v11, %v7656_v19  ;;  %v8362_v55 = vld [vmem:[#allocation2 + $0x48] sm:$0xf] }
 0x5c7   :  { %v7498_v58 = vadd.f32 %v19387_v41, %v7430_v8  ;;  %v7431_v17 = vmul.f32 %v19382_v39, %v7363_v15  ;;  %v8211_v36 = vunpack.c.l.b16 %v13849_v18 }
 0x5c8   :  { %v13850_v56 = vpack.c.bf16 %v7649_v62, %v7649_v62  ;;  %v7653_v3 = vmax.f32 %v7651_v57, %v7652_v10  ;;  %v7658_v54 = vrot.slane %v7657_v60, 2  ;;  %v7175_v12 = vpop.f32.mrb[24].mxu1 }
 0x5c9   :  { %v7662_v42 = vrot.slane %v7498_v58, 4  ;;  %v7499_v48 = vadd.f32 %v19387_v41, %v7431_v17  ;;  %v14730_v43 = vadd.f32 %v7175_v12, %v6020_v31  ;;  %v7177_v4 = vpop.f32.mrb[25].mxu1 }
 0x5ca   :  { %v8212_v7 = vunpack.c.l.b16 %v13850_v56  ;;  %v7654_v0 = vrot.slane %v7653_v3, 1  ;;  %v7659_v53 = vmax.f32 %v7657_v60, %v7658_v54  ;;  %v7178_v16 = vpop.f32.mrb[26].mxu1 }
 0x5cb   :  { %v7663_v61 = vmax.f32 %v7498_v58, %v7662_v42  ;;  %v7668_v22 = vrot.slane %v7499_v48, 4  ;;  %v7364_v2 = vmax.f32 %v14730_v43, 0.0  ;;  %v14732_v63 = vadd.f32 %v7178_v16, %v6023_v40  ;;  %v7180_v1 = vpop.f32.mrb[27].mxu1 }
 0x5cc   :  { %v8277_v13 = vsel %vm8259_vm14, %v8212_v7, %v8211_v36  ;;  %v7655_v28 = vmax.f32 %v7653_v3, %v7654_v0  ;;  %v7660_v46 = vrot.slane %v7659_v53, 1  ;;  %v21748_v1 = vld [vmem:[#allocation81_spill] sm:$0xff] }
 0x5cd   :  { %v7664_v6 = vrot.slane %v7663_v61, 2  ;;  %v7669_v51 = vmax.f32 %v7499_v48, %v7668_v22  ;;  %v7432_v32 = vmul.f32 %v19382_v39, %v7364_v2  ;;  %v7365_v50 = vmax.f32 %v14732_v63, 0.0  ;;  %v8370_v26 = vld [vmem:[#allocation2 + $0x50] sm:$0x1] }
 0x5ce   :  { %v13851_v20 = vpack.c.bf16 %v7655_v28, %v7655_v28  ;;  %v7661_v49 = vmax.f32 %v7659_v53, %v7660_v46  ;;  %v13132_v11 = vcombine.low %v8362_v55, %v8370_v26 }
 0x5cf   :  { %v7665_v14 = vmax.f32 %v7663_v61, %v7664_v6  ;;  %v7670_v25 = vrot.slane %v7669_v51, 2  ;;  %v7500_v29 = vadd.f32 %v19387_v41, %v7432_v32  ;;  %v7433_v45 = vmul.f32 %v19382_v39, %v7365_v50 }
 0x5d0   :  { %v8213_v9 = vunpack.c.l.b16 %v13851_v20  ;;  %v13852_v35 = vpack.c.bf16 %v7661_v49, %v7661_v49  ;;  %v7183_v38 = vpop.f32.mrb[28].mxu1  ;;  %v8449_v47 = vshrl.u32 %v13132_v11, 16  ;;  %v8451_v57 = vshll.u32 %v13132_v11, 16 }
 0x5d1   :  { %v7666_v19 = vrot.slane %v7665_v14, 1  ;;  %v7671_v8 = vmax.f32 %v7669_v51, %v7670_v25  ;;  %v7674_v15 = vrot.slane %v7500_v29, 4  ;;  %v7501_v52 = vadd.f32 %v19387_v41, %v7433_v45  ;;  %v7185_v31 = vpop.f32.mrb[29].mxu1 }
 0x5d2   :  { %v8278_v5 = vsel %vm2760_vm12, %v8213_v9, %v8277_v13  ;;  %v8214_v18 = vunpack.c.l.b16 %v13852_v35  ;;  %v14734_v62 = vadd.f32 %v7183_v38, %v6028_v21  ;;  %v7186_v10 = vpop.f32.mrb[30].mxu1  ;;  %v8453_v60 = vrot.slane %v8451_v57, 1 }
 0x5d3   :  { %v7667_v58 = vmax.f32 %v7665_v14, %v7666_v19  ;;  %v7672_v17 = vrot.slane %v7671_v8, 1  ;;  %v7675_v30 = vmax.f32 %v7500_v29, %v7674_v15  ;;  %v7680_v40 = vrot.slane %v7501_v52, 4  ;;  %v7188_v34 = vpop.f32.mrb[31].mxu1 }
 0x5d4   :  { %v8279_v56 = vsel %vm8263_vm15, %v8214_v18, %v8278_v5  ;;  %v7366_v3 = vmax.f32 %v14734_v62, 0.0  ;;  %v14736_v54 = vadd.f32 %v7186_v10, %v6031_v44  ;;  %v8454_v12 = vor.u32 %v8453_v60, %v8449_v47  ;;  %v21747_v44 = vld [vmem:[#allocation80_spill] sm:$0xff]  ;;  %v21750_v60 = vld [vmem:[#allocation83_spill] sm:$0xff] }
 0x5d5   :  { %v13853_v27 = vpack.c.bf16 %v7667_v58, %v7667_v58  ;;  %v7673_v42 = vmax.f32 %v7671_v8, %v7672_v17  ;;  %v7676_v48 = vrot.slane %v7675_v30, 2  ;;  %v7681_v43 = vmax.f32 %v7501_v52, %v7680_v40  ;;  %v21749_v52 = vld [vmem:[#allocation82_spill] sm:$0xff] }
 0x5d6   :  { %v7434_v4 = vmul.f32 %v19382_v39, %v7366_v3  ;;  %v7367_v59 = vmax.f32 %v14736_v54, 0.0  ;;  %v13164_v21 = vcombine.low %v19498_v24, %v8362_v55  ;;  %v13165_v36 = vcombine.low %v8447_v37, %v8454_v12 }
 0x5d7   :  { %v8215_v7 = vunpack.c.l.b16 %v13853_v27  ;;  %v13854_v0 = vpack.c.bf16 %v7673_v42, %v7673_v42  ;;  %v7677_v53 = vmax.f32 %v7675_v30, %v7676_v48  ;;  %v7682_v16 = vrot.slane %v7681_v43, 2 }
 0x5d8   :  { %v7502_v61 = vadd.f32 %v19387_v41, %v7434_v4  ;;  %v7435_v22 = vmul.f32 %v19382_v39, %v7367_v59  ;;  %v6036_v2 = vadd.f32 %v19367_v23, %v21747_v44  ;;  %v7191_v63 = vpop.f32.mrb[32].mxu1  ;;  %9077 = vmatprep.mubr.bf16.mxu0 %v13165_v36  ;;  %v6039_v13 = vadd.f32 %v19367_v23, %v21748_v1 }
 0x5d9   :  { %v8280_v28 = vsel %vm8265_vm0, %v8215_v7, %v8279_v56  ;;  %v8216_v24 = vunpack.c.l.b16 %v13854_v0  ;;  %v7678_v46 = vrot.slane %v7677_v53, 1  ;;  %v7683_v33 = vmax.f32 %v7681_v43, %v7682_v16  ;;  %v7193_v6 = vpop.f32.mrb[33].mxu1  ;;  %9078 = vmatmul.mubr.bf16.vlgmr.msra.gmra.mrb[0].mxu0 %v13164_v21 }
 0x5da   :  { %v7686_v51 = vrot.slane %v7502_v61, 4  ;;  %v7503_v32 = vadd.f32 %v19387_v41, %v7435_v22  ;;  %v14738_v50 = vadd.f32 %v7191_v63, %v6036_v2  ;;  %v7194_v55 = vpop.f32.mrb[34].mxu1  ;;  %v6044_v31 = vadd.f32 %v19367_v23, %v21749_v52  ;;  %v21751_v63 = vld [vmem:[#allocation16_spill] sm:$0xff] }
 0x5db   :  { %v8281_v26 = vsel %vm8267_vm1, %v8216_v24, %v8280_v28  ;;  %v7679_v20 = vmax.f32 %v7677_v53, %v7678_v46  ;;  %v7684_v49 = vrot.slane %v7683_v33, 1  ;;  %v14740_v11 = vadd.f32 %v7194_v55, %v6039_v13  ;;  %v7196_v37 = vpop.f32.mrb[35].mxu1 }
 0x5dc   :  { %v8317_v14 = vpack.c.b16 %v8281_v26, %v8281_v26  ;;  %v7687_v25 = vmax.f32 %v7502_v61, %v7686_v51  ;;  %v7692_v29 = vrot.slane %v7503_v32, 4  ;;  %v7368_v45 = vmax.f32 %v14738_v50, 0.0 }
 0x5dd   :  { %v13855_v9 = vpack.c.bf16 %v7679_v20, %v7679_v20  ;;  %v7685_v35 = vmax.f32 %v7683_v33, %v7684_v49  ;;  %v7369_v38 = vmax.f32 %v14740_v11, 0.0  ;;  %v6047_v58 = vadd.f32 %v19367_v23, %v21750_v60  ;;  %v19557_v20 = vld [vmem:[%s21075_s5] ss:$0 sm:$0xff]  ;;  %v19571_v60 = vld [vmem:[%s21075_s5 + $0x2] ss:$0 sm:$0xff] }
 0x5de   :  { %8349 = vst [vmem:[#allocation2 + $0x90] sm:$0xe] %v8317_v14  ;;  %v7688_v47 = vrot.slane %v7687_v25, 2  ;;  %v7693_v57 = vmax.f32 %v7503_v32, %v7692_v29  ;;  %v7436_v19 = vmul.f32 %v19382_v39, %v7368_v45  ;;  %v6052_v1 = vadd.f32 %v19367_v23, %v21751_v63  ;;  %v21752_v23 = vld [vmem:[#allocation84_spill] sm:$0xff] }
 0x5df   :  { %v13856_v8 = vpack.c.bf16 %v7685_v35, %v7685_v35  ;;  %v7437_v15 = vmul.f32 %v19382_v39, %v7369_v38  ;;  %v8217_v17 = vunpack.c.l.b16 %v13855_v9  ;;  %v6055_v49 = vadd.f32 %v19557_v20, %v21752_v23 }
 0x5e0   :  { %v7689_v5 = vmax.f32 %v7687_v25, %v7688_v47  ;;  %v7694_v18 = vrot.slane %v7693_v57, 2  ;;  %v7504_v62 = vadd.f32 %v19387_v41, %v7436_v19  ;;  %v7199_v10 = vpop.f32.mrb[36].mxu1 }
 0x5e1   :  { %v8218_v30 = vunpack.c.l.b16 %v13856_v8  ;;  %v7505_v40 = vadd.f32 %v19387_v41, %v7437_v15  ;;  %v14742_v34 = vadd.f32 %v7199_v10, %v6044_v31  ;;  %v7201_v56 = vpop.f32.mrb[37].mxu1  ;;  %v19565_v15 = vld [vmem:[%s21075_s5 + $0x1] ss:$0 sm:$0xff] }
 0x5e2   :  { %v7690_v3 = vrot.slane %v7689_v5, 1  ;;  %v7695_v54 = vmax.f32 %v7693_v57, %v7694_v18  ;;  %v7698_v12 = vrot.slane %v7504_v62, 4  ;;  %v7202_v27 = vpop.f32.mrb[38].mxu1 }
 0x5e3   :  { %v8282_v42 = vsel %vm8269_vm2, %v8218_v30, %v8217_v17  ;;  %v7704_v48 = vrot.slane %v7505_v40, 4  ;;  %v7370_v43 = vmax.f32 %v14742_v34, 0.0  ;;  %v14744_v4 = vadd.f32 %v7202_v27, %v6047_v58  ;;  %v7204_v59 = vpop.f32.mrb[39].mxu1  ;;  %v21753_v17 = vld [vmem:[#allocation17_spill] sm:$0xff] }
 0x5e4   :  { %v8318_v21 = vpack.c.b16 %v8282_v42, %v8282_v42  ;;  %v7691_v36 = vmax.f32 %v7689_v5, %v7690_v3  ;;  %v7696_v7 = vrot.slane %v7695_v54, 1  ;;  %v7699_v0 = vmax.f32 %v7504_v62, %v7698_v12 }
 0x5e5   :  { %v7705_v53 = vmax.f32 %v7505_v40, %v7704_v48  ;;  %v7438_v16 = vmul.f32 %v19382_v39, %v7370_v43  ;;  %v7371_v61 = vmax.f32 %v14744_v4, 0.0  ;;  %v6060_v30 = vadd.f32 %v19557_v20, %v21753_v17  ;;  %v21754_v48 = vld [vmem:[#allocation19_spill] sm:$0xff] }
 0x5e6   :  { %8350 = vst [vmem:[#allocation2 + $0x98] sm:$0x1] %v8318_v21  ;;  %v13857_v22 = vpack.c.bf16 %v7691_v36, %v7691_v36  ;;  %v7697_v44 = vmax.f32 %v7695_v54, %v7696_v7  ;;  %v7700_v2 = vrot.slane %v7699_v0, 2  ;;  %v6063_v43 = vadd.f32 %v19557_v20, %v21754_v48 }
 0x5e7   :  { %v7706_v13 = vrot.slane %v7705_v53, 2  ;;  %v7506_v28 = vadd.f32 %v19387_v41, %v7438_v16  ;;  %v7439_v24 = vmul.f32 %v19382_v39, %v7371_v61 }
 0x5e8   :  { %v13858_v46 = vpack.c.bf16 %v7697_v44, %v7697_v44  ;;  %v7701_v33 = vmax.f32 %v7699_v0, %v7700_v2  ;;  %v7207_v6 = vpop.f32.mrb[40].mxu1  ;;  %v8219_v11 = vunpack.c.l.b16 %v13857_v22 }
 0x5e9   :  { %v7707_v51 = vmax.f32 %v7705_v53, %v7706_v13  ;;  %v7710_v32 = vrot.slane %v7506_v28, 4  ;;  %v7507_v50 = vadd.f32 %v19387_v41, %v7439_v24  ;;  %v14746_v55 = vadd.f32 %v7207_v6, %v6052_v1  ;;  %v7209_v26 = vpop.f32.mrb[41].mxu1 }
 0x5ea   :  { %v8220_v37 = vunpack.c.l.b16 %v13858_v46  ;;  %v7702_v39 = vrot.slane %v7701_v33, 1  ;;  %v7210_v14 = vpop.f32.mrb[42].mxu1 }
 0x5eb   :  { %v7708_v25 = vrot.slane %v7707_v51, 1  ;;  %v7711_v29 = vmax.f32 %v7506_v28, %v7710_v32  ;;  %v7716_v45 = vrot.slane %v7507_v50, 4  ;;  %v7372_v9 = vmax.f32 %v14746_v55, 0.0  ;;  %v7212_v35 = vpop.f32.mrb[43].mxu1  ;;  %v21756_v55 = vld [vmem:[#allocation21_spill] sm:$0xff] }
 0x5ec   :  { %v8283_v41 = vsel %vm8259_vm14, %v8220_v37, %v8219_v11  ;;  %v7703_v38 = vmax.f32 %v7701_v33, %v7702_v39  ;;  %v14748_v47 = vadd.f32 %v7210_v14, %v6055_v49  ;;  %v21755_v33 = vld [vmem:[#allocation20_spill] sm:$0xff]  ;;  %v6071_v26 = vadd.f32 %v19557_v20, %v21756_v55 }
 0x5ed   :  { %v7709_v57 = vmax.f32 %v7707_v51, %v7708_v25  ;;  %v7712_v19 = vrot.slane %v7711_v29, 2  ;;  %v7717_v8 = vmax.f32 %v7507_v50, %v7716_v45  ;;  %v7440_v52 = vmul.f32 %v19565_v15, %v7372_v9 }
 0x5ee   :  { %v13859_v31 = vpack.c.bf16 %v7703_v38, %v7703_v38  ;;  %v7373_v5 = vmax.f32 %v14748_v47, 0.0  ;;  %v6068_v6 = vadd.f32 %v19557_v20, %v21755_v33 }
 0x5ef   :  { %v13860_v18 = vpack.c.bf16 %v7709_v57, %v7709_v57  ;;  %v7713_v62 = vmax.f32 %v7711_v29, %v7712_v19  ;;  %v7718_v10 = vrot.slane %v7717_v8, 2  ;;  %v7508_v58 = vadd.f32 %v19571_v60, %v7440_v52 }
 0x5f0   :  { %v8221_v40 = vunpack.c.l.b16 %v13859_v31  ;;  %v7441_v34 = vmul.f32 %v19565_v15, %v7373_v5  ;;  %v7215_v56 = vpop.f32.mrb[44].mxu1 }
 0x5f1   :  { %v8222_v3 = vunpack.c.l.b16 %v13860_v18  ;;  %v7714_v54 = vrot.slane %v7713_v62, 1  ;;  %v7719_v12 = vmax.f32 %v7717_v8, %v7718_v10  ;;  %v7722_v27 = vrot.slane %v7508_v58, 4  ;;  %v7217_v42 = vpop.f32.mrb[45].mxu1 }
 0x5f2   :  { %v8284_v4 = vsel %vm2760_vm12, %v8221_v40, %v8283_v41  ;;  %v7509_v59 = vadd.f32 %v19571_v60, %v7441_v34  ;;  %v14750_v21 = vadd.f32 %v7215_v56, %v6060_v30  ;;  %v7218_v36 = vpop.f32.mrb[46].mxu1  ;;  %v21757_v56 = vld [vmem:[#allocation22_spill] sm:$0xff] }
 0x5f3   :  { %v8285_v7 = vsel %vm8263_vm15, %v8222_v3, %v8284_v4  ;;  %v7715_v0 = vmax.f32 %v7713_v62, %v7714_v54  ;;  %v7720_v53 = vrot.slane %v7719_v12, 1  ;;  %v7723_v16 = vmax.f32 %v7508_v58, %v7722_v27  ;;  %v7220_v61 = vpop.f32.mrb[47].mxu1  ;;  %v21758_v4 = vld [vmem:[#allocation23_spill] sm:$0xff] }
 0x5f4   :  { %v7728_v22 = vrot.slane %v7509_v59, 4  ;;  %v7374_v44 = vmax.f32 %v14750_v21, 0.0  ;;  %v14752_v2 = vadd.f32 %v7218_v36, %v6063_v43  ;;  %v6076_v3 = vadd.f32 %v19557_v20, %v21757_v56 }
 0x5f5   :  { %v13861_v63 = vpack.c.bf16 %v7715_v0, %v7715_v0  ;;  %v7721_v1 = vmax.f32 %v7719_v12, %v7720_v53  ;;  %v7724_v13 = vrot.slane %v7723_v16, 2 }
 0x5f6   :  { %v7729_v28 = vmax.f32 %v7509_v59, %v7728_v22  ;;  %v7442_v24 = vmul.f32 %v19565_v15, %v7374_v44  ;;  %v7375_v46 = vmax.f32 %v14752_v2, 0.0  ;;  %v6079_v59 = vadd.f32 %v19557_v20, %v21758_v4 }
 0x5f7   :  { %v8223_v51 = vunpack.c.l.b16 %v13861_v63  ;;  %v13862_v32 = vpack.c.bf16 %v7721_v1, %v7721_v1  ;;  %v7725_v50 = vmax.f32 %v7723_v16, %v7724_v13 }
 0x5f8   :  { %v7730_v23 = vrot.slane %v7729_v28, 2  ;;  %v7510_v49 = vadd.f32 %v19571_v60, %v7442_v24  ;;  %v7443_v11 = vmul.f32 %v19565_v15, %v7375_v46  ;;  %v7223_v37 = vpop.f32.mrb[48].mxu1  ;;  %v8371_v24 = vld [vmem:[#allocation2 + $0x98] sm:$0x1]  ;;  %v21759_v46 = vld [vmem:[#allocation24_spill] sm:$0xff] }
 0x5f9   :  { %v8286_v39 = vsel %vm8265_vm0, %v8223_v51, %v8285_v7  ;;  %v8224_v14 = vunpack.c.l.b16 %v13862_v32  ;;  %v7726_v25 = vrot.slane %v7725_v50, 1  ;;  %v14754_v29 = vadd.f32 %v7223_v37, %v6068_v6  ;;  %v7225_v45 = vpop.f32.mrb[49].mxu1 }
 0x5fa   :  { %v7731_v9 = vmax.f32 %v7729_v28, %v7730_v23  ;;  %v7734_v35 = vrot.slane %v7510_v49, 4  ;;  %v7511_v41 = vadd.f32 %v19571_v60, %v7443_v11  ;;  %v7226_v38 = vpop.f32.mrb[50].mxu1  ;;  %v6084_v33 = vadd.f32 %v19557_v20, %v21759_v46  ;;  %v15347_v45 = vld [vmem:[%s21073_s3 + $0xc8] sm:$0xff]  }
 0x5fb   :  { %v8287_v47 = vsel %vm8267_vm1, %v8224_v14, %v8286_v39  ;;  %v7727_v57 = vmax.f32 %v7725_v50, %v7726_v25  ;;  %v7376_v19 = vmax.f32 %v14754_v29, 0.0  ;;  %v14756_v8 = vadd.f32 %v7226_v38, %v6071_v26  ;;  %v7228_v52 = vpop.f32.mrb[51].mxu1  ;;  %v15345_v25 = vld [vmem:[%s21073_s3 + $0xc0] sm:$0xff]  }
 0x5fc   :  { %v8319_v31 = vpack.c.b16 %v8287_v47, %v8287_v47  ;;  %v7732_v5 = vrot.slane %v7731_v9, 1  ;;  %v7735_v18 = vmax.f32 %v7510_v49, %v7734_v35  ;;  %v7740_v62 = vrot.slane %v7511_v41, 4  ;;  %v19604_v49 = vld [vmem:[#allocation2 + $0x90] sm:$0xf]  ;;  %v15346_v29 = vld [vmem:[%s21073_s3 + $0x80] sm:$0xff]   ;;  %13961 = vmatprep.subr.bf16.mxu0 %v15345_v25 }
 0x5fd   :  { %v7444_v10 = vmul.f32 %v19565_v15, %v7376_v19  ;;  %v7377_v58 = vmax.f32 %v14756_v8, 0.0  ;;  %v13863_v17 = vpack.c.bf16 %v7727_v57, %v7727_v57  ;;  %v19607_v14 = vcombine.low %v19604_v49, %v8371_v24  ;;  %v21761_v57 = vld [vmem:[#allocation27_spill] sm:$0xff]  ;;  %v21762_v8 = vld [vmem:[#allocation28_spill] sm:$0xff]  ;;  %13962 = vmatpush3.bf16.msra.mxu0 %v15346_v29 }
 0x5fe   :  { %8351 = vst [vmem:[#allocation2 + $0xd8] sm:$0xe] %v8319_v31  ;;  %v7733_v30 = vmax.f32 %v7731_v9, %v7732_v5  ;;  %v7736_v40 = vrot.slane %v7735_v18, 2  ;;  %v7741_v34 = vmax.f32 %v7511_v41, %v7740_v62  ;;  %v21760_v9 = vld [vmem:[#allocation25_spill] sm:$0xff]  ;;  %v6092_v19 = vadd.f32 %v19557_v20, %v21761_v57  ;;  %13963 = vmatprep.subr.bf16.mxu0 %v15347_v45 }
 0x5ff   :  { %v7512_v54 = vadd.f32 %v19571_v60, %v7444_v10  ;;  %v7445_v12 = vmul.f32 %v19565_v15, %v7377_v58  ;;  %v8225_v53 = vunpack.c.l.b16 %v13863_v17  ;;  %v6087_v35 = vadd.f32 %v19557_v20, %v21760_v9 }
 0x600   :  { %v13864_v27 = vpack.c.bf16 %v7733_v30, %v7733_v30  ;;  %v7737_v42 = vmax.f32 %v7735_v18, %v7736_v40  ;;  %v7742_v48 = vrot.slane %v7741_v34, 2  ;;  %v7231_v43 = vpop.f32.mrb[52].mxu1  ;;  %v19625_v52 = vadd.f32 %v19557_v20, %v21762_v8  ;;  %v15348_v40 = vld [vmem:[%s21073_s3 + $0x88] sm:$0xff]  }
 0x601   :  { %v7746_v21 = vrot.slane %v7512_v54, 4  ;;  %v7513_v36 = vadd.f32 %v19571_v60, %v7445_v12  ;;  %v14758_v7 = vadd.f32 %v7231_v43, %v6076_v3  ;;  %v7233_v0 = vpop.f32.mrb[53].mxu1  ;;  %v8458_v12 = vshll.u32 %v19607_v14, 16  ;;  %13964 = vmatpush3.bf16.msra.mxu0 %v15348_v40 }
 0x602   :  { %v8226_v16 = vunpack.c.l.b16 %v13864_v27  ;;  %v7738_v61 = vrot.slane %v7737_v42, 1  ;;  %v7743_v22 = vmax.f32 %v7741_v34, %v7742_v48  ;;  %v7234_v44 = vpop.f32.mrb[54].mxu1  ;;  %v15349_v27 = vld [vmem:[%s21073_s3 + $0xd0] sm:$0xff]  }
 0x603   :  { %v7747_v2 = vmax.f32 %v7512_v54, %v7746_v21  ;;  %v7752_v63 = vrot.slane %v7513_v36, 4  ;;  %v7378_v1 = vmax.f32 %v14758_v7, 0.0  ;;  %v14760_v13 = vadd.f32 %v7234_v44, %v6079_v59  ;;  %v7236_v28 = vpop.f32.mrb[55].mxu1  ;;  %v21763_v21 = vld [vmem:[#allocation29_spill] sm:$0xff]  ;;  %13965 = vmatprep.subr.bf16.mxu0 %v15349_v27 }
 0x604   :  { %v8288_v6 = vsel %vm8269_vm2, %v8226_v16, %v8225_v53  ;;  %v7739_v51 = vmax.f32 %v7737_v42, %v7738_v61  ;;  %v7744_v32 = vrot.slane %v7743_v22, 1  ;;  %v8460_v46 = vrot.slane %v8458_v12, 1  ;;  %v15354_v12 = vld [vmem:[%s21073_s3 + $0xa0] sm:$0xff]  }
 0x605   :  { %v8320_v50 = vpack.c.b16 %v8288_v6, %v8288_v6  ;;  %v7748_v55 = vrot.slane %v7747_v2, 2  ;;  %v7753_v26 = vmax.f32 %v7513_v36, %v7752_v63  ;;  %v7446_v23 = vmul.f32 %v19565_v15, %v7378_v1  ;;  %v21764_v63 = vld [vmem:[#allocation30_spill] sm:$0xff] }
 0x606   :  { %v13865_v11 = vpack.c.bf16 %v7739_v51, %v7739_v51  ;;  %v7745_v37 = vmax.f32 %v7743_v22, %v7744_v32  ;;  %v7379_v39 = vmax.f32 %v14760_v13, 0.0  ;;  %v19638_v36 = vadd.f32 %v19557_v20, %v21763_v21 }
 0x607   :  { %8352 = vst [vmem:[#allocation2 + $0xe0] sm:$0x1] %v8320_v50  ;;  %v7749_v41 = vmax.f32 %v7747_v2, %v7748_v55  ;;  %v7754_v38 = vrot.slane %v7753_v26, 2  ;;  %v7514_v47 = vadd.f32 %v19571_v60, %v7446_v23  ;;  %v15350_v2 = vld [vmem:[%s21073_s3 + $0x90] sm:$0xff]   ;;  %v19647_v1 = vadd.f32 %v19557_v20, %v21764_v63  ;;  %v19653_v55 = vld [vmem:[#allocation2 + $0xd8] sm:$0xf] }
 0x608   :  { %v13866_v31 = vpack.c.bf16 %v7745_v37, %v7745_v37  ;;  %v7447_v5 = vmul.f32 %v19565_v15, %v7379_v39  ;;  %v7239_v18 = vpop.f32.mrb[56].mxu1  ;;  %v8227_v34 = vunpack.c.l.b16 %v13865_v11  ;;  %v8456_v39 = vshrl.u32 %v19607_v14, 16  ;;  %13966 = vmatpush3.bf16.msra.mxu0 %v15350_v2  ;;  %v15353_v14 = vld [vmem:[%s21073_s3 + $0xe0] sm:$0xff]  }
 0x609   :  { %v7750_v62 = vrot.slane %v7749_v41, 1  ;;  %v7755_v10 = vmax.f32 %v7753_v26, %v7754_v38  ;;  %v7758_v58 = vrot.slane %v7514_v47, 4  ;;  %v14762_v17 = vadd.f32 %v7239_v18, %v6084_v33  ;;  %v7241_v30 = vpop.f32.mrb[57].mxu1  ;;  %v15351_v33 = vld [vmem:[%s21073_s3 + $0xd8] sm:$0xff]  }
 0x60a   :  { %v8228_v56 = vunpack.c.l.b16 %v13866_v31  ;;  %v7515_v3 = vadd.f32 %v19571_v60, %v7447_v5  ;;  %v7242_v54 = vpop.f32.mrb[58].mxu1  ;;  %v8461_v31 = vor.u32 %v8460_v46, %v8456_v39  ;;  %13967 = vmatprep.subr.bf16.mxu0 %v15351_v33 }
 0x60b   :  { %v7751_v42 = vmax.f32 %v7749_v41, %v7750_v62  ;;  %v7756_v48 = vrot.slane %v7755_v10, 1  ;;  %v7759_v43 = vmax.f32 %v7514_v47, %v7758_v58  ;;  %v7380_v4 = vmax.f32 %v14762_v17, 0.0  ;;  %v7244_v59 = vpop.f32.mrb[59].mxu1  ;;  %v15352_v41 = vld [vmem:[%s21073_s3 + $0x98] sm:$0xff]  }
 0x60c   :  { %v8289_v7 = vsel %vm8259_vm14, %v8228_v56, %v8227_v34  ;;  %v7764_v0 = vrot.slane %v7515_v3, 4  ;;  %v14764_v53 = vadd.f32 %v7242_v54, %v6087_v35  ;;  %13968 = vmatpush3.bf16.msra.mxu0 %v15352_v41 }
 0x60d   :  { %v13867_v16 = vpack.c.bf16 %v7751_v42, %v7751_v42  ;;  %v7757_v61 = vmax.f32 %v7755_v10, %v7756_v48  ;;  %v7760_v22 = vrot.slane %v7759_v43, 2  ;;  %v7448_v44 = vmul.f32 %v19565_v15, %v7380_v4  ;;  %13969 = vmatprep.subr.bf16.mxu0 %v15353_v14  ;;  %v15366_v14 = vld [vmem:[%s21073_s3 + $0xf8] sm:$0xff]  }
 0x60e   :  { %v7765_v13 = vmax.f32 %v7515_v3, %v7764_v0  ;;  %v7381_v28 = vmax.f32 %v14764_v53, 0.0  ;;  %v8372_v24 = vld [vmem:[#allocation2 + $0xe0] sm:$0x1] }
 0x60f   :  { %v8229_v6 = vunpack.c.l.b16 %v13867_v16  ;;  %v13868_v51 = vpack.c.bf16 %v7757_v61, %v7757_v61  ;;  %v7761_v32 = vmax.f32 %v7759_v43, %v7760_v22  ;;  %v7516_v50 = vadd.f32 %v19571_v60, %v7448_v44 }
 0x610   :  { %v7766_v26 = vrot.slane %v7765_v13, 2  ;;  %v7449_v23 = vmul.f32 %v19565_v15, %v7381_v28  ;;  %v7247_v11 = vpop.f32.mrb[60].mxu1  ;;  %v13134_v37 = vcombine.low %v19653_v55, %v8372_v24  ;;  %13970 = vmatpush3.bf16.msra.mxu0 %v15354_v12 }
 0x611   :  { %v8290_v25 = vsel %vm2760_vm12, %v8229_v6, %v8289_v7  ;;  %v8230_v29 = vunpack.c.l.b16 %v13868_v51  ;;  %v7762_v45 = vrot.slane %v7761_v32, 1  ;;  %v7770_v9 = vrot.slane %v7516_v50, 4  ;;  %v7249_v35 = vpop.f32.mrb[61].mxu1  ;;  %v15356_v51 = vld [vmem:[%s21073_s3 + $0xa8] sm:$0xff]  }
 0x612   :  { %v7767_v38 = vmax.f32 %v7765_v13, %v7766_v26  ;;  %v7517_v47 = vadd.f32 %v19571_v60, %v7449_v23  ;;  %v14766_v57 = vadd.f32 %v7247_v11, %v6092_v19  ;;  %v7250_v8 = vpop.f32.mrb[62].mxu1  ;;  %v8465_v34 = vshll.u32 %v13134_v37, 16 }
 0x613   :  { %v8291_v5 = vsel %vm8263_vm15, %v8230_v29, %v8290_v25  ;;  %v7763_v18 = vmax.f32 %v7761_v32, %v7762_v45  ;;  %v7771_v62 = vmax.f32 %v7516_v50, %v7770_v9  ;;  %v14768_v10 = vadd.f32 %v7250_v8, %v19625_v52  ;;  %v7252_v58 = vpop.f32.mrb[63].mxu1  ;;  %v15355_v52 = vld [vmem:[%s21073_s3 + $0xe8] sm:$0xff]  }
 0x614   :  { %v7768_v17 = vrot.slane %v7767_v38, 1  ;;  %v7776_v30 = vrot.slane %v7517_v47, 4  ;;  %v7382_v40 = vmax.f32 %v14766_v57, 0.0  ;;  %v8463_v54 = vshrl.u32 %v13134_v37, 16  ;;  %13971 = vmatprep.subr.bf16.mxu0 %v15355_v52  ;;  %v21766_v58 = vld [vmem:[#allocation32_spill] sm:$0xff] }
 0x615   :  { %v13869_v56 = vpack.c.bf16 %v7763_v18, %v7763_v18  ;;  %v7772_v19 = vrot.slane %v7771_v62, 2  ;;  %v7383_v3 = vmax.f32 %v14768_v10, 0.0  ;;  %v8467_v43 = vrot.slane %v8465_v34, 1  ;;  %13972 = vmatpush3.bf16.msra.mxu0 %v15356_v51 }
 0x616   :  { %v7769_v27 = vmax.f32 %v7767_v38, %v7768_v17  ;;  %v7777_v42 = vmax.f32 %v7517_v47, %v7776_v30  ;;  %v7450_v48 = vmul.f32 %v19565_v15, %v7382_v40  ;;  %v13169_v7 = vcombine.low %v19604_v49, %v19653_v55  ;;  %v21765_v47 = vld [vmem:[#allocation31_spill] sm:$0xff] }
 0x617   :  { %v8231_v4 = vunpack.c.l.b16 %v13869_v56  ;;  %v7773_v59 = vmax.f32 %v7771_v62, %v7772_v19  ;;  %v7451_v21 = vmul.f32 %v19565_v15, %v7383_v3  ;;  %v8468_v22 = vor.u32 %v8467_v43, %v8463_v54 }
 0x618   :  { %v13870_v0 = vpack.c.bf16 %v7769_v27, %v7769_v27  ;;  %v7778_v53 = vrot.slane %v7777_v42, 2  ;;  %v7518_v16 = vadd.f32 %v19571_v60, %v7450_v48  ;;  %v7255_v61 = vpop.f32.mrb[64].mxu1  ;;  %v6108_v57 = vadd.f32 %v19557_v20, %v21765_v47 }
 0x619   :  { %v8292_v44 = vsel %vm8265_vm0, %v8231_v4, %v8291_v5  ;;  %v7774_v2 = vrot.slane %v7773_v59, 1  ;;  %v7519_v63 = vadd.f32 %v19571_v60, %v7451_v21  ;;  %v14770_v13 = vadd.f32 %v7255_v61, %v19638_v36  ;;  %v7257_v28 = vpop.f32.mrb[65].mxu1  ;;  %v15360_v36 = vld [vmem:[%s21073_s3 + $0xf0] sm:$0xff]   ;;  %v19710_v21 = vld [vmem:[%s21073_s3 + $0x100] sm:$0xff]  }
 0x61a   :  { %v8232_v24 = vunpack.c.l.b16 %v13870_v0  ;;  %v7779_v46 = vmax.f32 %v7777_v42, %v7778_v53  ;;  %v7782_v33 = vrot.slane %v7518_v16, 4  ;;  %v13170_v6 = vcombine.low %v8461_v31, %v8468_v22  ;;  %v7258_v49 = vpop.f32.mrb[66].mxu1  ;;  %13973 = vmatprep.subr.bf16.mxu0 %v15360_v36  ;;  %v15367_v42 = vld [vmem:[%s21073_s3 + $0xb8] sm:$0xff]  }
 0x61b   :  { %v7775_v32 = vmax.f32 %v7773_v59, %v7774_v2  ;;  %v7788_v50 = vrot.slane %v7519_v63, 4  ;;  %v7384_v55 = vmax.f32 %v14770_v13, 0.0  ;;  %v14772_v26 = vadd.f32 %v7258_v49, %v19647_v1  ;;  %v7260_v23 = vpop.f32.mrb[67].mxu1  ;;  %v15361_v1 = vld [vmem:[%s21073_s3 + $0xb0] sm:$0xff]   ;;  %v21767_v28 = vld [vmem:[#allocation85_spill] sm:$0xff] }
 0x61c   :  { %v8293_v11 = vsel %vm8267_vm1, %v8232_v24, %v8292_v44  ;;  %v7780_v37 = vrot.slane %v7779_v46, 1  ;;  %v7783_v39 = vmax.f32 %v7518_v16, %v7782_v33  ;;  %9085 = vmatprep.mubr.bf16.mxu0 %v13170_v6  ;;  %v6111_v17 = vadd.f32 %v19557_v20, %v21766_v58  ;;  %13974 = vmatpush3.bf16.msra.mxu0 %v15361_v1  ;;  %v21769_v58 = vld [vmem:[#allocation37_spill] sm:$0xff] }
 0x61d   :  { %v8321_v25 = vpack.c.b16 %v8293_v11, %v8293_v11  ;;  %v7789_v29 = vmax.f32 %v7519_v63, %v7788_v50  ;;  %v7452_v45 = vmul.f32 %v19565_v15, %v7384_v55  ;;  %9086 = vmatmul.mubr.bf16.gmra.mrb[4].mxu0 %v13169_v7  ;;  %v13871_v9 = vpack.c.bf16 %v7775_v32, %v7775_v32 }
 0x61e   :  { %v7781_v35 = vmax.f32 %v7779_v46, %v7780_v37  ;;  %v7784_v41 = vrot.slane %v7783_v39, 2  ;;  %v7385_v38 = vmax.f32 %v14772_v26, 0.0  ;;  %13975 = vmatprep.subr.bf16.mxu0 %v15366_v14  ;;  %v6116_v24 = vadd.f32 %v19557_v20, %v21767_v28  ;;  %v21768_v37 = vld [vmem:[#allocation86_spill] sm:$0xff] }
 0x61f   :  { %8353 = vst [vmem:[#allocation2 + $0x120] sm:$0xe] %v8321_v25  ;;  %v7790_v8 = vrot.slane %v7789_v29, 2  ;;  %v7520_v31 = vadd.f32 %v19571_v60, %v7452_v45  ;;  %v8233_v19 = vunpack.c.l.b16 %v13871_v9 }
 0x620   :  { %v13872_v5 = vpack.c.bf16 %v7781_v35, %v7781_v35  ;;  %v7785_v18 = vmax.f32 %v7783_v39, %v7784_v41  ;;  %v7453_v62 = vmul.f32 %v19565_v15, %v7385_v38  ;;  %v7263_v10 = vpop.f32.mrb[68].mxu1  ;;  %13976 = vmatpush3.bf16.msra.mxu0 %v15367_v42  ;;  %v6119_v39 = vadd.f32 %v19557_v20, %v21768_v37 }
 0x621   :  { %v7791_v30 = vmax.f32 %v7789_v29, %v7790_v8  ;;  %v7794_v40 = vrot.slane %v7520_v31, 4  ;;  %v14774_v34 = vadd.f32 %v7263_v10, %v6108_v57  ;;  %v7265_v56 = vpop.f32.mrb[69].mxu1  ;;  %14429 = vmatprep.subr.bf16.mxu0 %v19710_v21 }
 0x622   :  { %v8234_v3 = vunpack.c.l.b16 %v13872_v5  ;;  %v7786_v54 = vrot.slane %v7785_v18, 1  ;;  %v7521_v12 = vadd.f32 %v19571_v60, %v7453_v62  ;;  %v7266_v27 = vpop.f32.mrb[70].mxu1  ;;  %v21770_v56 = vld [vmem:[#allocation87_spill] sm:$0xff] }
 0x623   :  { %v7792_v48 = vrot.slane %v7791_v30, 1  ;;  %v7795_v43 = vmax.f32 %v7520_v31, %v7794_v40  ;;  %v7386_v52 = vmax.f32 %v14774_v34, 0.0  ;;  %v14776_v4 = vadd.f32 %v7266_v27, %v6111_v17  ;;  %v7268_v59 = vpop.f32.mrb[71].mxu1 }
 0x624   :  { %v8294_v7 = vsel %vm8269_vm2, %v8234_v3, %v8233_v19  ;;  %v7787_v0 = vmax.f32 %v7785_v18, %v7786_v54  ;;  %v7800_v53 = vrot.slane %v7521_v12, 4  ;;  %v6124_v17 = vadd.f32 %v19557_v20, %v21769_v58 }
 0x625   :  { %v8322_v16 = vpack.c.b16 %v8294_v7, %v8294_v7  ;;  %v7793_v61 = vmax.f32 %v7791_v30, %v7792_v48  ;;  %v7796_v22 = vrot.slane %v7795_v43, 2  ;;  %v7454_v44 = vmul.f32 %v19565_v15, %v7386_v52 }
 0x626   :  { %v13873_v2 = vpack.c.bf16 %v7787_v0, %v7787_v0  ;;  %v7801_v63 = vmax.f32 %v7521_v12, %v7800_v53  ;;  %v7387_v13 = vmax.f32 %v14776_v4, 0.0  ;;  %v6127_v19 = vadd.f32 %v19557_v20, %v21770_v56 }
 0x627   :  { %8354 = vst [vmem:[#allocation2 + $0x128] sm:$0x1] %v8322_v16  ;;  %v13874_v46 = vpack.c.bf16 %v7793_v61, %v7793_v61  ;;  %v7797_v33 = vmax.f32 %v7795_v43, %v7796_v22  ;;  %v7522_v6 = vadd.f32 %v19571_v60, %v7454_v44 }
 0x628   :  { %v8235_v49 = vunpack.c.l.b16 %v13873_v2  ;;  %v7802_v51 = vrot.slane %v7801_v63, 2  ;;  %v7455_v32 = vmul.f32 %v19565_v15, %v7387_v13  ;;  %v7271_v50 = vpop.f32.mrb[72].mxu1 }
 0x629   :  { %v8236_v55 = vunpack.c.l.b16 %v13874_v46  ;;  %v7798_v26 = vrot.slane %v7797_v33, 1  ;;  %v7806_v23 = vrot.slane %v7522_v6, 4  ;;  %v14778_v36 = vadd.f32 %v7271_v50, %v6116_v24  ;;  %v7273_v11 = vpop.f32.mrb[73].mxu1 }
 0x62a   :  { %v7803_v25 = vmax.f32 %v7801_v63, %v7802_v51  ;;  %v7523_v29 = vadd.f32 %v19571_v60, %v7455_v32  ;;  %v7274_v45 = vpop.f32.mrb[74].mxu1  ;;  %v21772_v11 = vld [vmem:[#allocation90_spill] sm:$0xff] }
 0x62b   :  { %v8295_v9 = vsel %vm8259_vm14, %v8236_v55, %v8235_v49  ;;  %v7799_v35 = vmax.f32 %v7797_v33, %v7798_v26  ;;  %v7807_v41 = vmax.f32 %v7522_v6, %v7806_v23  ;;  %v7388_v38 = vmax.f32 %v14778_v36, 0.0  ;;  %v7276_v1 = vpop.f32.mrb[75].mxu1  ;;  %v21771_v23 = vld [vmem:[#allocation38_spill] sm:$0xff] }
 0x62c   :  { %v7804_v47 = vrot.slane %v7803_v25, 1  ;;  %v7812_v57 = vrot.slane %v7523_v29, 4  ;;  %v14780_v8 = vadd.f32 %v7274_v45, %v6119_v39  ;;  %v6132_v36 = vadd.f32 %v19557_v20, %v21771_v23 }
 0x62d   :  { %v13875_v31 = vpack.c.bf16 %v7799_v35, %v7799_v35  ;;  %v7808_v14 = vrot.slane %v7807_v41, 2  ;;  %v7456_v5 = vmul.f32 %v19565_v15, %v7388_v38  ;;  %v6135_v37 = vadd.f32 %v19557_v20, %v21772_v11 }
 0x62e   :  { %v7805_v18 = vmax.f32 %v7803_v25, %v7804_v47  ;;  %v7813_v62 = vmax.f32 %v7523_v29, %v7812_v57  ;;  %v7389_v10 = vmax.f32 %v14780_v8, 0.0 }
 0x62f   :  { %v8237_v30 = vunpack.c.l.b16 %v13875_v31  ;;  %v7809_v40 = vmax.f32 %v7807_v41, %v7808_v14  ;;  %v7524_v34 = vadd.f32 %v19571_v60, %v7456_v5 }
 0x630   :  { %v13876_v3 = vpack.c.bf16 %v7805_v18, %v7805_v18  ;;  %v7814_v54 = vrot.slane %v7813_v62, 2  ;;  %v7457_v12 = vmul.f32 %v19565_v15, %v7389_v10  ;;  %v7279_v27 = vpop.f32.mrb[76].mxu1 }
 0x631   :  { %v8296_v42 = vsel %vm2760_vm12, %v8237_v30, %v8295_v9  ;;  %v7810_v48 = vrot.slane %v7809_v40, 1  ;;  %v7818_v43 = vrot.slane %v7524_v34, 4  ;;  %v14782_v52 = vadd.f32 %v7279_v27, %v6124_v17  ;;  %v7281_v4 = vpop.f32.mrb[77].mxu1 }
 0x632   :  { %v8238_v59 = vunpack.c.l.b16 %v13876_v3  ;;  %v7815_v7 = vmax.f32 %v7813_v62, %v7814_v54  ;;  %v7525_v0 = vadd.f32 %v19571_v60, %v7457_v12  ;;  %v7282_v53 = vpop.f32.mrb[78].mxu1  ;;  %v21773_v12 = vld [vmem:[#allocation91_spill] sm:$0xff] }
 0x633   :  { %v7811_v16 = vmax.f32 %v7809_v40, %v7810_v48  ;;  %v7819_v61 = vmax.f32 %v7524_v34, %v7818_v43  ;;  %v7390_v22 = vmax.f32 %v14782_v52, 0.0  ;;  %v14784_v44 = vadd.f32 %v7282_v53, %v6127_v19  ;;  %v7284_v2 = vpop.f32.mrb[79].mxu1 }
 0x634   :  { %v8297_v63 = vsel %vm8263_vm15, %v8238_v59, %v8296_v42  ;;  %v7816_v13 = vrot.slane %v7815_v7, 1  ;;  %v7824_v28 = vrot.slane %v7525_v0, 4  ;;  %v6140_v27 = vadd.f32 %v19557_v20, %v21773_v12 }
 0x635   :  { %v13877_v24 = vpack.c.bf16 %v7811_v16, %v7811_v16  ;;  %v7820_v46 = vrot.slane %v7819_v61, 2  ;;  %v7458_v33 = vmul.f32 %v19565_v15, %v7390_v22  ;;  %v7391_v6 = vmax.f32 %v14784_v44, 0.0 }
 0x636   :  { %v7817_v49 = vmax.f32 %v7815_v7, %v7816_v13  ;;  %v7825_v51 = vmax.f32 %v7525_v0, %v7824_v28  ;;  %v21774_v7 = vld [vmem:[#allocation92_spill] sm:$0xff] }
 0x637   :  { %v8239_v32 = vunpack.c.l.b16 %v13877_v24  ;;  %v7821_v50 = vmax.f32 %v7819_v61, %v7820_v46  ;;  %v7526_v55 = vadd.f32 %v19571_v60, %v7458_v33  ;;  %v7459_v26 = vmul.f32 %v19565_v15, %v7391_v6 }
 0x638   :  { %v13878_v39 = vpack.c.bf16 %v7817_v49, %v7817_v49  ;;  %v7826_v25 = vrot.slane %v7825_v51, 2  ;;  %v7287_v29 = vpop.f32.mrb[80].mxu1  ;;  %v6143_v0 = vadd.f32 %v19557_v20, %v21774_v7 }
 0x639   :  { %v8298_v45 = vsel %vm8265_vm0, %v8239_v32, %v8297_v63  ;;  %v7822_v9 = vrot.slane %v7821_v50, 1  ;;  %v7830_v35 = vrot.slane %v7526_v55, 4  ;;  %v7527_v41 = vadd.f32 %v19571_v60, %v7459_v26  ;;  %v7289_v38 = vpop.f32.mrb[81].mxu1  ;;  %v21775_v32 = vld [vmem:[#allocation93_spill] sm:$0xff] }
 0x63a   :  { %v8240_v1 = vunpack.c.l.b16 %v13878_v39  ;;  %v7827_v47 = vmax.f32 %v7825_v51, %v7826_v25  ;;  %v14786_v57 = vadd.f32 %v7287_v29, %v6132_v36  ;;  %v7290_v8 = vpop.f32.mrb[82].mxu1  ;;  %v19751_v51 = vld [vmem:[#allocation2 + $0x128] sm:$0x1]  ;;  %v19757_v25 = vld [vmem:[#allocation2 + $0x120] sm:$0xf] }
 0x63b   :  { %v7823_v31 = vmax.f32 %v7821_v50, %v7822_v9  ;;  %v7831_v14 = vmax.f32 %v7526_v55, %v7830_v35  ;;  %v7836_v5 = vrot.slane %v7527_v41, 4  ;;  %v14788_v18 = vadd.f32 %v7290_v8, %v6135_v37  ;;  %v7292_v62 = vpop.f32.mrb[83].mxu1 }
 0x63c   :  { %v8299_v10 = vsel %vm8267_vm1, %v8240_v1, %v8298_v45  ;;  %v7828_v58 = vrot.slane %v7827_v47, 1  ;;  %v7392_v17 = vmax.f32 %v14786_v57, 0.0  ;;  %v6148_v50 = vadd.f32 %v19557_v20, %v21775_v32  ;;  %v21777_v1 = vld [vmem:[#allocation46_spill] sm:$0xff] }
 0x63d   :  { %v8323_v30 = vpack.c.b16 %v8299_v10, %v8299_v10  ;;  %v7832_v40 = vrot.slane %v7831_v14, 2  ;;  %v7837_v34 = vmax.f32 %v7527_v41, %v7836_v5  ;;  %v13879_v56 = vpack.c.bf16 %v7823_v31, %v7823_v31  ;;  %v21776_v41 = vld [vmem:[#allocation94_spill] sm:$0xff]  ;;  %v21778_v31 = vld [vmem:[#allocation95_spill] sm:$0xff] }
 0x63e   :  { %v7829_v19 = vmax.f32 %v7827_v47, %v7828_v58  ;;  %v7460_v3 = vmul.f32 %v19565_v15, %v7392_v17  ;;  %v7393_v54 = vmax.f32 %v14788_v18, 0.0  ;;  %v13135_v35 = vcombine.low %v19757_v25, %v19751_v51 }
 0x63f   :  { %8355 = vst [vmem:[#allocation2 + $0x168] sm:$0xe] %v8323_v30  ;;  %v7833_v42 = vmax.f32 %v7831_v14, %v7832_v40  ;;  %v7838_v48 = vrot.slane %v7837_v34, 2  ;;  %v8241_v44 = vunpack.c.l.b16 %v13879_v56  ;;  %v6151_v38 = vadd.f32 %v19557_v20, %v21776_v41 }
 0x640   :  { %v13880_v43 = vpack.c.bf16 %v7829_v19, %v7829_v19  ;;  %v7528_v52 = vadd.f32 %v19571_v60, %v7460_v3  ;;  %v7461_v4 = vmul.f32 %v19565_v15, %v7393_v54  ;;  %v7295_v59 = vpop.f32.mrb[84].mxu1  ;;  %v6156_v47 = vadd.f32 %v19557_v20, %v21777_v1 }
 0x641   :  { %v7834_v53 = vrot.slane %v7833_v42, 1  ;;  %v7839_v16 = vmax.f32 %v7837_v34, %v7838_v48  ;;  %v14790_v61 = vadd.f32 %v7295_v59, %v6140_v27  ;;  %v7297_v22 = vpop.f32.mrb[85].mxu1  ;;  %v6159_v14 = vadd.f32 %v19557_v20, %v21778_v31 }
 0x642   :  { %v8242_v2 = vunpack.c.l.b16 %v13880_v43  ;;  %v7842_v63 = vrot.slane %v7528_v52, 4  ;;  %v7529_v13 = vadd.f32 %v19571_v60, %v7461_v4  ;;  %v7298_v28 = vpop.f32.mrb[86].mxu1  ;;  %v8472_v12 = vshll.u32 %v13135_v35, 16  ;;  %v21779_v4 = vld [vmem:[#allocation47_spill] sm:$0xff] }
 0x643   :  { %v7835_v24 = vmax.f32 %v7833_v42, %v7834_v53  ;;  %v7840_v46 = vrot.slane %v7839_v16, 1  ;;  %v7394_v33 = vmax.f32 %v14790_v61, 0.0  ;;  %v14792_v6 = vadd.f32 %v7298_v28, %v6143_v0  ;;  %v7300_v49 = vpop.f32.mrb[87].mxu1 }
 0x644   :  { %v8300_v55 = vsel %vm8269_vm2, %v8242_v2, %v8241_v44  ;;  %v7843_v26 = vmax.f32 %v7528_v52, %v7842_v63  ;;  %v7848_v23 = vrot.slane %v7529_v13, 4  ;;  %v19773_v59 = vadd.f32 %v19557_v20, %v21779_v4 }
 0x645   :  { %v8324_v36 = vpack.c.b16 %v8300_v55, %v8300_v55  ;;  %v13881_v11 = vpack.c.bf16 %v7835_v24, %v7835_v24  ;;  %v7841_v37 = vmax.f32 %v7839_v16, %v7840_v46  ;;  %v7462_v39 = vmul.f32 %v19565_v15, %v7394_v33  ;;  %v21780_v16 = vld [vmem:[#allocation97_spill] sm:$0xff] }
 0x646   :  { %v7844_v29 = vrot.slane %v7843_v26, 2  ;;  %v7849_v45 = vmax.f32 %v7529_v13, %v7848_v23  ;;  %v7395_v9 = vmax.f32 %v14792_v6, 0.0  ;;  %v19777_v61 = vadd.f32 %v19557_v20, %v21780_v16  ;;  %v19784_v32 = vld [vmem:[#allocation2 + $0x168] sm:$0xf] }
 0x647   :  { %8356 = vst [vmem:[#allocation2 + $0x170] sm:$0x1] %v8324_v36  ;;  %v13882_v57 = vpack.c.bf16 %v7841_v37, %v7841_v37  ;;  %v7530_v8 = vadd.f32 %v19571_v60, %v7462_v39  ;;  %v8243_v58 = vunpack.c.l.b16 %v13881_v11  ;;  %v8474_v46 = vrot.slane %v8472_v12, 1 }
 0x648   :  { %v7845_v5 = vmax.f32 %v7843_v26, %v7844_v29  ;;  %v7850_v18 = vrot.slane %v7849_v45, 2  ;;  %v7463_v62 = vmul.f32 %v19565_v15, %v7395_v9  ;;  %v7303_v10 = vpop.f32.mrb[88].mxu1 }
 0x649   :  { %v8244_v17 = vunpack.c.l.b16 %v13882_v57  ;;  %v7854_v30 = vrot.slane %v7530_v8, 4  ;;  %v14794_v40 = vadd.f32 %v7303_v10, %v6148_v50  ;;  %v7305_v34 = vpop.f32.mrb[89].mxu1  ;;  %v8470_v50 = vshrl.u32 %v13135_v35, 16 }
 0x64a   :  { %v7846_v56 = vrot.slane %v7845_v5, 1  ;;  %v7851_v19 = vmax.f32 %v7849_v45, %v7850_v18  ;;  %v7531_v3 = vadd.f32 %v19571_v60, %v7463_v62  ;;  %v7306_v54 = vpop.f32.mrb[90].mxu1 }
 0x64b   :  { %v8301_v27 = vsel %vm8259_vm14, %v8244_v17, %v8243_v58  ;;  %v7855_v42 = vmax.f32 %v7530_v8, %v7854_v30  ;;  %v7396_v48 = vmax.f32 %v14794_v40, 0.0  ;;  %v14796_v43 = vadd.f32 %v7306_v54, %v6151_v38  ;;  %v7308_v52 = vpop.f32.mrb[91].mxu1 }
 0x64c   :  { %v7847_v7 = vmax.f32 %v7845_v5, %v7846_v56  ;;  %v7852_v0 = vrot.slane %v7851_v19, 1  ;;  %v7860_v53 = vrot.slane %v7531_v3, 4  ;;  %v8475_v57 = vor.u32 %v8474_v46, %v8470_v50 }
 0x64d   :  { %v7856_v22 = vrot.slane %v7855_v42, 2  ;;  %v7464_v44 = vmul.f32 %v19565_v15, %v7396_v48  ;;  %v7397_v2 = vmax.f32 %v14796_v43, 0.0 }
 0x64e   :  { %v13883_v63 = vpack.c.bf16 %v7847_v7, %v7847_v7  ;;  %v7853_v13 = vmax.f32 %v7851_v19, %v7852_v0  ;;  %v7861_v28 = vmax.f32 %v7531_v3, %v7860_v53  ;;  %v19780_v24 = vld [vmem:[#allocation2 + $0x170] sm:$0x1]  ;;  %v13174_v7 = vcombine.low %v19757_v25, %v19784_v32 }
 0x64f   :  { %v7857_v33 = vmax.f32 %v7855_v42, %v7856_v22  ;;  %v7532_v6 = vadd.f32 %v19571_v60, %v7464_v44  ;;  %v7465_v49 = vmul.f32 %v19565_v15, %v7397_v2  ;;  %v13136_v36 = vcombine.low %v19784_v32, %v19780_v24 }
 0x650   :  { %v8245_v20 = vunpack.c.l.b16 %v13883_v63  ;;  %v13884_v55 = vpack.c.bf16 %v7853_v13, %v7853_v13  ;;  %v7862_v26 = vrot.slane %v7861_v28, 2  ;;  %v7311_v23 = vpop.f32.mrb[92].mxu1 }
 0x651   :  { %v7858_v11 = vrot.slane %v7857_v33, 1  ;;  %v7866_v37 = vrot.slane %v7532_v6, 4  ;;  %v7533_v39 = vadd.f32 %v19571_v60, %v7465_v49  ;;  %v14798_v29 = vadd.f32 %v7311_v23, %v6156_v47  ;;  %v7313_v45 = vpop.f32.mrb[93].mxu1 }
 0x652   :  { %v8302_v9 = vsel %vm2760_vm12, %v8245_v20, %v8301_v27  ;;  %v8246_v41 = vunpack.c.l.b16 %v13884_v55  ;;  %v7863_v38 = vmax.f32 %v7861_v28, %v7862_v26  ;;  %v7314_v1 = vpop.f32.mrb[94].mxu1  ;;  %v8479_v17 = vshll.u32 %v13136_v36, 16 }
 0x653   :  { %v7859_v35 = vmax.f32 %v7857_v33, %v7858_v11  ;;  %v7867_v8 = vmax.f32 %v7532_v6, %v7866_v37  ;;  %v7872_v31 = vrot.slane %v7533_v39, 4  ;;  %v7398_v5 = vmax.f32 %v14798_v29, 0.0  ;;  %v7316_v18 = vpop.f32.mrb[95].mxu1  ;;  %v15648_v37 = vld [vmem:[%s21075_s5] ss:$0 sm:$0xff] }
 0x654   :  { %v8303_v62 = vsel %vm8263_vm15, %v8246_v41, %v8302_v9  ;;  %v7864_v10 = vrot.slane %v7863_v38, 1  ;;  %v14800_v58 = vadd.f32 %v7314_v1, %v6159_v14  ;;  %v8477_v3 = vshrl.u32 %v13136_v36, 16  ;;  %v21782_v41 = vld [vmem:[#allocation51_spill] sm:$0xff] }
 0x655   :  { %v13885_v30 = vpack.c.bf16 %v7859_v35, %v7859_v35  ;;  %v7868_v40 = vrot.slane %v7867_v8, 2  ;;  %v7873_v47 = vmax.f32 %v7533_v39, %v7872_v31  ;;  %v7466_v34 = vmul.f32 %v19565_v15, %v7398_v5  ;;  %v21781_v39 = vld [vmem:[#allocation49_spill] sm:$0xff] }
 0x656   :  { %v7865_v56 = vmax.f32 %v7863_v38, %v7864_v10  ;;  %v7399_v19 = vmax.f32 %v14800_v58, 0.0  ;;  %v8481_v54 = vrot.slane %v8479_v17, 1  ;;  %v6172_v29 = vadd.f32 %v15648_v37, %v21781_v39 }
 0x657   :  { %v8247_v12 = vunpack.c.l.b16 %v13885_v30  ;;  %v7869_v27 = vmax.f32 %v7867_v8, %v7868_v40  ;;  %v7874_v42 = vrot.slane %v7873_v47, 2  ;;  %v7534_v48 = vadd.f32 %v19571_v60, %v7466_v34 }
 0x658   :  { %v13886_v43 = vpack.c.bf16 %v7865_v56, %v7865_v56  ;;  %v7467_v52 = vmul.f32 %v19565_v15, %v7399_v19  ;;  %v7319_v4 = vpop.f32.mrb[96].mxu1  ;;  %v8482_v14 = vor.u32 %v8481_v54, %v8477_v3  ;;  %v6175_v38 = vadd.f32 %v15648_v37, %v21782_v41 }
 0x659   :  { %v8304_v0 = vsel %vm8265_vm0, %v8247_v12, %v8303_v62  ;;  %v7870_v53 = vrot.slane %v7869_v27, 1  ;;  %v7875_v16 = vmax.f32 %v7873_v47, %v7874_v42  ;;  %v7878_v22 = vrot.slane %v7534_v48, 4  ;;  %v7321_v44 = vpop.f32.mrb[97].mxu1 }
 0x65a   :  { %v8248_v2 = vunpack.c.l.b16 %v13886_v43  ;;  %v7535_v63 = vadd.f32 %v19571_v60, %v7467_v52  ;;  %v14802_v13 = vadd.f32 %v7319_v4, %v19773_v59  ;;  %v13175_v28 = vcombine.low %v8475_v57, %v8482_v14  ;;  %v7322_v46 = vpop.f32.mrb[98].mxu1  ;;  %v19804_v59 = vld [vmem:[%s21075_s5 + $0x1] ss:$0 sm:$0xff]  ;;  %v19815_v57 = vld [vmem:[%s21075_s5 + $0x2] ss:$0 sm:$0xff] }
 0x65b   :  { %v7871_v33 = vmax.f32 %v7869_v27, %v7870_v53  ;;  %v7876_v15 = vrot.slane %v7875_v16, 1  ;;  %v7879_v6 = vmax.f32 %v7534_v48, %v7878_v22  ;;  %v14804_v49 = vadd.f32 %v7322_v46, %v19777_v61  ;;  %v7324_v50 = vpop.f32.mrb[99].mxu1  ;;  %v21783_v53 = vld [vmem:[#allocation98_spill] sm:$0xff]  ;;  %v21784_v46 = vld [vmem:[#allocation99_spill] sm:$0xff] }
 0x65c   :  { %v8305_v25 = vsel %vm8267_vm1, %v8248_v2, %v8304_v0  ;;  %v7884_v32 = vrot.slane %v7535_v63, 4  ;;  %v7400_v20 = vmax.f32 %v14802_v13, 0.0  ;;  %9093 = vmatprep.mubr.bf16.mxu0 %v13175_v28 }
 0x65d   :  { %v8325_v55 = vpack.c.b16 %v8305_v25, %v8305_v25  ;;  %v13887_v26 = vpack.c.bf16 %v7871_v33, %v7871_v33  ;;  %v7877_v23 = vmax.f32 %v7875_v16, %v7876_v15  ;;  %v7880_v36 = vrot.slane %v7879_v6, 2  ;;  %9094 = vmatmul.mubr.bf16.gmra.mrb[8].mxu0 %v13174_v7 }
 0x65e   :  { %v7885_v60 = vmax.f32 %v7535_v63, %v7884_v32  ;;  %v7468_v11 = vmul.f32 %v19804_v59, %v7400_v20  ;;  %v7401_v61 = vmax.f32 %v14804_v49, 0.0  ;;  %v6180_v16 = vadd.f32 %v15648_v37, %v21783_v53 }
 0x65f   :  { %8357 = vst [vmem:[#allocation2 + $0x1b0] sm:$0xe] %v8325_v55  ;;  %v13888_v45 = vpack.c.bf16 %v7877_v23, %v7877_v23  ;;  %v7881_v9 = vmax.f32 %v7879_v6, %v7880_v36  ;;  %v8249_v5 = vunpack.c.l.b16 %v13887_v26  ;;  %v6183_v33 = vadd.f32 %v15648_v37, %v21784_v46 }
 0x660   :  { %v7886_v1 = vrot.slane %v7885_v60, 2  ;;  %v7536_v35 = vadd.f32 %v19815_v57, %v7468_v11  ;;  %v7469_v8 = vmul.f32 %v19804_v59, %v7401_v61  ;;  %v7327_v31 = vpop.f32.mrb[100].mxu1 }
 0x661   :  { %v8250_v18 = vunpack.c.l.b16 %v13888_v45  ;;  %v7882_v62 = vrot.slane %v7881_v9, 1  ;;  %v14806_v10 = vadd.f32 %v7327_v31, %v6172_v29  ;;  %v7329_v58 = vpop.f32.mrb[101].mxu1 }
 0x662   :  { %v7887_v17 = vmax.f32 %v7885_v60, %v7886_v1  ;;  %v7890_v30 = vrot.slane %v7536_v35, 4  ;;  %v7537_v40 = vadd.f32 %v19815_v57, %v7469_v8  ;;  %v7330_v47 = vpop.f32.mrb[102].mxu1 }
 0x663   :  { %v8306_v34 = vsel %vm8269_vm2, %v8250_v18, %v8249_v5  ;;  %v7883_v56 = vmax.f32 %v7881_v9, %v7882_v62  ;;  %v7402_v19 = vmax.f32 %v14806_v10, 0.0  ;;  %v14808_v3 = vadd.f32 %v7330_v47, %v6175_v38  ;;  %v7332_v54 = vpop.f32.mrb[103].mxu1 }
 0x664   :  { %v8326_v12 = vpack.c.b16 %v8306_v34, %v8306_v34  ;;  %v7888_v27 = vrot.slane %v7887_v17, 1  ;;  %v7891_v42 = vmax.f32 %v7536_v35, %v7890_v30  ;;  %v7896_v48 = vrot.slane %v7537_v40, 4 }
 0x665   :  { %v7470_v43 = vmul.f32 %v19804_v59, %v7402_v19  ;;  %v7403_v52 = vmax.f32 %v14808_v3, 0.0  ;;  %v13889_v4 = vpack.c.bf16 %v7883_v56, %v7883_v56 }
 0x666   :  { %8358 = vst [vmem:[#allocation2 + $0x1b8] sm:$0x1] %v8326_v12  ;;  %v7889_v14 = vmax.f32 %v7887_v17, %v7888_v27  ;;  %v7892_v7 = vrot.slane %v7891_v42, 2  ;;  %v7897_v0 = vmax.f32 %v7537_v40, %v7896_v48 }
 0x667   :  { %v7538_v22 = vadd.f32 %v19815_v57, %v7470_v43  ;;  %v7471_v44 = vmul.f32 %v19804_v59, %v7403_v52  ;;  %v8251_v25 = vunpack.c.l.b16 %v13889_v4 }
 0x668   :  { %v13890_v2 = vpack.c.bf16 %v7889_v14, %v7889_v14  ;;  %v7893_v63 = vmax.f32 %v7891_v42, %v7892_v7  ;;  %v7898_v13 = vrot.slane %v7897_v0, 2  ;;  %v7335_v28 = vpop.f32.mrb[104].mxu1 }
 0x669   :  { %v7902_v15 = vrot.slane %v7538_v22, 4  ;;  %v7539_v6 = vadd.f32 %v19815_v57, %v7471_v44  ;;  %v14810_v49 = vadd.f32 %v7335_v28, %v6180_v16  ;;  %v7337_v50 = vpop.f32.mrb[105].mxu1 }
 0x66a   :  { %v8252_v32 = vunpack.c.l.b16 %v13890_v2  ;;  %v7894_v20 = vrot.slane %v7893_v63, 1  ;;  %v7899_v55 = vmax.f32 %v7897_v0, %v7898_v13  ;;  %v7338_v26 = vpop.f32.mrb[106].mxu1 }
 0x66b   :  { %v7903_v23 = vmax.f32 %v7538_v22, %v7902_v15  ;;  %v7908_v36 = vrot.slane %v7539_v6, 4  ;;  %v7404_v60 = vmax.f32 %v14810_v49, 0.0  ;;  %v14812_v11 = vadd.f32 %v7338_v26, %v6183_v33  ;;  %v7340_v61 = vpop.f32.mrb[107].mxu1  ;;  %v19837_v49 = vld [vmem:[#allocation2 + $0x50] sm:$0x3] }
 0x66c   :  { %v8307_v39 = vsel %vm8259_vm14, %v8252_v32, %v8251_v25  ;;  %v7895_v29 = vmax.f32 %v7893_v63, %v7894_v20  ;;  %v7900_v45 = vrot.slane %v7899_v55, 1  ;;  %v8378_v25 = vld [vmem:[#allocation2 + $0x48] sm:$0xe]  ;;  %v8367_v20 = vld [vmem:[#allocation2 + $0x1b0] sm:$0xf] }
 0x66d   :  { %v7904_v37 = vrot.slane %v7903_v23, 2  ;;  %v7909_v9 = vmax.f32 %v7539_v6, %v7908_v36  ;;  %v7472_v41 = vmul.f32 %v19804_v59, %v7404_v60  ;;  %v7405_v38 = vmax.f32 %v14812_v11, 0.0  ;;  %v19839_v50 = vld [vmem:[#allocation2 + $0x1b8] sm:$0x1]  ;;  %v19841_v32 = vld [vmem:[#allocation2 + $0x8] sm:$0x3] }
 0x66e   :  { %v13891_v1 = vpack.c.bf16 %v7895_v29, %v7895_v29  ;;  %v7901_v35 = vmax.f32 %v7899_v55, %v7900_v45  ;;  %v13148_v55 = vcombine.low %v8378_v25, %v19837_v49  ;;  %v13137_v26 = vcombine.low %v8367_v20, %v19839_v50 }
 0x66f   :  { %v7905_v8 = vmax.f32 %v7903_v23, %v7904_v37  ;;  %v7910_v31 = vrot.slane %v7909_v9, 2  ;;  %v7540_v5 = vadd.f32 %v19815_v57, %v7472_v41  ;;  %v7473_v18 = vmul.f32 %v19804_v59, %v7405_v38  ;;  %v8377_v23 = vld [vmem:[#allocation2] sm:$0xe] }
 0x670   :  { %v8253_v62 = vunpack.c.l.b16 %v13891_v1  ;;  %v13892_v10 = vpack.c.bf16 %v7901_v35, %v7901_v35  ;;  %v13147_v36 = vcombine.low %v8377_v23, %v19841_v32  ;;  %v8562_v60 = vshrl.u32 %v13148_v55, 16  ;;  %v19851_v35 = vld [vmem:[#allocation2 + $0xd8] sm:$0xe] }
 0x671   :  { %v7906_v58 = vrot.slane %v7905_v8, 1  ;;  %v7911_v17 = vmax.f32 %v7909_v9, %v7910_v31  ;;  %v7914_v30 = vrot.slane %v7540_v5, 4  ;;  %v7541_v40 = vadd.f32 %v19815_v57, %v7473_v18 }
 0x672   :  { %v8308_v47 = vsel %vm2760_vm12, %v8253_v62, %v8307_v39  ;;  %v8254_v34 = vunpack.c.l.b16 %v13892_v10  ;;  %v8565_v11 = vshll.u32 %v13148_v55, 16  ;;  %v8486_v61 = vshll.u32 %v13137_v26, 16  ;;  %v19846_v39 = vld [vmem:[#allocation2 + $0xe0] sm:$0x3] }
 0x673   :  { %v7907_v56 = vmax.f32 %v7905_v8, %v7906_v58  ;;  %v7912_v19 = vrot.slane %v7911_v17, 1  ;;  %v7915_v3 = vmax.f32 %v7540_v5, %v7914_v30  ;;  %v7920_v54 = vrot.slane %v7541_v40, 4  ;;  %v19853_v8 = vld [vmem:[#allocation2 + $0x98] sm:$0x3]  ;;  %v19857_v58 = vld [vmem:[#allocation2 + $0x90] sm:$0xe] }
 0x674   :  { %v8309_v12 = vsel %vm8263_vm15, %v8254_v34, %v8308_v47  ;;  %v8554_v37 = vshrl.u32 %v13147_v36, 16  ;;  %v8557_v9 = vshll.u32 %v13147_v36, 16  ;;  %v8564_v38 = vrot.slane %v8562_v60, 1 }
 0x675   :  { %v13893_v27 = vpack.c.bf16 %v7907_v56, %v7907_v56  ;;  %v7913_v42 = vmax.f32 %v7911_v17, %v7912_v19  ;;  %v7916_v48 = vrot.slane %v7915_v3, 2  ;;  %v7921_v59 = vmax.f32 %v7541_v40, %v7920_v54 }
 0x676   :  { %v8567_v1 = vrot.slane %v8565_v11, 2  ;;  %v8488_v31 = vrot.slane %v8486_v61, 1  ;;  %v13150_v18 = vcombine.low %v19851_v35, %v19846_v39  ;;  %v8556_v62 = vrot.slane %v8554_v37, 1  ;;  %v15652_v11 = vld [vmem:[#allocation2 + $0xe0] sm:$0x1]  ;;  %v15375_v61 = vld [vmem:[%s21073_s3 + $0x108] sm:$0xff]  }
 0x677   :  { %v8255_v43 = vunpack.c.l.b16 %v13893_v27  ;;  %v13894_v52 = vpack.c.bf16 %v7913_v42, %v7913_v42  ;;  %v7917_v4 = vmax.f32 %v7915_v3, %v7916_v48  ;;  %v7922_v14 = vrot.slane %v7921_v59, 2  ;;  %v19878_v37 = vld [vmem:[#allocation2 + $0x1b8] sm:$0x3] }
 0x678   :  { %v8559_v10 = vrot.slane %v8557_v9, 2  ;;  %v8484_v17 = vshrl.u32 %v13137_v26, 16  ;;  %v13149_v47 = vcombine.low %v19857_v58, %v19853_v8  ;;  %v8568_v34 = vor.u32 %v8567_v1, %v8564_v38 }
 0x679   :  { %v8310_v7 = vsel %vm8265_vm0, %v8255_v43, %v8309_v12  ;;  %v8256_v57 = vunpack.c.l.b16 %v13894_v52  ;;  %v7918_v0 = vrot.slane %v7917_v4, 1  ;;  %v7923_v53 = vmax.f32 %v7921_v59, %v7922_v14  ;;  %v19861_v12 = vld [vmem:[#allocation2 + $0x170] sm:$0x3]  ;;  %v19863_v14 = vld [vmem:[#allocation2 + $0x168] sm:$0xe] }
 0x67a   :  { %v8489_v56 = vor.u32 %v8488_v31, %v8484_v17  ;;  %v8578_v3 = vshrl.u32 %v13150_v18, 16  ;;  %v8581_v54 = vshll.u32 %v13150_v18, 16  ;;  %v8560_v42 = vor.u32 %v8559_v10, %v8556_v62  ;;  %v15650_v52 = vld [vmem:[#allocation2 + $0x50] sm:$0x1]  ;;  %v15653_v31 = vld [vmem:[#allocation2 + $0x98] sm:$0x1] }
 0x67b   :  { %v8311_v16 = vsel %vm8267_vm1, %v8256_v57, %v8310_v7  ;;  %v7919_v22 = vmax.f32 %v7917_v4, %v7918_v0  ;;  %v7924_v44 = vrot.slane %v7923_v53, 1  ;;  %v8570_v48 = vshrl.u32 %v13149_v47, 16  ;;  %v19865_v7 = vld [vmem:[#allocation2 + $0x128] sm:$0x3]  ;;  %v8383_v18 = vld [vmem:[#allocation2 + $0x1b0] sm:$0xe] }
 0x67c   :  { %v8327_v2 = vpack.c.b16 %v8311_v16, %v8311_v16  ;;  %v8573_v59 = vshll.u32 %v13149_v47, 16  ;;  %v13140_v4 = vcombine.low %v8378_v25, %v15650_v52  ;;  %v13167_v57 = vcombine.low %v8560_v42, %v8568_v34 }
 0x67d   :  { %v13895_v63 = vpack.c.bf16 %v7919_v22, %v7919_v22  ;;  %v7925_v13 = vmax.f32 %v7923_v53, %v7924_v44  ;;  %v8580_v0 = vrot.slane %v8578_v3, 1  ;;  %v8583_v53 = vrot.slane %v8581_v54, 2  ;;  %v15651_v22 = vld [vmem:[#allocation2 + $0x8] sm:$0x1] }
 0x67e   :  { %8359 = vst [vmem:[#allocation2 + $0x1f8] sm:$0xe] %v8327_v2  ;;  %v13152_v16 = vcombine.low %v19863_v14, %v19861_v12  ;;  %v13139_v44 = vcombine.low %v8377_v23, %v15651_v22  ;;  %v8381_v2 = vld [vmem:[#allocation2 + $0x120] sm:$0xe]  ;;  %v13142_v23 = vcombine.low %v19851_v35, %v15652_v11  ;;  %v13153_v10 = vcombine.low %v8383_v18, %v19878_v37 }
 0x67f   :  { %v13896_v28 = vpack.c.bf16 %v7925_v13, %v7925_v13  ;;  %v8257_v46 = vunpack.c.l.b16 %v13895_v63  ;;  %v8572_v63 = vrot.slane %v8570_v48, 1  ;;  %v8575_v13 = vrot.slane %v8573_v59, 2 }
 0x680   :  { %v8521_v25 = vrot.slane %v13139_v44, 1  ;;  %v8524_v17 = vrot.slane %v13142_v23, 1  ;;  %v8605_v3 = vshll.u32 %v13153_v10, 16  ;;  %v13144_v54 = vcombine.low %v19863_v14, %v19780_v24  ;;  %v15382_v24 = vld [vmem:[%s21073_s3 + $0x120] sm:$0xff]   ;;  %v8396_v23 = vld [vmem:[#allocation2 + $0xd8] sm:$0xc] }
 0x681   :  { %v8258_v33 = vunpack.c.l.b16 %v13896_v28  ;;  %v13151_v28 = vcombine.low %v8381_v2, %v19865_v7  ;;  %v8576_v55 = vor.u32 %v8575_v13, %v8572_v63 }
 0x683   :  { %v8312_v15 = vsel %vm8269_vm2, %v8258_v33, %v8257_v46  ;;  %v8522_v46 = vrot.slane %v13140_v4, 1  ;;  %v8584_v33 = vor.u32 %v8583_v53, %v8580_v0  ;;  %v8586_v26 = vshrl.u32 %v13151_v28, 16 }
 0x684   :  { %v8328_v6 = vpack.c.b16 %v8312_v15, %v8312_v15  ;;  %v8594_v15 = vshrl.u32 %v13152_v16, 16  ;;  %v8589_v36 = vshll.u32 %v13151_v28, 16  ;;  %v8607_v4 = vrot.slane %v8605_v3, 2  ;;  %v15389_v28 = vld [vmem:[%s21073_s3 + $0x128] sm:$0xff]  }
 0x685   :  { %v8368_v29 = vld [vmem:[#allocation2 + $0x1f8] sm:$0xf]  ;;  %v13166_v60 = vcombine.low %v8521_v25, %v8522_v46  ;;  %v13172_v9 = vcombine.low %v8576_v55, %v8584_v33  ;;  %v8588_v35 = vrot.slane %v8586_v26, 1  ;;  %v8394_v46 = vld [vmem:[#allocation2 + $0x48] sm:$0xc]  ;;  %v13145_v25 = vcombine.low %v8383_v18, %v19839_v50 }
 0x686   :  { %8360 = vst [vmem:[#allocation2 + $0x200] sm:$0x1] %v8328_v6  ;;  %v13179_v43 = vcombine.low %v8367_v20, %v8368_v29  ;;  %v8597_v6 = vshll.u32 %v13152_v16, 16  ;;  %v8591_v62 = vrot.slane %v8589_v36, 2  ;;  %v8393_v55 = vld [vmem:[#allocation2] sm:$0xc] }
 0x687   :  { %v13155_v26 = vcombine.low %v8393_v55, %v19841_v32  ;;  %v8527_v11 = vrot.slane %v13145_v25, 1  ;;  %v8398_v32 = vld [vmem:[#allocation2 + $0x168] sm:$0xc] }
 0x688   :  { %v8599_v38 = vrot.slane %v8597_v6, 2  ;;  %v13156_v6 = vcombine.low %v8394_v46, %v19837_v49  ;;  %v13158_v49 = vcombine.low %v8396_v23, %v19846_v39  ;;  %v15411_v46 = vld [vmem:[%s21073_s3 + $0x178] sm:$0xff]  }
 0x68a   :  { %v8644_v39 = vrot.slane %v13158_v49, 2 }
 0x68d   :  { %v19848_v45 = vld [vmem:[#allocation2 + $0x200] sm:$0x1] }
 0x68e   :  { %v13138_v41 = vcombine.low %v8368_v29, %v19848_v45  ;;  %v19870_v20 = vld [vmem:[#allocation2 + $0x200] sm:$0x3]  ;;  %v19876_v29 = vld [vmem:[#allocation2 + $0x1f8] sm:$0xe] }
 0x68f   :  { %v13154_v1 = vcombine.low %v19876_v29, %v19870_v20  ;;  %v13146_v13 = vcombine.low %v19876_v29, %v19848_v45  ;;  %v15390_v45 = vld [vmem:[%s21073_s3 + $0x130] sm:$0xff]   ;;  %v15393_v29 = vld [vmem:[%s21073_s3 + $0x138] sm:$0xff]  }
 0x690   :  { %v8493_v5 = vshll.u32 %v13138_v41, 16  ;;  %v8491_v30 = vshrl.u32 %v13138_v41, 16  ;;  %v8596_v41 = vrot.slane %v8594_v15, 1 }
 0x691   :  { %v8610_v47 = vshrl.u32 %v13154_v1, 16  ;;  %v8613_v34 = vshll.u32 %v13154_v1, 16  ;;  %v8528_v36 = vrot.slane %v13146_v13, 1  ;;  %v15409_v13 = vld [vmem:[%s21073_s3 + $0x170] sm:$0xff]  }
 0x692   :  { %v8495_v40 = vrot.slane %v8493_v5, 1  ;;  %v13141_v5 = vcombine.low %v19857_v58, %v15653_v31  ;;  %v8592_v58 = vor.u32 %v8591_v62, %v8588_v35  ;;  %v8397_v31 = vld [vmem:[#allocation2 + $0x120] sm:$0xc]  ;;  %v8400_v62 = vld [vmem:[#allocation2 + $0x1f8] sm:$0xc] }
 0x693   :  { %v8612_v48 = vrot.slane %v8610_v47, 1  ;;  %v8615_v59 = vrot.slane %v8613_v34, 2  ;;  %v13181_v50 = vcombine.low %v8527_v11, %v8528_v36 }
 0x694   :  { %v8496_v19 = vor.u32 %v8495_v40, %v8491_v30  ;;  %v15376_v30 = vld [vmem:[%s21073_s3 + $0x110] sm:$0xff]   ;;  %v8600_v40 = vor.u32 %v8599_v38, %v8596_v41  ;;  %v13160_v38 = vcombine.low %v8398_v32, %v19861_v12 }
 0x695   :  { %v8616_v0 = vor.u32 %v8615_v59, %v8612_v48  ;;  %v15400_v48 = vld [vmem:[%s21073_s3 + $0x190] sm:$0xff]  }
 0x696   :  { %v13180_v27 = vcombine.low %v8489_v56, %v8496_v19  ;;  %v8523_v56 = vrot.slane %v13141_v5, 1  ;;  %v8602_v19 = vshrl.u32 %v13153_v10, 16  ;;  %v13177_v42 = vcombine.low %v8592_v58, %v8600_v40  ;;  %v8399_v40 = vld [vmem:[#allocation2 + $0x1b0] sm:$0xc] }
 0x697   :  { %v13159_v5 = vcombine.low %v8397_v31, %v19865_v7  ;;  %v8646_v18 = vrot.slane %v13160_v38, 2  ;;  %v15401_v59 = vld [vmem:[%s21073_s3 + $0x150] sm:$0xff]  }
 0x698   :  { %9101 = vmatprep.mubr.bf16.mxu0 %v13180_v27  ;;  %v15381_v27 = vld [vmem:[%s21073_s3 + $0x118] sm:$0xff]   ;;  %v8604_v52 = vrot.slane %v8602_v19, 1 }
 0x699   :  { %9102 = vmatmul.mubr.bf16.gmra.mrb[12].mxu0 %v13179_v43  ;;  %v13143_v43 = vcombine.low %v8381_v2, %v19751_v51  ;;  %v8645_v10 = vrot.slane %v13159_v5, 2 }
 0x69a   :  { %9142 = vmatprep.mubr.bf16.mxu0 %v13167_v57  ;;  %v8526_v57 = vrot.slane %v13144_v54, 1  ;;  %v8608_v63 = vor.u32 %v8607_v4, %v8604_v52  ;;  %v15403_v52 = vld [vmem:[%s21073_s3 + $0x158] sm:$0xff]   ;;  %v15404_v4 = vld [vmem:[%s21073_s3 + $0x1a0] sm:$0xff]  }
 0x69b   :  { %v8525_v53 = vrot.slane %v13143_v43, 1  ;;  %v13178_v12 = vcombine.low %v8645_v10, %v8646_v18  ;;  %v15402_v43 = vld [vmem:[%s21073_s3 + $0x198] sm:$0xff]  }
 0x69c   :  { %v13182_v15 = vcombine.low %v8608_v63, %v8616_v0 }
 0x69d   :  { %v13176_v2 = vcombine.low %v8525_v53, %v8526_v57  ;;  %v15405_v57 = vld [vmem:[%s21073_s3 + $0x160] sm:$0xff]  }
 0x6a1   :  { %9143 = vmatmul.mubr.bf16.vlgmr.msra.gmra.mrb[16].mxu0 %v13166_v60  ;;  %v8642_v60 = vrot.slane %v13156_v6, 2 }
 0x6a2   :  { %14430 = vmatpush3.bf16.msra.mxu0 %v19710_v21  ;;  %9150 = vmatprep.mubr.bf16.mxu0 %v13172_v9  ;;  %v13171_v21 = vcombine.low %v8523_v56, %v8524_v17  ;;  %v8395_v9 = vld [vmem:[#allocation2 + $0x90] sm:$0xc] }
 0x6a3   :  { %14431 = vmatprep.subr.bf16.mxu0 %v15375_v61  ;;  %v13157_v1 = vcombine.low %v8395_v9, %v19853_v8  ;;  %v13161_v8 = vcombine.low %v8399_v40, %v19878_v37  ;;  %v15397_v37 = vld [vmem:[%s21073_s3 + $0x140] sm:$0xff]  }
 0x6a5   :  { %v8643_v35 = vrot.slane %v13157_v1, 2  ;;  %v8647_v34 = vrot.slane %v13161_v8, 2 }
 0x6a6   :  { %14432 = vmatpush3.bf16.msra.mxu0 %v15375_v61  ;;  %v8641_v61 = vrot.slane %v13155_v26, 2 }
 0x6a7   :  { %14433 = vmatprep.subr.bf16.mxu0 %v15376_v30  ;;  %v13173_v17 = vcombine.low %v8643_v35, %v8644_v39 }
 0x6a8   :  { %v13168_v41 = vcombine.low %v8641_v61, %v8642_v60  ;;  %v13163_v60 = vld [vmem:[%s21075_s5 + $0x3] ss:$0 sm:$0xff] }
 0x6a9   :  { %9151 = vmatmul.mubr.bf16.gmra.mrb[20].mxu0 %v13171_v21 }
 0x6aa   :  { %14434 = vmatpush3.bf16.msra.mxu0 %v15376_v30  ;;  %9158 = vmatprep.mubr.bf16.mxu0 %v13177_v42  ;;  %v13162_v30 = vcombine.low %v8400_v62, %v19870_v20  ;;  %v15396_v20 = vld [vmem:[%s21073_s3 + $0x180] sm:$0xff]   ;;  %v15399_v42 = vld [vmem:[%s21073_s3 + $0x148] sm:$0xff]  }
 0x6ab   :  { %14435 = vmatprep.subr.bf16.mxu0 %v15381_v27 }
 0x6ac   :  { %v13937_v14 = vpop.f32.mrb[0].mxu0  ;;  %v8648_v47 = vrot.slane %v13162_v30, 2 }
 0x6ad   :  { %v13938_v16 = vpop.f32.mrb[1].mxu0 }
 0x6ae   :  { %v19897_v22 = vadd.f32 %v13938_v16, %v13937_v14  ;;  %14436 = vmatpush3.bf16.msra.mxu0 %v15381_v27  ;;  %v13940_v44 = vpop.f32.mrb[2].mxu0  ;;  %v13183_v56 = vcombine.low %v8647_v34, %v8648_v47  ;;  %v15398_v27 = vld [vmem:[%s21073_s3 + $0x188] sm:$0xff]  }
 0x6af   :  { %v13941_v51 = vpop.f32.mrb[3].mxu0  ;;  %14437 = vmatprep.subr.bf16.mxu0 %v15382_v24 }
 0x6b0   :  { %v19904_v33 = vadd.f32 %v13941_v51, %v13940_v44  ;;  %v15407_v44 = vld [vmem:[%s21073_s3 + $0x168] sm:$0xff]   ;;  %v15408_v51 = vld [vmem:[%s21073_s3 + $0x1b0] sm:$0xff]   ;;  %v9080_v61 = vadd.f32 %v19897_v22, %v13163_v60 }
 0x6b1   :  { %9159 = vmatmul.mubr.bf16.gmra.mrb[24].mxu0 %v13176_v2 }
 0x6b2   :  { %14438 = vmatpush3.bf16.msra.mxu0 %v15382_v24  ;;  %9166 = vmatprep.mubr.bf16.mxu0 %v13182_v15  ;;  %v15406_v24 = vld [vmem:[%s21073_s3 + $0x1a8] sm:$0xff]   ;;  %v15415_v15 = vld [vmem:[%s21073_s3 + $0x200] sm:$0xff]   ;;  %v9083_v32 = vadd.f32 %v19904_v33, %v13163_v60 }
 0x6b3   :  { %14439 = vmatprep.subr.bf16.mxu0 %v15389_v28 }
 0x6b6   :  { %14440 = vmatpush3.bf16.msra.mxu0 %v15389_v28  ;;  %v15410_v28 = vld [vmem:[%s21073_s3 + $0x1b8] sm:$0xff]  }
 0x6b7   :  { %14441 = vmatprep.subr.bf16.mxu0 %v15390_v45 }
 0x6b9   :  { %9167 = vmatmul.mubr.bf16.gmra.mrb[28].mxu0 %v13181_v50 }
 0x6ba   :  { %14442 = vmatpush3.bf16.msra.mxu0 %v15390_v45  ;;  %14445 = vmatprep.mubr.bf16.mxu0 %v13168_v41 }
 0x6bb   :  { %14443 = vmatprep.subr.bf16.mxu0 %v15393_v29 }
 0x6be   :  { %14444 = vmatpush3.bf16.msra.mxu0 %v15393_v29 }
 0x6bf   :  { %14013 = vmatprep.subr.bf16.mxu0 %v15396_v20 }
 0x6c1   :  { %14446 = vmatmul.mubr.bf16.vlgmr.msra.gmra.mrb[32].mxu0 %v13173_v17 }
 0x6c2   :  { %14449 = vmatprep.mubr.bf16.mxu0 %v13178_v12  ;;  %14014 = vmatpush3.bf16.msra.mxu0 %v15397_v37 }
 0x6c3   :  { %14015 = vmatprep.subr.bf16.mxu0 %v15398_v27 }
 0x6c6   :  { %14016 = vmatpush3.bf16.msra.mxu0 %v15399_v42 }
 0x6c7   :  { %14017 = vmatprep.subr.bf16.mxu0 %v15400_v48 }
 0x6c9   :  { %14450 = vmatmul.mubr.bf16.gmra.mrb[36].mxu0 %v13183_v56 }
 0x6ca   :  { %14018 = vmatpush3.bf16.msra.mxu0 %v15401_v59 }
 0x6cb   :  { %14019 = vmatprep.subr.bf16.mxu0 %v15402_v43 }
 0x6ce   :  { %14020 = vmatpush3.bf16.msra.mxu0 %v15403_v52 }
 0x6cf   :  { %14021 = vmatprep.subr.bf16.mxu0 %v15404_v4 }
 0x6d2   :  { %14022 = vmatpush3.bf16.msra.mxu0 %v15405_v57 }
 0x6d3   :  { %14023 = vmatprep.subr.bf16.mxu0 %v15406_v24 }
 0x6d6   :  { %14024 = vmatpush3.bf16.msra.mxu0 %v15407_v44 }
 0x6d7   :  { %14025 = vmatprep.subr.bf16.mxu0 %v15408_v51 }
 0x6da   :  { %14026 = vmatpush3.bf16.msra.mxu0 %v15409_v13 }
 0x6db   :  { %14027 = vmatprep.subr.bf16.mxu0 %v15410_v28 }
 0x6de   :  { %14028 = vmatpush3.bf16.msra.mxu0 %v15411_v46 }
 0x6df   :  { %14053 = vmatprep.subr.bf16.mxu0 %v15415_v15 }
 0x6f0   :  { %v13943_v7 = vpop.f32.mrb[4].mxu0 }
 0x6f1   :  { %v13944_v58 = vpop.f32.mrb[5].mxu0 }
 0x6f2   :  { %v19921_v19 = vadd.f32 %v13944_v58, %v13943_v7  ;;  %v13946_v3 = vpop.f32.mrb[6].mxu0 }
 0x6f3   :  { %v13947_v21 = vpop.f32.mrb[7].mxu0 }
 0x6f4   :  { %v19923_v54 = vadd.f32 %v13947_v21, %v13946_v3  ;;  %v9088_v5 = vadd.f32 %v19921_v19, %v13163_v60 }
 0x6f6   :  { %v9091_v62 = vadd.f32 %v19923_v54, %v13163_v60 }
 0x730   :  { %v13949_v14 = vpop.f32.mrb[8].mxu0 }
 0x731   :  { %v13950_v0 = vpop.f32.mrb[9].mxu0 }
 0x732   :  { %v13951_v53 = vadd.f32 %v13950_v0, %v13949_v14  ;;  %v13952_v16 = vpop.f32.mrb[10].mxu0 }
 0x733   :  { %v13953_v63 = vpop.f32.mrb[11].mxu0 }
 0x734   :  { %v13954_v2 = vadd.f32 %v13953_v63, %v13952_v16  ;;  %v9096_v12 = vadd.f32 %v13951_v53, %v13163_v60 }
 0x736   :  { %v9099_v34 = vadd.f32 %v13954_v2, %v13163_v60 }
 0x76c   :  { %v13955_v6 = vpop.f32.mrb[12].mxu0 }
 0x76d   :  { %v13956_v25 = vpop.f32.mrb[13].mxu0 }
 0x76e   :  { %v13957_v55 = vadd.f32 %v13956_v25, %v13955_v6  ;;  %v13958_v26 = vpop.f32.mrb[14].mxu0 }
 0x76f   :  { %v13959_v36 = vpop.f32.mrb[15].mxu0 }
 0x770   :  { %v13960_v45 = vadd.f32 %v13959_v36, %v13958_v26  ;;  %v9104_v21 = vadd.f32 %v13957_v55, %v13163_v60 }
 0x772   :  { %v9107_v54 = vadd.f32 %v13960_v45, %v13163_v60 }
 0x774   :  { %v13977_v11 = vpop.f32.mrb[16].mxu0 }
 0x775   :  { %v13978_v23 = vpop.f32.mrb[17].mxu0 }
 0x776   :  { %v13979_v49 = vadd.f32 %v13978_v23, %v13977_v11  ;;  %v13980_v50 = vpop.f32.mrb[18].mxu0 }
 0x777   :  { %v13981_v29 = vpop.f32.mrb[19].mxu0 }
 0x778   :  { %v13982_v9 = vadd.f32 %v13981_v29, %v13980_v50  ;;  %v9145_v41 = vadd.f32 %v13979_v49, %v9080_v61 }
 0x77a   :  { %v9148_v38 = vadd.f32 %v13982_v9, %v9083_v32 }
 0x77c   :  { %v13983_v1 = vpop.f32.mrb[20].mxu0 }
 0x77d   :  { %v13984_v31 = vpop.f32.mrb[21].mxu0 }
 0x77e   :  { %v13985_v39 = vadd.f32 %v13984_v31, %v13983_v1  ;;  %v13986_v18 = vpop.f32.mrb[22].mxu0 }
 0x77f   :  { %v13987_v35 = vpop.f32.mrb[23].mxu0 }
 0x780   :  { %v13988_v10 = vadd.f32 %v13987_v35, %v13986_v18  ;;  %v9153_v17 = vadd.f32 %v13985_v39, %v9088_v5 }
 0x782   :  { %v9156_v22 = vadd.f32 %v13988_v10, %v9091_v62 }
 0x784   :  { %v13989_v30 = vpop.f32.mrb[24].mxu0 }
 0x785   :  { %v13990_v40 = vpop.f32.mrb[25].mxu0 }
 0x786   :  { %v13991_v8 = vadd.f32 %v13990_v40, %v13989_v30  ;;  %v13992_v33 = vpop.f32.mrb[26].mxu0 }
 0x787   :  { %v13993_v47 = vpop.f32.mrb[27].mxu0 }
 0x788   :  { %v13994_v56 = vadd.f32 %v13993_v47, %v13992_v33  ;;  %v9161_v7 = vadd.f32 %v13991_v8, %v9096_v12 }
 0x78a   :  { %v9164_v58 = vadd.f32 %v13994_v56, %v9099_v34 }
 0x78c   :  { %v13995_v3 = vpop.f32.mrb[28].mxu0 }
 0x78d   :  { %v13996_v19 = vpop.f32.mrb[29].mxu0 }
 0x78e   :  { %v13997_v20 = vadd.f32 %v13996_v19, %v13995_v3  ;;  %v13998_v37 = vpop.f32.mrb[30].mxu0 }
 0x78f   :  { %v13999_v27 = vpop.f32.mrb[31].mxu0 }
 0x790   :  { %v14000_v42 = vadd.f32 %v13999_v27, %v13998_v37  ;;  %v9169_v48 = vadd.f32 %v13997_v20, %v9104_v21 }
 0x792   :  { %v9172_v59 = vadd.f32 %v14000_v42, %v9107_v54 }
 0x794   :  { %v14447_v43 = vpop.f32.mrb[32].mxu0 }
 0x795   :  { %v9218_v52 = vadd.f32 %v14447_v43, %v9153_v17  ;;  %v9209_v4 = vpop.f32.mrb[33].mxu0 }
 0x796   :  { %v9210_v57 = vadd.f32 %v9209_v4, %v9145_v41  ;;  %v14448_v24 = vpop.f32.mrb[34].mxu0 }
 0x797   :  { %v9242_v14 = vmax.f32 %v9218_v52, 0.0  ;;  %v9221_v0 = vadd.f32 %v14448_v24, %v9156_v22  ;;  %v9212_v53 = vpop.f32.mrb[35].mxu0 }
 0x798   :  { %v9240_v16 = vmax.f32 %v9210_v57, 0.0  ;;  %v9213_v44 = vadd.f32 %v9212_v53, %v9148_v38 }
 0x799   :  { %v13899_v63 = vpack.c.bf16 %v9242_v14, %v9242_v14  ;;  %v9243_v51 = vmax.f32 %v9221_v0, 0.0 }
 0x79a   :  { %v13897_v2 = vpack.c.bf16 %v9240_v16, %v9240_v16  ;;  %v9241_v13 = vmax.f32 %v9213_v44, 0.0 }
 0x79b   :  { %v9284_v28 = vrot.slane %v13899_v63, 7  ;;  %v13900_v46 = vpack.c.bf16 %v9243_v51, %v9243_v51 }
 0x79c   :  { %v9280_v15 = vrot.slane %v13897_v2, 7  ;;  %v13898_v6 = vpack.c.bf16 %v9241_v13, %v9241_v13  ;;  %v14451_v25 = vpop.f32.mrb[36].mxu0 }
 0x79d   :  { %v9285_v55 = vrot.slane %v9284_v28, 4  ;;  %9316 = vst [vmem:[#allocation2 + $0x90] sm:$0xe] %v9284_v28  ;;  %v9286_v26 = vrot.slane %v13900_v46, 7  ;;  %v9234_v36 = vadd.f32 %v14451_v25, %v9169_v48  ;;  %v9225_v45 = vpop.f32.mrb[37].mxu0  ;;  %v15416_v25 = vld [vmem:[%s21073_s3 + $0x1c0] sm:$0xff]  }
 0x79e   :  { %v9281_v60 = vrot.slane %v9280_v15, 4  ;;  %9312 = vst [vmem:[#allocation2] sm:$0xe] %v9280_v15  ;;  %v9282_v11 = vrot.slane %v13898_v6, 7  ;;  %v9226_v23 = vadd.f32 %v9225_v45, %v9161_v7  ;;  %v14452_v61 = vpop.f32.mrb[38].mxu0 }
 0x79f   :  { %9317 = vst [vmem:[#allocation2 + $0x98] sm:$0x1] %v9285_v55  ;;  %v9287_v49 = vrot.slane %v9286_v26, 4  ;;  %9318 = vst [vmem:[#allocation2 + $0xd8] sm:$0xe] %v9286_v26  ;;  %v9246_v50 = vmax.f32 %v9234_v36, 0.0  ;;  %v9237_v29 = vadd.f32 %v14452_v61, %v9172_v59 }
 0x7a0   :  { %v9228_v32 = vpop.f32.mrb[39].mxu0  ;;  %9313 = vst [vmem:[#allocation2 + $0x8] sm:$0x1] %v9281_v60  ;;  %v9283_v9 = vrot.slane %v9282_v11, 4  ;;  %9314 = vst [vmem:[#allocation2 + $0x48] sm:$0xe] %v9282_v11 }
 0x7a1   :  { %v9244_v41 = vmax.f32 %v9226_v23, 0.0  ;;  %v9229_v38 = vadd.f32 %v9228_v32, %v9164_v58  ;;  %9319 = vst [vmem:[#allocation2 + $0xe0] sm:$0x1] %v9287_v49  ;;  %v13903_v1 = vpack.c.bf16 %v9246_v50, %v9246_v50  ;;  %v9247_v31 = vmax.f32 %v9237_v29, 0.0  ;;  %v15420_v60 = vld [vmem:[%s21073_s3 + $0x208] sm:$0xff]  }
 0x7a2   :  { %9315 = vst [vmem:[#allocation2 + $0x50] sm:$0x1] %v9283_v9  ;;  %v15421_v32 = vld [vmem:[%s21073_s3 + $0x1c8] sm:$0xff]  }
 0x7a3   :  { %v13901_v5 = vpack.c.bf16 %v9244_v41, %v9244_v41  ;;  %v9245_v39 = vmax.f32 %v9229_v38, 0.0  ;;  %v9292_v18 = vrot.slane %v13903_v1, 7  ;;  %v13904_v35 = vpack.c.bf16 %v9247_v31, %v9247_v31  ;;  %v15422_v31 = vld [vmem:[%s21073_s3 + $0x210] sm:$0xff]  }
 0x7a4   :  { %v19983_v12 = vld [vmem:[#allocation2 + $0x90] sm:$0xf] }
 0x7a5   :  { %v9288_v62 = vrot.slane %v13901_v5, 7  ;;  %v13902_v10 = vpack.c.bf16 %v9245_v39, %v9245_v39  ;;  %v9293_v17 = vrot.slane %v9292_v18, 4  ;;  %9324 = vst [vmem:[#allocation2 + $0x1b0] sm:$0xe] %v9292_v18  ;;  %v9294_v22 = vrot.slane %v13904_v35, 7 }
 0x7a6   :  { %v19985_v8 = vld [vmem:[#allocation2 + $0x98] sm:$0x1]  ;;  %v9328_v47 = vld [vmem:[#allocation2] sm:$0xf] }
 0x7a7   :  { %v9289_v30 = vrot.slane %v9288_v62, 4  ;;  %9320 = vst [vmem:[#allocation2 + $0x120] sm:$0xe] %v9288_v62  ;;  %v9290_v40 = vrot.slane %v13902_v10, 7  ;;  %9325 = vst [vmem:[#allocation2 + $0x1b8] sm:$0x1] %v9293_v17  ;;  %v13234_v56 = vcombine.low %v19983_v12, %v19985_v8 }
 0x7a8   :  { %v9295_v33 = vrot.slane %v9294_v22, 4  ;;  %9326 = vst [vmem:[#allocation2 + $0x1f8] sm:$0xe] %v9294_v22  ;;  %v19987_v34 = vld [vmem:[#allocation2 + $0x8] sm:$0x1]  ;;  %v15423_v62 = vld [vmem:[%s21073_s3 + $0x1d0] sm:$0xff]  }
 0x7a9   :  { %9321 = vst [vmem:[#allocation2 + $0x128] sm:$0x1] %v9289_v30  ;;  %v9291_v7 = vrot.slane %v9290_v40, 4  ;;  %9322 = vst [vmem:[#allocation2 + $0x168] sm:$0xe] %v9290_v40  ;;  %v13232_v58 = vcombine.low %v9328_v47, %v19987_v34  ;;  %v9425_v42 = vshll.u32 %v13234_v56, 16 }
 0x7aa   :  { %v19992_v3 = vld [vmem:[#allocation2 + $0xd8] sm:$0xf]  ;;  %v19994_v19 = vld [vmem:[#allocation2 + $0xe0] sm:$0x1]  ;;  %9327 = vst [vmem:[#allocation2 + $0x200] sm:$0x1] %v9295_v33 }
 0x7ab   :  { %v9329_v21 = vld [vmem:[#allocation2 + $0x48] sm:$0xf]  ;;  %v19996_v20 = vld [vmem:[#allocation2 + $0x50] sm:$0x1]  ;;  %v13235_v37 = vcombine.low %v19992_v3, %v19994_v19  ;;  %9323 = vst [vmem:[#allocation2 + $0x170] sm:$0x1] %v9291_v7  ;;  %v13350_v22 = vcombine.low %v19983_v12, %v19992_v3 }
 0x7ac   :  { %v13233_v27 = vcombine.low %v9329_v21, %v19996_v20  ;;  %v9411_v54 = vshll.u32 %v13232_v58, 16  ;;  %v9409_v52 = vshrl.u32 %v13232_v58, 16  ;;  %v9427_v14 = vrot.slane %v9425_v42, 1  ;;  %v20027_v29 = vld [vmem:[#allocation2 + $0x1b0] sm:$0xf]  ;;  %v15427_v30 = vld [vmem:[%s21073_s3 + $0x218] sm:$0xff]  }
 0x7ad   :  { %v9432_v48 = vshll.u32 %v13235_v37, 16  ;;  %v9430_v0 = vshrl.u32 %v13235_v37, 16  ;;  %v9423_v53 = vshrl.u32 %v13234_v56, 16  ;;  %v13345_v45 = vcombine.low %v9328_v47, %v9329_v21  ;;  %v20037_v35 = vld [vmem:[#allocation2 + $0x50] sm:$0x3]  ;;  %v15428_v12 = vld [vmem:[%s21073_s3 + $0x1d8] sm:$0xff]  }
 0x7ae   :  { %v9413_v59 = vrot.slane %v9411_v54, 1  ;;  %v9418_v43 = vshll.u32 %v13233_v27, 16  ;;  %v9416_v57 = vshrl.u32 %v13233_v27, 16  ;;  %v20001_v16 = vld [vmem:[#allocation2 + $0x120] sm:$0xf] }
 0x7af   :  { %v9434_v4 = vrot.slane %v9432_v48, 1  ;;  %v9428_v55 = vor.u32 %v9427_v14, %v9423_v53  ;;  %v20021_v11 = vld [vmem:[#allocation2 + $0x1f8] sm:$0xf]  ;;  %v20047_v40 = vld [vmem:[#allocation2 + $0x48] sm:$0xe]  ;;  %v15429_v27 = vld [vmem:[%s21073_s3 + $0x220] sm:$0xff]  }
 0x7b0   :  { %v9420_v24 = vrot.slane %v9418_v43, 1  ;;  %v20003_v44 = vld [vmem:[#allocation2 + $0x128] sm:$0x1]  ;;  %v9414_v63 = vor.u32 %v9413_v59, %v9409_v52  ;;  %v20023_v23 = vld [vmem:[#allocation2 + $0x1b8] sm:$0x1]  ;;  %v13249_v7 = vcombine.low %v20047_v40, %v20037_v35  ;;  %v15430_v52 = vld [vmem:[%s21073_s3 + $0x1e0] sm:$0xff]  }
 0x7b1   :  { %v9435_v2 = vor.u32 %v9434_v4, %v9430_v0  ;;  %v13236_v13 = vcombine.low %v20001_v16, %v20003_v44  ;;  %v20007_v28 = vld [vmem:[#allocation2 + $0x168] sm:$0xf]  ;;  %v20011_v15 = vld [vmem:[#allocation2 + $0x200] sm:$0x1]  ;;  %v13238_v1 = vcombine.low %v20027_v29, %v20023_v23  ;;  %v20053_v58 = vld [vmem:[#allocation2] sm:$0xe] }
 0x7b2   :  { %v9421_v51 = vor.u32 %v9420_v24, %v9416_v57  ;;  %v20009_v46 = vld [vmem:[#allocation2 + $0x170] sm:$0x1]  ;;  %v13239_v50 = vcombine.low %v20021_v11, %v20011_v15  ;;  %v20049_v33 = vld [vmem:[#allocation2 + $0x8] sm:$0x3]  ;;  %v9529_v48 = vshrl.u32 %v13249_v7, 16  ;;  %v9532_v59 = vshll.u32 %v13249_v7, 16 }
 0x7b3   :  { %v13237_v26 = vcombine.low %v20007_v28, %v20009_v46  ;;  %v9439_v36 = vshll.u32 %v13236_v13, 16  ;;  %v13351_v61 = vcombine.low %v9428_v55, %v9435_v2  ;;  %v9437_v5 = vshrl.u32 %v13236_v13, 16  ;;  %v20063_v43 = vld [vmem:[#allocation2 + $0xe0] sm:$0x3]  ;;  %v15434_v0 = vld [vmem:[%s21073_s3 + $0x228] sm:$0xff]  }
 0x7b4   :  { %v13346_v6 = vcombine.low %v9414_v63, %v9421_v51  ;;  %v9460_v18 = vshll.u32 %v13239_v50, 16  ;;  %v9453_v17 = vshll.u32 %v13238_v1, 16  ;;  %v9458_v21 = vshrl.u32 %v13239_v50, 16  ;;  %v20073_v53 = vld [vmem:[#allocation2 + $0xd8] sm:$0xe]  ;;  %v15437_v50 = vld [vmem:[%s21073_s3 + $0x1f0] sm:$0xff]  }
 0x7b5   :  { %v9446_v49 = vshll.u32 %v13237_v26, 16  ;;  %v9441_v9 = vrot.slane %v9439_v36, 1  ;;  %v9444_v41 = vshrl.u32 %v13237_v26, 16  ;;  %v13248_v37 = vcombine.low %v20053_v58, %v20049_v33  ;;  %v20075_v63 = vld [vmem:[#allocation2 + $0x98] sm:$0x3]  ;;  %v15436_v36 = vld [vmem:[%s21073_s3 + $0x230] sm:$0xff]  }
 0x7b6   :  { %10045 = vmatprep.mubr.bf16.mxu0 %v13346_v6  ;;  %v9462_v56 = vrot.slane %v9460_v18, 1  ;;  %v9455_v3 = vrot.slane %v9453_v17, 1  ;;  %v9451_v54 = vshrl.u32 %v13238_v1, 16  ;;  %v13355_v14 = vcombine.low %v20001_v16, %v20007_v28  ;;  %v15435_v16 = vld [vmem:[%s21073_s3 + $0x1e8] sm:$0xff]  }
 0x7b7   :  { %10046 = vmatmul.mubr.bf16.vlgmr.msra.gmra.mrb[40].mxu0 %v13345_v45  ;;  %v9448_v38 = vrot.slane %v9446_v49, 1  ;;  %v9442_v10 = vor.u32 %v9441_v9, %v9437_v5  ;;  %v9521_v57 = vshrl.u32 %v13248_v37, 16  ;;  %v9524_v24 = vshll.u32 %v13248_v37, 16  ;;  %v20089_v49 = vld [vmem:[#allocation2 + $0x170] sm:$0x3] }
 0x7b8   :  { %14054 = vmatpush3.bf16.msra.mxu0 %v15416_v25  ;;  %10053 = vmatprep.mubr.bf16.mxu0 %v13351_v61  ;;  %v9463_v42 = vor.u32 %v9462_v56, %v9458_v21  ;;  %v9456_v4 = vor.u32 %v9455_v3, %v9451_v54  ;;  %v9531_v2 = vrot.slane %v9529_v48, 1  ;;  %v9534_v13 = vrot.slane %v9532_v59, 2  ;;  %v20079_v25 = vld [vmem:[#allocation2 + $0x90] sm:$0xe]  ;;  %v20101_v5 = vld [vmem:[#allocation2 + $0x168] sm:$0xe] }
 0x7b9   :  { %14055 = vmatprep.subr.bf16.mxu0 %v15420_v60  ;;  %v9449_v39 = vor.u32 %v9448_v38, %v9444_v41  ;;  %v13251_v6 = vcombine.low %v20073_v53, %v20063_v43  ;;  %v9523_v28 = vrot.slane %v9521_v57, 1  ;;  %v9526_v55 = vrot.slane %v9524_v24, 2  ;;  %v15444_v56 = vld [vmem:[%s21073_s3 + $0x240] sm:$0xff]   ;;  %v15451_v48 = vld [vmem:[%s21073_s3 + $0x248] sm:$0xff]   ;;  %v9351_v59 = vld [vmem:[#allocation2 + $0x1f8] sm:$0xe] }
 0x7ba   :  { %v13361_v51 = vcombine.low %v9456_v4, %v9463_v42  ;;  %v13250_v26 = vcombine.low %v20079_v25, %v20075_v63  ;;  %v9535_v45 = vor.u32 %v9534_v13, %v9531_v2  ;;  %v13360_v38 = vcombine.low %v20027_v29, %v20021_v11  ;;  %v20109_v29 = vld [vmem:[#allocation2 + $0x120] sm:$0xe] }
 0x7bb   :  { %v13356_v47 = vcombine.low %v9442_v10, %v9449_v39  ;;  %v9545_v60 = vshrl.u32 %v13251_v6, 16  ;;  %v9548_v61 = vshll.u32 %v13251_v6, 16  ;;  %v13241_v1 = vcombine.low %v20047_v40, %v19996_v20  ;;  %v20103_v39 = vld [vmem:[#allocation2 + $0x128] sm:$0x3]  ;;  %v15443_v20 = vld [vmem:[%s21073_s3 + $0x1f8] sm:$0xff]   ;;  %v15452_v6 = vld [vmem:[%s21073_s3 + $0x250] sm:$0xff]  }
 0x7bc   :  { %14056 = vmatpush3.bf16.msra.mxu0 %v15421_v32  ;;  %v9527_v32 = vor.u32 %v9526_v55, %v9523_v28  ;;  %v9537_v9 = vshrl.u32 %v13250_v26, 16  ;;  %v9540_v41 = vshll.u32 %v13250_v26, 16  ;;  %v13253_v17 = vcombine.low %v20101_v5, %v20089_v49  ;;  %v20119_v3 = vld [vmem:[#allocation2 + $0x200] sm:$0x3] }
 0x7bd   :  { %14057 = vmatprep.subr.bf16.mxu0 %v15422_v31  ;;  %v15442_v31 = vld [vmem:[%s21073_s3 + $0x238] sm:$0xff]   ;;  %v9550_v10 = vrot.slane %v9548_v61, 2  ;;  %v13240_v11 = vcombine.low %v20053_v58, %v19987_v34  ;;  %v13252_v40 = vcombine.low %v20109_v29, %v20103_v39  ;;  %v13243_v42 = vcombine.low %v20073_v53, %v19994_v19 }
 0x7be   :  { %v13348_v18 = vcombine.low %v9527_v32, %v9535_v45  ;;  %v9561_v7 = vshrl.u32 %v13253_v17, 16  ;;  %v9564_v58 = vshll.u32 %v13253_v17, 16  ;;  %v15457_v61 = vld [vmem:[%s21073_s3 + $0x258] sm:$0xff]   ;;  %v13247_v17 = vcombine.low %v9351_v59, %v20011_v15  ;;  %v15466_v15 = vld [vmem:[%s21073_s3 + $0x270] sm:$0xff]  }
 0x7bf   :  { %10054 = vmatmul.mubr.bf16.gmra.mrb[44].mxu0 %v13350_v22  ;;  %v9539_v22 = vrot.slane %v9537_v9, 1  ;;  %v9553_v37 = vshrl.u32 %v13252_v40, 16  ;;  %v9491_v13 = vrot.slane %v13243_v42, 1  ;;  %v9364_v42 = vld [vmem:[#allocation2 + $0x120] sm:$0xc] }
 0x7c0   :  { %14058 = vmatpush3.bf16.msra.mxu0 %v15423_v62  ;;  %10061 = vmatprep.mubr.bf16.mxu0 %v13356_v47  ;;  %v9547_v62 = vrot.slane %v9545_v60, 1  ;;  %v9489_v47 = vrot.slane %v13241_v1, 1  ;;  %v9563_v57 = vrot.slane %v9561_v7, 1  ;;  %v9566_v24 = vrot.slane %v9564_v58, 2  ;;  %v9363_v7 = vld [vmem:[#allocation2 + $0xd8] sm:$0xc] }
 0x7c1   :  { %14059 = vmatprep.subr.bf16.mxu0 %v15427_v30  ;;  %v9542_v30 = vrot.slane %v9540_v41, 2  ;;  %v9555_v19 = vrot.slane %v9553_v37, 1  ;;  %v13245_v60 = vcombine.low %v20101_v5, %v20009_v46  ;;  %v13244_v41 = vcombine.low %v20109_v29, %v20003_v44  ;;  %v15458_v46 = vld [vmem:[%s21073_s3 + $0x260] sm:$0xff]   ;;  %v15465_v44 = vld [vmem:[%s21073_s3 + $0x268] sm:$0xff]  }
 0x7c2   :  { %v9551_v34 = vor.u32 %v9550_v10, %v9547_v62 }
 0x7c3   :  { %v9543_v21 = vor.u32 %v9542_v30, %v9539_v22  ;;  %v9360_v30 = vld [vmem:[#allocation2] sm:$0xc] }
 0x7c4   :  { %14060 = vmatpush3.bf16.msra.mxu0 %v15428_v12  ;;  %v9488_v12 = vrot.slane %v13240_v11, 1  ;;  %v9361_v11 = vld [vmem:[#allocation2 + $0x48] sm:$0xc] }
 0x7c5   :  { %14061 = vmatprep.subr.bf16.mxu0 %v15429_v27  ;;  %v9556_v27 = vshll.u32 %v13252_v40, 16  ;;  %v13353_v4 = vcombine.low %v9543_v21, %v9551_v34  ;;  %v13256_v40 = vcombine.low %v9360_v30, %v20049_v33  ;;  %v9365_v33 = vld [vmem:[#allocation2 + $0x168] sm:$0xc]  ;;  %v9362_v21 = vld [vmem:[#allocation2 + $0x90] sm:$0xc] }
 0x7c6   :  { %v13347_v54 = vcombine.low %v9488_v12, %v9489_v47  ;;  %v9495_v47 = vrot.slane %v13247_v17, 1 }
 0x7c7   :  { %10062 = vmatmul.mubr.bf16.gmra.mrb[48].mxu0 %v13355_v14  ;;  %v13255_v14 = vcombine.low %v9351_v59, %v20119_v3  ;;  %v9558_v53 = vrot.slane %v9556_v27, 2  ;;  %v9608_v58 = vrot.slane %v13256_v40, 2  ;;  %v13261_v27 = vcombine.low %v9365_v33, %v20089_v49 }
 0x7c8   :  { %14062 = vmatpush3.bf16.msra.mxu0 %v15430_v52  ;;  %10069 = vmatprep.mubr.bf16.mxu0 %v13361_v51  ;;  %v20126_v52 = vld [vmem:[#allocation2 + $0x1b8] sm:$0x3]  ;;  %v9350_v51 = vld [vmem:[#allocation2 + $0x1b0] sm:$0xe] }
 0x7c9   :  { %14063 = vmatprep.subr.bf16.mxu0 %v15434_v0  ;;  %v13242_v0 = vcombine.low %v20079_v25, %v19985_v8  ;;  %v13254_v2 = vcombine.low %v9350_v51, %v20126_v52  ;;  %v9577_v28 = vshrl.u32 %v13255_v14, 16  ;;  %v9580_v55 = vshll.u32 %v13255_v14, 16 }
 0x7ca   :  { %v13246_v22 = vcombine.low %v9350_v51, %v20023_v23  ;;  %v15469_v23 = vld [vmem:[%s21073_s3 + $0x278] sm:$0xff]   ;;  %v9613_v59 = vrot.slane %v13261_v27, 2  ;;  %v9366_v51 = vld [vmem:[#allocation2 + $0x1b0] sm:$0xc] }
 0x7cb   :  { %v9490_v26 = vrot.slane %v13242_v0, 1  ;;  %v9569_v8 = vshrl.u32 %v13254_v2, 16  ;;  %v9572_v25 = vshll.u32 %v13254_v2, 16  ;;  %v9579_v32 = vrot.slane %v9577_v28, 1  ;;  %v15478_v28 = vld [vmem:[%s21073_s3 + $0x2d8] sm:$0xff]  }
 0x7cc   :  { %14064 = vmatpush3.bf16.msra.mxu0 %v15435_v16  ;;  %v9567_v16 = vor.u32 %v9566_v24, %v9563_v57  ;;  %v9582_v9 = vrot.slane %v9580_v55, 2  ;;  %v9494_v34 = vrot.slane %v13246_v22, 1  ;;  %v9367_v57 = vld [vmem:[#allocation2 + $0x1f8] sm:$0xc] }
 0x7cd   :  { %14065 = vmatprep.subr.bf16.mxu0 %v15436_v36  ;;  %v9559_v36 = vor.u32 %v9558_v53, %v9555_v19  ;;  %v13352_v45 = vcombine.low %v9490_v26, %v9491_v13  ;;  %v9574_v1 = vrot.slane %v9572_v25, 2  ;;  %v13263_v0 = vcombine.low %v9367_v57, %v20119_v3  ;;  %v15473_v13 = vld [vmem:[%s21073_s3 + $0x280] sm:$0xff]   ;;  %v15474_v3 = vld [vmem:[%s21073_s3 + $0x2c8] sm:$0xff]   ;;  %v15479_v55 = vld [vmem:[%s21073_s3 + $0x298] sm:$0xff]  }
 0x7ce   :  { %v9583_v5 = vor.u32 %v9582_v9, %v9579_v32  ;;  %v13362_v12 = vcombine.low %v9494_v34, %v9495_v47  ;;  %v15480_v26 = vld [vmem:[%s21073_s3 + $0x2e0] sm:$0xff]   ;;  %v15483_v25 = vld [vmem:[%s21073_s3 + $0x2a8] sm:$0xff]  }
 0x7cf   :  { %10070 = vmatmul.mubr.bf16.gmra.mrb[52].mxu0 %v13360_v38  ;;  %v9571_v38 = vrot.slane %v9569_v8, 1  ;;  %v9615_v19 = vrot.slane %v13263_v0, 2  ;;  %v15482_v8 = vld [vmem:[%s21073_s3 + $0x2e8] sm:$0xff]   ;;  %v15491_v32 = vld [vmem:[%s21073_s3 + $0x340] sm:$0xff]  }
 0x7d0   :  { %14066 = vmatpush3.bf16.msra.mxu0 %v15437_v50  ;;  %10110 = vmatprep.mubr.bf16.mxu0 %v13348_v18  ;;  %v13358_v50 = vcombine.low %v9559_v36, %v9567_v16  ;;  %v9492_v18 = vrot.slane %v13244_v41, 1  ;;  %v15477_v16 = vld [vmem:[%s21073_s3 + $0x290] sm:$0xff]   ;;  %v15481_v36 = vld [vmem:[%s21073_s3 + $0x2a0] sm:$0xff]  }
 0x7d1   :  { %14067 = vmatprep.subr.bf16.mxu0 %v15442_v31  ;;  %v9493_v31 = vrot.slane %v13245_v60, 1  ;;  %v9575_v62 = vor.u32 %v9574_v1, %v9571_v38  ;;  %v15485_v60 = vld [vmem:[%s21073_s3 + $0x2b0] sm:$0xff]  }
 0x7d3   :  { %v13357_v10 = vcombine.low %v9492_v18, %v9493_v31  ;;  %v13363_v29 = vcombine.low %v9575_v62, %v9583_v5 }
 0x7d4   :  { %14068 = vmatpush3.bf16.msra.mxu0 %v15443_v20  ;;  %v13257_v20 = vcombine.low %v9361_v11, %v20037_v35  ;;  %v13259_v35 = vcombine.low %v9363_v7, %v20063_v43 }
 0x7d5   :  { %14453 = vmatprep.subr.bf16.mxu0 %v15444_v56 }
 0x7d6   :  { %v9611_v43 = vrot.slane %v13259_v35, 2  ;;  %v13344_v35 = vld [vmem:[%s21075_s5 + $0x4] ss:$0 sm:$0xff] }
 0x7d7   :  { %10111 = vmatmul.mubr.bf16.vlgmr.msra.gmra.mrb[56].mxu0 %v13347_v54  ;;  %v13258_v54 = vcombine.low %v9362_v21, %v20075_v63  ;;  %v13262_v63 = vcombine.low %v9366_v51, %v20126_v52  ;;  %v15475_v52 = vld [vmem:[%s21073_s3 + $0x288] sm:$0xff]  }
 0x7d8   :  { %14454 = vmatpush3.bf16.msra.mxu0 %v15444_v56  ;;  %10118 = vmatprep.mubr.bf16.mxu0 %v13353_v4  ;;  %v9609_v56 = vrot.slane %v13257_v20, 2 }
 0x7d9   :  { %14455 = vmatprep.subr.bf16.mxu0 %v15451_v48  ;;  %v9610_v4 = vrot.slane %v13258_v54, 2  ;;  %v9614_v53 = vrot.slane %v13262_v63, 2 }
 0x7da   :  { %v13349_v37 = vcombine.low %v9608_v58, %v9609_v56 }
 0x7db   :  { %v13354_v14 = vcombine.low %v9610_v4, %v9611_v43  ;;  %v13364_v2 = vcombine.low %v9614_v53, %v9615_v19 }
 0x7dc   :  { %14456 = vmatpush3.bf16.msra.mxu0 %v15451_v48  ;;  %v13260_v48 = vcombine.low %v9364_v42, %v20103_v39  ;;  %v15472_v39 = vld [vmem:[%s21073_s3 + $0x2c0] sm:$0xff]  }
 0x7dd   :  { %14457 = vmatprep.subr.bf16.mxu0 %v15452_v6 }
 0x7de   :  { %v9612_v24 = vrot.slane %v13260_v48, 2 }
 0x7df   :  { %10119 = vmatmul.mubr.bf16.gmra.mrb[60].mxu0 %v13352_v45  ;;  %v15484_v45 = vld [vmem:[%s21073_s3 + $0x2f0] sm:$0xff]  }
 0x7e0   :  { %14458 = vmatpush3.bf16.msra.mxu0 %v15452_v6  ;;  %10126 = vmatprep.mubr.bf16.mxu0 %v13358_v50  ;;  %v13359_v49 = vcombine.low %v9612_v24, %v9613_v59  ;;  %v15476_v6 = vld [vmem:[%s21073_s3 + $0x2d0] sm:$0xff]   ;;  %v15487_v50 = vld [vmem:[%s21073_s3 + $0x2b8] sm:$0xff]  }
 0x7e1   :  { %14459 = vmatprep.subr.bf16.mxu0 %v15457_v61 }
 0x7e4   :  { %14460 = vmatpush3.bf16.msra.mxu0 %v15457_v61  ;;  %v15486_v61 = vld [vmem:[%s21073_s3 + $0x2f8] sm:$0xff]  }
 0x7e5   :  { %14461 = vmatprep.subr.bf16.mxu0 %v15458_v46 }
 0x7e7   :  { %10127 = vmatmul.mubr.bf16.gmra.mrb[64].mxu0 %v13357_v10 }
 0x7e8   :  { %14462 = vmatpush3.bf16.msra.mxu0 %v15458_v46  ;;  %10134 = vmatprep.mubr.bf16.mxu0 %v13363_v29 }
 0x7e9   :  { %14463 = vmatprep.subr.bf16.mxu0 %v15465_v44 }
 0x7ec   :  { %14464 = vmatpush3.bf16.msra.mxu0 %v15465_v44 }
 0x7ed   :  { %14465 = vmatprep.subr.bf16.mxu0 %v15466_v15 }
 0x7ef   :  { %10135 = vmatmul.mubr.bf16.gmra.mrb[68].mxu0 %v13362_v12 }
 0x7f0   :  { %14466 = vmatpush3.bf16.msra.mxu0 %v15466_v15  ;;  %14469 = vmatprep.mubr.bf16.mxu0 %v13349_v37 }
 0x7f1   :  { %14467 = vmatprep.subr.bf16.mxu0 %v15469_v23 }
 0x7f4   :  { %14468 = vmatpush3.bf16.msra.mxu0 %v15469_v23 }
 0x7f5   :  { %14105 = vmatprep.subr.bf16.mxu0 %v15472_v39 }
 0x7f7   :  { %14470 = vmatmul.mubr.bf16.vlgmr.msra.gmra.mrb[72].mxu0 %v13354_v14 }
 0x7f8   :  { %14473 = vmatprep.mubr.bf16.mxu0 %v13359_v49  ;;  %14106 = vmatpush3.bf16.msra.mxu0 %v15473_v13 }
 0x7f9   :  { %14107 = vmatprep.subr.bf16.mxu0 %v15474_v3 }
 0x7fc   :  { %14108 = vmatpush3.bf16.msra.mxu0 %v15475_v52 }
 0x7fd   :  { %14109 = vmatprep.subr.bf16.mxu0 %v15476_v6 }
 0x7ff   :  { %14474 = vmatmul.mubr.bf16.gmra.mrb[76].mxu0 %v13364_v2 }
 0x800   :  { %14110 = vmatpush3.bf16.msra.mxu0 %v15477_v16 }
 0x801   :  { %14111 = vmatprep.subr.bf16.mxu0 %v15478_v28 }
 0x804   :  { %14112 = vmatpush3.bf16.msra.mxu0 %v15479_v55 }
 0x805   :  { %14113 = vmatprep.subr.bf16.mxu0 %v15480_v26 }
 0x808   :  { %14114 = vmatpush3.bf16.msra.mxu0 %v15481_v36 }
 0x809   :  { %14115 = vmatprep.subr.bf16.mxu0 %v15482_v8 }
 0x80c   :  { %14116 = vmatpush3.bf16.msra.mxu0 %v15483_v25 }
 0x80d   :  { %14117 = vmatprep.subr.bf16.mxu0 %v15484_v45 }
 0x810   :  { %14118 = vmatpush3.bf16.msra.mxu0 %v15485_v60 }
 0x811   :  { %14119 = vmatprep.subr.bf16.mxu0 %v15486_v61 }
 0x814   :  { %14120 = vmatpush3.bf16.msra.mxu0 %v15487_v50 }
 0x815   :  { %14145 = vmatprep.subr.bf16.mxu0 %v15491_v32 }
 0x88a   :  { %v14029_v9 = vpop.f32.mrb[40].mxu0 }
 0x88b   :  { %v14030_v41 = vpop.f32.mrb[41].mxu0 }
 0x88c   :  { %v14031_v38 = vadd.f32 %v14030_v41, %v14029_v9  ;;  %v14032_v1 = vpop.f32.mrb[42].mxu0 }
 0x88d   :  { %v14033_v31 = vpop.f32.mrb[43].mxu0 }
 0x88e   :  { %v14034_v46 = vadd.f32 %v14033_v31, %v14032_v1  ;;  %v10048_v33 = vadd.f32 %v14031_v38, %v13344_v35 }
 0x890   :  { %v10051_v54 = vadd.f32 %v14034_v46, %v13344_v35 }
 0x892   :  { %v14035_v5 = vpop.f32.mrb[44].mxu0 }
 0x893   :  { %v14036_v18 = vpop.f32.mrb[45].mxu0 }
 0x894   :  { %v14037_v62 = vadd.f32 %v14036_v18, %v14035_v5  ;;  %v14038_v10 = vpop.f32.mrb[46].mxu0 }
 0x895   :  { %v14039_v17 = vpop.f32.mrb[47].mxu0 }
 0x896   :  { %v14040_v44 = vadd.f32 %v14039_v17, %v14038_v10  ;;  %v10056_v57 = vadd.f32 %v14037_v62, %v13344_v35 }
 0x898   :  { %v10059_v51 = vadd.f32 %v14040_v44, %v13344_v35 }
 0x89a   :  { %v14041_v11 = vpop.f32.mrb[48].mxu0 }
 0x89b   :  { %v14042_v29 = vpop.f32.mrb[49].mxu0 }
 0x89c   :  { %v14043_v20 = vadd.f32 %v14042_v29, %v14041_v11  ;;  %v14044_v22 = vpop.f32.mrb[50].mxu0 }
 0x89d   :  { %v14045_v30 = vpop.f32.mrb[51].mxu0 }
 0x89e   :  { %v14046_v40 = vadd.f32 %v14045_v30, %v14044_v22  ;;  %v10064_v39 = vadd.f32 %v14043_v20, %v13344_v35 }
 0x8a0   :  { %v10067_v6 = vadd.f32 %v14046_v40, %v13344_v35 }
 0x8a2   :  { %v14047_v47 = vpop.f32.mrb[52].mxu0 }
 0x8a3   :  { %v14048_v15 = vpop.f32.mrb[53].mxu0 }
 0x8a4   :  { %v14049_v56 = vadd.f32 %v14048_v15, %v14047_v47  ;;  %v14050_v34 = vpop.f32.mrb[54].mxu0 }
 0x8a5   :  { %v14051_v7 = vpop.f32.mrb[55].mxu0 }
 0x8a6   :  { %v14052_v58 = vadd.f32 %v14051_v7, %v14050_v34  ;;  %v10072_v8 = vadd.f32 %v14049_v56, %v13344_v35 }
 0x8a8   :  { %v10075_v61 = vadd.f32 %v14052_v58, %v13344_v35 }
 0x8aa   :  { %v14069_v12 = vpop.f32.mrb[56].mxu0 }
 0x8ab   :  { %v14070_v23 = vpop.f32.mrb[57].mxu0 }
 0x8ac   :  { %v14071_v21 = vadd.f32 %v14070_v23, %v14069_v12  ;;  %v14072_v37 = vpop.f32.mrb[58].mxu0 }
 0x8ad   :  { %v14073_v27 = vpop.f32.mrb[59].mxu0 }
 0x8ae   :  { %v14074_v42 = vadd.f32 %v14073_v27, %v14072_v37  ;;  %v10113_v48 = vadd.f32 %v14071_v21, %v10048_v33 }
 0x8b0   :  { %v10116_v43 = vadd.f32 %v14074_v42, %v10051_v54 }
 0x8b2   :  { %v14075_v59 = vpop.f32.mrb[60].mxu0 }
 0x8b3   :  { %v14076_v4 = vpop.f32.mrb[61].mxu0 }
 0x8b4   :  { %v14077_v24 = vadd.f32 %v14076_v4, %v14075_v59  ;;  %v14078_v14 = vpop.f32.mrb[62].mxu0 }
 0x8b5   :  { %v14079_v0 = vpop.f32.mrb[63].mxu0 }
 0x8b6   :  { %v14080_v49 = vadd.f32 %v14079_v0, %v14078_v14  ;;  %v10121_v63 = vadd.f32 %v14077_v24, %v10056_v57 }
 0x8b8   :  { %v10124_v19 = vadd.f32 %v14080_v49, %v10059_v51 }
 0x8ba   :  { %v14081_v53 = vpop.f32.mrb[64].mxu0 }
 0x8bb   :  { %v14082_v2 = vpop.f32.mrb[65].mxu0 }
 0x8bc   :  { %v14083_v13 = vadd.f32 %v14082_v2, %v14081_v53  ;;  %v14084_v3 = vpop.f32.mrb[66].mxu0 }
 0x8bd   :  { %v14085_v52 = vpop.f32.mrb[67].mxu0 }
 0x8be   :  { %v14086_v16 = vadd.f32 %v14085_v52, %v14084_v3  ;;  %v10129_v28 = vadd.f32 %v14083_v13, %v10064_v39 }
 0x8c0   :  { %v10132_v55 = vadd.f32 %v14086_v16, %v10067_v6 }
 0x8c2   :  { %v14087_v26 = vpop.f32.mrb[68].mxu0 }
 0x8c3   :  { %v14088_v36 = vpop.f32.mrb[69].mxu0 }
 0x8c4   :  { %v14089_v25 = vadd.f32 %v14088_v36, %v14087_v26  ;;  %v14090_v45 = vpop.f32.mrb[70].mxu0 }
 0x8c5   :  { %v14091_v60 = vpop.f32.mrb[71].mxu0 }
 0x8c6   :  { %v14092_v50 = vadd.f32 %v14091_v60, %v14090_v45  ;;  %v10137_v32 = vadd.f32 %v14089_v25, %v10072_v8 }
 0x8c8   :  { %v10140_v9 = vadd.f32 %v14092_v50, %v10075_v61 }
 0x8ca   :  { %v14471_v41 = vpop.f32.mrb[72].mxu0 }
 0x8cb   :  { %v10186_v38 = vadd.f32 %v14471_v41, %v10121_v63  ;;  %v10177_v1 = vpop.f32.mrb[73].mxu0 }
 0x8cc   :  { %v10178_v31 = vadd.f32 %v10177_v1, %v10113_v48  ;;  %v14472_v46 = vpop.f32.mrb[74].mxu0 }
 0x8cd   :  { %v10210_v5 = vmax.f32 %v10186_v38, 0.0  ;;  %v10189_v18 = vadd.f32 %v14472_v46, %v10124_v19  ;;  %v10180_v62 = vpop.f32.mrb[75].mxu0 }
 0x8ce   :  { %v10208_v10 = vmax.f32 %v10178_v31, 0.0  ;;  %v10181_v17 = vadd.f32 %v10180_v62, %v10116_v43 }
 0x8cf   :  { %v13907_v44 = vpack.c.bf16 %v10210_v5, %v10210_v5  ;;  %v10211_v11 = vmax.f32 %v10189_v18, 0.0 }
 0x8d0   :  { %v13905_v29 = vpack.c.bf16 %v10208_v10, %v10208_v10  ;;  %v10209_v20 = vmax.f32 %v10181_v17, 0.0 }
 0x8d1   :  { %v10252_v22 = vrot.slane %v13907_v44, 7  ;;  %v13908_v30 = vpack.c.bf16 %v10211_v11, %v10211_v11 }
 0x8d2   :  { %v10248_v40 = vrot.slane %v13905_v29, 7  ;;  %v13906_v47 = vpack.c.bf16 %v10209_v20, %v10209_v20  ;;  %v14475_v15 = vpop.f32.mrb[76].mxu0 }
 0x8d3   :  { %v10253_v56 = vrot.slane %v10252_v22, 4  ;;  %10284 = vst [vmem:[#allocation2 + $0x90] sm:$0xe] %v10252_v22  ;;  %v10254_v34 = vrot.slane %v13908_v30, 7  ;;  %v10202_v7 = vadd.f32 %v14475_v15, %v10137_v32  ;;  %v10193_v58 = vpop.f32.mrb[77].mxu0  ;;  %v15492_v15 = vld [vmem:[%s21073_s3 + $0x300] sm:$0xff]  }
 0x8d4   :  { %v10249_v35 = vrot.slane %v10248_v40, 4  ;;  %10280 = vst [vmem:[#allocation2] sm:$0xe] %v10248_v40  ;;  %v10250_v12 = vrot.slane %v13906_v47, 7  ;;  %v10194_v23 = vadd.f32 %v10193_v58, %v10129_v28  ;;  %v14476_v33 = vpop.f32.mrb[78].mxu0 }
 0x8d5   :  { %10285 = vst [vmem:[#allocation2 + $0x98] sm:$0x1] %v10253_v56  ;;  %v10255_v21 = vrot.slane %v10254_v34, 4  ;;  %10286 = vst [vmem:[#allocation2 + $0xd8] sm:$0xe] %v10254_v34  ;;  %v10214_v37 = vmax.f32 %v10202_v7, 0.0  ;;  %v10205_v27 = vadd.f32 %v14476_v33, %v10140_v9 }
 0x8d6   :  { %v10196_v54 = vpop.f32.mrb[79].mxu0  ;;  %10281 = vst [vmem:[#allocation2 + $0x8] sm:$0x1] %v10249_v35  ;;  %v10251_v42 = vrot.slane %v10250_v12, 4  ;;  %10282 = vst [vmem:[#allocation2 + $0x48] sm:$0xe] %v10250_v12 }
 0x8d7   :  { %v10212_v48 = vmax.f32 %v10194_v23, 0.0  ;;  %v10197_v43 = vadd.f32 %v10196_v54, %v10132_v55  ;;  %10287 = vst [vmem:[#allocation2 + $0xe0] sm:$0x1] %v10255_v21  ;;  %v13911_v59 = vpack.c.bf16 %v10214_v37, %v10214_v37  ;;  %v10215_v4 = vmax.f32 %v10205_v27, 0.0  ;;  %v15496_v35 = vld [vmem:[%s21073_s3 + $0x348] sm:$0xff]  }
 0x8d8   :  { %10283 = vst [vmem:[#allocation2 + $0x50] sm:$0x1] %v10251_v42  ;;  %v15497_v54 = vld [vmem:[%s21073_s3 + $0x308] sm:$0xff]  }
 0x8d9   :  { %v13909_v57 = vpack.c.bf16 %v10212_v48, %v10212_v48  ;;  %v10213_v24 = vmax.f32 %v10197_v43, 0.0  ;;  %v10260_v14 = vrot.slane %v13911_v59, 7  ;;  %v13912_v0 = vpack.c.bf16 %v10215_v4, %v10215_v4  ;;  %v15498_v4 = vld [vmem:[%s21073_s3 + $0x350] sm:$0xff]  }
 0x8da   :  { %v20218_v39 = vld [vmem:[#allocation2 + $0x90] sm:$0xf] }
 0x8db   :  { %v10256_v51 = vrot.slane %v13909_v57, 7  ;;  %v13910_v49 = vpack.c.bf16 %v10213_v24, %v10213_v24  ;;  %v10261_v63 = vrot.slane %v10260_v14, 4  ;;  %10292 = vst [vmem:[#allocation2 + $0x1b0] sm:$0xe] %v10260_v14  ;;  %v10262_v19 = vrot.slane %v13912_v0, 7 }
 0x8dc   :  { %v20220_v13 = vld [vmem:[#allocation2 + $0x98] sm:$0x1]  ;;  %v10296_v52 = vld [vmem:[#allocation2] sm:$0xf] }
 0x8dd   :  { %v10257_v53 = vrot.slane %v10256_v51, 4  ;;  %10288 = vst [vmem:[#allocation2 + $0x120] sm:$0xe] %v10256_v51  ;;  %v10258_v2 = vrot.slane %v13910_v49, 7  ;;  %10293 = vst [vmem:[#allocation2 + $0x1b8] sm:$0x1] %v10261_v63  ;;  %v13415_v16 = vcombine.low %v20218_v39, %v20220_v13 }
 0x8de   :  { %v10263_v3 = vrot.slane %v10262_v19, 4  ;;  %10294 = vst [vmem:[#allocation2 + $0x1f8] sm:$0xe] %v10262_v19  ;;  %v20222_v6 = vld [vmem:[#allocation2 + $0x8] sm:$0x1]  ;;  %v15499_v51 = vld [vmem:[%s21073_s3 + $0x310] sm:$0xff]  }
 0x8df   :  { %10289 = vst [vmem:[#allocation2 + $0x128] sm:$0x1] %v10257_v53  ;;  %v10259_v28 = vrot.slane %v10258_v2, 4  ;;  %10290 = vst [vmem:[#allocation2 + $0x168] sm:$0xe] %v10258_v2  ;;  %v13413_v55 = vcombine.low %v10296_v52, %v20222_v6  ;;  %v10393_v50 = vshll.u32 %v13415_v16, 16 }
 0x8e0   :  { %v20227_v26 = vld [vmem:[#allocation2 + $0xd8] sm:$0xf]  ;;  %v20229_v36 = vld [vmem:[#allocation2 + $0xe0] sm:$0x1]  ;;  %10295 = vst [vmem:[#allocation2 + $0x200] sm:$0x1] %v10263_v3 }
 0x8e1   :  { %v10297_v8 = vld [vmem:[#allocation2 + $0x48] sm:$0xf]  ;;  %v20231_v25 = vld [vmem:[#allocation2 + $0x50] sm:$0x1]  ;;  %v13416_v45 = vcombine.low %v20227_v26, %v20229_v36  ;;  %10291 = vst [vmem:[#allocation2 + $0x170] sm:$0x1] %v10259_v28  ;;  %v13530_v19 = vcombine.low %v20218_v39, %v20227_v26 }
 0x8e2   :  { %v13414_v60 = vcombine.low %v10297_v8, %v20231_v25  ;;  %v10379_v61 = vshll.u32 %v13413_v55, 16  ;;  %v10377_v38 = vshrl.u32 %v13413_v55, 16  ;;  %v10395_v5 = vrot.slane %v10393_v50, 1  ;;  %v20262_v27 = vld [vmem:[#allocation2 + $0x1b0] sm:$0xf]  ;;  %v15503_v53 = vld [vmem:[%s21073_s3 + $0x358] sm:$0xff]  }
 0x8e3   :  { %v10400_v32 = vshll.u32 %v13416_v45, 16  ;;  %v10398_v18 = vshrl.u32 %v13416_v45, 16  ;;  %v10391_v62 = vshrl.u32 %v13415_v16, 16  ;;  %v13525_v58 = vcombine.low %v10296_v52, %v10297_v8  ;;  %v20272_v0 = vld [vmem:[#allocation2 + $0x50] sm:$0x3]  ;;  %v15504_v39 = vld [vmem:[%s21073_s3 + $0x318] sm:$0xff]  }
 0x8e4   :  { %v10381_v9 = vrot.slane %v10379_v61, 1  ;;  %v10386_v41 = vshll.u32 %v13414_v60, 16  ;;  %v10384_v31 = vshrl.u32 %v13414_v60, 16  ;;  %v20236_v10 = vld [vmem:[#allocation2 + $0x120] sm:$0xf] }
 0x8e5   :  { %v10402_v1 = vrot.slane %v10400_v32, 1  ;;  %v10396_v56 = vor.u32 %v10395_v5, %v10391_v62  ;;  %v20256_v12 = vld [vmem:[#allocation2 + $0x1f8] sm:$0xf]  ;;  %v20282_v2 = vld [vmem:[#allocation2 + $0x48] sm:$0xe]  ;;  %v15505_v60 = vld [vmem:[%s21073_s3 + $0x360] sm:$0xff]  }
 0x8e6   :  { %v10388_v46 = vrot.slane %v10386_v41, 1  ;;  %v20238_v17 = vld [vmem:[#allocation2 + $0x128] sm:$0x1]  ;;  %v10382_v44 = vor.u32 %v10381_v9, %v10377_v38  ;;  %v20258_v23 = vld [vmem:[#allocation2 + $0x1b8] sm:$0x1]  ;;  %v13430_v28 = vcombine.low %v20282_v2, %v20272_v0  ;;  %v15506_v38 = vld [vmem:[%s21073_s3 + $0x320] sm:$0xff]  }
 0x8e7   :  { %v10403_v29 = vor.u32 %v10402_v1, %v10398_v18  ;;  %v13417_v20 = vcombine.low %v20236_v10, %v20238_v17  ;;  %v20242_v22 = vld [vmem:[#allocation2 + $0x168] sm:$0xf]  ;;  %v20246_v40 = vld [vmem:[#allocation2 + $0x200] sm:$0x1]  ;;  %v13419_v59 = vcombine.low %v20262_v27, %v20258_v23  ;;  %v20288_v55 = vld [vmem:[#allocation2] sm:$0xe] }
 0x8e8   :  { %v10389_v11 = vor.u32 %v10388_v46, %v10384_v31  ;;  %v20244_v30 = vld [vmem:[#allocation2 + $0x170] sm:$0x1]  ;;  %v13420_v37 = vcombine.low %v20256_v12, %v20246_v40  ;;  %v20284_v3 = vld [vmem:[#allocation2 + $0x8] sm:$0x3]  ;;  %v10497_v32 = vshrl.u32 %v13430_v28, 16  ;;  %v10500_v9 = vshll.u32 %v13430_v28, 16 }
 0x8e9   :  { %v13418_v34 = vcombine.low %v20242_v22, %v20244_v30  ;;  %v10407_v7 = vshll.u32 %v13417_v20, 16  ;;  %v13531_v33 = vcombine.low %v10396_v56, %v10403_v29  ;;  %v10405_v57 = vshrl.u32 %v13417_v20, 16  ;;  %v20298_v41 = vld [vmem:[#allocation2 + $0xe0] sm:$0x3]  ;;  %v15510_v18 = vld [vmem:[%s21073_s3 + $0x368] sm:$0xff]  }
 0x8ea   :  { %v13526_v47 = vcombine.low %v10382_v44, %v10389_v11  ;;  %v10428_v14 = vshll.u32 %v13420_v37, 16  ;;  %v10421_v63 = vshll.u32 %v13419_v59, 16  ;;  %v10426_v8 = vshrl.u32 %v13420_v37, 16  ;;  %v20308_v62 = vld [vmem:[#allocation2 + $0xd8] sm:$0xe]  ;;  %v15513_v37 = vld [vmem:[%s21073_s3 + $0x330] sm:$0xff]  }
 0x8eb   :  { %v10414_v21 = vshll.u32 %v13418_v34, 16  ;;  %v10409_v42 = vrot.slane %v10407_v7, 1  ;;  %v10412_v48 = vshrl.u32 %v13418_v34, 16  ;;  %v13429_v45 = vcombine.low %v20288_v55, %v20284_v3  ;;  %v20310_v44 = vld [vmem:[#allocation2 + $0x98] sm:$0x3]  ;;  %v15512_v7 = vld [vmem:[%s21073_s3 + $0x370] sm:$0xff]  }
 0x8ec   :  { %11009 = vmatprep.mubr.bf16.mxu0 %v13526_v47  ;;  %v10430_v16 = vrot.slane %v10428_v14, 1  ;;  %v10423_v26 = vrot.slane %v10421_v63, 1  ;;  %v10419_v61 = vshrl.u32 %v13419_v59, 16  ;;  %v13535_v5 = vcombine.low %v20236_v10, %v20242_v22  ;;  %v15511_v10 = vld [vmem:[%s21073_s3 + $0x328] sm:$0xff]  }
 0x8ed   :  { %11010 = vmatmul.mubr.bf16.vlgmr.msra.gmra.mrb[80].mxu0 %v13525_v58  ;;  %v10416_v43 = vrot.slane %v10414_v21, 1  ;;  %v10410_v49 = vor.u32 %v10409_v42, %v10405_v57  ;;  %v10489_v31 = vshrl.u32 %v13429_v45, 16  ;;  %v10492_v46 = vshll.u32 %v13429_v45, 16  ;;  %v20324_v21 = vld [vmem:[#allocation2 + $0x170] sm:$0x3] }
 0x8ee   :  { %14146 = vmatpush3.bf16.msra.mxu0 %v15492_v15  ;;  %11017 = vmatprep.mubr.bf16.mxu0 %v13531_v33  ;;  %v10431_v50 = vor.u32 %v10430_v16, %v10426_v8  ;;  %v10424_v1 = vor.u32 %v10423_v26, %v10419_v61  ;;  %v10499_v29 = vrot.slane %v10497_v32, 1  ;;  %v10502_v20 = vrot.slane %v10500_v9, 2  ;;  %v20314_v15 = vld [vmem:[#allocation2 + $0x90] sm:$0xe]  ;;  %v20336_v57 = vld [vmem:[#allocation2 + $0x168] sm:$0xe] }
 0x8ef   :  { %14147 = vmatprep.subr.bf16.mxu0 %v15496_v35  ;;  %v10417_v24 = vor.u32 %v10416_v43, %v10412_v48  ;;  %v13432_v47 = vcombine.low %v20308_v62, %v20298_v41  ;;  %v10491_v22 = vrot.slane %v10489_v31, 1  ;;  %v10494_v56 = vrot.slane %v10492_v46, 2  ;;  %v15520_v16 = vld [vmem:[%s21073_s3 + $0x380] sm:$0xff]   ;;  %v15527_v32 = vld [vmem:[%s21073_s3 + $0x388] sm:$0xff]   ;;  %v10319_v9 = vld [vmem:[#allocation2 + $0x1f8] sm:$0xe] }
 0x8f0   :  { %v13541_v11 = vcombine.low %v10424_v1, %v10431_v50  ;;  %v13431_v34 = vcombine.low %v20314_v15, %v20310_v44  ;;  %v10503_v58 = vor.u32 %v10502_v20, %v10499_v29  ;;  %v13540_v43 = vcombine.low %v20262_v27, %v20256_v12  ;;  %v20344_v27 = vld [vmem:[#allocation2 + $0x120] sm:$0xe] }
 0x8f1   :  { %v13536_v52 = vcombine.low %v10410_v49, %v10417_v24  ;;  %v10513_v35 = vshrl.u32 %v13432_v47, 16  ;;  %v10516_v33 = vshll.u32 %v13432_v47, 16  ;;  %v13422_v59 = vcombine.low %v20282_v2, %v20231_v25  ;;  %v20338_v24 = vld [vmem:[#allocation2 + $0x128] sm:$0x3]  ;;  %v15519_v25 = vld [vmem:[%s21073_s3 + $0x338] sm:$0xff]   ;;  %v15528_v47 = vld [vmem:[%s21073_s3 + $0x390] sm:$0xff]  }
 0x8f2   :  { %14148 = vmatpush3.bf16.msra.mxu0 %v15497_v54  ;;  %v10495_v54 = vor.u32 %v10494_v56, %v10491_v22  ;;  %v10505_v42 = vshrl.u32 %v13431_v34, 16  ;;  %v10508_v48 = vshll.u32 %v13431_v34, 16  ;;  %v13434_v63 = vcombine.low %v20336_v57, %v20324_v21  ;;  %v20354_v26 = vld [vmem:[#allocation2 + $0x200] sm:$0x3] }
 0x8f3   :  { %14149 = vmatprep.subr.bf16.mxu0 %v15498_v4  ;;  %v15518_v4 = vld [vmem:[%s21073_s3 + $0x378] sm:$0xff]   ;;  %v10518_v49 = vrot.slane %v10516_v33, 2  ;;  %v13421_v12 = vcombine.low %v20288_v55, %v20222_v6  ;;  %v13433_v2 = vcombine.low %v20344_v27, %v20338_v24  ;;  %v13424_v50 = vcombine.low %v20308_v62, %v20229_v36 }
 0x8f4   :  { %v13528_v14 = vcombine.low %v10495_v54, %v10503_v58  ;;  %v10529_v28 = vshrl.u32 %v13434_v63, 16  ;;  %v10532_v55 = vshll.u32 %v13434_v63, 16  ;;  %v15533_v33 = vld [vmem:[%s21073_s3 + $0x398] sm:$0xff]   ;;  %v13428_v63 = vcombine.low %v10319_v9, %v20246_v40  ;;  %v15542_v40 = vld [vmem:[%s21073_s3 + $0x3b0] sm:$0xff]  }
 0x8f5   :  { %11018 = vmatmul.mubr.bf16.gmra.mrb[84].mxu0 %v13530_v19  ;;  %v10507_v19 = vrot.slane %v10505_v42, 1  ;;  %v10521_v45 = vshrl.u32 %v13433_v2, 16  ;;  %v10459_v20 = vrot.slane %v13424_v50, 1  ;;  %v10332_v50 = vld [vmem:[#allocation2 + $0x120] sm:$0xc] }
 0x8f6   :  { %14150 = vmatpush3.bf16.msra.mxu0 %v15499_v51  ;;  %11025 = vmatprep.mubr.bf16.mxu0 %v13536_v52  ;;  %v10515_v51 = vrot.slane %v10513_v35, 1  ;;  %v10457_v52 = vrot.slane %v13422_v59, 1  ;;  %v10531_v31 = vrot.slane %v10529_v28, 1  ;;  %v10534_v46 = vrot.slane %v10532_v55, 2  ;;  %v10331_v28 = vld [vmem:[#allocation2 + $0xd8] sm:$0xc] }
 0x8f7   :  { %14151 = vmatprep.subr.bf16.mxu0 %v15503_v53  ;;  %v10510_v53 = vrot.slane %v10508_v48, 2  ;;  %v10523_v36 = vrot.slane %v10521_v45, 1  ;;  %v13426_v35 = vcombine.low %v20336_v57, %v20244_v30  ;;  %v13425_v48 = vcombine.low %v20344_v27, %v20238_v17  ;;  %v15534_v30 = vld [vmem:[%s21073_s3 + $0x3a0] sm:$0xff]   ;;  %v15541_v17 = vld [vmem:[%s21073_s3 + $0x3a8] sm:$0xff]  }
 0x8f8   :  { %v10519_v6 = vor.u32 %v10518_v49, %v10515_v51 }
 0x8f9   :  { %v10511_v8 = vor.u32 %v10510_v53, %v10507_v19  ;;  %v10328_v53 = vld [vmem:[#allocation2] sm:$0xc] }
 0x8fa   :  { %14152 = vmatpush3.bf16.msra.mxu0 %v15504_v39  ;;  %v10456_v39 = vrot.slane %v13421_v12, 1  ;;  %v10329_v12 = vld [vmem:[#allocation2 + $0x48] sm:$0xc] }
 0x8fb   :  { %14153 = vmatprep.subr.bf16.mxu0 %v15505_v60  ;;  %v10524_v60 = vshll.u32 %v13433_v2, 16  ;;  %v13533_v1 = vcombine.low %v10511_v8, %v10519_v6  ;;  %v13437_v2 = vcombine.low %v10328_v53, %v20284_v3  ;;  %v10333_v3 = vld [vmem:[#allocation2 + $0x168] sm:$0xc]  ;;  %v10330_v8 = vld [vmem:[#allocation2 + $0x90] sm:$0xc] }
 0x8fc   :  { %v13527_v61 = vcombine.low %v10456_v39, %v10457_v52  ;;  %v10463_v52 = vrot.slane %v13428_v63, 1 }
 0x8fd   :  { %11026 = vmatmul.mubr.bf16.gmra.mrb[88].mxu0 %v13535_v5  ;;  %v13436_v5 = vcombine.low %v10319_v9, %v20354_v26  ;;  %v10526_v62 = vrot.slane %v10524_v60, 2  ;;  %v10576_v55 = vrot.slane %v13437_v2, 2  ;;  %v13442_v60 = vcombine.low %v10333_v3, %v20324_v21 }
 0x8fe   :  { %14154 = vmatpush3.bf16.msra.mxu0 %v15506_v38  ;;  %11033 = vmatprep.mubr.bf16.mxu0 %v13541_v11  ;;  %v20361_v38 = vld [vmem:[#allocation2 + $0x1b8] sm:$0x3]  ;;  %v10318_v11 = vld [vmem:[#allocation2 + $0x1b0] sm:$0xe] }
 0x8ff   :  { %14155 = vmatprep.subr.bf16.mxu0 %v15510_v18  ;;  %v13423_v18 = vcombine.low %v20314_v15, %v20220_v13  ;;  %v13435_v29 = vcombine.low %v10318_v11, %v20361_v38  ;;  %v10545_v22 = vshrl.u32 %v13436_v5, 16  ;;  %v10548_v56 = vshll.u32 %v13436_v5, 16 }
 0x900   :  { %v13427_v19 = vcombine.low %v10318_v11, %v20258_v23  ;;  %v15545_v23 = vld [vmem:[%s21073_s3 + $0x3b8] sm:$0xff]   ;;  %v10581_v9 = vrot.slane %v13442_v60, 2  ;;  %v10334_v11 = vld [vmem:[#allocation2 + $0x1b0] sm:$0xc] }
 0x901   :  { %v10458_v34 = vrot.slane %v13423_v18, 1  ;;  %v10537_v13 = vshrl.u32 %v13435_v29, 16  ;;  %v10540_v15 = vshll.u32 %v13435_v29, 16  ;;  %v10547_v54 = vrot.slane %v10545_v22, 1  ;;  %v15554_v22 = vld [vmem:[%s21073_s3 + $0x418] sm:$0xff]  }
 0x902   :  { %14156 = vmatpush3.bf16.msra.mxu0 %v15511_v10  ;;  %v10535_v10 = vor.u32 %v10534_v46, %v10531_v31  ;;  %v10550_v42 = vrot.slane %v10548_v56, 2  ;;  %v10462_v6 = vrot.slane %v13427_v19, 1  ;;  %v10335_v31 = vld [vmem:[#allocation2 + $0x1f8] sm:$0xc] }
 0x903   :  { %14157 = vmatprep.subr.bf16.mxu0 %v15512_v7  ;;  %v10527_v7 = vor.u32 %v10526_v62, %v10523_v36  ;;  %v13532_v58 = vcombine.low %v10458_v34, %v10459_v20  ;;  %v10542_v59 = vrot.slane %v10540_v15, 2  ;;  %v13444_v18 = vcombine.low %v10335_v31, %v20354_v26  ;;  %v15549_v20 = vld [vmem:[%s21073_s3 + $0x3c0] sm:$0xff]   ;;  %v15550_v26 = vld [vmem:[%s21073_s3 + $0x408] sm:$0xff]   ;;  %v15555_v56 = vld [vmem:[%s21073_s3 + $0x3d8] sm:$0xff]  }
 0x904   :  { %v10551_v57 = vor.u32 %v10550_v42, %v10547_v54  ;;  %v13542_v39 = vcombine.low %v10462_v6, %v10463_v52  ;;  %v15556_v34 = vld [vmem:[%s21073_s3 + $0x420] sm:$0xff]   ;;  %v15559_v15 = vld [vmem:[%s21073_s3 + $0x3e8] sm:$0xff]  }
 0x905   :  { %11034 = vmatmul.mubr.bf16.gmra.mrb[92].mxu0 %v13540_v43  ;;  %v10539_v43 = vrot.slane %v10537_v13, 1  ;;  %v10583_v36 = vrot.slane %v13444_v18, 2  ;;  %v15558_v13 = vld [vmem:[%s21073_s3 + $0x428] sm:$0xff]   ;;  %v15567_v54 = vld [vmem:[%s21073_s3 + $0x480] sm:$0xff]  }
 0x906   :  { %14158 = vmatpush3.bf16.msra.mxu0 %v15513_v37  ;;  %11074 = vmatprep.mubr.bf16.mxu0 %v13528_v14  ;;  %v13538_v37 = vcombine.low %v10527_v7, %v10535_v10  ;;  %v10460_v14 = vrot.slane %v13425_v48, 1  ;;  %v15553_v10 = vld [vmem:[%s21073_s3 + $0x3d0] sm:$0xff]   ;;  %v15557_v7 = vld [vmem:[%s21073_s3 + $0x3e0] sm:$0xff]  }
 0x907   :  { %14159 = vmatprep.subr.bf16.mxu0 %v15518_v4  ;;  %v10461_v4 = vrot.slane %v13426_v35, 1  ;;  %v10543_v51 = vor.u32 %v10542_v59, %v10539_v43  ;;  %v15561_v35 = vld [vmem:[%s21073_s3 + $0x3f0] sm:$0xff]  }
 0x909   :  { %v13537_v49 = vcombine.low %v10460_v14, %v10461_v4  ;;  %v13543_v27 = vcombine.low %v10543_v51, %v10551_v57 }
 0x90a   :  { %14160 = vmatpush3.bf16.msra.mxu0 %v15519_v25  ;;  %v13438_v25 = vcombine.low %v10329_v12, %v20272_v0  ;;  %v13440_v0 = vcombine.low %v10331_v28, %v20298_v41 }
 0x90b   :  { %14477 = vmatprep.subr.bf16.mxu0 %v15520_v16 }
 0x90c   :  { %v10579_v41 = vrot.slane %v13440_v0, 2 }
 0x90d   :  { %11075 = vmatmul.mubr.bf16.vlgmr.msra.gmra.mrb[96].mxu0 %v13527_v61  ;;  %v13439_v61 = vcombine.low %v10330_v8, %v20310_v44  ;;  %v13443_v44 = vcombine.low %v10334_v11, %v20361_v38  ;;  %v15551_v38 = vld [vmem:[%s21073_s3 + $0x3c8] sm:$0xff]  }
 0x90e   :  { %14478 = vmatpush3.bf16.msra.mxu0 %v15520_v16  ;;  %11082 = vmatprep.mubr.bf16.mxu0 %v13533_v1  ;;  %v10577_v16 = vrot.slane %v13438_v25, 2 }
 0x90f   :  { %14479 = vmatprep.subr.bf16.mxu0 %v15527_v32  ;;  %v10578_v1 = vrot.slane %v13439_v61, 2  ;;  %v10582_v62 = vrot.slane %v13443_v44, 2 }
 0x910   :  { %v13529_v45 = vcombine.low %v10576_v55, %v10577_v16 }
 0x911   :  { %v13534_v5 = vcombine.low %v10578_v1, %v10579_v41  ;;  %v13544_v29 = vcombine.low %v10582_v62, %v10583_v36 }
 0x912   :  { %14480 = vmatpush3.bf16.msra.mxu0 %v15527_v32  ;;  %v13441_v32 = vcombine.low %v10332_v50, %v20338_v24  ;;  %v15548_v24 = vld [vmem:[%s21073_s3 + $0x400] sm:$0xff]  }
 0x913   :  { %14481 = vmatprep.subr.bf16.mxu0 %v15528_v47 }
 0x914   :  { %v10580_v46 = vrot.slane %v13441_v32, 2 }
 0x915   :  { %11083 = vmatmul.mubr.bf16.gmra.mrb[100].mxu0 %v13532_v58  ;;  %v15560_v58 = vld [vmem:[%s21073_s3 + $0x430] sm:$0xff]  }
 0x916   :  { %14482 = vmatpush3.bf16.msra.mxu0 %v15528_v47  ;;  %11090 = vmatprep.mubr.bf16.mxu0 %v13538_v37  ;;  %v13539_v21 = vcombine.low %v10580_v46, %v10581_v9  ;;  %v15552_v47 = vld [vmem:[%s21073_s3 + $0x410] sm:$0xff]   ;;  %v15563_v37 = vld [vmem:[%s21073_s3 + $0x3f8] sm:$0xff]  }
 0x917   :  { %14483 = vmatprep.subr.bf16.mxu0 %v15533_v33 }
 0x91a   :  { %14484 = vmatpush3.bf16.msra.mxu0 %v15533_v33  ;;  %v15562_v33 = vld [vmem:[%s21073_s3 + $0x438] sm:$0xff]  }
 0x91b   :  { %14485 = vmatprep.subr.bf16.mxu0 %v15534_v30 }
 0x91d   :  { %11091 = vmatmul.mubr.bf16.gmra.mrb[104].mxu0 %v13537_v49 }
 0x91e   :  { %14486 = vmatpush3.bf16.msra.mxu0 %v15534_v30  ;;  %11098 = vmatprep.mubr.bf16.mxu0 %v13543_v27 }
 0x91f   :  { %14487 = vmatprep.subr.bf16.mxu0 %v15541_v17 }
 0x922   :  { %14488 = vmatpush3.bf16.msra.mxu0 %v15541_v17 }
 0x923   :  { %14489 = vmatprep.subr.bf16.mxu0 %v15542_v40 }
 0x925   :  { %11099 = vmatmul.mubr.bf16.gmra.mrb[108].mxu0 %v13542_v39 }
 0x926   :  { %14490 = vmatpush3.bf16.msra.mxu0 %v15542_v40  ;;  %14493 = vmatprep.mubr.bf16.mxu0 %v13529_v45 }
 0x927   :  { %14491 = vmatprep.subr.bf16.mxu0 %v15545_v23 }
 0x92a   :  { %14492 = vmatpush3.bf16.msra.mxu0 %v15545_v23 }
 0x92b   :  { %14197 = vmatprep.subr.bf16.mxu0 %v15548_v24 }
 0x92d   :  { %14494 = vmatmul.mubr.bf16.vlgmr.msra.gmra.mrb[112].mxu0 %v13534_v5 }
 0x92e   :  { %14497 = vmatprep.mubr.bf16.mxu0 %v13539_v21  ;;  %14198 = vmatpush3.bf16.msra.mxu0 %v15549_v20 }
 0x92f   :  { %14199 = vmatprep.subr.bf16.mxu0 %v15550_v26 }
 0x932   :  { %14200 = vmatpush3.bf16.msra.mxu0 %v15551_v38 }
 0x933   :  { %14201 = vmatprep.subr.bf16.mxu0 %v15552_v47 }
 0x935   :  { %14498 = vmatmul.mubr.bf16.gmra.mrb[116].mxu0 %v13544_v29 }
 0x936   :  { %14202 = vmatpush3.bf16.msra.mxu0 %v15553_v10 }
 0x937   :  { %14203 = vmatprep.subr.bf16.mxu0 %v15554_v22 }
 0x93a   :  { %14204 = vmatpush3.bf16.msra.mxu0 %v15555_v56 }
 0x93b   :  { %14205 = vmatprep.subr.bf16.mxu0 %v15556_v34 }
 0x93e   :  { %14206 = vmatpush3.bf16.msra.mxu0 %v15557_v7  ;;  %v13585_v7 = vld [vmem:[%s21075_s5 + $0x5] ss:$0 sm:$0xff] }
 0x93f   :  { %14207 = vmatprep.subr.bf16.mxu0 %v15558_v13 }
 0x942   :  { %14208 = vmatpush3.bf16.msra.mxu0 %v15559_v15 }
 0x943   :  { %14209 = vmatprep.subr.bf16.mxu0 %v15560_v58 }
 0x946   :  { %14210 = vmatpush3.bf16.msra.mxu0 %v15561_v35  ;;  %v13586_v35 = vld [vmem:[%s21075_s5 + $0x6] ss:$0 sm:$0xff] }
 0x947   :  { %14211 = vmatprep.subr.bf16.mxu0 %v15562_v33 }
 0x94a   :  { %14212 = vmatpush3.bf16.msra.mxu0 %v15563_v37 }
 0x94b   :  { %14237 = vmatprep.subr.bf16.mxu0 %v15567_v54 }
 0x9c0   :  { %v14121_v42 = vpop.f32.mrb[80].mxu0 }
 0x9c1   :  { %v14122_v48 = vpop.f32.mrb[81].mxu0 }
 0x9c2   :  { %v14123_v43 = vadd.f32 %v14122_v48, %v14121_v42  ;;  %v14124_v59 = vpop.f32.mrb[82].mxu0 }
 0x9c3   :  { %v14125_v4 = vpop.f32.mrb[83].mxu0 }
 0x9c4   :  { %v14126_v30 = vadd.f32 %v14125_v4, %v14124_v59 }
 0x9c8   :  { %v14127_v57 = vpop.f32.mrb[84].mxu0 }
 0x9c9   :  { %v14128_v14 = vpop.f32.mrb[85].mxu0 }
 0x9ca   :  { %v14129_v51 = vadd.f32 %v14128_v14, %v14127_v57  ;;  %v14130_v49 = vpop.f32.mrb[86].mxu0 }
 0x9cb   :  { %v14131_v63 = vpop.f32.mrb[87].mxu0 }
 0x9cc   :  { %v14132_v17 = vadd.f32 %v14131_v63, %v14130_v49 }
 0x9d0   :  { %v14133_v12 = vpop.f32.mrb[88].mxu0 }
 0x9d1   :  { %v14134_v27 = vpop.f32.mrb[89].mxu0 }
 0x9d2   :  { %v14135_v25 = vadd.f32 %v14134_v27, %v14133_v12  ;;  %v14136_v19 = vpop.f32.mrb[90].mxu0 }
 0x9d3   :  { %v14137_v53 = vpop.f32.mrb[91].mxu0 }
 0x9d4   :  { %v14138_v2 = vadd.f32 %v14137_v53, %v14136_v19 }
 0x9d8   :  { %v14139_v52 = vpop.f32.mrb[92].mxu0 }
 0x9d9   :  { %v14140_v40 = vpop.f32.mrb[93].mxu0 }
 0x9da   :  { %v14141_v16 = vadd.f32 %v14140_v40, %v14139_v52  ;;  %v14142_v6 = vpop.f32.mrb[94].mxu0 }
 0x9db   :  { %v14143_v28 = vpop.f32.mrb[95].mxu0 }
 0x9dc   :  { %v14144_v55 = vadd.f32 %v14143_v28, %v14142_v6 }
 0x9e0   :  { %v14161_v0 = vpop.f32.mrb[96].mxu0 }
 0x9e1   :  { %v14162_v39 = vpop.f32.mrb[97].mxu0 }
 0x9e2   :  { %v14163_v23 = vadd.f32 %v14162_v39, %v14161_v0  ;;  %v14164_v3 = vpop.f32.mrb[98].mxu0 }
 0x9e3   :  { %v14165_v8 = vpop.f32.mrb[99].mxu0 }
 0x9e4   :  { %v14166_v45 = vadd.f32 %v14165_v8, %v14164_v3  ;;  %v11077_v60 = vadd.f32 %v14163_v23, %v14123_v43 }
 0x9e6   :  { %v11080_v61 = vadd.f32 %v14166_v45, %v14126_v30 }
 0x9e8   :  { %v14167_v50 = vpop.f32.mrb[100].mxu0 }
 0x9e9   :  { %v14168_v32 = vpop.f32.mrb[101].mxu0 }
 0x9ea   :  { %v14169_v41 = vadd.f32 %v14168_v32, %v14167_v50  ;;  %v14170_v9 = vpop.f32.mrb[102].mxu0 }
 0x9eb   :  { %v14171_v1 = vpop.f32.mrb[103].mxu0 }
 0x9ec   :  { %v14172_v31 = vadd.f32 %v14171_v1, %v14170_v9  ;;  %v11085_v46 = vadd.f32 %v14169_v41, %v14129_v51 }
 0x9ee   :  { %v11088_v5 = vadd.f32 %v14172_v31, %v14132_v17 }
 0x9f0   :  { %v14173_v18 = vpop.f32.mrb[104].mxu0 }
 0x9f1   :  { %v14174_v11 = vpop.f32.mrb[105].mxu0 }
 0x9f2   :  { %v14175_v21 = vadd.f32 %v14174_v11, %v14173_v18  ;;  %v14176_v44 = vpop.f32.mrb[106].mxu0 }
 0x9f3   :  { %v14177_v36 = vpop.f32.mrb[107].mxu0 }
 0x9f4   :  { %v14178_v62 = vadd.f32 %v14177_v36, %v14176_v44  ;;  %v11093_v29 = vadd.f32 %v14175_v21, %v14135_v25 }
 0x9f6   :  { %v11096_v24 = vadd.f32 %v14178_v62, %v14138_v2 }
 0x9f8   :  { %v14179_v20 = vpop.f32.mrb[108].mxu0 }
 0x9f9   :  { %v14180_v26 = vpop.f32.mrb[109].mxu0 }
 0x9fa   :  { %v14181_v38 = vadd.f32 %v14180_v26, %v14179_v20  ;;  %v14182_v47 = vpop.f32.mrb[110].mxu0 }
 0x9fb   :  { %v14183_v10 = vpop.f32.mrb[111].mxu0 }
 0x9fc   :  { %v14184_v22 = vadd.f32 %v14183_v10, %v14182_v47  ;;  %v11101_v56 = vadd.f32 %v14181_v38, %v14141_v16 }
 0x9fe   :  { %v11104_v34 = vadd.f32 %v14184_v22, %v14144_v55 }
 0xa00   :  { %v14495_v13 = vpop.f32.mrb[112].mxu0 }
 0xa01   :  { %v11150_v15 = vadd.f32 %v14495_v13, %v11085_v46  ;;  %v11141_v58 = vpop.f32.mrb[113].mxu0 }
 0xa02   :  { %v11142_v33 = vadd.f32 %v11141_v58, %v11077_v60  ;;  %v14496_v37 = vpop.f32.mrb[114].mxu0 }
 0xa03   :  { %v11178_v54 = vmul.f32 %v13585_v7, %v11150_v15  ;;  %v11153_v42 = vadd.f32 %v14496_v37, %v11088_v5  ;;  %v11144_v48 = vpop.f32.mrb[115].mxu0 }
 0xa04   :  { %v11176_v43 = vmul.f32 %v13585_v7, %v11142_v33  ;;  %v11145_v59 = vadd.f32 %v11144_v48, %v11080_v61 }
 0xa05   :  { %v11190_v4 = vadd.f32 %v13586_v35, %v11178_v54  ;;  %v11179_v30 = vmul.f32 %v13585_v7, %v11153_v42 }
 0xa06   :  { %v11188_v57 = vadd.f32 %v13586_v35, %v11176_v43  ;;  %v11177_v14 = vmul.f32 %v13585_v7, %v11145_v59 }
 0xa07   :  { %v11198_v51 = vmax.f32 %v11190_v4, 0.0  ;;  %v11191_v49 = vadd.f32 %v13586_v35, %v11179_v30 }
 0xa08   :  { %v11196_v63 = vmax.f32 %v11188_v57, 0.0  ;;  %v11189_v17 = vadd.f32 %v13586_v35, %v11177_v14  ;;  %v14499_v12 = vpop.f32.mrb[116].mxu0 }
 0xa09   :  { %v13915_v27 = vpack.c.bf16 %v11198_v51, %v11198_v51  ;;  %v11199_v25 = vmax.f32 %v11191_v49, 0.0  ;;  %v11166_v19 = vadd.f32 %v14499_v12, %v11101_v56  ;;  %v11157_v53 = vpop.f32.mrb[117].mxu0 }
 0xa0a   :  { %v13913_v2 = vpack.c.bf16 %v11196_v63, %v11196_v63  ;;  %v11197_v52 = vmax.f32 %v11189_v17, 0.0  ;;  %v11158_v40 = vadd.f32 %v11157_v53, %v11093_v29  ;;  %v14500_v16 = vpop.f32.mrb[118].mxu0 }
 0xa0b   :  { %v11240_v6 = vrot.slane %v13915_v27, 7  ;;  %v13916_v28 = vpack.c.bf16 %v11199_v25, %v11199_v25  ;;  %v11182_v55 = vmul.f32 %v13585_v7, %v11166_v19  ;;  %v11169_v0 = vadd.f32 %v14500_v16, %v11104_v34  ;;  %v11160_v39 = vpop.f32.mrb[119].mxu0 }
 0xa0c   :  { %v11236_v23 = vrot.slane %v13913_v2, 7  ;;  %v13914_v3 = vpack.c.bf16 %v11197_v52, %v11197_v52  ;;  %v11180_v8 = vmul.f32 %v13585_v7, %v11158_v40  ;;  %v11161_v45 = vadd.f32 %v11160_v39, %v11096_v24 }
 0xa0d   :  { %v11241_v60 = vrot.slane %v11240_v6, 4  ;;  %11272 = vst [vmem:[#allocation2 + $0x90] sm:$0xe] %v11240_v6  ;;  %v11242_v61 = vrot.slane %v13916_v28, 7  ;;  %v11194_v50 = vadd.f32 %v13586_v35, %v11182_v55  ;;  %v11183_v32 = vmul.f32 %v13585_v7, %v11169_v0 }
 0xa0e   :  { %v11237_v41 = vrot.slane %v11236_v23, 4  ;;  %11268 = vst [vmem:[#allocation2] sm:$0xe] %v11236_v23  ;;  %v11238_v9 = vrot.slane %v13914_v3, 7  ;;  %v11192_v1 = vadd.f32 %v13586_v35, %v11180_v8  ;;  %v11181_v31 = vmul.f32 %v13585_v7, %v11161_v45  ;;  %v15568_v8 = vld [vmem:[%s21073_s3 + $0x440] sm:$0xff]  }
 0xa0f   :  { %11273 = vst [vmem:[#allocation2 + $0x98] sm:$0x1] %v11241_v60  ;;  %v11243_v46 = vrot.slane %v11242_v61, 4  ;;  %11274 = vst [vmem:[#allocation2 + $0xd8] sm:$0xe] %v11242_v61  ;;  %v11202_v5 = vmax.f32 %v11194_v50, 0.0  ;;  %v11195_v18 = vadd.f32 %v13586_v35, %v11183_v32 }
 0xa10   :  { %11269 = vst [vmem:[#allocation2 + $0x8] sm:$0x1] %v11237_v41  ;;  %v11239_v11 = vrot.slane %v11238_v9, 4  ;;  %11270 = vst [vmem:[#allocation2 + $0x48] sm:$0xe] %v11238_v9  ;;  %v11200_v21 = vmax.f32 %v11192_v1, 0.0  ;;  %v11193_v44 = vadd.f32 %v13586_v35, %v11181_v31 }
 0xa11   :  { %11275 = vst [vmem:[#allocation2 + $0xe0] sm:$0x1] %v11243_v46  ;;  %v13919_v36 = vpack.c.bf16 %v11202_v5, %v11202_v5  ;;  %v11203_v62 = vmax.f32 %v11195_v18, 0.0  ;;  %v15572_v32 = vld [vmem:[%s21073_s3 + $0x488] sm:$0xff]  }
 0xa12   :  { %11271 = vst [vmem:[#allocation2 + $0x50] sm:$0x1] %v11239_v11  ;;  %v13917_v29 = vpack.c.bf16 %v11200_v21, %v11200_v21  ;;  %v11201_v24 = vmax.f32 %v11193_v44, 0.0  ;;  %v15573_v18 = vld [vmem:[%s21073_s3 + $0x448] sm:$0xff]  }
 0xa13   :  { %v11248_v20 = vrot.slane %v13919_v36, 7  ;;  %v13920_v26 = vpack.c.bf16 %v11203_v62, %v11203_v62  ;;  %v15574_v62 = vld [vmem:[%s21073_s3 + $0x490] sm:$0xff]  }
 0xa14   :  { %v11244_v38 = vrot.slane %v13917_v29, 7  ;;  %v13918_v47 = vpack.c.bf16 %v11201_v24, %v11201_v24  ;;  %v20456_v7 = vld [vmem:[#allocation2 + $0x90] sm:$0xf] }
 0xa15   :  { %v11249_v10 = vrot.slane %v11248_v20, 4  ;;  %11280 = vst [vmem:[#allocation2 + $0x1b0] sm:$0xe] %v11248_v20  ;;  %v11250_v22 = vrot.slane %v13920_v26, 7  ;;  %v11284_v58 = vld [vmem:[#allocation2] sm:$0xf] }
 0xa16   :  { %v11245_v56 = vrot.slane %v11244_v38, 4  ;;  %11276 = vst [vmem:[#allocation2 + $0x120] sm:$0xe] %v11244_v38  ;;  %v11246_v34 = vrot.slane %v13918_v47, 7  ;;  %v20458_v13 = vld [vmem:[#allocation2 + $0x98] sm:$0x1] }
 0xa17   :  { %11281 = vst [vmem:[#allocation2 + $0x1b8] sm:$0x1] %v11249_v10  ;;  %v11251_v15 = vrot.slane %v11250_v22, 4  ;;  %11282 = vst [vmem:[#allocation2 + $0x1f8] sm:$0xe] %v11250_v22  ;;  %v13597_v33 = vcombine.low %v20456_v7, %v20458_v13  ;;  %v15575_v38 = vld [vmem:[%s21073_s3 + $0x450] sm:$0xff]  }
 0xa18   :  { %v20460_v35 = vld [vmem:[#allocation2 + $0x8] sm:$0x1]  ;;  %11277 = vst [vmem:[#allocation2 + $0x128] sm:$0x1] %v11245_v56  ;;  %v11247_v37 = vrot.slane %v11246_v34, 4  ;;  %v15579_v56 = vld [vmem:[%s21073_s3 + $0x498] sm:$0xff]  }
 0xa19   :  { %11278 = vst [vmem:[#allocation2 + $0x168] sm:$0xe] %v11246_v34  ;;  %v13595_v54 = vcombine.low %v11284_v58, %v20460_v35  ;;  %v20465_v42 = vld [vmem:[#allocation2 + $0xd8] sm:$0xf]  ;;  %v20467_v48 = vld [vmem:[#allocation2 + $0xe0] sm:$0x1] }
 0xa1a   :  { %11283 = vst [vmem:[#allocation2 + $0x200] sm:$0x1] %v11251_v15  ;;  %v11285_v43 = vld [vmem:[#allocation2 + $0x48] sm:$0xf]  ;;  %v20469_v59 = vld [vmem:[#allocation2 + $0x50] sm:$0x1]  ;;  %v13598_v4 = vcombine.low %v20465_v42, %v20467_v48  ;;  %v13713_v22 = vcombine.low %v20456_v7, %v20465_v42 }
 0xa1b   :  { %11279 = vst [vmem:[#allocation2 + $0x170] sm:$0x1] %v11247_v37  ;;  %v13596_v30 = vcombine.low %v11285_v43, %v20469_v59  ;;  %v11367_v57 = vshll.u32 %v13595_v54, 16  ;;  %v11381_v14 = vshll.u32 %v13597_v33, 16  ;;  %v11365_v17 = vshrl.u32 %v13595_v54, 16  ;;  %v15580_v7 = vld [vmem:[%s21073_s3 + $0x458] sm:$0xff]  }
 0xa1c   :  { %v11388_v51 = vshll.u32 %v13598_v4, 16  ;;  %v11386_v53 = vshrl.u32 %v13598_v4, 16  ;;  %v11379_v2 = vshrl.u32 %v13597_v33, 16  ;;  %v13708_v50 = vcombine.low %v11284_v58, %v11285_v43  ;;  %v20500_v5 = vld [vmem:[#allocation2 + $0x1b0] sm:$0xf] }
 0xa1d   :  { %v11369_v49 = vrot.slane %v11367_v57, 1  ;;  %v11374_v63 = vshll.u32 %v13596_v30, 16  ;;  %v11372_v27 = vshrl.u32 %v13596_v30, 16  ;;  %v11383_v19 = vrot.slane %v11381_v14, 1  ;;  %v20474_v52 = vld [vmem:[#allocation2 + $0x120] sm:$0xf] }
 0xa1e   :  { %v11390_v12 = vrot.slane %v11388_v51, 1  ;;  %v20494_v41 = vld [vmem:[#allocation2 + $0x1f8] sm:$0xf]  ;;  %v20510_v26 = vld [vmem:[#allocation2 + $0x50] sm:$0x3]  ;;  %v15581_v30 = vld [vmem:[%s21073_s3 + $0x4a0] sm:$0xff]  }
 0xa1f   :  { %v11376_v25 = vrot.slane %v11374_v63, 1  ;;  %v20476_v40 = vld [vmem:[#allocation2 + $0x128] sm:$0x1]  ;;  %v11370_v16 = vor.u32 %v11369_v49, %v11365_v17  ;;  %v11384_v45 = vor.u32 %v11383_v19, %v11379_v2  ;;  %v20496_v9 = vld [vmem:[#allocation2 + $0x1b8] sm:$0x1]  ;;  %v15582_v17 = vld [vmem:[%s21073_s3 + $0x460] sm:$0xff]  }
 0xa20   :  { %v11391_v28 = vor.u32 %v11390_v12, %v11386_v53  ;;  %v13599_v55 = vcombine.low %v20474_v52, %v20476_v40  ;;  %v20480_v0 = vld [vmem:[#allocation2 + $0x168] sm:$0xf]  ;;  %v13601_v36 = vcombine.low %v20500_v5, %v20496_v9  ;;  %v20526_v54 = vld [vmem:[#allocation2] sm:$0xe]  ;;  %v20546_v2 = vld [vmem:[#allocation2 + $0xd8] sm:$0xe] }
 0xa21   :  { %v11377_v6 = vor.u32 %v11376_v25, %v11372_v27  ;;  %v20484_v23 = vld [vmem:[#allocation2 + $0x200] sm:$0x1]  ;;  %v20520_v34 = vld [vmem:[#allocation2 + $0x48] sm:$0xe]  ;;  %v13718_v19 = vcombine.low %v20474_v52, %v20480_v0 }
 0xa22   :  { %v20482_v39 = vld [vmem:[#allocation2 + $0x170] sm:$0x1]  ;;  %v11395_v61 = vshll.u32 %v13599_v55, 16  ;;  %v13714_v1 = vcombine.low %v11384_v45, %v11391_v28  ;;  %v13602_v46 = vcombine.low %v20494_v41, %v20484_v23  ;;  %v11393_v29 = vshrl.u32 %v13599_v55, 16  ;;  %v20522_v15 = vld [vmem:[#allocation2 + $0x8] sm:$0x3] }
 0xa23   :  { %v13709_v3 = vcombine.low %v11370_v16, %v11377_v6  ;;  %v13600_v60 = vcombine.low %v20480_v0, %v20482_v39  ;;  %v11409_v10 = vshll.u32 %v13601_v36, 16  ;;  %v13612_v37 = vcombine.low %v20520_v34, %v20510_v26  ;;  %v20536_v63 = vld [vmem:[#allocation2 + $0xe0] sm:$0x3]  ;;  %v15586_v53 = vld [vmem:[%s21073_s3 + $0x4a8] sm:$0xff]   ;;  %v20548_v16 = vld [vmem:[#allocation2 + $0x98] sm:$0x3] }
 0xa24   :  { %v11397_v11 = vrot.slane %v11395_v61, 1  ;;  %v11416_v20 = vshll.u32 %v13602_v46, 16  ;;  %v11414_v43 = vshrl.u32 %v13602_v46, 16  ;;  %v13611_v4 = vcombine.low %v20526_v54, %v20522_v15  ;;  %v15587_v52 = vld [vmem:[%s21073_s3 + $0x468] sm:$0xff]   ;;  %v15588_v61 = vld [vmem:[%s21073_s3 + $0x4b0] sm:$0xff]  }
 0xa25   :  { %12001 = vmatprep.mubr.bf16.mxu0 %v13709_v3  ;;  %v11402_v31 = vshll.u32 %v13600_v60, 16  ;;  %v11400_v21 = vshrl.u32 %v13600_v60, 16  ;;  %v11411_v42 = vrot.slane %v11409_v10, 1  ;;  %v11407_v57 = vshrl.u32 %v13601_v36, 16  ;;  %v15589_v46 = vld [vmem:[%s21073_s3 + $0x470] sm:$0xff]  }
 0xa26   :  { %12002 = vmatmul.mubr.bf16.vlgmr.msra.gmra.mrb[120].mxu0 %v13708_v50  ;;  %v11398_v47 = vor.u32 %v11397_v11, %v11393_v29  ;;  %v11418_v33 = vrot.slane %v11416_v20, 1  ;;  %v11485_v51 = vshrl.u32 %v13612_v37, 16  ;;  %v11488_v49 = vshll.u32 %v13612_v37, 16  ;;  %v20574_v29 = vld [vmem:[#allocation2 + $0x168] sm:$0xe] }
 0xa27   :  { %14238 = vmatpush3.bf16.msra.mxu0 %v15568_v8  ;;  %12009 = vmatprep.mubr.bf16.mxu0 %v13714_v1  ;;  %v11404_v44 = vrot.slane %v11402_v31, 1  ;;  %v11412_v12 = vor.u32 %v11411_v42, %v11407_v57  ;;  %v11477_v27 = vshrl.u32 %v13611_v4, 16  ;;  %v11480_v25 = vshll.u32 %v13611_v4, 16  ;;  %v20552_v8 = vld [vmem:[#allocation2 + $0x90] sm:$0xe] }
 0xa28   :  { %14239 = vmatprep.subr.bf16.mxu0 %v15572_v32  ;;  %v11419_v14 = vor.u32 %v11418_v33, %v11414_v43  ;;  %v11487_v28 = vrot.slane %v11485_v51, 1  ;;  %v11490_v55 = vrot.slane %v11488_v49, 2  ;;  %v13614_v3 = vcombine.low %v20546_v2, %v20536_v63  ;;  %v20562_v31 = vld [vmem:[#allocation2 + $0x170] sm:$0x3]  ;;  %v15596_v33 = vld [vmem:[%s21073_s3 + $0x4c0] sm:$0xff]   ;;  %v15603_v51 = vld [vmem:[%s21073_s3 + $0x4c8] sm:$0xff]  }
 0xa29   :  { %v11405_v24 = vor.u32 %v11404_v44, %v11400_v21  ;;  %v11479_v0 = vrot.slane %v11477_v27, 1  ;;  %v11482_v45 = vrot.slane %v11480_v25, 2  ;;  %v13613_v60 = vcombine.low %v20552_v8, %v20548_v16  ;;  %v20592_v42 = vld [vmem:[#allocation2 + $0x200] sm:$0x3]  ;;  %v11307_v49 = vld [vmem:[#allocation2 + $0x1f8] sm:$0xe] }
 0xa2a   :  { %v13724_v6 = vcombine.low %v11412_v12, %v11419_v14  ;;  %v11491_v50 = vor.u32 %v11490_v55, %v11487_v28  ;;  %v11501_v32 = vshrl.u32 %v13614_v3, 16  ;;  %v11504_v1 = vshll.u32 %v13614_v3, 16  ;;  %v15604_v3 = vld [vmem:[%s21073_s3 + $0x4d0] sm:$0xff]  }
 0xa2b   :  { %14240 = vmatpush3.bf16.msra.mxu0 %v15573_v18  ;;  %v13719_v58 = vcombine.low %v11398_v47, %v11405_v24  ;;  %v11483_v18 = vor.u32 %v11482_v45, %v11479_v0  ;;  %v11493_v11 = vshrl.u32 %v13613_v60, 16  ;;  %v11496_v21 = vshll.u32 %v13613_v60, 16  ;;  %v20576_v24 = vld [vmem:[#allocation2 + $0x128] sm:$0x3] }
 0xa2c   :  { %14241 = vmatprep.subr.bf16.mxu0 %v15574_v62  ;;  %v13723_v44 = vcombine.low %v20500_v5, %v20494_v41  ;;  %v13604_v36 = vcombine.low %v20520_v34, %v20469_v59  ;;  %v15594_v62 = vld [vmem:[%s21073_s3 + $0x4b8] sm:$0xff]   ;;  %v11506_v47 = vrot.slane %v11504_v1, 2  ;;  %v13616_v10 = vcombine.low %v20574_v29, %v20562_v31  ;;  %v20582_v5 = vld [vmem:[#allocation2 + $0x120] sm:$0xe] }
 0xa2d   :  { %v13711_v20 = vcombine.low %v11483_v18, %v11491_v50  ;;  %v13603_v41 = vcombine.low %v20526_v54, %v20460_v35  ;;  %v15595_v59 = vld [vmem:[%s21073_s3 + $0x478] sm:$0xff]   ;;  %v13615_v34 = vcombine.low %v20582_v5, %v20576_v24  ;;  %v13606_v14 = vcombine.low %v20546_v2, %v20467_v48 }
 0xa2e   :  { %12010 = vmatmul.mubr.bf16.gmra.mrb[124].mxu0 %v13713_v22  ;;  %v11495_v22 = vrot.slane %v11493_v11, 1  ;;  %v11517_v37 = vshrl.u32 %v13616_v10, 16  ;;  %v11520_v54 = vshll.u32 %v13616_v10, 16  ;;  %v15609_v1 = vld [vmem:[%s21073_s3 + $0x4d8] sm:$0xff]   ;;  %v13610_v10 = vcombine.low %v11307_v49, %v20484_v23  ;;  %v15618_v23 = vld [vmem:[%s21073_s3 + $0x4f0] sm:$0xff]  }
 0xa2f   :  { %14242 = vmatpush3.bf16.msra.mxu0 %v15575_v38  ;;  %12017 = vmatprep.mubr.bf16.mxu0 %v13719_v58  ;;  %v11503_v38 = vrot.slane %v11501_v32, 1  ;;  %v11445_v58 = vrot.slane %v13604_v36, 1  ;;  %v11509_v4 = vshrl.u32 %v13615_v34, 16  ;;  %v11447_v55 = vrot.slane %v13606_v14, 1  ;;  %v11320_v14 = vld [vmem:[#allocation2 + $0x120] sm:$0xc] }
 0xa30   :  { %14243 = vmatprep.subr.bf16.mxu0 %v15579_v56  ;;  %v11498_v56 = vrot.slane %v11496_v21, 2  ;;  %v11519_v27 = vrot.slane %v11517_v37, 1  ;;  %v11522_v25 = vrot.slane %v11520_v54, 2  ;;  %v13608_v32 = vcombine.low %v20574_v29, %v20482_v39  ;;  %v15610_v39 = vld [vmem:[%s21073_s3 + $0x4e0] sm:$0xff]   ;;  %v11319_v37 = vld [vmem:[#allocation2 + $0xd8] sm:$0xc] }
 0xa31   :  { %v11507_v35 = vor.u32 %v11506_v47, %v11503_v38  ;;  %v11511_v48 = vrot.slane %v11509_v4, 1  ;;  %v13607_v21 = vcombine.low %v20582_v5, %v20476_v40  ;;  %v15617_v40 = vld [vmem:[%s21073_s3 + $0x4e8] sm:$0xff]  }
 0xa32   :  { %v11499_v43 = vor.u32 %v11498_v56, %v11495_v22  ;;  %v11316_v56 = vld [vmem:[#allocation2] sm:$0xc] }
 0xa33   :  { %14244 = vmatpush3.bf16.msra.mxu0 %v15580_v7  ;;  %v11444_v7 = vrot.slane %v13603_v41, 1  ;;  %v11317_v41 = vld [vmem:[#allocation2 + $0x48] sm:$0xc] }
 0xa34   :  { %14245 = vmatprep.subr.bf16.mxu0 %v15581_v30  ;;  %v11512_v30 = vshll.u32 %v13615_v34, 16  ;;  %v13716_v12 = vcombine.low %v11499_v43, %v11507_v35  ;;  %v13619_v34 = vcombine.low %v11316_v56, %v20522_v15  ;;  %v11321_v15 = vld [vmem:[#allocation2 + $0x168] sm:$0xc]  ;;  %v11318_v43 = vld [vmem:[#allocation2 + $0x90] sm:$0xc]  ;;  %v12183_v56 = vld [vmem:[%s21076_s6 + $0x58] sm:$0xff] }
 0xa35   :  { %v13710_v57 = vcombine.low %v11444_v7, %v11445_v58  ;;  %v11451_v58 = vrot.slane %v13610_v10, 1  ;;  %v12180_v10 = vld [vmem:[%s21076_s6 + $0x40] sm:$0xff] }
 0xa36   :  { %12018 = vmatmul.mubr.bf16.gmra.mrb[148].mxu0 %v13718_v19  ;;  %v13618_v19 = vcombine.low %v11307_v49, %v20592_v42  ;;  %v11514_v2 = vrot.slane %v11512_v30, 2  ;;  %v11564_v54 = vrot.slane %v13619_v34, 2  ;;  %v13624_v30 = vcombine.low %v11321_v15, %v20562_v31 }
 0xa37   :  { %14246 = vmatpush3.bf16.msra.mxu0 %v15582_v17  ;;  %12025 = vmatprep.mubr.bf16.mxu0 %v13724_v6  ;;  %v20599_v17 = vld [vmem:[#allocation2 + $0x1b8] sm:$0x3]  ;;  %v11306_v6 = vld [vmem:[#allocation2 + $0x1b0] sm:$0xe] }
 0xa38   :  { %14247 = vmatprep.subr.bf16.mxu0 %v15586_v53  ;;  %v13605_v53 = vcombine.low %v20552_v8, %v20458_v13  ;;  %v13617_v28 = vcombine.low %v11306_v6, %v20599_v17  ;;  %v11533_v0 = vshrl.u32 %v13618_v19, 16  ;;  %v11536_v45 = vshll.u32 %v13618_v19, 16 }
 0xa39   :  { %v13609_v22 = vcombine.low %v11306_v6, %v20496_v9  ;;  %v15621_v9 = vld [vmem:[%s21073_s3 + $0x4f8] sm:$0xff]   ;;  %v11569_v49 = vrot.slane %v13624_v30, 2  ;;  %v11322_v6 = vld [vmem:[#allocation2 + $0x1b0] sm:$0xc]  ;;  %v12220_v30 = vld [vmem:[%s21076_s6 + $0x180] sm:$0xff] }
 0xa3a   :  { %v11446_v60 = vrot.slane %v13605_v53, 1  ;;  %v11525_v13 = vshrl.u32 %v13617_v28, 16  ;;  %v11528_v8 = vshll.u32 %v13617_v28, 16  ;;  %v11535_v18 = vrot.slane %v11533_v0, 1 }
 0xa3b   :  { %14248 = vmatpush3.bf16.msra.mxu0 %v15587_v52  ;;  %v11523_v52 = vor.u32 %v11522_v25, %v11519_v27  ;;  %v11538_v11 = vrot.slane %v11536_v45, 2  ;;  %v11450_v35 = vrot.slane %v13609_v22, 1  ;;  %v11323_v27 = vld [vmem:[#allocation2 + $0x1f8] sm:$0xc]  ;;  %v12182_v22 = vld [vmem:[%s21076_s6 + $0x50] sm:$0xff] }
 0xa3c   :  { %14249 = vmatprep.subr.bf16.mxu0 %v15588_v61  ;;  %v11515_v61 = vor.u32 %v11514_v2, %v11511_v48  ;;  %v13715_v50 = vcombine.low %v11446_v60, %v11447_v55  ;;  %v11530_v36 = vrot.slane %v11528_v8, 2  ;;  %v13626_v53 = vcombine.low %v11323_v27, %v20592_v42  ;;  %v12189_v55 = vld [vmem:[%s21076_s6 + $0x88] sm:$0xff]  ;;  %v12172_v42 = vld [vmem:[%s21076_s6] sm:$0xff]  ;;  %v12191_v45 = vld [vmem:[%s21076_s6 + $0x98] sm:$0xff] }
 0xa3d   :  { %v11539_v29 = vor.u32 %v11538_v11, %v11535_v18  ;;  %v13725_v7 = vcombine.low %v11450_v35, %v11451_v58  ;;  %v12174_v60 = vld [vmem:[%s21076_s6 + $0x10] sm:$0xff]  ;;  %v12177_v18 = vld [vmem:[%s21076_s6 + $0x28] sm:$0xff]  ;;  %v12200_v58 = vld [vmem:[%s21076_s6 + $0xe0] sm:$0xff] }
 0xa3e   :  { %12026 = vmatmul.mubr.bf16.gmra.mrb[152].mxu0 %v13723_v44  ;;  %v11527_v44 = vrot.slane %v11525_v13, 1  ;;  %v11571_v48 = vrot.slane %v13626_v53, 2  ;;  %v12194_v11 = vld [vmem:[%s21076_s6 + $0xb0] sm:$0xff] }
 0xa3f   :  { %14250 = vmatpush3.bf16.msra.mxu0 %v15589_v46  ;;  %12066 = vmatprep.mubr.bf16.mxu0 %v13711_v20  ;;  %v13721_v46 = vcombine.low %v11515_v61, %v11523_v52  ;;  %v11448_v20 = vrot.slane %v13607_v21, 1  ;;  %v12190_v52 = vld [vmem:[%s21076_s6 + $0x90] sm:$0xff]  ;;  %v12175_v61 = vld [vmem:[%s21076_s6 + $0x18] sm:$0xff] }
 0xa40   :  { %14251 = vmatprep.subr.bf16.mxu0 %v15594_v62  ;;  %v11449_v62 = vrot.slane %v13608_v32, 1  ;;  %v11531_v38 = vor.u32 %v11530_v36, %v11527_v44  ;;  %v14529_v13 = vpack.c.bf16 %v12191_v45, %v12190_v52  ;;  %v14531_v8 = vpack.c.bf16 %v12175_v61, %v12174_v60  ;;  %v12193_v32 = vld [vmem:[%s21076_s6 + $0xa8] sm:$0xff]  ;;  %v12195_v44 = vld [vmem:[%s21076_s6 + $0xb8] sm:$0xff]  ;;  %v12178_v36 = vld [vmem:[%s21076_s6 + $0x30] sm:$0xff] }
 0xa42   :  { %v13720_v47 = vcombine.low %v11448_v20, %v11449_v62  ;;  %v13726_v5 = vcombine.low %v11531_v38, %v11539_v29  ;;  %v12179_v62 = vld [vmem:[%s21076_s6 + $0x38] sm:$0xff]  ;;  %v12196_v20 = vld [vmem:[%s21076_s6 + $0xc0] sm:$0xff]  ;;  %v12197_v38 = vld [vmem:[%s21076_s6 + $0xc8] sm:$0xff] }
 0xa43   :  { %14252 = vmatpush3.bf16.msra.mxu0 %v15595_v59  ;;  %v13620_v59 = vcombine.low %v11317_v41, %v20510_v26  ;;  %v13622_v26 = vcombine.low %v11319_v37, %v20536_v63  ;;  %v14539_v29 = vpack.c.bf16 %v12179_v62, %v12178_v36  ;;  %v12198_v41 = vld [vmem:[%s21076_s6 + $0xd0] sm:$0xff]  ;;  %v12184_v37 = vld [vmem:[%s21076_s6 + $0x60] sm:$0xff] }
 0xa44   :  { %14501 = vmatprep.subr.bf16.mxu0 %v15596_v33 }
 0xa45   :  { %v11567_v63 = vrot.slane %v13622_v26, 2  ;;  %v12202_v26 = vld [vmem:[%s21076_s6 + $0xf0] sm:$0xff] }
 0xa46   :  { %12067 = vmatmul.mubr.bf16.vlgmr.msra.gmra.mrb[156].mxu0 %v13710_v57  ;;  %v13621_v57 = vcombine.low %v11318_v43, %v20548_v16  ;;  %v13625_v16 = vcombine.low %v11322_v6, %v20599_v17  ;;  %v12173_v17 = vld [vmem:[%s21076_s6 + $0x8] sm:$0xff]  ;;  %v12186_v43 = vld [vmem:[%s21076_s6 + $0x70] sm:$0xff] }
 0xa47   :  { %14502 = vmatpush3.bf16.msra.mxu0 %v15596_v33  ;;  %12074 = vmatprep.mubr.bf16.mxu0 %v13716_v12  ;;  %v11565_v33 = vrot.slane %v13620_v59, 2  ;;  %v14527_v0 = vpack.c.bf16 %v12173_v17, %v12172_v42  ;;  %v12199_v59 = vld [vmem:[%s21076_s6 + $0xd8] sm:$0xff] }
 0xa48   :  { %14503 = vmatprep.subr.bf16.mxu0 %v15603_v51  ;;  %v11566_v12 = vrot.slane %v13621_v57, 2  ;;  %v11570_v2 = vrot.slane %v13625_v16, 2  ;;  %v14545_v34 = vpack.c.bf16 %v12199_v59, %v12198_v41  ;;  %v12221_v57 = vld [vmem:[%s21076_s6 + $0x188] sm:$0xff] }
 0xa49   :  { %v13712_v4 = vcombine.low %v11564_v54, %v11565_v33  ;;  %v14547_v33 = vpack.c.bf16 %v12183_v56, %v12182_v22  ;;  %v12185_v54 = vld [vmem:[%s21076_s6 + $0x68] sm:$0xff] }
 0xa4a   :  { %v13717_v19 = vcombine.low %v11566_v12, %v11567_v63  ;;  %v13727_v28 = vcombine.low %v11570_v2, %v11571_v48 }
 0xa4b   :  { %14504 = vmatpush3.bf16.msra.mxu0 %v15603_v51  ;;  %v13623_v51 = vcombine.low %v11320_v14, %v20576_v24  ;;  %v12188_v24 = vld [vmem:[%s21076_s6 + $0x80] sm:$0xff] }
 0xa4c   :  { %14505 = vmatprep.subr.bf16.mxu0 %v15604_v3 }
 0xa4d   :  { %v11568_v25 = vrot.slane %v13623_v51, 2  ;;  %v14557_v51 = vpack.c.bf16 %v12221_v57, %v12220_v30 }
 0xa4e   :  { %12075 = vmatmul.mubr.bf16.gmra.mrb[160].mxu0 %v13715_v50  ;;  %v12192_v50 = vld [vmem:[%s21076_s6 + $0xa0] sm:$0xff] }
 0xa4f   :  { %14506 = vmatpush3.bf16.msra.mxu0 %v15604_v3  ;;  %12082 = vmatprep.mubr.bf16.mxu0 %v13721_v46  ;;  %v13722_v31 = vcombine.low %v11568_v25, %v11569_v49  ;;  %v14525_v3 = vpack.c.bf16 %v12189_v55, %v12188_v24  ;;  %v12176_v46 = vld [vmem:[%s21076_s6 + $0x20] sm:$0xff] }
 0xa50   :  { %14507 = vmatprep.subr.bf16.mxu0 %v15609_v1  ;;  %v14535_v21 = vpack.c.bf16 %v12177_v18, %v12176_v46 }
 0xa53   :  { %14508 = vmatpush3.bf16.msra.mxu0 %v15609_v1  ;;  %v14533_v1 = vpack.c.bf16 %v12193_v32, %v12192_v50 }
 0xa54   :  { %14509 = vmatprep.subr.bf16.mxu0 %v15610_v39 }
 0xa56   :  { %12083 = vmatmul.mubr.bf16.gmra.mrb[164].mxu0 %v13720_v47  ;;  %v14541_v47 = vpack.c.bf16 %v12197_v38, %v12196_v20 }
 0xa57   :  { %14510 = vmatpush3.bf16.msra.mxu0 %v15610_v39  ;;  %12090 = vmatprep.mubr.bf16.mxu0 %v13726_v5  ;;  %v14537_v39 = vpack.c.bf16 %v12195_v44, %v12194_v11 }
 0xa58   :  { %14511 = vmatprep.subr.bf16.mxu0 %v15617_v40 }
 0xa5b   :  { %14512 = vmatpush3.bf16.msra.mxu0 %v15617_v40  ;;  %v12181_v40 = vld [vmem:[%s21076_s6 + $0x48] sm:$0xff] }
 0xa5c   :  { %14513 = vmatprep.subr.bf16.mxu0 %v15618_v23  ;;  %v14543_v5 = vpack.c.bf16 %v12181_v40, %v12180_v10 }
 0xa5e   :  { %12091 = vmatmul.mubr.bf16.gmra.mrb[168].mxu0 %v13725_v7  ;;  %v12203_v7 = vld [vmem:[%s21076_s6 + $0xf8] sm:$0xff] }
 0xa5f   :  { %14514 = vmatpush3.bf16.msra.mxu0 %v15618_v23  ;;  %14517 = vmatprep.mubr.bf16.mxu0 %v13712_v4  ;;  %v12201_v23 = vld [vmem:[%s21076_s6 + $0xe8] sm:$0xff]  ;;  %v14553_v15 = vpack.c.bf16 %v12203_v7, %v12202_v26  ;;  %v12187_v4 = vld [vmem:[%s21076_s6 + $0x78] sm:$0xff] }
 0xa60   :  { %14515 = vmatprep.subr.bf16.mxu0 %v15621_v9  ;;  %v14549_v35 = vpack.c.bf16 %v12201_v23, %v12200_v58  ;;  %v14555_v14 = vpack.c.bf16 %v12187_v4, %v12186_v43 }
 0xa63   :  { %14516 = vmatpush3.bf16.msra.mxu0 %v15621_v9  ;;  %v14551_v9 = vpack.c.bf16 %v12185_v54, %v12184_v37 }
 0xa64   :  { %14526 = vmatprep.subr.bf16.mxu0 %v14525_v3 }
 0xa66   :  { %14518 = vmatmul.mubr.bf16.vlgmr.msra.gmra.mrb[172].mxu0 %v13717_v19 }
 0xa67   :  { %14521 = vmatprep.mubr.bf16.mxu0 %v13722_v31  ;;  %14528 = vmatpush3.bf16.msra.mxu0 %v14527_v0 }
 0xa68   :  { %14530 = vmatprep.subr.bf16.mxu0 %v14529_v13 }
 0xa6b   :  { %14532 = vmatpush3.bf16.msra.mxu0 %v14531_v8  ;;  %v13707_v8 = vld [vmem:[%s21075_s5 + $0x7] ss:$0 sm:$0xff] }
 0xa6c   :  { %14534 = vmatprep.subr.bf16.mxu0 %v14533_v1 }
 0xa6e   :  { %14522 = vmatmul.mubr.bf16.gmra.mrb[176].mxu0 %v13727_v28 }
 0xa6f   :  { %14536 = vmatpush3.bf16.msra.mxu0 %v14535_v21 }
 0xa70   :  { %14538 = vmatprep.subr.bf16.mxu0 %v14537_v39 }
 0xa73   :  { %14540 = vmatpush3.bf16.msra.mxu0 %v14539_v29 }
 0xa74   :  { %14542 = vmatprep.subr.bf16.mxu0 %v14541_v47 }
 0xa77   :  { %14544 = vmatpush3.bf16.msra.mxu0 %v14543_v5 }
 0xa78   :  { %14546 = vmatprep.subr.bf16.mxu0 %v14545_v34 }
 0xa7b   :  { %14548 = vmatpush3.bf16.msra.mxu0 %v14547_v33 }
 0xa7c   :  { %14550 = vmatprep.subr.bf16.mxu0 %v14549_v35 }
 0xa7f   :  { %14552 = vmatpush3.bf16.msra.mxu0 %v14551_v9 }
 0xa80   :  { %14554 = vmatprep.subr.bf16.mxu0 %v14553_v15 }
 0xa83   :  { %14556 = vmatpush3.bf16.msra.mxu0 %v14555_v14 }
 0xa84   :  { %14558 = vmatprep.subr.bf16.mxu0 %v14557_v51 }
 0xaf9   :  { %v14213_v63 = vpop.f32.mrb[120].mxu0 }
 0xafa   :  { %v14214_v49 = vpop.f32.mrb[121].mxu0 }
 0xafb   :  { %v14215_v12 = vadd.f32 %v14214_v49, %v14213_v63  ;;  %v14216_v27 = vpop.f32.mrb[122].mxu0  ;;  %v15686_v63 = vmov 1966171168  }
 0xafc   :  { %v14217_v25 = vpop.f32.mrb[123].mxu0  ;;  %v12324_v49 = vunpack.c.l.s4 %v15686_v63  ;;  %v12222_v63 = vld [vmem:[%s21076_s6 + $0x190] sm:$0xff] }
 0xafd   :  { %v14218_v19 = vadd.f32 %v14217_v25, %v14216_v27  ;;  %v12004_v1 = vadd.f32 %v14215_v12, %v13707_v8 }
 0xaff   :  { %v12007_v21 = vadd.f32 %v14218_v19, %v13707_v8 }
 0xb01   :  { %v14219_v53 = vpop.f32.mrb[124].mxu0 }
 0xb02   :  { %v14220_v6 = vpop.f32.mrb[125].mxu0 }
 0xb03   :  { %v14221_v31 = vadd.f32 %v14220_v6, %v14219_v53  ;;  %v14222_v16 = vpop.f32.mrb[126].mxu0  ;;  %v12325_v53 = vunpack.c.0.s8 %v12324_v49  ;;  %v12223_v49 = vld [vmem:[%s21076_s6 + $0x198] sm:$0xff] }
 0xb04   :  { %v14223_v48 = vpop.f32.mrb[127].mxu0 }
 0xb05   :  { %v14224_v2 = vadd.f32 %v14223_v48, %v14222_v16  ;;  %v12012_v20 = vadd.f32 %v14221_v31, %v13707_v8 }
 0xb07   :  { %v12015_v40 = vadd.f32 %v14224_v2, %v13707_v8 }
 0xb09   :  { %v14225_v28 = vpop.f32.mrb[148].mxu0 }
 0xb0a   :  { %v14226_v24 = vpop.f32.mrb[149].mxu0 }
 0xb0b   :  { %v14227_v55 = vadd.f32 %v14226_v24, %v14225_v28  ;;  %v14228_v3 = vpop.f32.mrb[150].mxu0 }
 0xb0c   :  { %v14229_v42 = vpop.f32.mrb[151].mxu0 }
 0xb0d   :  { %v14230_v17 = vadd.f32 %v14229_v42, %v14228_v3  ;;  %v12020_v34 = vadd.f32 %v14227_v55, %v13707_v8  ;;  %v21785_v55 = vld [vmem:[#allocation6_spill] sm:$0xff] }
 0xb0e   :  { %v12328_v3 = vsub.s32 %v12325_v53, %v21785_v55  ;;  %v12224_v55 = vld [vmem:[%s21076_s6 + $0x1a0] sm:$0xff] }
 0xb0f   :  { %v12023_v35 = vadd.f32 %v14230_v17, %v13707_v8 }
 0xb11   :  { %v14231_v52 = vpop.f32.mrb[152].mxu0 }
 0xb12   :  { %v14232_v0 = vpop.f32.mrb[153].mxu0 }
 0xb13   :  { %v14233_v45 = vadd.f32 %v14232_v0, %v14231_v52  ;;  %v14234_v60 = vpop.f32.mrb[154].mxu0 }
 0xb14   :  { %v14235_v61 = vpop.f32.mrb[155].mxu0 }
 0xb15   :  { %v14236_v13 = vadd.f32 %v14235_v61, %v14234_v60  ;;  %v12028_v15 = vadd.f32 %v14233_v45, %v13707_v8 }
 0xb17   :  { %v12031_v57 = vadd.f32 %v14236_v13, %v13707_v8 }
 0xb19   :  { %v14253_v50 = vpop.f32.mrb[156].mxu0 }
 0xb1a   :  { %v14254_v32 = vpop.f32.mrb[157].mxu0 }
 0xb1b   :  { %v14255_v46 = vadd.f32 %v14254_v32, %v14253_v50  ;;  %v14256_v18 = vpop.f32.mrb[158].mxu0 }
 0xb1c   :  { %v14257_v11 = vpop.f32.mrb[159].mxu0 }
 0xb1d   :  { %v14258_v44 = vadd.f32 %v14257_v11, %v14256_v18  ;;  %v12069_v36 = vadd.f32 %v14255_v46, %v12004_v1 }
 0xb1f   :  { %v12072_v62 = vadd.f32 %v14258_v44, %v12007_v21 }
 0xb21   :  { %v14259_v39 = vpop.f32.mrb[160].mxu0 }
 0xb22   :  { %v14260_v29 = vpop.f32.mrb[161].mxu0 }
 0xb23   :  { %v14261_v38 = vadd.f32 %v14260_v29, %v14259_v39  ;;  %v14262_v47 = vpop.f32.mrb[162].mxu0 }
 0xb24   :  { %v14263_v10 = vpop.f32.mrb[163].mxu0 }
 0xb25   :  { %v14264_v41 = vadd.f32 %v14263_v10, %v14262_v47  ;;  %v12077_v5 = vadd.f32 %v14261_v38, %v12012_v20 }
 0xb27   :  { %v12080_v59 = vadd.f32 %v14264_v41, %v12015_v40 }
 0xb29   :  { %v14265_v22 = vpop.f32.mrb[164].mxu0 }
 0xb2a   :  { %v14266_v56 = vpop.f32.mrb[165].mxu0 }
 0xb2b   :  { %v14267_v58 = vadd.f32 %v14266_v56, %v14265_v22  ;;  %v14268_v23 = vpop.f32.mrb[166].mxu0 }
 0xb2c   :  { %v14269_v33 = vpop.f32.mrb[167].mxu0 }
 0xb2d   :  { %v14270_v37 = vadd.f32 %v14269_v33, %v14268_v23  ;;  %v12085_v54 = vadd.f32 %v14267_v58, %v12020_v34 }
 0xb2f   :  { %v12088_v26 = vadd.f32 %v14270_v37, %v12023_v35 }
 0xb31   :  { %v14271_v7 = vpop.f32.mrb[168].mxu0 }
 0xb32   :  { %v14272_v9 = vpop.f32.mrb[169].mxu0 }
 0xb33   :  { %v14273_v43 = vadd.f32 %v14272_v9, %v14271_v7  ;;  %v14274_v4 = vpop.f32.mrb[170].mxu0  ;;  %v12205_v9 = vld [vmem:[%s21076_s6 + $0x108] sm:$0xff] }
 0xb34   :  { %v14275_v30 = vpop.f32.mrb[171].mxu0 }
 0xb35   :  { %v14276_v14 = vadd.f32 %v14275_v30, %v14274_v4  ;;  %v12093_v51 = vadd.f32 %v14273_v43, %v12028_v15 }
 0xb37   :  { %v12096_v12 = vadd.f32 %v14276_v14, %v12031_v57 }
 0xb39   :  { %v14519_v27 = vpop.f32.mrb[172].mxu0 }
 0xb3a   :  { %v12142_v25 = vadd.f32 %v14519_v27, %v12077_v5  ;;  %v12133_v19 = vpop.f32.mrb[173].mxu0 }
 0xb3b   :  { %v12134_v6 = vadd.f32 %v12133_v19, %v12069_v36  ;;  %v14520_v31 = vpop.f32.mrb[174].mxu0 }
 0xb3c   :  { %v12145_v16 = vadd.f32 %v14520_v31, %v12080_v59  ;;  %v12136_v48 = vpop.f32.mrb[175].mxu0  ;;  %v12166_v28 = vmax.f32 %v12142_v25, 0.0 }
 0xb3d   :  { %v12137_v2 = vadd.f32 %v12136_v48, %v12072_v62  ;;  %v12164_v42 = vmax.f32 %v12134_v6, 0.0 }
 0xb3e   :  { %v12167_v24 = vmax.f32 %v12145_v16, 0.0 }
 0xb3f   :  { %v12165_v17 = vmax.f32 %v12137_v2, 0.0  ;;  %v14561_v2 = vpack.c.bf16 %v12223_v49, %v12222_v63  ;;  %v12238_v49 = vld [vmem:[%s21076_s6 + $0x210] sm:$0xff] }
 0xb40   :  { %v12317_v52 = vcombine.low %v12166_v28, %v12167_v24  ;;  %v12318_v0 = vcombine.high %v12166_v28, %v12167_v24  ;;  %v12206_v28 = vld [vmem:[%s21076_s6 + $0x110] sm:$0xff]  ;;  %v12207_v24 = vld [vmem:[%s21076_s6 + $0x118] sm:$0xff] }
 0xb41   :  { %v12315_v45 = vcombine.low %v12164_v42, %v12165_v17  ;;  %v12316_v60 = vcombine.high %v12164_v42, %v12165_v17  ;;  %v14523_v61 = vpop.f32.mrb[176].mxu0  ;;  %v14563_v42 = vpack.c.bf16 %v12207_v24, %v12206_v28  ;;  %v12240_v24 = vld [vmem:[%s21076_s6 + $0x220] sm:$0xff] }
 0xb42   :  { %v12343_v13 = vrot.slane %v12317_v52, %v12328_v3  ;;  %v12350_v8 = vrot.slane %v12318_v0, %v12328_v3  ;;  %v12158_v50 = vadd.f32 %v14523_v61, %v12093_v51  ;;  %v12149_v32 = vpop.f32.mrb[177].mxu0  ;;  %v12208_v52 = vld [vmem:[%s21076_s6 + $0x120] sm:$0xff]  ;;  %v12209_v0 = vld [vmem:[%s21076_s6 + $0x128] sm:$0xff] }
 0xb43   :  { %v12329_v1 = vrot.slane %v12315_v45, %v12328_v3  ;;  %v12336_v46 = vrot.slane %v12316_v60, %v12328_v3  ;;  %v12150_v18 = vadd.f32 %v12149_v32, %v12085_v54  ;;  %v14524_v11 = vpop.f32.mrb[178].mxu0  ;;  %v12226_v45 = vld [vmem:[%s21076_s6 + $0x1b0] sm:$0xff]  ;;  %v12227_v60 = vld [vmem:[%s21076_s6 + $0x1b8] sm:$0xff]  ;;  %v14567_v61 = vpack.c.bf16 %v12209_v0, %v12208_v52  ;;  %v12228_v32 = vld [vmem:[%s21076_s6 + $0x1c0] sm:$0xff] }
 0xb44   :  { %v12161_v21 = vadd.f32 %v14524_v11, %v12096_v12  ;;  %v12152_v44 = vpop.f32.mrb[179].mxu0  ;;  %v12170_v20 = vmax.f32 %v12158_v50, 0.0  ;;  %v12211_v50 = vld [vmem:[%s21076_s6 + $0x138] sm:$0xff]  ;;  %v12212_v11 = vld [vmem:[%s21076_s6 + $0x140] sm:$0xff]  ;;  %v12261_v52 = vld [vmem:[%s21076_s6 + $0x2c8] sm:$0xff] }
 0xb45   :  { %v12379_v36 = vcombine.low %v12329_v1, %v12343_v13  ;;  %v12380_v62 = vcombine.high %v12329_v1, %v12343_v13  ;;  %v12381_v39 = vcombine.low %v12336_v46, %v12350_v8  ;;  %v12382_v29 = vcombine.high %v12336_v46, %v12350_v8  ;;  %v12210_v8 = vld [vmem:[%s21076_s6 + $0x130] sm:$0xff]  ;;  %v12229_v1 = vld [vmem:[%s21076_s6 + $0x1c8] sm:$0xff] }
 0xb46   :  { %v12171_v38 = vmax.f32 %v12161_v21, 0.0  ;;  %v12153_v47 = vadd.f32 %v12152_v44, %v12088_v26  ;;  %v12168_v40 = vmax.f32 %v12150_v18, 0.0  ;;  %v12204_v26 = vld [vmem:[%s21076_s6 + $0x100] sm:$0xff]  ;;  %v14569_v13 = vpack.c.bf16 %v12227_v60, %v12226_v45  ;;  %v12213_v21 = vld [vmem:[%s21076_s6 + $0x148] sm:$0xff]  ;;  %v12230_v44 = vld [vmem:[%s21076_s6 + $0x1d0] sm:$0xff] }
 0xb47   :  { %v20743_v10 = vrot.slane %v12381_v39, %v12328_v3  ;;  %v20751_v15 = vrot.slane %v12379_v36, %v12328_v3  ;;  %v12407_v14 = vrot.slane %v12380_v62, %v12328_v3  ;;  %v14559_v51 = vpack.c.bf16 %v12205_v9, %v12204_v26  ;;  %v12231_v36 = vld [vmem:[%s21076_s6 + $0x1d8] sm:$0xff]  ;;  %v12236_v26 = vld [vmem:[%s21076_s6 + $0x200] sm:$0xff]  ;;  %v12237_v9 = vld [vmem:[%s21076_s6 + $0x208] sm:$0xff] }
 0xb48   :  { %v12321_v41 = vcombine.low %v12170_v20, %v12171_v38  ;;  %v12322_v5 = vcombine.high %v12170_v20, %v12171_v38  ;;  %v12169_v59 = vmax.f32 %v12153_v47, 0.0  ;;  %v20765_v12 = vrot.slane %v12382_v29, %v12328_v3  ;;  %v12214_v29 = vld [vmem:[%s21076_s6 + $0x150] sm:$0xff]  ;;  %v12215_v20 = vld [vmem:[%s21076_s6 + $0x158] sm:$0xff]  ;;  %v12232_v38 = vld [vmem:[%s21076_s6 + $0x1e0] sm:$0xff] }
 0xb49   :  { %v14571_v46 = vpack.c.bf16 %v12211_v50, %v12210_v8  ;;  %v14573_v18 = vpack.c.bf16 %v12229_v1, %v12228_v32  ;;  %v14575_v62 = vpack.c.bf16 %v12213_v21, %v12212_v11  ;;  %v14577_v39 = vpack.c.bf16 %v12231_v36, %v12230_v44  ;;  %v12233_v47 = vld [vmem:[%s21076_s6 + $0x1e8] sm:$0xff]  ;;  %v12244_v60 = vld [vmem:[%s21076_s6 + $0x240] sm:$0xff]  ;;  %v12263_v8 = vld [vmem:[%s21076_s6 + $0x2d8] sm:$0xff] }
 0xb4a   :  { %v12371_v22 = vrot.slane %v12321_v41, %v12328_v3  ;;  %v12378_v56 = vrot.slane %v12322_v5, %v12328_v3  ;;  %v12319_v34 = vcombine.low %v12168_v40, %v12169_v59  ;;  %v12320_v58 = vcombine.high %v12168_v40, %v12169_v59  ;;  %v12216_v5 = vld [vmem:[%s21076_s6 + $0x160] sm:$0xff]  ;;  %v12217_v59 = vld [vmem:[%s21076_s6 + $0x168] sm:$0xff]  ;;  %v12246_v1 = vld [vmem:[%s21076_s6 + $0x250] sm:$0xff] }
 0xb4b   :  { %v14579_v40 = vpack.c.bf16 %v12215_v20, %v12214_v29  ;;  %v14581_v41 = vpack.c.bf16 %v12233_v47, %v12232_v38  ;;  %v12265_v11 = vld [vmem:[%s21076_s6 + $0x2e8] sm:$0xff]  ;;  %v12248_v36 = vld [vmem:[%s21076_s6 + $0x260] sm:$0xff]  ;;  %v12267_v29 = vld [vmem:[%s21076_s6 + $0x2f8] sm:$0xff] }
 0xb4c   :  { %v12357_v23 = vrot.slane %v12319_v34, %v12328_v3  ;;  %v12364_v33 = vrot.slane %v12320_v58, %v12328_v3  ;;  %v14583_v34 = vpack.c.bf16 %v12217_v59, %v12216_v5  ;;  %v12250_v47 = vld [vmem:[%s21076_s6 + $0x270] sm:$0xff]  ;;  %v12285_v5 = vld [vmem:[%s21076_s6 + $0x388] sm:$0xff] }
 0xb4e   :  { %v12383_v35 = vcombine.low %v12357_v23, %v12371_v22  ;;  %v12384_v37 = vcombine.high %v12357_v23, %v12371_v22  ;;  %v12385_v54 = vcombine.low %v12364_v33, %v12378_v56  ;;  %v12386_v7 = vcombine.high %v12364_v33, %v12378_v56  ;;  %v12234_v22 = vld [vmem:[%s21076_s6 + $0x1f0] sm:$0xff]  ;;  %v12235_v56 = vld [vmem:[%s21076_s6 + $0x1f8] sm:$0xff] }
 0xb4f   :  { %v14585_v58 = vpack.c.bf16 %v12235_v56, %v12234_v22  ;;  %v12218_v23 = vld [vmem:[%s21076_s6 + $0x170] sm:$0xff]  ;;  %v12219_v33 = vld [vmem:[%s21076_s6 + $0x178] sm:$0xff]  ;;  %v12268_v56 = vld [vmem:[%s21076_s6 + $0x300] sm:$0xff] }
 0xb50   :  { %v20753_v43 = vrot.slane %v12383_v35, %v12328_v3  ;;  %v20755_v4 = vrot.slane %v12385_v54, %v12328_v3  ;;  %v12435_v30 = vrot.slane %v12384_v37, %v12328_v3  ;;  %v20757_v57 = vrot.slane %v12386_v7, %v12328_v3  ;;  %v12225_v3 = vld [vmem:[%s21076_s6 + $0x1a8] sm:$0xff]  ;;  %v12252_v35 = vld [vmem:[%s21076_s6 + $0x280] sm:$0xff] }
 0xb51   :  { %v14565_v17 = vpack.c.bf16 %v12225_v3, %v12224_v55  ;;  %v12253_v37 = vld [vmem:[%s21076_s6 + $0x288] sm:$0xff]  ;;  %v14587_v54 = vpack.c.bf16 %v12219_v33, %v12218_v23  ;;  %v12242_v3 = vld [vmem:[%s21076_s6 + $0x230] sm:$0xff]  ;;  %v12287_v23 = vld [vmem:[%s21076_s6 + $0x398] sm:$0xff] }
 0xb52   :  { %v12443_v27 = vcombine.low %v20751_v15, %v20753_v43  ;;  %v12444_v25 = vcombine.high %v20751_v15, %v20753_v43  ;;  %v12445_v19 = vcombine.low %v20743_v10, %v20755_v4  ;;  %v12446_v53 = vcombine.high %v20743_v10, %v20755_v4  ;;  %v12241_v55 = vld [vmem:[%s21076_s6 + $0x228] sm:$0xff]  ;;  %v12258_v15 = vld [vmem:[%s21076_s6 + $0x2b0] sm:$0xff]  ;;  %v12259_v43 = vld [vmem:[%s21076_s6 + $0x2b8] sm:$0xff] }
 0xb53   :  { %v12447_v6 = vcombine.low %v12407_v14, %v12435_v30  ;;  %v12448_v31 = vcombine.high %v12407_v14, %v12435_v30  ;;  %v12449_v16 = vcombine.low %v20765_v12, %v20757_v57  ;;  %v12450_v48 = vcombine.high %v20765_v12, %v20757_v57  ;;  %v12254_v30 = vld [vmem:[%s21076_s6 + $0x290] sm:$0xff]  ;;  %v12255_v14 = vld [vmem:[%s21076_s6 + $0x298] sm:$0xff] }
 0xb54   :  { %v14589_v7 = vpack.c.bf16 %v12253_v37, %v12252_v35  ;;  %v14593_v63 = vpack.c.bf16 %v12255_v14, %v12254_v30  ;;  %v12270_v37 = vld [vmem:[%s21076_s6 + $0x310] sm:$0xff]  ;;  %v12272_v14 = vld [vmem:[%s21076_s6 + $0x320] sm:$0xff]  ;;  %v12291_v57 = vld [vmem:[%s21076_s6 + $0x3b8] sm:$0xff] }
 0xb55   :  { %12523 = vmatprep.mubr.f32.mxu0 %v12447_v6  ;;  %v12256_v6 = vld [vmem:[%s21076_s6 + $0x2a0] sm:$0xff] }
 0xb56   :  { %12524 = vmatmul.mubr.f32.vlgmr.msra.gmra.mrb[180].mxu0 %v12443_v27  ;;  %v12239_v27 = vld [vmem:[%s21076_s6 + $0x218] sm:$0xff] }
 0xb57   :  { %14560 = vmatpush3.bf16.msra.mxu0 %v14559_v51  ;;  %12593 = vmatprep.mubr.f32.mxu0 %v12448_v31  ;;  %v14591_v51 = vpack.c.bf16 %v12237_v9, %v12236_v26  ;;  %v12257_v31 = vld [vmem:[%s21076_s6 + $0x2a8] sm:$0xff] }
 0xb58   :  { %14562 = vmatprep.subr.bf16.mxu0 %v14561_v2  ;;  %v14595_v2 = vpack.c.bf16 %v12239_v27, %v12238_v49  ;;  %v14597_v28 = vpack.c.bf16 %v12257_v31, %v12256_v6  ;;  %v12289_v26 = vld [vmem:[%s21076_s6 + $0x3a8] sm:$0xff]  ;;  %v12275_v49 = vld [vmem:[%s21076_s6 + $0x338] sm:$0xff]  ;;  %v12292_v27 = vld [vmem:[%s21076_s6 + $0x3c0] sm:$0xff] }
 0xb59   :  { %v12293_v6 = vld [vmem:[%s21076_s6 + $0x3c8] sm:$0xff] }
 0xb5b   :  { %14564 = vmatpush3.bf16.msra.mxu0 %v14563_v42  ;;  %v12243_v42 = vld [vmem:[%s21076_s6 + $0x238] sm:$0xff] }
 0xb5c   :  { %14566 = vmatprep.subr.bf16.mxu0 %v14565_v17  ;;  %v12260_v17 = vld [vmem:[%s21076_s6 + $0x2c0] sm:$0xff]  ;;  %v14603_v0 = vpack.c.bf16 %v12243_v42, %v12242_v3  ;;  %v12279_v3 = vld [vmem:[%s21076_s6 + $0x358] sm:$0xff] }
 0xb5d   :  { %v14605_v45 = vpack.c.bf16 %v12261_v52, %v12260_v17  ;;  %v12296_v42 = vld [vmem:[%s21076_s6 + $0x3e0] sm:$0xff]  ;;  %v12297_v17 = vld [vmem:[%s21076_s6 + $0x3e8] sm:$0xff] }
 0xb5f   :  { %14568 = vmatpush3.bf16.msra.mxu0 %v14567_v61  ;;  %v12245_v61 = vld [vmem:[%s21076_s6 + $0x248] sm:$0xff] }
 0xb60   :  { %14570 = vmatprep.subr.bf16.mxu0 %v14569_v13  ;;  %v12262_v13 = vld [vmem:[%s21076_s6 + $0x2d0] sm:$0xff]  ;;  %v14607_v50 = vpack.c.bf16 %v12245_v61, %v12244_v60  ;;  %v12281_v60 = vld [vmem:[%s21076_s6 + $0x368] sm:$0xff] }
 0xb61   :  { %v14609_v32 = vpack.c.bf16 %v12263_v8, %v12262_v13  ;;  %v12298_v61 = vld [vmem:[%s21076_s6 + $0x3f0] sm:$0xff]  ;;  %v12299_v13 = vld [vmem:[%s21076_s6 + $0x3f8] sm:$0xff] }
 0xb63   :  { %14572 = vmatpush3.bf16.msra.mxu0 %v14571_v46  ;;  %v12247_v46 = vld [vmem:[%s21076_s6 + $0x258] sm:$0xff] }
 0xb64   :  { %14574 = vmatprep.subr.bf16.mxu0 %v14573_v18  ;;  %v12264_v18 = vld [vmem:[%s21076_s6 + $0x2e0] sm:$0xff]  ;;  %v14611_v21 = vpack.c.bf16 %v12247_v46, %v12246_v1  ;;  %v12283_v1 = vld [vmem:[%s21076_s6 + $0x378] sm:$0xff] }
 0xb65   :  { %v14613_v44 = vpack.c.bf16 %v12265_v11, %v12264_v18 }
 0xb67   :  { %14576 = vmatpush3.bf16.msra.mxu0 %v14575_v62  ;;  %v12249_v62 = vld [vmem:[%s21076_s6 + $0x268] sm:$0xff] }
 0xb68   :  { %14578 = vmatprep.subr.bf16.mxu0 %v14577_v39  ;;  %v12266_v39 = vld [vmem:[%s21076_s6 + $0x2f0] sm:$0xff]  ;;  %v14615_v20 = vpack.c.bf16 %v12249_v62, %v12248_v36 }
 0xb69   :  { %v14617_v38 = vpack.c.bf16 %v12267_v29, %v12266_v39 }
 0xb6b   :  { %14580 = vmatpush3.bf16.msra.mxu0 %v14579_v40  ;;  %v12251_v40 = vld [vmem:[%s21076_s6 + $0x278] sm:$0xff] }
 0xb6c   :  { %14582 = vmatprep.subr.bf16.mxu0 %v14581_v41  ;;  %v12284_v41 = vld [vmem:[%s21076_s6 + $0x380] sm:$0xff]  ;;  %v14619_v59 = vpack.c.bf16 %v12251_v40, %v12250_v47 }
 0xb6d   :  { %v14621_v22 = vpack.c.bf16 %v12285_v5, %v12284_v41 }
 0xb6f   :  { %14584 = vmatpush3.bf16.msra.mxu0 %v14583_v34  ;;  %v12269_v34 = vld [vmem:[%s21076_s6 + $0x308] sm:$0xff] }
 0xb70   :  { %14586 = vmatprep.subr.bf16.mxu0 %v14585_v58  ;;  %v12286_v58 = vld [vmem:[%s21076_s6 + $0x390] sm:$0xff]  ;;  %v14623_v33 = vpack.c.bf16 %v12269_v34, %v12268_v56 }
 0xb71   :  { %v14625_v35 = vpack.c.bf16 %v12287_v23, %v12286_v58 }
 0xb73   :  { %14588 = vmatpush3.bf16.msra.mxu0 %v14587_v54  ;;  %v12271_v54 = vld [vmem:[%s21076_s6 + $0x318] sm:$0xff] }
 0xb74   :  { %14590 = vmatprep.subr.bf16.mxu0 %v14589_v7  ;;  %v12288_v7 = vld [vmem:[%s21076_s6 + $0x3a0] sm:$0xff]  ;;  %v14627_v9 = vpack.c.bf16 %v12271_v54, %v12270_v37 }
 0xb75   :  { %v14629_v30 = vpack.c.bf16 %v12289_v26, %v12288_v7 }
 0xb76   :  { %12594 = vmatmul.mubr.f32.vlgmr.msra.gmra.mrb[182].mxu0 %v12444_v25  ;;  %v14599_v25 = vpack.c.bf16 %v12241_v55, %v12240_v24  ;;  %v12277_v24 = vld [vmem:[%s21076_s6 + $0x348] sm:$0xff]  ;;  %v12294_v55 = vld [vmem:[%s21076_s6 + $0x3d0] sm:$0xff] }
 0xb77   :  { %14592 = vmatpush3.bf16.msra.mxu0 %v14591_v51  ;;  %12663 = vmatprep.mubr.f32.mxu0 %v12449_v16  ;;  %v14601_v16 = vpack.c.bf16 %v12259_v43, %v12258_v15  ;;  %v12273_v51 = vld [vmem:[%s21076_s6 + $0x328] sm:$0xff]  ;;  %v12295_v15 = vld [vmem:[%s21076_s6 + $0x3d8] sm:$0xff] }
 0xb78   :  { %14594 = vmatprep.subr.bf16.mxu0 %v14593_v63  ;;  %v14631_v12 = vpack.c.bf16 %v12273_v51, %v12272_v14  ;;  %v12274_v63 = vld [vmem:[%s21076_s6 + $0x330] sm:$0xff] }
 0xb79   :  { %v14635_v31 = vpack.c.bf16 %v12275_v49, %v12274_v63 }
 0xb7b   :  { %14596 = vmatpush3.bf16.msra.mxu0 %v14595_v2  ;;  %v14637_v2 = vpack.c.bf16 %v12293_v6, %v12292_v27 }
 0xb7c   :  { %14598 = vmatprep.subr.bf16.mxu0 %v14597_v28  ;;  %v12276_v28 = vld [vmem:[%s21076_s6 + $0x340] sm:$0xff] }
 0xb7d   :  { %v14639_v43 = vpack.c.bf16 %v12277_v24, %v12276_v28 }
 0xb7f   :  { %14600 = vmatpush3.bf16.msra.mxu0 %v14599_v25  ;;  %v14641_v25 = vpack.c.bf16 %v12295_v15, %v12294_v55 }
 0xb80   :  { %14602 = vmatprep.subr.bf16.mxu0 %v14601_v16  ;;  %v12278_v16 = vld [vmem:[%s21076_s6 + $0x350] sm:$0xff] }
 0xb81   :  { %v14643_v52 = vpack.c.bf16 %v12279_v3, %v12278_v16 }
 0xb83   :  { %14604 = vmatpush3.bf16.msra.mxu0 %v14603_v0  ;;  %v14645_v0 = vpack.c.bf16 %v12297_v17, %v12296_v42 }
 0xb84   :  { %14606 = vmatprep.subr.bf16.mxu0 %v14605_v45  ;;  %v12280_v45 = vld [vmem:[%s21076_s6 + $0x360] sm:$0xff] }
 0xb85   :  { %v14647_v8 = vpack.c.bf16 %v12281_v60, %v12280_v45 }
 0xb87   :  { %14608 = vmatpush3.bf16.msra.mxu0 %v14607_v50  ;;  %v14649_v50 = vpack.c.bf16 %v12299_v13, %v12298_v61 }
 0xb88   :  { %14610 = vmatprep.subr.bf16.mxu0 %v14609_v32  ;;  %v12282_v32 = vld [vmem:[%s21076_s6 + $0x370] sm:$0xff] }
 0xb89   :  { %v14651_v46 = vpack.c.bf16 %v12283_v1, %v12282_v32 }
 0xb8b   :  { %14612 = vmatpush3.bf16.msra.mxu0 %v14611_v21 }
 0xb8c   :  { %14614 = vmatprep.subr.bf16.mxu0 %v14613_v44  ;;  %v13768_v44 = vld [vmem:[%s21077_s7] ss:$0 sm:$0xff] }
 0xb8f   :  { %14616 = vmatpush3.bf16.msra.mxu0 %v14615_v20 }
 0xb90   :  { %14618 = vmatprep.subr.bf16.mxu0 %v14617_v38 }
 0xb93   :  { %14620 = vmatpush3.bf16.msra.mxu0 %v14619_v59 }
 0xb94   :  { %14622 = vmatprep.subr.bf16.mxu0 %v14621_v22 }
 0xb96   :  { %12664 = vmatmul.mubr.f32.vlgmr.msra.gmra.mrb[184].mxu0 %v12445_v19  ;;  %v12290_v19 = vld [vmem:[%s21076_s6 + $0x3b0] sm:$0xff] }
 0xb97   :  { %14624 = vmatpush3.bf16.msra.mxu0 %v14623_v33  ;;  %12733 = vmatprep.mubr.f32.mxu0 %v12450_v48  ;;  %v14633_v48 = vpack.c.bf16 %v12291_v57, %v12290_v19 }
 0xb98   :  { %14626 = vmatprep.subr.bf16.mxu0 %v14625_v35 }
 0xb9b   :  { %14628 = vmatpush3.bf16.msra.mxu0 %v14627_v9 }
 0xb9c   :  { %14630 = vmatprep.subr.bf16.mxu0 %v14629_v30 }
 0xb9f   :  { %14632 = vmatpush3.bf16.msra.mxu0 %v14631_v12 }
 0xba0   :  { %14634 = vmatprep.subr.bf16.mxu0 %v14633_v48 }
 0xba3   :  { %14636 = vmatpush3.bf16.msra.mxu0 %v14635_v31 }
 0xba4   :  { %14638 = vmatprep.subr.bf16.mxu0 %v14637_v2 }
 0xba7   :  { %14640 = vmatpush3.bf16.msra.mxu0 %v14639_v43 }
 0xba8   :  { %14642 = vmatprep.subr.bf16.mxu0 %v14641_v25 }
 0xbab   :  { %14644 = vmatpush3.bf16.msra.mxu0 %v14643_v52 }
 0xbac   :  { %14646 = vmatprep.subr.bf16.mxu0 %v14645_v0 }
 0xbaf   :  { %14648 = vmatpush3.bf16.msra.mxu0 %v14647_v8 }
 0xbb0   :  { %14650 = vmatprep.subr.bf16.mxu0 %v14649_v50 }
 0xbb3   :  { %14652 = vmatpush3.bf16.msra.mxu0 %v14651_v46 }
 0xbb6   :  { %12734 = vmatmul.mubr.f32.vlgmr.msra.gmra.mrb[186].mxu0 %v12446_v53 }
 0xc29   :  { %v14321_v18 = vpop.f32.mrb[180].mxu0 }
 0xc2a   :  { %v14322_v11 = vpop.f32.mrb[181].mxu0 }
 0xc2b   :  { %v14323_v21 = vadd.f32 %v14322_v11, %v14321_v18 }
 0xc2d   :  { %v12526_v39 = vadd.f32 %v14323_v21, %v13768_v44 }
 0xc49   :  { %v14356_v36 = vpop.f32.mrb[182].mxu0 }
 0xc4a   :  { %v14357_v62 = vpop.f32.mrb[183].mxu0 }
 0xc4b   :  { %v14358_v29 = vadd.f32 %v14357_v62, %v14356_v36 }
 0xc4d   :  { %v12596_v20 = vadd.f32 %v14358_v29, %v12526_v39 }
 0xc69   :  { %v14391_v38 = vpop.f32.mrb[184].mxu0 }
 0xc6a   :  { %v14392_v47 = vpop.f32.mrb[185].mxu0 }
 0xc6b   :  { %v14393_v40 = vadd.f32 %v14392_v47, %v14391_v38 }
 0xc6d   :  { %v12666_v41 = vadd.f32 %v14393_v40, %v12596_v20 }
 0xc89   :  { %v14426_v5 = vpop.f32.mrb[186].mxu0 }
 0xc8a   :  { %v14427_v59 = vpop.f32.mrb[187].mxu0 }
 0xc8b   :  { %v14428_v10 = vadd.f32 %v14427_v59, %v14426_v5 }
 0xc8d   :  { %v12736_v4 = vadd.f32 %v14428_v10, %v12666_v41 }
 0xc8f   :  { %v12740_v53 = vsel %vm12739_vm3, %v12736_v4, -inf }
 0xc90   :  { %12741 = vmax.xlane.f32.xlu0 %v12740_v53 }
 0xd1d   :  { %v12742_v22 = vpop.xlane.xlu0 %12741 }
 0xd1e   :  { %v12743_v56 = vsub.f32 %v12736_v4, %v12742_v22 }
 0xd20   :  { %v12744_v34 = vmul.f32 1.442695, %v12743_v56 }
 0xd22   :  { %15624 = vpow2.f32 %v12744_v34 }
 0xd2c   :  { %v15625_v58 = vpop.eup %15624 }
 0xd2d   :  { %v12746_v23 = vsel %vm12739_vm3, %v15625_v58, 0.0 }
 0xd2e   :  { %12747 = vadd.xlane.f32.xlu1 %v12746_v23 }
 0xdbb   :  { %v12748_v33 = vpop.xlane.xlu1 %12747 }
 0xdbc   :  { %15626 = vrcp.f32 %v12748_v33 }
 0xdc6   :  { %v15627_v35 = vpop.eup %15626 }
 0xdc7   :  { %v12750_v37 = vmul.f32 %v15627_v35, %v15625_v58 }
 0xdc9   :  { %12751 = vst.msk [vmem:[%s21078_s8] sm:$0xff] %vm12739_vm3, %v12750_v37 }
 0xdca   :  { %12756 = vsyncpa [#allocation4], 1 }

</bundles_post_ra>
